<compile_context>
chip_gen: v7x
topology: tpu7x:2x2x1
jax: 0.10.0
libtpu: 0.0.40
codegen_flags: <defaults>
</compile_context>

<pallas_src>
import functools

import jax
import jax.numpy as jnp
from jax.experimental import pallas as pl
from jax.experimental.pallas import tpu as pltpu


# fc1 contraction: 2112 -> zero-padded to 2304 (= 18*128) so it can be tiled in
# 3 lane-aligned chunks of 768 and pipelined.
_FC_K = 2112
_FC_KP = 2304
_FC_TK = 768
_CONV_NP = 128          # conv output channels padded to one full lane width


def _round_up(x, m):
    return (x + m - 1) // m * m


# -----------------------------------------------------------------------------
# Conv matmul kernel: one (tm, K) patch tile  @  (K, 128) padded weight  + bias + ReLU
# -----------------------------------------------------------------------------
def _conv_mm_kernel(p_ref, w_ref, b_ref, o_ref):
    acc = jnp.dot(p_ref[...], w_ref[...], preferred_element_type=jnp.float32)
    acc = jnp.maximum(acc + b_ref[...], 0.0)
    o_ref[...] = acc.astype(o_ref.dtype)


def im2col(x, kh, kw, stride):
    # x: (B, C, H, W) -> (B*OH*OW, C*kh*kw) with PyTorch (C, kh, kw) K-ordering
    B, C, H, W = x.shape
    oh = (H - kh) // stride + 1
    ow = (W - kw) // stride + 1
    cols = []
    for i in range(kh):
        for j in range(kw):
            cols.append(
                x[:, :, i:i + stride * (oh - 1) + 1:stride,
                        j:j + stride * (ow - 1) + 1:stride]
            )
    p = jnp.stack(cols, axis=0).reshape(kh, kw, B, C, oh, ow)
    p = p.transpose(2, 4, 5, 3, 0, 1)               # (B, oh, ow, C, kh, kw)
    return p.reshape(B * oh * ow, C * kh * kw), oh, ow


def conv2d_relu(x, w, b, stride):
    # TODO(synk): im2col patch matrix is still materialized XLA-side; an in-kernel
    # accumulation over kh*kw shifted matmuls would remove that HBM round-trip.
    O, C, kh, kw = w.shape
    B = x.shape[0]
    patches, oh, ow = im2col(x, kh, kw, stride)     # (M, K) f32
    M, K = patches.shape

    # Weight -> (K, 128): zero-pad output channels to a full lane width so the conv
    # output stores are unmasked / lane-dense. bf16 operands, f32 accumulation.
    w2 = jnp.pad(w.reshape(O, K).T, ((0, 0), (0, _CONV_NP - O))).astype(jnp.bfloat16)
    b2 = jnp.pad(b, (0, _CONV_NP - O)).reshape(1, _CONV_NP).astype(jnp.float32)

    tm = 256 if M >= 256 else _round_up(M, 8)
    M_pad = _round_up(M, tm)
    p = jnp.pad(patches, ((0, M_pad - M), (0, 0))).astype(jnp.bfloat16)

    y = pl.pallas_call(
        _conv_mm_kernel,
        grid=(M_pad // tm,),
        in_specs=[
            pl.BlockSpec((tm, K), lambda i: (i, 0)),
            pl.BlockSpec((K, _CONV_NP), lambda i: (0, 0)),
            pl.BlockSpec((1, _CONV_NP), lambda i: (0, 0)),
        ],
        out_specs=pl.BlockSpec((tm, _CONV_NP), lambda i: (i, 0)),
        out_shape=jax.ShapeDtypeStruct((M_pad, _CONV_NP), jnp.float32),
        compiler_params=pltpu.CompilerParams(
            dimension_semantics=("parallel",)),      # rows split across TCs on v7x
    )(p, w2, b2)

    y = y[:M, :O]
    return y.reshape(B, oh, ow, O).transpose(0, 3, 1, 2)   # back to NCHW


# -----------------------------------------------------------------------------
# Fused FC tail: fc1 (K-tiled, accumulated) + dropout + fc2 + dropout + fc3 + fc4 + fc5
# -----------------------------------------------------------------------------
def _fc_tail_kernel(x_ref, w1_ref, b1_ref, u1_ref,
                    w2_ref, b2_ref, u2_ref,
                    w3_ref, b3_ref, w4_ref, b4_ref, w5_ref, b5_ref,
                    o_ref, acc_ref, *, rate):
    k = pl.program_id(0)

    @pl.when(k == 0)
    def _():
        acc_ref[...] = jnp.zeros_like(acc_ref)

    # fc1 partial product for this K-tile (bf16 operands, f32 accumulation)
    acc_ref[...] += jnp.dot(x_ref[...], w1_ref[...],
                            preferred_element_type=jnp.float32)

    @pl.when(k == pl.num_programs(0) - 1)
    def _():
        scale = jnp.float32(1.0 / (1.0 - rate))
        # fc1: bias + ReLU + dropout (mask from precomputed uniforms; inverted dropout)
        h = jnp.maximum(acc_ref[...] + b1_ref[...], 0.0)
        h = jnp.where(u1_ref[...] >= rate, h * scale, 0.0)
        # fc2 + ReLU + dropout
        h = jnp.dot(h.astype(jnp.bfloat16), w2_ref[...],
                    preferred_element_type=jnp.float32) + b2_ref[...]
        h = jnp.maximum(h, 0.0)
        h = jnp.where(u2_ref[...] >= rate, h * scale, 0.0)
        # fc3 + ReLU
        h = jnp.dot(h.astype(jnp.bfloat16), w3_ref[...],
                    preferred_element_type=jnp.float32) + b3_ref[...]
        h = jnp.maximum(h, 0.0)
        # fc4 + ReLU
        h = jnp.dot(h.astype(jnp.bfloat16), w4_ref[...],
                    preferred_element_type=jnp.float32) + b4_ref[...]
        h = jnp.maximum(h, 0.0)
        # fc5 (out_features = 1): row-weighted sum instead of an N=1 matmul
        out = jnp.sum(h * w5_ref[...], axis=1, keepdims=True) + b5_ref[...]
        o_ref[...] = out.astype(o_ref.dtype)


def fc_tail(x_flat, params, u1, u2, *, rate):
    B, K = x_flat.shape
    assert K == _FC_K, K
    x_p = jnp.pad(x_flat, ((0, 0), (0, _FC_KP - K))).astype(jnp.bfloat16)

    w1 = params["fc1_w"]                                    # (2304, 1164) bf16, zero rows 2112..
    b1 = params["fc1_b"].reshape(1, -1)
    w2 = params["fc2_w"]; b2 = params["fc2_b"].reshape(1, -1)
    w3 = params["fc3_w"]; b3 = params["fc3_b"].reshape(1, -1)
    w4 = params["fc4_w"]; b4 = params["fc4_b"].reshape(1, -1)
    w5 = params["fc5_w"].astype(jnp.float32).reshape(1, -1)  # (1, 10)
    b5 = params["fc5_b"].reshape(1, 1)
    n1, n2, n3, n4 = w1.shape[1], w2.shape[1], w3.shape[1], w4.shape[1]

    def full(shape):
        return pl.BlockSpec(shape, lambda k: (0, 0))

    return pl.pallas_call(
        functools.partial(_fc_tail_kernel, rate=rate),
        grid=(_FC_KP // _FC_TK,),                            # 3 K-steps, fc1 weight pipelined
        in_specs=[
            pl.BlockSpec((B, _FC_TK), lambda k: (0, k)),     # x, tiled over K
            pl.BlockSpec((_FC_TK, n1), lambda k: (k, 0)),    # fc1 weight, tiled over K
            full((1, n1)), full((B, n1)),                    # fc1 bias, dropout-1 uniforms
            full((n1, n2)), full((1, n2)), full((B, n2)),    # fc2 w/b, dropout-2 uniforms
            full((n2, n3)), full((1, n3)),                   # fc3
            full((n3, n4)), full((1, n4)),                   # fc4
            full((1, n4)), full((1, 1)),                     # fc5 (row vector), fc5 bias
        ],
        out_specs=pl.BlockSpec((B, 1), lambda k: (0, 0)),
        out_shape=jax.ShapeDtypeStruct((B, 1), jnp.float32),
        scratch_shapes=[pltpu.VMEM((B, n1), jnp.float32)],   # fc1 accumulator, VMEM-resident
        compiler_params=pltpu.CompilerParams(
            dimension_semantics=("arbitrary",)),
    )(x_p, w1, b1, u1, w2, b2, u2, w3, b3, w4, b4, w5, b5)


# -----------------------------------------------------------------------------
# Parameters (deterministic, PyTorch default-style uniform(-1/sqrt(fan_in), ...))
# -----------------------------------------------------------------------------
def _uniform(key, shape, fan_in):
    bound = 1.0 / float(fan_in) ** 0.5
    return jax.random.uniform(key, shape, jnp.float32, -bound, bound)


def init_params(key):
    conv_cfg = [  # (name, out_ch, in_ch, k)
        ("conv1", 24, 3, 5), ("conv2", 36, 24, 5), ("conv3", 48, 36, 5),
        ("conv4", 64, 48, 3), ("conv5", 64, 64, 3),
    ]
    fc_cfg = [  # (name, in_features, out_features)
        ("fc1", 2112, 1164), ("fc2", 1164, 100), ("fc3", 100, 50),
        ("fc4", 50, 10), ("fc5", 10, 1),
    ]
    keys = jax.random.split(key, 2 * (len(conv_cfg) + len(fc_cfg)))
    params = {}
    ki = 0
    for name, oc, ic, k in conv_cfg:
        fan_in = ic * k * k
        params[name + "_w"] = _uniform(keys[ki], (oc, ic, k, k), fan_in); ki += 1
        params[name + "_b"] = _uniform(keys[ki], (oc,), fan_in); ki += 1
    for name, fin, fout in fc_cfg:
        w = _uniform(keys[ki], (fin, fout), fin); ki += 1          # stored (in, out): x @ W
        if name == "fc1":
            w = jnp.pad(w, ((0, _FC_KP - fin), (0, 0)))             # zero rows for padded K
        params[name + "_w"] = w.astype(jnp.bfloat16)                # bf16 weights (f32 accum on MXU)
        params[name + "_b"] = _uniform(keys[ki], (fout,), fin); ki += 1
    return params


# -----------------------------------------------------------------------------
# Forward pass (mirrors ConvNet.forward; F.dropout default training=True -> active)
# -----------------------------------------------------------------------------
def convnet_forward(params, x, rng):
    out = conv2d_relu(x, params["conv1_w"], params["conv1_b"], stride=2)
    out = conv2d_relu(out, params["conv2_w"], params["conv2_b"], stride=2)
    out = conv2d_relu(out, params["conv3_w"], params["conv3_b"], stride=2)
    out = conv2d_relu(out, params["conv4_w"], params["conv4_b"], stride=1)
    out = conv2d_relu(out, params["conv5_w"], params["conv5_b"], stride=1)
    out = out.reshape(out.shape[0], -1)                      # (B, 2112), C,H,W flatten order
    B = out.shape[0]
    # TODO(synk): torch's dropout RNG stream cannot be reproduced bit-exactly; masks are
    # drawn from jax.random outside the kernel and applied inside the fused FC kernel.
    k1, k2 = jax.random.split(rng)
    u1 = jax.random.uniform(k1, (B, 1164), jnp.float32)
    u2 = jax.random.uniform(k2, (B, 100), jnp.float32)
    return fc_tail(out, params, u1, u2, rate=0.3)            # (B, 1)


if __name__ == "__main__":
    key = jax.random.PRNGKey(0)
    kx, kp, kd = jax.random.split(key, 3)
    # batch=2, 3-channel 77x141 image (smallest spatial size consistent with fc1=2112)
    x = jax.random.normal(kx, (2, 3, 77, 141), jnp.float32)
    params = init_params(kp)

    fwd = jax.jit(convnet_forward)
    out = fwd(params, x, kd)
    jax.block_until_ready(out)
    assert out.shape == (2, 1) and out.dtype == jnp.float32
    print("KERNEL_OK")
</pallas_src>

<mosaic_0001>
module attributes {stable_mosaic.version = 11 : i64} {
  func.func @_conv_mm_kernel(%arg0: i32, %arg1: memref<256x75xbf16, #tpu.memory_space<vmem>>, %arg2: memref<75x128xbf16, #tpu.memory_space<vmem>>, %arg3: memref<1x128xf32, #tpu.memory_space<vmem>>, %arg4: memref<256x128xf32, #tpu.memory_space<vmem>>) attributes {dimension_semantics = [#tpu.dimension_semantics<parallel>], iteration_bounds = array<i64: 20>, scalar_prefetch = 0 : i64, scratch_operands = 0 : i64, tpu.core_type = #tpu.core_type<tc>, window_params = [{transform_indices = @transform_0, window_bounds = array<i64: 256, 75>}, {pipeline_mode = #tpu.pipeline_mode<synchronous>, transform_indices = @transform_1, window_bounds = array<i64: 75, 128>}, {pipeline_mode = #tpu.pipeline_mode<synchronous>, transform_indices = @transform_2, window_bounds = array<i64: 1, 128>}, {transform_indices = @transform_3, window_bounds = array<i64: 256, 128>}]} {
    %c0 = arith.constant 0 : index
    %c0_0 = arith.constant 0 : index
    %0 = vector.load %arg1[%c0, %c0_0] : memref<256x75xbf16, #tpu.memory_space<vmem>>, vector<256x75xbf16>
    %c0_1 = arith.constant 0 : index
    %c0_2 = arith.constant 0 : index
    %1 = vector.load %arg2[%c0_1, %c0_2] : memref<75x128xbf16, #tpu.memory_space<vmem>>, vector<75x128xbf16>
    %cst = arith.constant dense<0.000000e+00> : vector<256x128xf32>
    %2 = tpu.matmul %0, %1, %cst {dimension_numbers = #tpu.dot_dimension_numbers<[1], [0], [0], [1], [0, 0, 1, 1], [], []>} : vector<256x75xbf16>, vector<75x128xbf16>, vector<256x128xf32> -> vector<256x128xf32>
    %c0_3 = arith.constant 0 : index
    %c0_4 = arith.constant 0 : index
    %3 = vector.load %arg3[%c0_3, %c0_4] : memref<1x128xf32, #tpu.memory_space<vmem>>, vector<1x128xf32>
    %4 = vector.broadcast %3 : vector<1x128xf32> to vector<256x128xf32>
    %5 = arith.addf %2, %4 : vector<256x128xf32>
    %cst_5 = arith.constant 0.000000e+00 : f32
    %6 = vector.broadcast %cst_5 : f32 to vector<256x128xf32>
    %7 = arith.maximumf %5, %6 : vector<256x128xf32>
    %c0_6 = arith.constant 0 : index
    %c0_7 = arith.constant 0 : index
    %8 = vector.load %arg4[%c0_6, %c0_7] : memref<256x128xf32, #tpu.memory_space<vmem>>, vector<256x128xf32>
    tpu.vector_store %arg4[%c0_6, %c0_7], %7 {strides = array<i32>} : memref<256x128xf32, #tpu.memory_space<vmem>>, vector<256x128xf32>,
    return
  }
  func.func @transform_0(%arg0: i32) -> (i32, i32) {
    %c0_i32 = arith.constant 0 : i32
    %c0_i32_0 = arith.constant 0 : i32
    return %arg0, %c0_i32 : i32, i32
  }
  func.func @transform_1(%arg0: i32) -> (i32, i32) {
    %c0_i32 = arith.constant 0 : i32
    %c0_i32_0 = arith.constant 0 : i32
    %c0_i32_1 = arith.constant 0 : i32
    return %c0_i32, %c0_i32_0 : i32, i32
  }
  func.func @transform_2(%arg0: i32) -> (i32, i32) {
    %c0_i32 = arith.constant 0 : i32
    %c0_i32_0 = arith.constant 0 : i32
    %c0_i32_1 = arith.constant 0 : i32
    return %c0_i32, %c0_i32_0 : i32, i32
  }
  func.func @transform_3(%arg0: i32) -> (i32, i32) {
    %c0_i32 = arith.constant 0 : i32
    %c0_i32_0 = arith.constant 0 : i32
    return %arg0, %c0_i32 : i32, i32
  }
}

module attributes {stable_mosaic.version = 11 : i64} {
  func.func @_conv_mm_kernel(%arg0: i32, %arg1: memref<256x600xbf16, #tpu.memory_space<vmem>>, %arg2: memref<600x128xbf16, #tpu.memory_space<vmem>>, %arg3: memref<1x128xf32, #tpu.memory_space<vmem>>, %arg4: memref<256x128xf32, #tpu.memory_space<vmem>>) attributes {dimension_semantics = [#tpu.dimension_semantics<parallel>], iteration_bounds = array<i64: 5>, scalar_prefetch = 0 : i64, scratch_operands = 0 : i64, tpu.core_type = #tpu.core_type<tc>, window_params = [{transform_indices = @transform_0, window_bounds = array<i64: 256, 600>}, {pipeline_mode = #tpu.pipeline_mode<synchronous>, transform_indices = @transform_1, window_bounds = array<i64: 600, 128>}, {pipeline_mode = #tpu.pipeline_mode<synchronous>, transform_indices = @transform_2, window_bounds = array<i64: 1, 128>}, {transform_indices = @transform_3, window_bounds = array<i64: 256, 128>}]} {
    %c0 = arith.constant 0 : index
    %c0_0 = arith.constant 0 : index
    %0 = vector.load %arg1[%c0, %c0_0] : memref<256x600xbf16, #tpu.memory_space<vmem>>, vector<256x600xbf16>
    %c0_1 = arith.constant 0 : index
    %c0_2 = arith.constant 0 : index
    %1 = vector.load %arg2[%c0_1, %c0_2] : memref<600x128xbf16, #tpu.memory_space<vmem>>, vector<600x128xbf16>
    %cst = arith.constant dense<0.000000e+00> : vector<256x128xf32>
    %2 = tpu.matmul %0, %1, %cst {dimension_numbers = #tpu.dot_dimension_numbers<[1], [0], [0], [1], [0, 0, 1, 1], [], []>} : vector<256x600xbf16>, vector<600x128xbf16>, vector<256x128xf32> -> vector<256x128xf32>
    %c0_3 = arith.constant 0 : index
    %c0_4 = arith.constant 0 : index
    %3 = vector.load %arg3[%c0_3, %c0_4] : memref<1x128xf32, #tpu.memory_space<vmem>>, vector<1x128xf32>
    %4 = vector.broadcast %3 : vector<1x128xf32> to vector<256x128xf32>
    %5 = arith.addf %2, %4 : vector<256x128xf32>
    %cst_5 = arith.constant 0.000000e+00 : f32
    %6 = vector.broadcast %cst_5 : f32 to vector<256x128xf32>
    %7 = arith.maximumf %5, %6 : vector<256x128xf32>
    %c0_6 = arith.constant 0 : index
    %c0_7 = arith.constant 0 : index
    %8 = vector.load %arg4[%c0_6, %c0_7] : memref<256x128xf32, #tpu.memory_space<vmem>>, vector<256x128xf32>
    tpu.vector_store %arg4[%c0_6, %c0_7], %7 {strides = array<i32>} : memref<256x128xf32, #tpu.memory_space<vmem>>, vector<256x128xf32>,
    return
  }
  func.func @transform_0(%arg0: i32) -> (i32, i32) {
    %c0_i32 = arith.constant 0 : i32
    %c0_i32_0 = arith.constant 0 : i32
    return %arg0, %c0_i32 : i32, i32
  }
  func.func @transform_1(%arg0: i32) -> (i32, i32) {
    %c0_i32 = arith.constant 0 : i32
    %c0_i32_0 = arith.constant 0 : i32
    %c0_i32_1 = arith.constant 0 : i32
    return %c0_i32, %c0_i32_0 : i32, i32
  }
  func.func @transform_2(%arg0: i32) -> (i32, i32) {
    %c0_i32 = arith.constant 0 : i32
    %c0_i32_0 = arith.constant 0 : i32
    %c0_i32_1 = arith.constant 0 : i32
    return %c0_i32, %c0_i32_0 : i32, i32
  }
  func.func @transform_3(%arg0: i32) -> (i32, i32) {
    %c0_i32 = arith.constant 0 : i32
    %c0_i32_0 = arith.constant 0 : i32
    return %arg0, %c0_i32 : i32, i32
  }
}

module attributes {stable_mosaic.version = 11 : i64} {
  func.func @_conv_mm_kernel(%arg0: i32, %arg1: memref<216x900xbf16, #tpu.memory_space<vmem>>, %arg2: memref<900x128xbf16, #tpu.memory_space<vmem>>, %arg3: memref<1x128xf32, #tpu.memory_space<vmem>>, %arg4: memref<216x128xf32, #tpu.memory_space<vmem>>) attributes {dimension_semantics = [#tpu.dimension_semantics<parallel>], iteration_bounds = array<i64: 1>, scalar_prefetch = 0 : i64, scratch_operands = 0 : i64, tpu.core_type = #tpu.core_type<tc>, window_params = [{transform_indices = @transform_0, window_bounds = array<i64: 216, 900>}, {pipeline_mode = #tpu.pipeline_mode<synchronous>, transform_indices = @transform_1, window_bounds = array<i64: 900, 128>}, {pipeline_mode = #tpu.pipeline_mode<synchronous>, transform_indices = @transform_2, window_bounds = array<i64: 1, 128>}, {transform_indices = @transform_3, window_bounds = array<i64: 216, 128>}]} {
    %c0 = arith.constant 0 : index
    %c0_0 = arith.constant 0 : index
    %0 = vector.load %arg1[%c0, %c0_0] : memref<216x900xbf16, #tpu.memory_space<vmem>>, vector<216x900xbf16>
    %c0_1 = arith.constant 0 : index
    %c0_2 = arith.constant 0 : index
    %1 = vector.load %arg2[%c0_1, %c0_2] : memref<900x128xbf16, #tpu.memory_space<vmem>>, vector<900x128xbf16>
    %cst = arith.constant dense<0.000000e+00> : vector<216x128xf32>
    %2 = tpu.matmul %0, %1, %cst {dimension_numbers = #tpu.dot_dimension_numbers<[1], [0], [0], [1], [0, 0, 1, 1], [], []>} : vector<216x900xbf16>, vector<900x128xbf16>, vector<216x128xf32> -> vector<216x128xf32>
    %c0_3 = arith.constant 0 : index
    %c0_4 = arith.constant 0 : index
    %3 = vector.load %arg3[%c0_3, %c0_4] : memref<1x128xf32, #tpu.memory_space<vmem>>, vector<1x128xf32>
    %4 = vector.broadcast %3 : vector<1x128xf32> to vector<216x128xf32>
    %5 = arith.addf %2, %4 : vector<216x128xf32>
    %cst_5 = arith.constant 0.000000e+00 : f32
    %6 = vector.broadcast %cst_5 : f32 to vector<216x128xf32>
    %7 = arith.maximumf %5, %6 : vector<216x128xf32>
    %c0_6 = arith.constant 0 : index
    %c0_7 = arith.constant 0 : index
    %8 = vector.load %arg4[%c0_6, %c0_7] : memref<216x128xf32, #tpu.memory_space<vmem>>, vector<216x128xf32>
    tpu.vector_store %arg4[%c0_6, %c0_7], %7 {strides = array<i32>} : memref<216x128xf32, #tpu.memory_space<vmem>>, vector<216x128xf32>,
    return
  }
  func.func @transform_0(%arg0: i32) -> (i32, i32) {
    %c0_i32 = arith.constant 0 : i32
    %c0_i32_0 = arith.constant 0 : i32
    return %arg0, %c0_i32 : i32, i32
  }
  func.func @transform_1(%arg0: i32) -> (i32, i32) {
    %c0_i32 = arith.constant 0 : i32
    %c0_i32_0 = arith.constant 0 : i32
    %c0_i32_1 = arith.constant 0 : i32
    return %c0_i32, %c0_i32_0 : i32, i32
  }
  func.func @transform_2(%arg0: i32) -> (i32, i32) {
    %c0_i32 = arith.constant 0 : i32
    %c0_i32_0 = arith.constant 0 : i32
    %c0_i32_1 = arith.constant 0 : i32
    return %c0_i32, %c0_i32_0 : i32, i32
  }
  func.func @transform_3(%arg0: i32) -> (i32, i32) {
    %c0_i32 = arith.constant 0 : i32
    %c0_i32_0 = arith.constant 0 : i32
    return %arg0, %c0_i32 : i32, i32
  }
}

module attributes {stable_mosaic.version = 11 : i64} {
  func.func @_conv_mm_kernel(%arg0: i32, %arg1: memref<136x432xbf16, #tpu.memory_space<vmem>>, %arg2: memref<432x128xbf16, #tpu.memory_space<vmem>>, %arg3: memref<1x128xf32, #tpu.memory_space<vmem>>, %arg4: memref<136x128xf32, #tpu.memory_space<vmem>>) attributes {dimension_semantics = [#tpu.dimension_semantics<parallel>], iteration_bounds = array<i64: 1>, scalar_prefetch = 0 : i64, scratch_operands = 0 : i64, tpu.core_type = #tpu.core_type<tc>, window_params = [{transform_indices = @transform_0, window_bounds = array<i64: 136, 432>}, {pipeline_mode = #tpu.pipeline_mode<synchronous>, transform_indices = @transform_1, window_bounds = array<i64: 432, 128>}, {pipeline_mode = #tpu.pipeline_mode<synchronous>, transform_indices = @transform_2, window_bounds = array<i64: 1, 128>}, {transform_indices = @transform_3, window_bounds = array<i64: 136, 128>}]} {
    %c0 = arith.constant 0 : index
    %c0_0 = arith.constant 0 : index
    %0 = vector.load %arg1[%c0, %c0_0] : memref<136x432xbf16, #tpu.memory_space<vmem>>, vector<136x432xbf16>
    %c0_1 = arith.constant 0 : index
    %c0_2 = arith.constant 0 : index
    %1 = vector.load %arg2[%c0_1, %c0_2] : memref<432x128xbf16, #tpu.memory_space<vmem>>, vector<432x128xbf16>
    %cst = arith.constant dense<0.000000e+00> : vector<136x128xf32>
    %2 = tpu.matmul %0, %1, %cst {dimension_numbers = #tpu.dot_dimension_numbers<[1], [0], [0], [1], [0, 0, 1, 1], [], []>} : vector<136x432xbf16>, vector<432x128xbf16>, vector<136x128xf32> -> vector<136x128xf32>
    %c0_3 = arith.constant 0 : index
    %c0_4 = arith.constant 0 : index
    %3 = vector.load %arg3[%c0_3, %c0_4] : memref<1x128xf32, #tpu.memory_space<vmem>>, vector<1x128xf32>
    %4 = vector.broadcast %3 : vector<1x128xf32> to vector<136x128xf32>
    %5 = arith.addf %2, %4 : vector<136x128xf32>
    %cst_5 = arith.constant 0.000000e+00 : f32
    %6 = vector.broadcast %cst_5 : f32 to vector<136x128xf32>
    %7 = arith.maximumf %5, %6 : vector<136x128xf32>
    %c0_6 = arith.constant 0 : index
    %c0_7 = arith.constant 0 : index
    %8 = vector.load %arg4[%c0_6, %c0_7] : memref<136x128xf32, #tpu.memory_space<vmem>>, vector<136x128xf32>
    tpu.vector_store %arg4[%c0_6, %c0_7], %7 {strides = array<i32>} : memref<136x128xf32, #tpu.memory_space<vmem>>, vector<136x128xf32>,
    return
  }
  func.func @transform_0(%arg0: i32) -> (i32, i32) {
    %c0_i32 = arith.constant 0 : i32
    %c0_i32_0 = arith.constant 0 : i32
    return %arg0, %c0_i32 : i32, i32
  }
  func.func @transform_1(%arg0: i32) -> (i32, i32) {
    %c0_i32 = arith.constant 0 : i32
    %c0_i32_0 = arith.constant 0 : i32
    %c0_i32_1 = arith.constant 0 : i32
    return %c0_i32, %c0_i32_0 : i32, i32
  }
  func.func @transform_2(%arg0: i32) -> (i32, i32) {
    %c0_i32 = arith.constant 0 : i32
    %c0_i32_0 = arith.constant 0 : i32
    %c0_i32_1 = arith.constant 0 : i32
    return %c0_i32, %c0_i32_0 : i32, i32
  }
  func.func @transform_3(%arg0: i32) -> (i32, i32) {
    %c0_i32 = arith.constant 0 : i32
    %c0_i32_0 = arith.constant 0 : i32
    return %arg0, %c0_i32 : i32, i32
  }
}

module attributes {stable_mosaic.version = 11 : i64} {
  func.func @_conv_mm_kernel(%arg0: i32, %arg1: memref<72x576xbf16, #tpu.memory_space<vmem>>, %arg2: memref<576x128xbf16, #tpu.memory_space<vmem>>, %arg3: memref<1x128xf32, #tpu.memory_space<vmem>>, %arg4: memref<72x128xf32, #tpu.memory_space<vmem>>) attributes {dimension_semantics = [#tpu.dimension_semantics<parallel>], iteration_bounds = array<i64: 1>, scalar_prefetch = 0 : i64, scratch_operands = 0 : i64, tpu.core_type = #tpu.core_type<tc>, window_params = [{transform_indices = @transform_0, window_bounds = array<i64: 72, 576>}, {pipeline_mode = #tpu.pipeline_mode<synchronous>, transform_indices = @transform_1, window_bounds = array<i64: 576, 128>}, {pipeline_mode = #tpu.pipeline_mode<synchronous>, transform_indices = @transform_2, window_bounds = array<i64: 1, 128>}, {transform_indices = @transform_3, window_bounds = array<i64: 72, 128>}]} {
    %c0 = arith.constant 0 : index
    %c0_0 = arith.constant 0 : index
    %0 = vector.load %arg1[%c0, %c0_0] : memref<72x576xbf16, #tpu.memory_space<vmem>>, vector<72x576xbf16>
    %c0_1 = arith.constant 0 : index
    %c0_2 = arith.constant 0 : index
    %1 = vector.load %arg2[%c0_1, %c0_2] : memref<576x128xbf16, #tpu.memory_space<vmem>>, vector<576x128xbf16>
    %cst = arith.constant dense<0.000000e+00> : vector<72x128xf32>
    %2 = tpu.matmul %0, %1, %cst {dimension_numbers = #tpu.dot_dimension_numbers<[1], [0], [0], [1], [0, 0, 1, 1], [], []>} : vector<72x576xbf16>, vector<576x128xbf16>, vector<72x128xf32> -> vector<72x128xf32>
    %c0_3 = arith.constant 0 : index
    %c0_4 = arith.constant 0 : index
    %3 = vector.load %arg3[%c0_3, %c0_4] : memref<1x128xf32, #tpu.memory_space<vmem>>, vector<1x128xf32>
    %4 = vector.broadcast %3 : vector<1x128xf32> to vector<72x128xf32>
    %5 = arith.addf %2, %4 : vector<72x128xf32>
    %cst_5 = arith.constant 0.000000e+00 : f32
    %6 = vector.broadcast %cst_5 : f32 to vector<72x128xf32>
    %7 = arith.maximumf %5, %6 : vector<72x128xf32>
    %c0_6 = arith.constant 0 : index
    %c0_7 = arith.constant 0 : index
    %8 = vector.load %arg4[%c0_6, %c0_7] : memref<72x128xf32, #tpu.memory_space<vmem>>, vector<72x128xf32>
    tpu.vector_store %arg4[%c0_6, %c0_7], %7 {strides = array<i32>} : memref<72x128xf32, #tpu.memory_space<vmem>>, vector<72x128xf32>,
    return
  }
  func.func @transform_0(%arg0: i32) -> (i32, i32) {
    %c0_i32 = arith.constant 0 : i32
    %c0_i32_0 = arith.constant 0 : i32
    return %arg0, %c0_i32 : i32, i32
  }
  func.func @transform_1(%arg0: i32) -> (i32, i32) {
    %c0_i32 = arith.constant 0 : i32
    %c0_i32_0 = arith.constant 0 : i32
    %c0_i32_1 = arith.constant 0 : i32
    return %c0_i32, %c0_i32_0 : i32, i32
  }
  func.func @transform_2(%arg0: i32) -> (i32, i32) {
    %c0_i32 = arith.constant 0 : i32
    %c0_i32_0 = arith.constant 0 : i32
    %c0_i32_1 = arith.constant 0 : i32
    return %c0_i32, %c0_i32_0 : i32, i32
  }
  func.func @transform_3(%arg0: i32) -> (i32, i32) {
    %c0_i32 = arith.constant 0 : i32
    %c0_i32_0 = arith.constant 0 : i32
    return %arg0, %c0_i32 : i32, i32
  }
}

module attributes {stable_mosaic.version = 11 : i64} {
  func.func @_fc_tail_kernel(%arg0: i32, %arg1: memref<2x768xbf16, #tpu.memory_space<vmem>>, %arg2: memref<768x1164xbf16, #tpu.memory_space<vmem>>, %arg3: memref<1x1164xf32, #tpu.memory_space<vmem>>, %arg4: memref<2x1164xf32, #tpu.memory_space<vmem>>, %arg5: memref<1164x100xbf16, #tpu.memory_space<vmem>>, %arg6: memref<1x100xf32, #tpu.memory_space<vmem>>, %arg7: memref<2x100xf32, #tpu.memory_space<vmem>>, %arg8: memref<100x50xbf16, #tpu.memory_space<vmem>>, %arg9: memref<1x50xf32, #tpu.memory_space<vmem>>, %arg10: memref<50x10xbf16, #tpu.memory_space<vmem>>, %arg11: memref<1x10xf32, #tpu.memory_space<vmem>>, %arg12: memref<1x10xf32, #tpu.memory_space<vmem>>, %arg13: memref<1x1xf32, #tpu.memory_space<vmem>>, %arg14: memref<2x1xf32, #tpu.memory_space<vmem>>, %arg15: memref<2x1164xf32, #tpu.memory_space<vmem>>) attributes {dimension_semantics = [#tpu.dimension_semantics<arbitrary>], iteration_bounds = array<i64: 3>, scalar_prefetch = 0 : i64, scratch_operands = 1 : i64, tpu.core_type = #tpu.core_type<tc>, window_params = [{transform_indices = @transform_0, window_bounds = array<i64: 2, 768>}, {transform_indices = @transform_1, window_bounds = array<i64: 768, 1164>}, {pipeline_mode = #tpu.pipeline_mode<synchronous>, transform_indices = @transform_2, window_bounds = array<i64: 1, 1164>}, {pipeline_mode = #tpu.pipeline_mode<synchronous>, transform_indices = @transform_3, window_bounds = array<i64: 2, 1164>}, {pipeline_mode = #tpu.pipeline_mode<synchronous>, transform_indices = @transform_4, window_bounds = array<i64: 1164, 100>}, {pipeline_mode = #tpu.pipeline_mode<synchronous>, transform_indices = @transform_5, window_bounds = array<i64: 1, 100>}, {pipeline_mode = #tpu.pipeline_mode<synchronous>, transform_indices = @transform_6, window_bounds = array<i64: 2, 100>}, {pipeline_mode = #tpu.pipeline_mode<synchronous>, transform_indices = @transform_7, window_bounds = array<i64: 100, 50>}, {pipeline_mode = #tpu.pipeline_mode<synchronous>, transform_indices = @transform_8, window_bounds = array<i64: 1, 50>}, {pipeline_mode = #tpu.pipeline_mode<synchronous>, transform_indices = @transform_9, window_bounds = array<i64: 50, 10>}, {pipeline_mode = #tpu.pipeline_mode<synchronous>, transform_indices = @transform_10, window_bounds = array<i64: 1, 10>}, {pipeline_mode = #tpu.pipeline_mode<synchronous>, transform_indices = @transform_11, window_bounds = array<i64: 1, 10>}, {pipeline_mode = #tpu.pipeline_mode<synchronous>, transform_indices = @transform_12, window_bounds = array<i64: 1, 1>}, {pipeline_mode = #tpu.pipeline_mode<synchronous>, transform_indices = @transform_13, window_bounds = array<i64: 2, 1>}]} {
    %c0_i32 = arith.constant 0 : i32
    %0 = arith.cmpi eq, %arg0, %c0_i32 : i32
    %1 = arith.extui %0 : i1 to i32
    %c0_i32_0 = arith.constant 0 : i32
    %2 = arith.cmpi ne, %1, %c0_i32_0 : i32
    scf.if %2 {
      %cst_9 = arith.constant 0.000000e+00 : f32
      %12 = vector.broadcast %cst_9 : f32 to vector<2x1164xf32>
      %c0_10 = arith.constant 0 : index
      %c0_11 = arith.constant 0 : index
      %13 = vector.load %arg15[%c0_10, %c0_11] : memref<2x1164xf32, #tpu.memory_space<vmem>>, vector<2x1164xf32>
      tpu.vector_store %arg15[%c0_10, %c0_11], %12 {strides = array<i32>} : memref<2x1164xf32, #tpu.memory_space<vmem>>, vector<2x1164xf32>,
    } else {
    }
    %c0 = arith.constant 0 : index
    %c0_1 = arith.constant 0 : index
    %3 = vector.load %arg15[%c0, %c0_1] : memref<2x1164xf32, #tpu.memory_space<vmem>>, vector<2x1164xf32>
    %c0_2 = arith.constant 0 : index
    %c0_3 = arith.constant 0 : index
    %4 = vector.load %arg1[%c0_2, %c0_3] : memref<2x768xbf16, #tpu.memory_space<vmem>>, vector<2x768xbf16>
    %c0_4 = arith.constant 0 : index
    %c0_5 = arith.constant 0 : index
    %5 = vector.load %arg2[%c0_4, %c0_5] : memref<768x1164xbf16, #tpu.memory_space<vmem>>, vector<768x1164xbf16>
    %cst = arith.constant dense<0.000000e+00> : vector<2x1164xf32>
    %6 = tpu.matmul %4, %5, %cst {dimension_numbers = #tpu.dot_dimension_numbers<[1], [0], [0], [1], [0, 0, 1, 1], [], []>} : vector<2x768xbf16>, vector<768x1164xbf16>, vector<2x1164xf32> -> vector<2x1164xf32>
    %7 = arith.addf %3, %6 : vector<2x1164xf32>
    %c0_6 = arith.constant 0 : index
    %c0_7 = arith.constant 0 : index
    %8 = vector.load %arg15[%c0_6, %c0_7] : memref<2x1164xf32, #tpu.memory_space<vmem>>, vector<2x1164xf32>
    tpu.vector_store %arg15[%c0_6, %c0_7], %7 {strides = array<i32>} : memref<2x1164xf32, #tpu.memory_space<vmem>>, vector<2x1164xf32>,
    %c2_i32 = arith.constant 2 : i32
    %9 = arith.cmpi eq, %arg0, %c2_i32 : i32
    %10 = arith.extui %9 : i1 to i32
    %c0_i32_8 = arith.constant 0 : i32
    %11 = arith.cmpi ne, %10, %c0_i32_8 : i32
    scf.if %11 {
      %c0_9 = arith.constant 0 : index
      %c0_10 = arith.constant 0 : index
      %12 = vector.load %arg15[%c0_9, %c0_10] : memref<2x1164xf32, #tpu.memory_space<vmem>>, vector<2x1164xf32>
      %c0_11 = arith.constant 0 : index
      %c0_12 = arith.constant 0 : index
      %13 = vector.load %arg3[%c0_11, %c0_12] : memref<1x1164xf32, #tpu.memory_space<vmem>>, vector<1x1164xf32>
      %14 = vector.broadcast %13 : vector<1x1164xf32> to vector<2x1164xf32>
      %15 = arith.addf %12, %14 : vector<2x1164xf32>
      %cst_13 = arith.constant 0.000000e+00 : f32
      %16 = vector.broadcast %cst_13 : f32 to vector<2x1164xf32>
      %17 = arith.maximumf %15, %16 : vector<2x1164xf32>
      %c0_14 = arith.constant 0 : index
      %c0_15 = arith.constant 0 : index
      %18 = vector.load %arg4[%c0_14, %c0_15] : memref<2x1164xf32, #tpu.memory_space<vmem>>, vector<2x1164xf32>
      %cst_16 = arith.constant 3.000000e-01 : f32
      %19 = vector.broadcast %cst_16 : f32 to vector<2x1164xf32>
      %20 = arith.cmpf oge, %18, %19 : vector<2x1164xf32>
      %cst_17 = arith.constant 1.42857146 : f32
      %21 = vector.broadcast %cst_17 : f32 to vector<2x1164xf32>
      %22 = arith.mulf %17, %21 : vector<2x1164xf32>
      %cst_18 = arith.constant 0.000000e+00 : f32
      %23 = vector.broadcast %cst_18 : f32 to vector<2x1164xf32>
      %24 = arith.select %20, %22, %23 : vector<2x1164xi1>, vector<2x1164xf32>
      %25 = arith.truncf %24 : vector<2x1164xf32> to vector<2x1164xbf16>
      %c0_19 = arith.constant 0 : index
      %c0_20 = arith.constant 0 : index
      %26 = vector.load %arg5[%c0_19, %c0_20] : memref<1164x100xbf16, #tpu.memory_space<vmem>>, vector<1164x100xbf16>
      %cst_21 = arith.constant dense<0.000000e+00> : vector<2x100xf32>
      %27 = tpu.matmul %25, %26, %cst_21 {dimension_numbers = #tpu.dot_dimension_numbers<[1], [0], [0], [1], [0, 0, 1, 1], [], []>} : vector<2x1164xbf16>, vector<1164x100xbf16>, vector<2x100xf32> -> vector<2x100xf32>
      %c0_22 = arith.constant 0 : index
      %c0_23 = arith.constant 0 : index
      %28 = vector.load %arg6[%c0_22, %c0_23] : memref<1x100xf32, #tpu.memory_space<vmem>>, vector<1x100xf32>
      %29 = vector.broadcast %28 : vector<1x100xf32> to vector<2x100xf32>
      %30 = arith.addf %27, %29 : vector<2x100xf32>
      %cst_24 = arith.constant 0.000000e+00 : f32
      %31 = vector.broadcast %cst_24 : f32 to vector<2x100xf32>
      %32 = arith.maximumf %30, %31 : vector<2x100xf32>
      %c0_25 = arith.constant 0 : index
      %c0_26 = arith.constant 0 : index
      %33 = vector.load %arg7[%c0_25, %c0_26] : memref<2x100xf32, #tpu.memory_space<vmem>>, vector<2x100xf32>
      %cst_27 = arith.constant 3.000000e-01 : f32
      %34 = vector.broadcast %cst_27 : f32 to vector<2x100xf32>
      %35 = arith.cmpf oge, %33, %34 : vector<2x100xf32>
      %cst_28 = arith.constant 1.42857146 : f32
      %36 = vector.broadcast %cst_28 : f32 to vector<2x100xf32>
      %37 = arith.mulf %32, %36 : vector<2x100xf32>
      %cst_29 = arith.constant 0.000000e+00 : f32
      %38 = vector.broadcast %cst_29 : f32 to vector<2x100xf32>
      %39 = arith.select %35, %37, %38 : vector<2x100xi1>, vector<2x100xf32>
      %40 = arith.truncf %39 : vector<2x100xf32> to vector<2x100xbf16>
      %c0_30 = arith.constant 0 : index
      %c0_31 = arith.constant 0 : index
      %41 = vector.load %arg8[%c0_30, %c0_31] : memref<100x50xbf16, #tpu.memory_space<vmem>>, vector<100x50xbf16>
      %cst_32 = arith.constant dense<0.000000e+00> : vector<2x50xf32>
      %42 = tpu.matmul %40, %41, %cst_32 {dimension_numbers = #tpu.dot_dimension_numbers<[1], [0], [0], [1], [0, 0, 1, 1], [], []>} : vector<2x100xbf16>, vector<100x50xbf16>, vector<2x50xf32> -> vector<2x50xf32>
      %c0_33 = arith.constant 0 : index
      %c0_34 = arith.constant 0 : index
      %43 = vector.load %arg9[%c0_33, %c0_34] : memref<1x50xf32, #tpu.memory_space<vmem>>, vector<1x50xf32>
      %44 = vector.broadcast %43 : vector<1x50xf32> to vector<2x50xf32>
      %45 = arith.addf %42, %44 : vector<2x50xf32>
      %cst_35 = arith.constant 0.000000e+00 : f32
      %46 = vector.broadcast %cst_35 : f32 to vector<2x50xf32>
      %47 = arith.maximumf %45, %46 : vector<2x50xf32>
      %48 = arith.truncf %47 : vector<2x50xf32> to vector<2x50xbf16>
      %c0_36 = arith.constant 0 : index
      %c0_37 = arith.constant 0 : index
      %49 = vector.load %arg10[%c0_36, %c0_37] : memref<50x10xbf16, #tpu.memory_space<vmem>>, vector<50x10xbf16>
      %cst_38 = arith.constant dense<0.000000e+00> : vector<2x10xf32>
      %50 = tpu.matmul %48, %49, %cst_38 {dimension_numbers = #tpu.dot_dimension_numbers<[1], [0], [0], [1], [0, 0, 1, 1], [], []>} : vector<2x50xbf16>, vector<50x10xbf16>, vector<2x10xf32> -> vector<2x10xf32>
      %c0_39 = arith.constant 0 : index
      %c0_40 = arith.constant 0 : index
      %51 = vector.load %arg11[%c0_39, %c0_40] : memref<1x10xf32, #tpu.memory_space<vmem>>, vector<1x10xf32>
      %52 = vector.broadcast %51 : vector<1x10xf32> to vector<2x10xf32>
      %53 = arith.addf %50, %52 : vector<2x10xf32>
      %cst_41 = arith.constant 0.000000e+00 : f32
      %54 = vector.broadcast %cst_41 : f32 to vector<2x10xf32>
      %55 = arith.maximumf %53, %54 : vector<2x10xf32>
      %c0_42 = arith.constant 0 : index
      %c0_43 = arith.constant 0 : index
      %56 = vector.load %arg12[%c0_42, %c0_43] : memref<1x10xf32, #tpu.memory_space<vmem>>, vector<1x10xf32>
      %57 = vector.broadcast %56 : vector<1x10xf32> to vector<2x10xf32>
      %58 = arith.mulf %55, %57 : vector<2x10xf32>
      %cst_44 = arith.constant dense<0.000000e+00> : vector<2xf32>
      %59 = vector.multi_reduction <add>, %58, %cst_44 [1] : vector<2x10xf32> to vector<2xf32>
      %60 = vector.shape_cast %59 : vector<2xf32> to vector<2x1xf32>
      %c0_45 = arith.constant 0 : index
      %c0_46 = arith.constant 0 : index
      %61 = vector.load %arg13[%c0_45, %c0_46] : memref<1x1xf32, #tpu.memory_space<vmem>>, vector<1x1xf32>
      %62 = vector.broadcast %61 : vector<1x1xf32> to vector<2x1xf32>
      %63 = arith.addf %60, %62 : vector<2x1xf32>
      %c0_47 = arith.constant 0 : index
      %c0_48 = arith.constant 0 : index
      %64 = vector.load %arg14[%c0_47, %c0_48] : memref<2x1xf32, #tpu.memory_space<vmem>>, vector<2x1xf32>
      tpu.vector_store %arg14[%c0_47, %c0_48], %63 {strides = array<i32>} : memref<2x1xf32, #tpu.memory_space<vmem>>, vector<2x1xf32>,
    } else {
    }
    return
  }
  func.func @transform_0(%arg0: i32) -> (i32, i32) {
    %c0_i32 = arith.constant 0 : i32
    %c0_i32_0 = arith.constant 0 : i32
    return %c0_i32, %arg0 : i32, i32
  }
  func.func @transform_1(%arg0: i32) -> (i32, i32) {
    %c0_i32 = arith.constant 0 : i32
    %c0_i32_0 = arith.constant 0 : i32
    return %arg0, %c0_i32 : i32, i32
  }
  func.func @transform_2(%arg0: i32) -> (i32, i32) {
    %c0_i32 = arith.constant 0 : i32
    %c0_i32_0 = arith.constant 0 : i32
    %c0_i32_1 = arith.constant 0 : i32
    return %c0_i32, %c0_i32_0 : i32, i32
  }
  func.func @transform_3(%arg0: i32) -> (i32, i32) {
    %c0_i32 = arith.constant 0 : i32
    %c0_i32_0 = arith.constant 0 : i32
    %c0_i32_1 = arith.constant 0 : i32
    return %c0_i32, %c0_i32_0 : i32, i32
  }
  func.func @transform_4(%arg0: i32) -> (i32, i32) {
    %c0_i32 = arith.constant 0 : i32
    %c0_i32_0 = arith.constant 0 : i32
    %c0_i32_1 = arith.constant 0 : i32
    return %c0_i32, %c0_i32_0 : i32, i32
  }
  func.func @transform_5(%arg0: i32) -> (i32, i32) {
    %c0_i32 = arith.constant 0 : i32
    %c0_i32_0 = arith.constant 0 : i32
    %c0_i32_1 = arith.constant 0 : i32
    return %c0_i32, %c0_i32_0 : i32, i32
  }
  func.func @transform_6(%arg0: i32) -> (i32, i32) {
    %c0_i32 = arith.constant 0 : i32
    %c0_i32_0 = arith.constant 0 : i32
    %c0_i32_1 = arith.constant 0 : i32
    return %c0_i32, %c0_i32_0 : i32, i32
  }
  func.func @transform_7(%arg0: i32) -> (i32, i32) {
    %c0_i32 = arith.constant 0 : i32
    %c0_i32_0 = arith.constant 0 : i32
    %c0_i32_1 = arith.constant 0 : i32
    return %c0_i32, %c0_i32_0 : i32, i32
  }
  func.func @transform_8(%arg0: i32) -> (i32, i32) {
    %c0_i32 = arith.constant 0 : i32
    %c0_i32_0 = arith.constant 0 : i32
    %c0_i32_1 = arith.constant 0 : i32
    return %c0_i32, %c0_i32_0 : i32, i32
  }
  func.func @transform_9(%arg0: i32) -> (i32, i32) {
    %c0_i32 = arith.constant 0 : i32
    %c0_i32_0 = arith.constant 0 : i32
    %c0_i32_1 = arith.constant 0 : i32
    return %c0_i32, %c0_i32_0 : i32, i32
  }
  func.func @transform_10(%arg0: i32) -> (i32, i32) {
    %c0_i32 = arith.constant 0 : i32
    %c0_i32_0 = arith.constant 0 : i32
    %c0_i32_1 = arith.constant 0 : i32
    return %c0_i32, %c0_i32_0 : i32, i32
  }
  func.func @transform_11(%arg0: i32) -> (i32, i32) {
    %c0_i32 = arith.constant 0 : i32
    %c0_i32_0 = arith.constant 0 : i32
    %c0_i32_1 = arith.constant 0 : i32
    return %c0_i32, %c0_i32_0 : i32, i32
  }
  func.func @transform_12(%arg0: i32) -> (i32, i32) {
    %c0_i32 = arith.constant 0 : i32
    %c0_i32_0 = arith.constant 0 : i32
    %c0_i32_1 = arith.constant 0 : i32
    return %c0_i32, %c0_i32_0 : i32, i32
  }
  func.func @transform_13(%arg0: i32) -> (i32, i32) {
    %c0_i32 = arith.constant 0 : i32
    %c0_i32_0 = arith.constant 0 : i32
    %c0_i32_1 = arith.constant 0 : i32
    return %c0_i32, %c0_i32_0 : i32, i32
  }
}

</mosaic_0001>

<bundles_post_ra>
// kernel: convnet_forward.8
= control target key start
LH: loop header
LB: loop body
LE: loop exit
PB: predicated region body
PF: predicated region fallthrough
CT: control target
= control target key end

     0   :  { %s851_s12 = smov 0   ;;  %s992_s0 = inlined_call_operand.vmem [shape: bf16[5120,75], index: 0, kind: input, shape index: {}]   ;;  %s993_s1 = inlined_call_operand.vmem [shape: bf16[75,128], index: 1, kind: input, shape index: {}]   ;;  %s994_s2 = inlined_call_operand.vmem [shape: f32[1,128], index: 2, kind: input, shape index: {}]   ;;  %s995_s3 = inlined_call_operand.vmem [shape: f32[5120,128], index: 3, kind: output, shape index: {}]  }
   0x1 LB: > { %s670_s13 = sadd.s32 4294967295, %s828_s12   ;;  %p674_p0 = scmp.ge.s32.totalorder %s828_s12, 1  ;;  %s828_s12 = sphi %s851_s12, %s13_s12  }
   0x2   : > { %p138_p1 = scmp.lt.s32.totalorder %s828_s12, 21 }
   0x4   : > { %p139_p2 = pnand %p674_p0, %p138_p1 }
   0x5   : > { %v801_v0 = vld [vmem:[%s993_s1] sm:$0xff] (!%p139_p2)   ;;  %v802_v1 = vld [vmem:[%s993_s1 + $0x8] sm:$0xff] (!%p139_p2)   ;;  %vm382_vm0 = vcmask (!%p139_p2), 1044480   ;;  %v803_v2 = vld [vmem:[%s993_s1 + $0x10] sm:$0xff] (!%p139_p2)   ;;  %s675_s20 = sshll.u32 (!%p139_p2), %s670_s13, 5  ;;  %vm383_vm1 = vcmask (!%p139_p2), 1045504  }
   0x6   : > { %142 = sbr.rel (%p139_p2) target bundleno = 270 (0x10e), region = 32  ;;  %740 = vmatprep.subr.bf16.mxu0 (!%p139_p2), %v801_v0  ;;  %782 = vmatprep.subr.bf16.mxu1 (!%p139_p2), %v801_v0  ;;  %v830_v3 = vmov (!%p139_p2), 65535   ;;  %p163_p3 = scmp.lt.s32.totalorder (!%p139_p2), %s675_s20, 639  ;;  %v804_v5 = vld [vmem:[%s993_s1 + $0x18] sm:$0xff] (!%p139_p2)   ;;  %v805_v6 = vld [vmem:[%s993_s1 + $0x20] sm:$0x3f] (!%p139_p2)  }
   0x7   : > { %741 = vmatpush3.bf16.msra.mxu0 (!%p139_p2), %v801_v0  ;;  %787 = vmatpush3.bf16.msra.mxu1 (!%p139_p2), %v801_v0  ;;  %v384_v4 = vsel (!%p139_p2), %vm382_vm0, 4294967295, %v830_v3  ;;  %vm333_vm2 = vcmask (!%p139_p2), 613376   ;;  %v917_v25 = vld [vmem:[%s994_s2] ss:$0 sm:$0xff] (!%p139_p2) }
   0x8   : > { %742 = vmatprep.subr.bf16.mxu0 (!%p139_p2), %v802_v1  ;;  %783 = vmatprep.subr.bf16.mxu1 (!%p139_p2), %v802_v1  ;;  %v385_v7 = vsel (!%p139_p2), %vm383_vm1, %v384_v4, 0 }
   0x9   : > { %v387_v8 = vand.u32 (!%p139_p2), %v805_v6, %v385_v7 }
   0xb   : > { %743 = vmatpush3.bf16.msra.mxu0 (!%p139_p2), %v802_v1  ;;  %788 = vmatpush3.bf16.msra.mxu1 (!%p139_p2), %v802_v1 }
   0xc   : > { %744 = vmatprep.subr.bf16.mxu0 (!%p139_p2), %v803_v2  ;;  %784 = vmatprep.subr.bf16.mxu1 (!%p139_p2), %v803_v2 }
   0xd   : > { %s997_s20 = smov (!%p163_p3, %s675_s20), 639 }
   0xe   : > { %s676_s25 = sshll.u32 %s997_s20, 2  ;;  %s678_s4 = sshll.u32 %s997_s20, 3 }
   0xf   : > { %745 = vmatpush3.bf16.msra.mxu0 %v803_v2  ;;  %789 = vmatpush3.bf16.msra.mxu1 %v803_v2  ;;  %s880_s28 = scalar_lea.vmem %s992_s0, %s676_s25  ;;  %s925_s7 = scalar_lea.vmem %s995_s3, %s678_s4 }
  0x10   : > { %746 = vmatprep.subr.bf16.mxu0 %v804_v5  ;;  %785 = vmatprep.subr.bf16.mxu1 %v804_v5  ;;  %v806_v9 = vld [vmem:[%s880_s28] sm:$0xff]   ;;  %v808_v11 = vld [vmem:[%s880_s28 + $0x8] sm:$0xff]   ;;  %v810_v13 = vld [vmem:[%s880_s28 + $0x10] sm:$0xff]  }
  0x11   : > { %v807_v10 = vld [vmem:[%s880_s28 + $0x40] sm:$0xff]   ;;  %750 = vmatprep.mubr.msk.bf16.mxu0 %vm333_vm2, %v806_v9  ;;  %v809_v12 = vld [vmem:[%s880_s28 + $0x48] sm:$0xff]   ;;  %v811_v14 = vld [vmem:[%s880_s28 + $0x50] sm:$0xff]  }
  0x12   : > { %766 = vmatprep.mubr.msk.bf16.mxu1 %vm333_vm2, %v807_v10  ;;  %v812_v15 = vld [vmem:[%s880_s28 + $0x18] sm:$0xff]   ;;  %v814_v17 = vld [vmem:[%s880_s28 + $0x20] sm:$0xff]   ;;  %v816_v19 = vld [vmem:[%s880_s28 + $0x28] sm:$0xff]  }
  0x13   : > { %747 = vmatpush3.bf16.msra.mxu0 %v804_v5  ;;  %790 = vmatpush3.bf16.msra.mxu1 %v804_v5  ;;  %v813_v16 = vld [vmem:[%s880_s28 + $0x58] sm:$0xff]   ;;  %v815_v18 = vld [vmem:[%s880_s28 + $0x60] sm:$0xff]   ;;  %v817_v20 = vld [vmem:[%s880_s28 + $0x68] sm:$0xff]  }
  0x14   : > { %748 = vmatprep.subr.bf16.mxu0 %v387_v8  ;;  %786 = vmatprep.subr.bf16.mxu1 %v387_v8  ;;  %v818_v21 = vld [vmem:[%s880_s28 + $0x30] sm:$0xff]   ;;  %v820_v23 = vld [vmem:[%s880_s28 + $0x38] sm:$0xff]  }
  0x15   : > { %v819_v22 = vld [vmem:[%s880_s28 + $0x70] sm:$0xff]   ;;  %v821_v24 = vld [vmem:[%s880_s28 + $0x78] sm:$0xff]  }
  0x17   : > { %749 = vmatpush3.bf16.msra.mxu0 %v387_v8  ;;  %791 = vmatpush3.bf16.msra.mxu1 %v387_v8 }
  0x1a   : > { %751 = vmatmul.mubr.msk.bf16.vlgmr.msra.gmra.mrb[0].mxu0 %vm333_vm2, %v808_v11  ;;  %767 = vmatmul.mubr.msk.bf16.vlgmr.msra.gmra.mrb[0].mxu1 %vm333_vm2, %v809_v12 }
  0x1b   : > { %754 = vmatprep.mubr.msk.bf16.mxu0 %vm333_vm2, %v810_v13  ;;  %770 = vmatprep.mubr.msk.bf16.mxu1 %vm333_vm2, %v811_v14 }
  0x22   : > { %755 = vmatmul.mubr.msk.bf16.gmra.mrb[4].mxu0 %vm333_vm2, %v812_v15  ;;  %771 = vmatmul.mubr.msk.bf16.gmra.mrb[4].mxu1 %vm333_vm2, %v813_v16 }
  0x23   : > { %758 = vmatprep.mubr.msk.bf16.mxu0 %vm333_vm2, %v814_v17  ;;  %774 = vmatprep.mubr.msk.bf16.mxu1 %vm333_vm2, %v815_v18 }
  0x2a   : > { %759 = vmatmul.mubr.msk.bf16.gmra.mrb[8].mxu0 %vm333_vm2, %v816_v19  ;;  %775 = vmatmul.mubr.msk.bf16.gmra.mrb[8].mxu1 %vm333_vm2, %v817_v20 }
  0x2b   : > { %762 = vmatprep.mubr.msk.bf16.mxu0 %vm333_vm2, %v818_v21  ;;  %778 = vmatprep.mubr.msk.bf16.mxu1 %vm333_vm2, %v819_v22 }
  0x32   : > { %763 = vmatmul.mubr.msk.bf16.gmra.mrb[12].mxu0 %vm333_vm2, %v820_v23  ;;  %779 = vmatmul.mubr.msk.bf16.gmra.mrb[12].mxu1 %vm333_vm2, %v821_v24 }
  0xed   : > { %v752_v26 = vpop.f32.mrb[0].mxu0  ;;  %v768_v27 = vpop.f32.mrb[0].mxu1 }
  0xee   : > { %v432_v28 = vadd.f32 %v752_v26, %v917_v25  ;;  %v496_v29 = vadd.f32 %v768_v27, %v917_v25  ;;  %v423_v30 = vpop.f32.mrb[1].mxu0  ;;  %v487_v31 = vpop.f32.mrb[1].mxu1 }
  0xef   : > { %v424_v32 = vadd.f32 %v917_v25, %v423_v30  ;;  %v488_v33 = vadd.f32 %v917_v25, %v487_v31  ;;  %v753_v34 = vpop.f32.mrb[2].mxu0  ;;  %v769_v35 = vpop.f32.mrb[2].mxu1 }
  0xf0   : > { %v552_v36 = vmax.f32 %v432_v28, 0.0  ;;  %v568_v37 = vmax.f32 %v496_v29, 0.0  ;;  %v435_v38 = vadd.f32 %v753_v34, %v917_v25  ;;  %v499_v39 = vadd.f32 %v769_v35, %v917_v25  ;;  %v426_v40 = vpop.f32.mrb[3].mxu0  ;;  %v490_v41 = vpop.f32.mrb[3].mxu1 }
  0xf1   : > { %v550_v42 = vmax.f32 %v424_v32, 0.0  ;;  %v566_v43 = vmax.f32 %v488_v33, 0.0  ;;  %v427_v44 = vadd.f32 %v917_v25, %v426_v40  ;;  %v491_v45 = vadd.f32 %v917_v25, %v490_v41 }
  0xf2   : > { %584 = vst [vmem:[%s925_s7 + $0x10] sm:$0xff] %v552_v36  ;;  %600 = vst [vmem:[%s925_s7 + $0x90] sm:$0xff] %v568_v37  ;;  %v553_v46 = vmax.f32 %v435_v38, 0.0  ;;  %v569_v47 = vmax.f32 %v499_v39, 0.0 }
  0xf3   : > { %582 = vst [vmem:[%s925_s7] sm:$0xff] %v550_v42  ;;  %598 = vst [vmem:[%s925_s7 + $0x80] sm:$0xff] %v566_v43  ;;  %v551_v48 = vmax.f32 %v427_v44, 0.0  ;;  %v567_v49 = vmax.f32 %v491_v45, 0.0 }
  0xf4   : > { %585 = vst [vmem:[%s925_s7 + $0x18] sm:$0xff] %v553_v46  ;;  %601 = vst [vmem:[%s925_s7 + $0x98] sm:$0xff] %v569_v47 }
  0xf5   : > { %583 = vst [vmem:[%s925_s7 + $0x8] sm:$0xff] %v551_v48  ;;  %599 = vst [vmem:[%s925_s7 + $0x88] sm:$0xff] %v567_v49  ;;  %v756_v50 = vpop.f32.mrb[4].mxu0  ;;  %v772_v51 = vpop.f32.mrb[4].mxu1 }
  0xf6   : > { %v448_v52 = vadd.f32 %v756_v50, %v917_v25  ;;  %v512_v53 = vadd.f32 %v772_v51, %v917_v25  ;;  %v439_v54 = vpop.f32.mrb[5].mxu0  ;;  %v503_v55 = vpop.f32.mrb[5].mxu1 }
  0xf7   : > { %v440_v56 = vadd.f32 %v917_v25, %v439_v54  ;;  %v504_v57 = vadd.f32 %v917_v25, %v503_v55  ;;  %v757_v58 = vpop.f32.mrb[6].mxu0  ;;  %v773_v59 = vpop.f32.mrb[6].mxu1 }
  0xf8   : > { %v556_v60 = vmax.f32 %v448_v52, 0.0  ;;  %v572_v61 = vmax.f32 %v512_v53, 0.0  ;;  %v451_v62 = vadd.f32 %v757_v58, %v917_v25  ;;  %v515_v63 = vadd.f32 %v773_v59, %v917_v25  ;;  %v442_v0 = vpop.f32.mrb[7].mxu0  ;;  %v506_v1 = vpop.f32.mrb[7].mxu1 }
  0xf9   : > { %v554_v2 = vmax.f32 %v440_v56, 0.0  ;;  %v570_v3 = vmax.f32 %v504_v57, 0.0  ;;  %v443_v4 = vadd.f32 %v917_v25, %v442_v0  ;;  %v507_v5 = vadd.f32 %v917_v25, %v506_v1 }
  0xfa   : > { %588 = vst [vmem:[%s925_s7 + $0x30] sm:$0xff] %v556_v60  ;;  %604 = vst [vmem:[%s925_s7 + $0xb0] sm:$0xff] %v572_v61  ;;  %v557_v6 = vmax.f32 %v451_v62, 0.0  ;;  %v573_v7 = vmax.f32 %v515_v63, 0.0 }
  0xfb   : > { %586 = vst [vmem:[%s925_s7 + $0x20] sm:$0xff] %v554_v2  ;;  %602 = vst [vmem:[%s925_s7 + $0xa0] sm:$0xff] %v570_v3  ;;  %v555_v8 = vmax.f32 %v443_v4, 0.0  ;;  %v571_v9 = vmax.f32 %v507_v5, 0.0 }
  0xfc   : > { %589 = vst [vmem:[%s925_s7 + $0x38] sm:$0xff] %v557_v6  ;;  %605 = vst [vmem:[%s925_s7 + $0xb8] sm:$0xff] %v573_v7 }
  0xfd   : > { %587 = vst [vmem:[%s925_s7 + $0x28] sm:$0xff] %v555_v8  ;;  %603 = vst [vmem:[%s925_s7 + $0xa8] sm:$0xff] %v571_v9  ;;  %v760_v10 = vpop.f32.mrb[8].mxu0  ;;  %v776_v11 = vpop.f32.mrb[8].mxu1 }
  0xfe   : > { %v464_v12 = vadd.f32 %v760_v10, %v917_v25  ;;  %v528_v13 = vadd.f32 %v776_v11, %v917_v25  ;;  %v455_v14 = vpop.f32.mrb[9].mxu0  ;;  %v519_v15 = vpop.f32.mrb[9].mxu1 }
  0xff   : > { %v456_v16 = vadd.f32 %v917_v25, %v455_v14  ;;  %v520_v17 = vadd.f32 %v917_v25, %v519_v15  ;;  %v761_v18 = vpop.f32.mrb[10].mxu0  ;;  %v777_v19 = vpop.f32.mrb[10].mxu1 }
 0x100   : > { %v560_v20 = vmax.f32 %v464_v12, 0.0  ;;  %v576_v21 = vmax.f32 %v528_v13, 0.0  ;;  %v467_v22 = vadd.f32 %v761_v18, %v917_v25  ;;  %v531_v23 = vadd.f32 %v777_v19, %v917_v25  ;;  %v458_v24 = vpop.f32.mrb[11].mxu0  ;;  %v522_v26 = vpop.f32.mrb[11].mxu1 }
 0x101   : > { %v558_v27 = vmax.f32 %v456_v16, 0.0  ;;  %v574_v28 = vmax.f32 %v520_v17, 0.0  ;;  %v459_v29 = vadd.f32 %v917_v25, %v458_v24  ;;  %v523_v30 = vadd.f32 %v917_v25, %v522_v26 }
 0x102   : > { %592 = vst [vmem:[%s925_s7 + $0x50] sm:$0xff] %v560_v20  ;;  %608 = vst [vmem:[%s925_s7 + $0xd0] sm:$0xff] %v576_v21  ;;  %v561_v31 = vmax.f32 %v467_v22, 0.0  ;;  %v577_v32 = vmax.f32 %v531_v23, 0.0 }
 0x103   : > { %590 = vst [vmem:[%s925_s7 + $0x40] sm:$0xff] %v558_v27  ;;  %606 = vst [vmem:[%s925_s7 + $0xc0] sm:$0xff] %v574_v28  ;;  %v559_v33 = vmax.f32 %v459_v29, 0.0  ;;  %v575_v34 = vmax.f32 %v523_v30, 0.0 }
 0x104   : > { %593 = vst [vmem:[%s925_s7 + $0x58] sm:$0xff] %v561_v31  ;;  %609 = vst [vmem:[%s925_s7 + $0xd8] sm:$0xff] %v577_v32 }
 0x105   : > { %591 = vst [vmem:[%s925_s7 + $0x48] sm:$0xff] %v559_v33  ;;  %607 = vst [vmem:[%s925_s7 + $0xc8] sm:$0xff] %v575_v34  ;;  %v764_v35 = vpop.f32.mrb[12].mxu0  ;;  %v780_v36 = vpop.f32.mrb[12].mxu1 }
 0x106   : > { %v480_v37 = vadd.f32 %v764_v35, %v917_v25  ;;  %v544_v38 = vadd.f32 %v780_v36, %v917_v25  ;;  %v471_v39 = vpop.f32.mrb[13].mxu0  ;;  %v535_v40 = vpop.f32.mrb[13].mxu1 }
 0x107   : > { %v472_v41 = vadd.f32 %v917_v25, %v471_v39  ;;  %v536_v42 = vadd.f32 %v917_v25, %v535_v40  ;;  %v765_v43 = vpop.f32.mrb[14].mxu0  ;;  %v781_v44 = vpop.f32.mrb[14].mxu1 }
 0x108   : > { %v564_v45 = vmax.f32 %v480_v37, 0.0  ;;  %v580_v46 = vmax.f32 %v544_v38, 0.0  ;;  %v483_v47 = vadd.f32 %v765_v43, %v917_v25  ;;  %v547_v48 = vadd.f32 %v781_v44, %v917_v25  ;;  %v474_v49 = vpop.f32.mrb[15].mxu0  ;;  %v538_v50 = vpop.f32.mrb[15].mxu1 }
 0x109   : > { %v562_v51 = vmax.f32 %v472_v41, 0.0  ;;  %v578_v52 = vmax.f32 %v536_v42, 0.0  ;;  %v475_v53 = vadd.f32 %v917_v25, %v474_v49  ;;  %v539_v54 = vadd.f32 %v917_v25, %v538_v50 }
 0x10a   : > { %596 = vst [vmem:[%s925_s7 + $0x70] sm:$0xff] %v564_v45  ;;  %612 = vst [vmem:[%s925_s7 + $0xf0] sm:$0xff] %v580_v46  ;;  %v565_v55 = vmax.f32 %v483_v47, 0.0  ;;  %v581_v56 = vmax.f32 %v547_v48, 0.0 }
 0x10b   : > { %594 = vst [vmem:[%s925_s7 + $0x60] sm:$0xff] %v562_v51  ;;  %610 = vst [vmem:[%s925_s7 + $0xe0] sm:$0xff] %v578_v52  ;;  %v563_v57 = vmax.f32 %v475_v53, 0.0  ;;  %v579_v58 = vmax.f32 %v539_v54, 0.0 }
 0x10c   : > { %597 = vst [vmem:[%s925_s7 + $0x78] sm:$0xff] %v565_v55  ;;  %613 = vst [vmem:[%s925_s7 + $0xf8] sm:$0xff] %v581_v56 }
 0x10d   : > { %595 = vst [vmem:[%s925_s7 + $0x68] sm:$0xff] %v563_v57  ;;  %611 = vst [vmem:[%s925_s7 + $0xe8] sm:$0xff] %v579_v58 }
 0x10e PF: > { %s13_s12 = sadd.s32 1, %s828_s12  }
 0x10f   : > { %p10_p4 = scmp.ge.s32.totalorder %s13_s12, 22  }
 0x111   :  { %12 = sbr.rel (!%p10_p4) target bundleno = 1 (0x1), region = 62 }

// kernel: convnet_forward.9
= control target key start
LH: loop header
LB: loop body
LE: loop exit
PB: predicated region body
PF: predicated region fallthrough
CT: control target
= control target key end

     0   :  { %s2277_s12 = smov 0   ;;  %s2692_s0 = inlined_call_operand.vmem [shape: bf16[1280,600], index: 0, kind: input, shape index: {}]   ;;  %s2693_s1 = inlined_call_operand.vmem [shape: bf16[600,128], index: 1, kind: input, shape index: {}]   ;;  %s2694_s2 = inlined_call_operand.vmem [shape: f32[1,128], index: 2, kind: input, shape index: {}]   ;;  %s2695_s3 = inlined_call_operand.vmem [shape: f32[1280,128], index: 3, kind: output, shape index: {}]  }
   0x1 LB: > { %s1637_s13 = sadd.s32 4294967295, %s2255_s12   ;;  %p1641_p0 = scmp.ge.s32.totalorder %s2255_s12, 1  ;;  %s2255_s12 = sphi %s2277_s12, %s13_s12  }
   0x2   : > { %p139_p1 = scmp.lt.s32.totalorder %s2255_s12, 6 }
   0x4   : > { %p140_p2 = pnand %p1641_p0, %p139_p1 }
   0x5   : > { %v2099_v0 = vld [vmem:[%s2693_s1 + $0x40] sm:$0xff] (!%p140_p2)   ;;  %s1642_s16 = sshll.u32 (!%p140_p2), %s1637_s13, 5  ;;  %v2101_v2 = vld [vmem:[%s2693_s1 + $0x48] sm:$0xff] (!%p140_p2)   ;;  %v2103_v4 = vld [vmem:[%s2693_s1 + $0x50] sm:$0xff] (!%p140_p2)   ;;  %vm1030_vm0 = vcmask (!%p140_p2), 1043456   ;;  %vm981_vm1 = vcmask (!%p140_p2), 719872  }
   0x6   : > { %143 = sbr.rel (%p140_p2) target bundleno = 414 (0x19e), region = 32  ;;  %v2100_v1 = vld [vmem:[%s2693_s1] sm:$0xff] (!%p140_p2)   ;;  %1783 = vmatprep.subr.bf16.mxu0 (!%p140_p2), %v2099_v0  ;;  %2073 = vmatprep.subr.bf16.mxu1 (!%p140_p2), %v2099_v0  ;;  %p165_p3 = scmp.lt.s32.totalorder (!%p140_p2), %s1642_s16, 159  ;;  %v2102_v3 = vld [vmem:[%s2693_s1 + $0x8] sm:$0xff] (!%p140_p2)   ;;  %v2104_v5 = vld [vmem:[%s2693_s1 + $0x10] sm:$0xff] (!%p140_p2)  }
   0x7   : > { %1784 = vmatpush3.bf16.msra.mxu0 (!%p140_p2), %v2100_v1  ;;  %2081 = vmatpush3.bf16.msra.mxu1 (!%p140_p2), %v2100_v1  ;;  %v2105_v6 = vld [vmem:[%s2693_s1 + $0x58] sm:$0xff] (!%p140_p2)   ;;  %v2107_v8 = vld [vmem:[%s2693_s1 + $0x60] sm:$0xff] (!%p140_p2)   ;;  %v2109_v10 = vld [vmem:[%s2693_s1 + $0x68] sm:$0xff] (!%p140_p2)  }
   0x8   : > { %1785 = vmatprep.subr.bf16.mxu0 (!%p140_p2), %v2101_v2  ;;  %2074 = vmatprep.subr.bf16.mxu1 (!%p140_p2), %v2101_v2  ;;  %v2106_v7 = vld [vmem:[%s2693_s1 + $0x18] sm:$0xff] (!%p140_p2)   ;;  %v2108_v9 = vld [vmem:[%s2693_s1 + $0x20] sm:$0xff] (!%p140_p2)   ;;  %v2110_v13 = vld [vmem:[%s2693_s1 + $0x28] sm:$0xff] (!%p140_p2)  }
   0x9   : > { %v2111_v14 = vld [vmem:[%s2693_s1 + $0x70] sm:$0xff] (!%p140_p2)   ;;  %v2113_v16 = vld [vmem:[%s2693_s1 + $0x78] sm:$0xff] (!%p140_p2)   ;;  %v2121_v18 = vld [vmem:[%s2693_s1 + $0xc0] sm:$0xff] (!%p140_p2)  }
   0xa   : > { %v2112_v15 = vld [vmem:[%s2693_s1 + $0x30] sm:$0xff] (!%p140_p2)   ;;  %v2114_v17 = vld [vmem:[%s2693_s1 + $0x38] sm:$0xff] (!%p140_p2)   ;;  %v2124_v19 = vld [vmem:[%s2693_s1 + $0x100] sm:$0xff] (!%p140_p2)  }
   0xb   : > { %1786 = vmatpush3.bf16.msra.mxu0 (!%p140_p2), %v2102_v3  ;;  %2082 = vmatpush3.bf16.msra.mxu1 (!%p140_p2), %v2102_v3  ;;  %v2122_v22 = vld [vmem:[%s2693_s1 + $0x80] sm:$0xff] (!%p140_p2)   ;;  %v2123_v23 = vld [vmem:[%s2693_s1 + $0xc8] sm:$0xff] (!%p140_p2)   ;;  %v2132_v27 = vld [vmem:[%s2693_s1 + $0xd0] sm:$0xff] (!%p140_p2)  }
   0xc   : > { %1787 = vmatprep.subr.bf16.mxu0 (!%p140_p2), %v2103_v4  ;;  %2075 = vmatprep.subr.bf16.mxu1 (!%p140_p2), %v2103_v4  ;;  %v2125_v26 = vld [vmem:[%s2693_s1 + $0x88] sm:$0xff] (!%p140_p2)   ;;  %v2133_v31 = vld [vmem:[%s2693_s1 + $0x90] sm:$0xff] (!%p140_p2)   ;;  %v2134_v33 = vld [vmem:[%s2693_s1 + $0xd8] sm:$0xff] (!%p140_p2)  }
   0xd   : > { %s2697_s16 = smov (!%p165_p3, %s1642_s16), 159  ;;  %v2145_v29 = vld [vmem:[%s2693_s1 + $0x108] sm:$0xff]   ;;  %v2135_v35 = vld [vmem:[%s2693_s1 + $0x98] sm:$0xff]   ;;  %v2142_v37 = vld [vmem:[%s2693_s1 + $0xe0] sm:$0xff]  }
   0xe   : > { %s2090_s29 = smul.u32 20, %s2697_s16  ;;  %v2143_v39 = vld [vmem:[%s2693_s1 + $0xa0] sm:$0xff]   ;;  %v2144_v40 = vld [vmem:[%s2693_s1 + $0xe8] sm:$0xff]   ;;  %v2163_v43 = vld [vmem:[%s2693_s1 + $0x110] sm:$0xff]   ;;  %s1645_s23 = sshll.u32 %s2697_s16, 3 }
   0xf   : > { %1788 = vmatpush3.bf16.msra.mxu0 %v2104_v5  ;;  %2083 = vmatpush3.bf16.msra.mxu1 %v2104_v5  ;;  %v2146_v44 = vld [vmem:[%s2693_s1 + $0xa8] sm:$0xff]   ;;  %v2153_v46 = vld [vmem:[%s2693_s1 + $0xf0] sm:$0xff]   ;;  %v2176_v49 = vld [vmem:[%s2693_s1 + $0x118] sm:$0xff]   ;;  %s2595_s26 = scalar_lea.vmem %s2695_s3, %s1645_s23 }
  0x10   : > { %1789 = vmatprep.subr.bf16.mxu0 %v2105_v6  ;;  %2076 = vmatprep.subr.bf16.mxu1 %v2105_v6  ;;  %s2318_s9 = scalar_lea.vmem %s2692_s0, %s2090_s29  ;;  %v2154_v48 = vld [vmem:[%s2693_s1 + $0xb0] sm:$0xff]   ;;  %v2155_v51 = vld [vmem:[%s2693_s1 + $0xf8] sm:$0xff]   ;;  %v2189_v54 = vld [vmem:[%s2693_s1 + $0x120] sm:$0xff]  }
  0x11   : > { %v2117_v11 = vld [vmem:[%s2318_s9 + $0x4] ss:$20 sps:$4 sm:$0xff]   ;;  %v2115_v20 = vld [vmem:[%s2318_s9] ss:$20 sps:$4 sm:$0xff]   ;;  %v2130_v28 = vld [vmem:[%s2318_s9 + $0x28] ss:$20 sps:$4 sm:$0xff]  }
  0x12   : > { %v2120_v12 = vld [vmem:[%s2318_s9 + $0x1e4] ss:$20 sps:$4 sm:$0xff]   ;;  %1066 = vmatprep.mubr.bf16.mxu0 %v2117_v11  ;;  %v2118_v21 = vld [vmem:[%s2318_s9 + $0x1e0] ss:$20 sps:$4 sm:$0xff]   ;;  %v2131_v30 = vld [vmem:[%s2318_s9 + $0x208] ss:$20 sps:$4 sm:$0xff]  }
  0x13   : > { %1790 = vmatpush3.bf16.msra.mxu0 %v2106_v7  ;;  %2084 = vmatpush3.bf16.msra.mxu1 %v2106_v7  ;;  %v2126_v24 = vld [vmem:[%s2318_s9 + $0x2c] ss:$20 sps:$4 sm:$0xff]   ;;  %v2136_v32 = vld [vmem:[%s2318_s9 + $0x54] ss:$20 sps:$4 sm:$0xff]   ;;  %v2140_v36 = vld [vmem:[%s2318_s9 + $0x50] ss:$20 sps:$4 sm:$0xff]  }
  0x14   : > { %1791 = vmatprep.subr.bf16.mxu0 %v2107_v8  ;;  %2077 = vmatprep.subr.bf16.mxu1 %v2107_v8  ;;  %v2128_v25 = vld [vmem:[%s2318_s9 + $0x20c] ss:$20 sps:$4 sm:$0xff]   ;;  %v2138_v34 = vld [vmem:[%s2318_s9 + $0x234] ss:$20 sps:$4 sm:$0xff]   ;;  %v2141_v38 = vld [vmem:[%s2318_s9 + $0x230] ss:$20 sps:$4 sm:$0xff]  }
  0x15   : > { %1162 = vmatprep.mubr.bf16.mxu1 %v2120_v12  ;;  %v2147_v41 = vld [vmem:[%s2318_s9 + $0x7c] ss:$20 sps:$4 sm:$0xff]   ;;  %v2151_v45 = vld [vmem:[%s2318_s9 + $0x78] ss:$20 sps:$4 sm:$0xff]   ;;  %v2162_v56 = vld [vmem:[%s2318_s9 + $0xa0] ss:$20 sps:$4 sm:$0xff]  }
  0x16   : > { %v2149_v42 = vld [vmem:[%s2318_s9 + $0x25c] ss:$20 sps:$4 sm:$0xff]   ;;  %v2152_v47 = vld [vmem:[%s2318_s9 + $0x258] ss:$20 sps:$4 sm:$0xff]   ;;  %v2166_v58 = vld [vmem:[%s2318_s9 + $0x34] ss:$20 sps:$4 sm:$0xff]  }
  0x17   : > { %1792 = vmatpush3.bf16.msra.mxu0 %v2108_v9  ;;  %2085 = vmatpush3.bf16.msra.mxu1 %v2108_v9  ;;  %v2157_v50 = vld [vmem:[%s2318_s9 + $0xa4] ss:$20 sps:$4 sm:$0xff]   ;;  %v2161_v52 = vld [vmem:[%s2318_s9 + $0xc] ss:$20 sps:$4 sm:$0xff]   ;;  %v2159_v55 = vld [vmem:[%s2318_s9 + $0x8] ss:$20 sps:$4 sm:$0xff]  }
  0x18   : > { %1793 = vmatprep.subr.bf16.mxu0 %v2109_v10  ;;  %2078 = vmatprep.subr.bf16.mxu1 %v2109_v10  ;;  %v2156_v53 = vld [vmem:[%s2693_s1 + $0xb8] sm:$0xff]   ;;  %v2164_v57 = vld [vmem:[%s2318_s9 + $0xcc] ss:$20 sps:$4 sm:$0xff]   ;;  %v2202_v59 = vld [vmem:[%s2693_s1 + $0x128] ss:$0 sps:$4 sm:$0xff]  }
  0x19   : > { %v1032_v60 = vsel %vm1030_vm0, %v2202_v59, 0  ;;  %v2168_v61 = vld [vmem:[%s2318_s9 + $0xc8] ss:$20 sps:$4 sm:$0xff]   ;;  %v2169_v62 = vld [vmem:[%s2318_s9 + $0x30] ss:$20 sps:$4 sm:$0xff]  }
  0x1a   : > { %v2170_v63 = vld [vmem:[%s2318_s9 + $0xf4] ss:$20 sps:$4 sm:$0xff]   ;;  %v2172_v0 = vld [vmem:[%s2318_s9 + $0x5c] ss:$20 sps:$4 sm:$0xff]   ;;  %v2175_v2 = vld [vmem:[%s2318_s9 + $0x58] ss:$20 sps:$4 sm:$0xff]  }
  0x1b   : > { %1794 = vmatpush3.bf16.msra.mxu0 %v2110_v13  ;;  %2086 = vmatpush3.bf16.msra.mxu1 %v2110_v13  ;;  %v2174_v1 = vld [vmem:[%s2318_s9 + $0xf0] ss:$20 sps:$4 sm:$0xff]   ;;  %v2181_v5 = vld [vmem:[%s2318_s9 + $0x118] ss:$20 sps:$4 sm:$0xff]   ;;  %v2182_v6 = vld [vmem:[%s2318_s9 + $0x80] ss:$20 sps:$4 sm:$0xff]  }
  0x1c   : > { %1795 = vmatprep.subr.bf16.mxu0 %v2111_v14  ;;  %2079 = vmatprep.subr.bf16.mxu1 %v2111_v14  ;;  %v2177_v3 = vld [vmem:[%s2318_s9 + $0x11c] ss:$20 sps:$4 sm:$0xff]   ;;  %v2179_v4 = vld [vmem:[%s2318_s9 + $0x84] ss:$20 sps:$4 sm:$0xff]   ;;  %v2185_v8 = vld [vmem:[%s2318_s9 + $0xac] ss:$20 sps:$4 sm:$0xff]  }
  0x1d   : > { %v2183_v7 = vld [vmem:[%s2318_s9 + $0x144] ss:$20 sps:$4 sm:$0xff]   ;;  %v2187_v9 = vld [vmem:[%s2318_s9 + $0x140] ss:$20 sps:$4 sm:$0xff]   ;;  %v2188_v10 = vld [vmem:[%s2318_s9 + $0xa8] ss:$20 sps:$4 sm:$0xff]  }
  0x1e   : > { %v2190_v11 = vld [vmem:[%s2318_s9 + $0x16c] ss:$20 sps:$4 sm:$0xff]   ;;  %v2192_v12 = vld [vmem:[%s2318_s9 + $0xd4] ss:$20 sps:$4 sm:$0xff]   ;;  %v2195_v14 = vld [vmem:[%s2318_s9 + $0xd0] ss:$20 sps:$4 sm:$0xff]  }
  0x1f   : > { %1796 = vmatpush3.bf16.msra.mxu0 %v2112_v15  ;;  %2087 = vmatpush3.bf16.msra.mxu1 %v2112_v15  ;;  %v2194_v13 = vld [vmem:[%s2318_s9 + $0x168] ss:$20 sps:$4 sm:$0xff]  }
  0x20   : > { %1797 = vmatprep.subr.bf16.mxu0 %v2113_v16  ;;  %2080 = vmatprep.subr.bf16.mxu1 %v2113_v16  ;;  %v2196_v15 = vld [vmem:[%s2318_s9 + $0x194] ss:$20 sps:$4 sm:$0xff]   ;;  %v2198_v16 = vld [vmem:[%s2318_s9 + $0xfc] ss:$20 sps:$4 sm:$0xff]  }
  0x23   : > { %1798 = vmatpush3.bf16.msra.mxu0 %v2114_v17  ;;  %2088 = vmatpush3.bf16.msra.mxu1 %v2114_v17  ;;  %v2200_v17 = vld [vmem:[%s2318_s9 + $0x190] ss:$20 sps:$4 sm:$0xff]  }
  0x24   : > { %1895 = vmatprep.subr.bf16.mxu1 %v2121_v18  ;;  %2029 = vmatprep.subr.bf16.mxu0 %v2124_v19  ;;  %v2201_v18 = vld [vmem:[%s2318_s9 + $0xf8] ss:$20 sps:$4 sm:$0xff]  }
  0x26   : > { %1067 = vmatmul.mubr.bf16.vlgmr.msra.gmra.mrb[0].mxu0 %v2115_v20  ;;  %1163 = vmatmul.mubr.bf16.vlgmr.msra.gmra.mrb[0].mxu1 %v2118_v21  ;;  %v2205_v20 = vld [vmem:[%s2318_s9 + $0x124] ss:$20 sps:$4 sm:$0xff]  }
  0x27   : > { %1896 = vmatpush3.bf16.msra.mxu1 %v2122_v22  ;;  %2030 = vmatpush3.bf16.msra.mxu0 %v2124_v19  ;;  %v2203_v19 = vld [vmem:[%s2318_s9 + $0x1bc] ss:$20 sps:$4 sm:$0xff]   ;;  %v2207_v21 = vld [vmem:[%s2318_s9 + $0x1b8] ss:$20 sps:$4 sm:$0xff]   ;;  %v2208_v22 = vld [vmem:[%s2318_s9 + $0x120] ss:$20 sps:$4 sm:$0xff]  }
  0x28   : > { %1897 = vmatprep.subr.bf16.mxu1 %v2123_v23  ;;  %1074 = vmatprep.mubr.bf16.mxu0 %v2126_v24  ;;  %v2209_v23 = vld [vmem:[%s2318_s9 + $0x14c] ss:$20 sps:$4 sm:$0xff]   ;;  %v2211_v24 = vld [vmem:[%s2318_s9 + $0x10] ss:$20 sps:$4 sm:$0xff]  }
  0x29   : > { %1170 = vmatprep.mubr.bf16.mxu1 %v2128_v25  ;;  %2031 = vmatprep.subr.bf16.mxu0 %v2145_v29  ;;  %v2212_v25 = vld [vmem:[%s2318_s9 + $0x148] ss:$20 sps:$4 sm:$0xff]  }
  0x2b   : > { %1898 = vmatpush3.bf16.msra.mxu1 %v2125_v26  ;;  %2032 = vmatpush3.bf16.msra.mxu0 %v2145_v29  ;;  %v2213_v26 = vld [vmem:[%s2318_s9 + $0x38] ss:$20 sps:$4 sm:$0xff]   ;;  %v2217_v29 = vld [vmem:[%s2318_s9 + $0x170] ss:$20 sps:$4 sm:$0xff]  }
  0x2c   : > { %1899 = vmatprep.subr.bf16.mxu1 %v2132_v27  ;;  %2033 = vmatprep.subr.bf16.mxu0 %v2163_v43  ;;  %v2214_v27 = vld [vmem:[%s2318_s9 + $0x174] ss:$20 sps:$4 sm:$0xff]  }
  0x2e   : > { %1075 = vmatmul.mubr.bf16.gmra.mrb[4].mxu0 %v2130_v28  ;;  %1171 = vmatmul.mubr.bf16.gmra.mrb[4].mxu1 %v2131_v30  ;;  %v2216_v28 = vld [vmem:[%s2318_s9 + $0x60] ss:$20 sps:$4 sm:$0xff]   ;;  %v2218_v30 = vld [vmem:[%s2318_s9 + $0x88] ss:$20 sps:$4 sm:$0xff]  }
  0x2f   : > { %1900 = vmatpush3.bf16.msra.mxu1 %v2133_v31  ;;  %1082 = vmatprep.mubr.bf16.mxu0 %v2136_v32  ;;  %v2219_v31 = vld [vmem:[%s2318_s9 + $0x19c] ss:$20 sps:$4 sm:$0xff]  }
  0x30   : > { %1901 = vmatprep.subr.bf16.mxu1 %v2134_v33  ;;  %1178 = vmatprep.mubr.bf16.mxu1 %v2138_v34  ;;  %v2221_v32 = vld [vmem:[%s2318_s9 + $0xb0] ss:$20 sps:$4 sm:$0xff]   ;;  %v2222_v33 = vld [vmem:[%s2318_s9 + $0x198] ss:$20 sps:$4 sm:$0xff]  }
  0x31   : > { %2034 = vmatpush3.bf16.msra.mxu0 %v2163_v43  ;;  %v2223_v34 = vld [vmem:[%s2318_s9 + $0xd8] ss:$20 sps:$4 sm:$0xff]   ;;  %v2234_v43 = vld [vmem:[%s2318_s9 + $0x214] ss:$20 sps:$4 sm:$0xff]  }
  0x32   : > { %2035 = vmatprep.subr.bf16.mxu0 %v2176_v49 }
  0x33   : > { %1902 = vmatpush3.bf16.msra.mxu1 %v2135_v35  ;;  %v2224_v35 = vld [vmem:[%s2318_s9 + $0x1c4] ss:$20 sps:$4 sm:$0xff]  }
  0x34   : > { %1903 = vmatprep.subr.bf16.mxu1 %v2142_v37  ;;  %v2227_v37 = vld [vmem:[%s2318_s9 + $0x1c0] ss:$20 sps:$4 sm:$0xff]  }
  0x35   : > { %2036 = vmatpush3.bf16.msra.mxu0 %v2176_v49  ;;  %v2242_v49 = vld [vmem:[%s2318_s9 + $0x238] ss:$20 sps:$4 sm:$0xff]  }
  0x36   : > { %1083 = vmatmul.mubr.bf16.gmra.mrb[8].mxu0 %v2140_v36  ;;  %1179 = vmatmul.mubr.bf16.gmra.mrb[8].mxu1 %v2141_v38  ;;  %v2226_v36 = vld [vmem:[%s2318_s9 + $0x100] ss:$20 sps:$4 sm:$0xff]   ;;  %v2228_v38 = vld [vmem:[%s2318_s9 + $0x128] ss:$20 sps:$4 sm:$0xff]  }
  0x37   : > { %1904 = vmatpush3.bf16.msra.mxu1 %v2143_v39  ;;  %1090 = vmatprep.mubr.bf16.mxu0 %v2147_v41  ;;  %v2229_v39 = vld [vmem:[%s2318_s9 + $0x1ec] ss:$20 sps:$4 sm:$0xff]   ;;  %v2232_v41 = vld [vmem:[%s2318_s9 + $0x1e8] ss:$20 sps:$4 sm:$0xff]  }
  0x38   : > { %1905 = vmatprep.subr.bf16.mxu1 %v2144_v40  ;;  %1186 = vmatprep.mubr.bf16.mxu1 %v2149_v42  ;;  %v2231_v40 = vld [vmem:[%s2318_s9 + $0x150] ss:$20 sps:$4 sm:$0xff]   ;;  %v2233_v42 = vld [vmem:[%s2318_s9 + $0x178] ss:$20 sps:$4 sm:$0xff]  }
  0x39   : > { %2037 = vmatprep.subr.bf16.mxu0 %v2189_v54 }
  0x3a   : > { %2038 = vmatpush3.bf16.msra.mxu0 %v2189_v54  ;;  %v2248_v54 = vld [vmem:[%s2318_s9 + $0x268] ss:$20 sps:$4 sm:$0xff]  }
  0x3b   : > { %1906 = vmatpush3.bf16.msra.mxu1 %v2146_v44  ;;  %2089 = vmatprep.subr.msk.bf16.mxu0 %vm1030_vm0, %v2202_v59  ;;  %v2236_v44 = vld [vmem:[%s2318_s9 + $0x1a0] ss:$20 sps:$4 sm:$0xff]  }
  0x3c   : > { %1907 = vmatprep.subr.bf16.mxu1 %v2153_v46  ;;  %v2238_v46 = vld [vmem:[%s2318_s9 + $0x1c8] ss:$20 sps:$4 sm:$0xff]  }
  0x3e   : > { %1091 = vmatmul.mubr.bf16.gmra.mrb[12].mxu0 %v2151_v45  ;;  %1187 = vmatmul.mubr.bf16.gmra.mrb[12].mxu1 %v2152_v47  ;;  %v2237_v45 = vld [vmem:[%s2318_s9 + $0x210] ss:$20 sps:$4 sm:$0xff]  }
  0x3f   : > { %1908 = vmatpush3.bf16.msra.mxu1 %v2154_v48  ;;  %1098 = vmatprep.mubr.bf16.mxu0 %v2157_v50  ;;  %v2239_v47 = vld [vmem:[%s2318_s9 + $0x23c] ss:$20 sps:$4 sm:$0xff]   ;;  %v2243_v50 = vld [vmem:[%s2318_s9 + $0x218] ss:$20 sps:$4 sm:$0xff]  }
  0x40   : > { %1909 = vmatprep.subr.bf16.mxu1 %v2155_v51  ;;  %1227 = vmatprep.mubr.bf16.mxu1 %v2161_v52  ;;  %v2241_v48 = vld [vmem:[%s2318_s9 + $0x1f0] ss:$20 sps:$4 sm:$0xff]   ;;  %v2246_v52 = vld [vmem:[%s2318_s9 + $0x240] ss:$20 sps:$4 sm:$0xff]  }
  0x41   : > { %2040 = vmatpush3.bf16.msra.mxu0 %v1032_v60  ;;  %v2244_v51 = vld [vmem:[%s2318_s9 + $0x264] ss:$20 sps:$4 sm:$0xff]  }
  0x43   : > { %1910 = vmatpush3.bf16.msra.mxu1 %v2156_v53  ;;  %v2247_v53 = vld [vmem:[%s2318_s9 + $0x260] ss:$20 sps:$4 sm:$0xff]  }
  0x46   : > { %1099 = vmatmul.mubr.bf16.gmra.mrb[16].mxu0 %v2162_v56  ;;  %1228 = vmatmul.mubr.bf16.vlgmr.msra.gmra.mrb[16].mxu1 %v2159_v55 }
  0x47   : > { %1106 = vmatprep.mubr.bf16.mxu0 %v2164_v57  ;;  %1235 = vmatprep.mubr.bf16.mxu1 %v2166_v58 }
  0x4e   : > { %1107 = vmatmul.mubr.bf16.gmra.mrb[20].mxu0 %v2168_v61  ;;  %1236 = vmatmul.mubr.bf16.gmra.mrb[20].mxu1 %v2169_v62 }
  0x4f   : > { %1114 = vmatprep.mubr.bf16.mxu0 %v2170_v63  ;;  %1243 = vmatprep.mubr.bf16.mxu1 %v2172_v0 }
  0x56   : > { %1115 = vmatmul.mubr.bf16.gmra.mrb[24].mxu0 %v2174_v1  ;;  %1244 = vmatmul.mubr.bf16.gmra.mrb[24].mxu1 %v2175_v2 }
  0x57   : > { %1122 = vmatprep.mubr.bf16.mxu0 %v2177_v3  ;;  %1251 = vmatprep.mubr.bf16.mxu1 %v2179_v4 }
  0x5e   : > { %1123 = vmatmul.mubr.bf16.gmra.mrb[28].mxu0 %v2181_v5  ;;  %1252 = vmatmul.mubr.bf16.gmra.mrb[28].mxu1 %v2182_v6 }
  0x5f   : > { %1130 = vmatprep.mubr.bf16.mxu0 %v2183_v7  ;;  %1259 = vmatprep.mubr.bf16.mxu1 %v2185_v8 }
  0x66   : > { %1131 = vmatmul.mubr.bf16.gmra.mrb[32].mxu0 %v2187_v9  ;;  %1260 = vmatmul.mubr.bf16.gmra.mrb[32].mxu1 %v2188_v10 }
  0x67   : > { %1138 = vmatprep.mubr.bf16.mxu0 %v2190_v11  ;;  %1267 = vmatprep.mubr.bf16.mxu1 %v2192_v12 }
  0x6e   : > { %1139 = vmatmul.mubr.bf16.gmra.mrb[36].mxu0 %v2194_v13  ;;  %1268 = vmatmul.mubr.bf16.gmra.mrb[36].mxu1 %v2195_v14 }
  0x6f   : > { %1146 = vmatprep.mubr.bf16.mxu0 %v2196_v15  ;;  %1275 = vmatprep.mubr.bf16.mxu1 %v2198_v16 }
  0x76   : > { %1147 = vmatmul.mubr.bf16.gmra.mrb[40].mxu0 %v2200_v17  ;;  %1276 = vmatmul.mubr.bf16.gmra.mrb[40].mxu1 %v2201_v18 }
  0x77   : > { %1154 = vmatprep.mubr.bf16.mxu0 %v2203_v19  ;;  %1283 = vmatprep.mubr.bf16.mxu1 %v2205_v20 }
  0x7e   : > { %1155 = vmatmul.mubr.bf16.gmra.mrb[44].mxu0 %v2207_v21  ;;  %1284 = vmatmul.mubr.bf16.gmra.mrb[44].mxu1 %v2208_v22 }
  0x7f   : > { %1291 = vmatprep.mubr.bf16.mxu1 %v2209_v23  ;;  %2041 = vmatprep.mubr.msk.bf16.mxu0 %vm981_vm1, %v2211_v24 }
  0x86   : > { %1292 = vmatmul.mubr.bf16.gmra.mrb[48].mxu1 %v2212_v25  ;;  %2042 = vmatmul.mubr.msk.bf16.vlgmr.msra.gmra.mrb[48].mxu0 %vm981_vm1, %v2213_v26 }
  0x87   : > { %1299 = vmatprep.mubr.bf16.mxu1 %v2214_v27  ;;  %2045 = vmatprep.mubr.msk.bf16.mxu0 %vm981_vm1, %v2216_v28 }
  0x8e   : > { %1300 = vmatmul.mubr.bf16.gmra.mrb[52].mxu1 %v2217_v29  ;;  %2046 = vmatmul.mubr.msk.bf16.gmra.mrb[52].mxu0 %vm981_vm1, %v2218_v30 }
  0x8f   : > { %1307 = vmatprep.mubr.bf16.mxu1 %v2219_v31  ;;  %2049 = vmatprep.mubr.msk.bf16.mxu0 %vm981_vm1, %v2221_v32 }
  0x96   : > { %1308 = vmatmul.mubr.bf16.gmra.mrb[56].mxu1 %v2222_v33  ;;  %2050 = vmatmul.mubr.msk.bf16.gmra.mrb[56].mxu0 %vm981_vm1, %v2223_v34 }
  0x97   : > { %1315 = vmatprep.mubr.bf16.mxu1 %v2224_v35  ;;  %2053 = vmatprep.mubr.msk.bf16.mxu0 %vm981_vm1, %v2226_v36 }
  0x9e   : > { %1316 = vmatmul.mubr.bf16.gmra.mrb[60].mxu1 %v2227_v37  ;;  %2054 = vmatmul.mubr.msk.bf16.gmra.mrb[60].mxu0 %vm981_vm1, %v2228_v38 }
  0x9f   : > { %1323 = vmatprep.mubr.bf16.mxu1 %v2229_v39  ;;  %2057 = vmatprep.mubr.msk.bf16.mxu0 %vm981_vm1, %v2231_v40 }
  0xa6   : > { %1324 = vmatmul.mubr.bf16.gmra.mrb[64].mxu1 %v2232_v41  ;;  %2058 = vmatmul.mubr.msk.bf16.gmra.mrb[64].mxu0 %vm981_vm1, %v2233_v42  ;;  %v2522_v41 = vld [vmem:[%s2694_s2] ss:$0 sm:$0xff] }
  0xa7   : > { %1331 = vmatprep.mubr.bf16.mxu1 %v2234_v43  ;;  %2061 = vmatprep.mubr.msk.bf16.mxu0 %vm981_vm1, %v2236_v44 }
  0xae   : > { %1332 = vmatmul.mubr.bf16.gmra.mrb[68].mxu1 %v2237_v45  ;;  %2062 = vmatmul.mubr.msk.bf16.gmra.mrb[68].mxu0 %vm981_vm1, %v2238_v46 }
  0xaf   : > { %1339 = vmatprep.mubr.bf16.mxu1 %v2239_v47  ;;  %2065 = vmatprep.mubr.msk.bf16.mxu0 %vm981_vm1, %v2241_v48 }
  0xb6   : > { %1340 = vmatmul.mubr.bf16.gmra.mrb[72].mxu1 %v2242_v49  ;;  %2066 = vmatmul.mubr.msk.bf16.gmra.mrb[72].mxu0 %vm981_vm1, %v2243_v50 }
  0xb7   : > { %1347 = vmatprep.mubr.bf16.mxu1 %v2244_v51  ;;  %2069 = vmatprep.mubr.msk.bf16.mxu0 %vm981_vm1, %v2246_v52 }
  0xbe   : > { %1348 = vmatmul.mubr.bf16.gmra.mrb[76].mxu1 %v2247_v53  ;;  %2070 = vmatmul.mubr.msk.bf16.gmra.mrb[76].mxu0 %vm981_vm1, %v2248_v54 }
  0xf9   : > { %v1871_v55 = vpop.f32.mrb[0].mxu1  ;;  %v1799_v56 = vpop.f32.mrb[0].mxu0 }
  0xfa   : > { %v1872_v57 = vpop.f32.mrb[1].mxu1  ;;  %v1800_v58 = vpop.f32.mrb[1].mxu0 }
  0xfb   : > { %v2503_v59 = vadd.f32 %v1872_v57, %v1871_v55  ;;  %v1874_v60 = vpop.f32.mrb[2].mxu1  ;;  %v1801_v61 = vadd.f32 %v1800_v58, %v1799_v56  ;;  %v1802_v62 = vpop.f32.mrb[2].mxu0 }
  0xfc   : > { %v1875_v63 = vpop.f32.mrb[3].mxu1  ;;  %v1803_v0 = vpop.f32.mrb[3].mxu0 }
  0xfd   : > { %v2505_v1 = vadd.f32 %v1875_v63, %v1874_v60  ;;  %v1804_v2 = vadd.f32 %v1803_v0, %v1802_v62  ;;  %v1069_v44 = vadd.f32 %v1801_v61, %v2522_v41 }
  0xff   : > { %v1072_v51 = vadd.f32 %v1804_v2, %v2522_v41 }
 0x101   : > { %v1877_v3 = vpop.f32.mrb[4].mxu1  ;;  %v1805_v4 = vpop.f32.mrb[4].mxu0 }
 0x102   : > { %v1878_v5 = vpop.f32.mrb[5].mxu1  ;;  %v1806_v6 = vpop.f32.mrb[5].mxu0 }
 0x103   : > { %v2507_v7 = vadd.f32 %v1878_v5, %v1877_v3  ;;  %v1880_v8 = vpop.f32.mrb[6].mxu1  ;;  %v1807_v9 = vadd.f32 %v1806_v6, %v1805_v4  ;;  %v1808_v10 = vpop.f32.mrb[6].mxu0 }
 0x104   : > { %v1881_v11 = vpop.f32.mrb[7].mxu1  ;;  %v1809_v12 = vpop.f32.mrb[7].mxu0 }
 0x105   : > { %v2509_v13 = vadd.f32 %v1881_v11, %v1880_v8  ;;  %v1810_v14 = vadd.f32 %v1809_v12, %v1808_v10  ;;  %v1077_v61 = vadd.f32 %v1807_v9, %v2522_v41 }
 0x107   : > { %v1080_v2 = vadd.f32 %v1810_v14, %v2522_v41 }
 0x109   : > { %v1883_v15 = vpop.f32.mrb[8].mxu1  ;;  %v1811_v16 = vpop.f32.mrb[8].mxu0 }
 0x10a   : > { %v1884_v17 = vpop.f32.mrb[9].mxu1  ;;  %v1812_v18 = vpop.f32.mrb[9].mxu0 }
 0x10b   : > { %v2511_v19 = vadd.f32 %v1884_v17, %v1883_v15  ;;  %v1886_v20 = vpop.f32.mrb[10].mxu1  ;;  %v1813_v21 = vadd.f32 %v1812_v18, %v1811_v16  ;;  %v1814_v22 = vpop.f32.mrb[10].mxu0 }
 0x10c   : > { %v1887_v23 = vpop.f32.mrb[11].mxu1  ;;  %v1815_v24 = vpop.f32.mrb[11].mxu0 }
 0x10d   : > { %v2513_v25 = vadd.f32 %v1887_v23, %v1886_v20  ;;  %v1816_v26 = vadd.f32 %v1815_v24, %v1814_v22  ;;  %v1085_v9 = vadd.f32 %v1813_v21, %v2522_v41 }
 0x10f   : > { %v1088_v14 = vadd.f32 %v1816_v26, %v2522_v41 }
 0x111   : > { %v1889_v27 = vpop.f32.mrb[12].mxu1  ;;  %v1817_v28 = vpop.f32.mrb[12].mxu0 }
 0x112   : > { %v1890_v29 = vpop.f32.mrb[13].mxu1  ;;  %v1818_v30 = vpop.f32.mrb[13].mxu0 }
 0x113   : > { %v2515_v31 = vadd.f32 %v1890_v29, %v1889_v27  ;;  %v1892_v32 = vpop.f32.mrb[14].mxu1  ;;  %v1819_v33 = vadd.f32 %v1818_v30, %v1817_v28  ;;  %v1820_v34 = vpop.f32.mrb[14].mxu0 }
 0x114   : > { %v1893_v35 = vpop.f32.mrb[15].mxu1  ;;  %v1821_v36 = vpop.f32.mrb[15].mxu0 }
 0x115   : > { %v2517_v37 = vadd.f32 %v1893_v35, %v1892_v32  ;;  %v1822_v38 = vadd.f32 %v1821_v36, %v1820_v34  ;;  %v1093_v21 = vadd.f32 %v1819_v33, %v2522_v41 }
 0x117   : > { %v1096_v26 = vadd.f32 %v1822_v38, %v2522_v41 }
 0x119   : > { %v1911_v39 = vpop.f32.mrb[16].mxu1  ;;  %v1823_v40 = vpop.f32.mrb[16].mxu0 }
 0x11a   : > { %v1912_v42 = vpop.f32.mrb[17].mxu1  ;;  %v1824_v43 = vpop.f32.mrb[17].mxu0 }
 0x11b   : > { %v1913_v45 = vadd.f32 %v1912_v42, %v1911_v39  ;;  %v1914_v46 = vpop.f32.mrb[18].mxu1  ;;  %v1825_v47 = vadd.f32 %v1824_v43, %v1823_v40  ;;  %v1826_v48 = vpop.f32.mrb[18].mxu0 }
 0x11c   : > { %v1915_v49 = vpop.f32.mrb[19].mxu1  ;;  %v1827_v50 = vpop.f32.mrb[19].mxu0 }
 0x11d   : > { %v1916_v52 = vadd.f32 %v1915_v49, %v1914_v46  ;;  %v1828_v53 = vadd.f32 %v1827_v50, %v1826_v48  ;;  %v2526_v54 = vadd.f32 %v1913_v45, %v1069_v44  ;;  %v1101_v33 = vadd.f32 %v1825_v47, %v2522_v41 }
 0x11f   : > { %v2528_v55 = vadd.f32 %v1916_v52, %v1072_v51  ;;  %v1104_v38 = vadd.f32 %v1828_v53, %v2522_v41 }
 0x121   : > { %v1917_v56 = vpop.f32.mrb[20].mxu1  ;;  %v1829_v57 = vpop.f32.mrb[20].mxu0 }
 0x122   : > { %v1918_v58 = vpop.f32.mrb[21].mxu1  ;;  %v1830_v60 = vpop.f32.mrb[21].mxu0 }
 0x123   : > { %v1919_v62 = vadd.f32 %v1918_v58, %v1917_v56  ;;  %v1920_v63 = vpop.f32.mrb[22].mxu1  ;;  %v1831_v0 = vadd.f32 %v1830_v60, %v1829_v57  ;;  %v1832_v3 = vpop.f32.mrb[22].mxu0 }
 0x124   : > { %v1921_v4 = vpop.f32.mrb[23].mxu1  ;;  %v1833_v5 = vpop.f32.mrb[23].mxu0 }
 0x125   : > { %v1922_v6 = vadd.f32 %v1921_v4, %v1920_v63  ;;  %v1834_v8 = vadd.f32 %v1833_v5, %v1832_v3  ;;  %v2532_v10 = vadd.f32 %v1919_v62, %v1077_v61 }
 0x127   : > { %v2534_v11 = vadd.f32 %v1922_v6, %v1080_v2 }
 0x129   : > { %v1923_v12 = vpop.f32.mrb[24].mxu1  ;;  %v1835_v15 = vpop.f32.mrb[24].mxu0 }
 0x12a   : > { %v1924_v16 = vpop.f32.mrb[25].mxu1  ;;  %v1836_v17 = vpop.f32.mrb[25].mxu0 }
 0x12b   : > { %v1925_v18 = vadd.f32 %v1924_v16, %v1923_v12  ;;  %v1926_v20 = vpop.f32.mrb[26].mxu1  ;;  %v1837_v22 = vadd.f32 %v1836_v17, %v1835_v15  ;;  %v1838_v23 = vpop.f32.mrb[26].mxu0 }
 0x12c   : > { %v1927_v24 = vpop.f32.mrb[27].mxu1  ;;  %v1839_v27 = vpop.f32.mrb[27].mxu0 }
 0x12d   : > { %v1928_v28 = vadd.f32 %v1927_v24, %v1926_v20  ;;  %v1840_v29 = vadd.f32 %v1839_v27, %v1838_v23  ;;  %v2538_v30 = vadd.f32 %v1925_v18, %v1085_v9  ;;  %v1109_v9 = vadd.f32 %v1831_v0, %v2522_v41 }
 0x12f   : > { %v2540_v32 = vadd.f32 %v1928_v28, %v1088_v14  ;;  %v1112_v14 = vadd.f32 %v1834_v8, %v2522_v41 }
 0x131   : > { %v1929_v34 = vpop.f32.mrb[28].mxu1  ;;  %v1841_v35 = vpop.f32.mrb[28].mxu0 }
 0x132   : > { %v1930_v36 = vpop.f32.mrb[29].mxu1  ;;  %v1842_v39 = vpop.f32.mrb[29].mxu0 }
 0x133   : > { %v1931_v40 = vadd.f32 %v1930_v36, %v1929_v34  ;;  %v1932_v42 = vpop.f32.mrb[30].mxu1  ;;  %v1843_v43 = vadd.f32 %v1842_v39, %v1841_v35  ;;  %v1844_v44 = vpop.f32.mrb[30].mxu0 }
 0x134   : > { %v1933_v45 = vpop.f32.mrb[31].mxu1  ;;  %v1845_v46 = vpop.f32.mrb[31].mxu0 }
 0x135   : > { %v1934_v48 = vadd.f32 %v1933_v45, %v1932_v42  ;;  %v1846_v49 = vadd.f32 %v1845_v46, %v1844_v44  ;;  %v2544_v50 = vadd.f32 %v1931_v40, %v1093_v21  ;;  %v1117_v42 = vadd.f32 %v1837_v22, %v2522_v41 }
 0x137   : > { %v2546_v51 = vadd.f32 %v1934_v48, %v1096_v26 }
 0x139   : > { %v1935_v52 = vpop.f32.mrb[32].mxu1  ;;  %v1847_v56 = vpop.f32.mrb[32].mxu0 }
 0x13a   : > { %v1936_v57 = vpop.f32.mrb[33].mxu1  ;;  %v1848_v58 = vpop.f32.mrb[33].mxu0 }
 0x13b   : > { %v1937_v60 = vadd.f32 %v1936_v57, %v1935_v52  ;;  %v1938_v61 = vpop.f32.mrb[34].mxu1  ;;  %v2549_v62 = vadd.f32 %v1848_v58, %v1847_v56  ;;  %v1850_v63 = vpop.f32.mrb[34].mxu0  ;;  %v1120_v52 = vadd.f32 %v1840_v29, %v2522_v41 }
 0x13c   : > { %v1939_v3 = vpop.f32.mrb[35].mxu1  ;;  %v1851_v4 = vpop.f32.mrb[35].mxu0 }
 0x13d   : > { %v1940_v5 = vadd.f32 %v1939_v3, %v1938_v61  ;;  %v2552_v2 = vadd.f32 %v1851_v4, %v1850_v63  ;;  %v2554_v6 = vadd.f32 %v1937_v60, %v1101_v33  ;;  %v1125_v3 = vadd.f32 %v1843_v43, %v2522_v41 }
 0x13f   : > { %v2556_v12 = vadd.f32 %v1940_v5, %v1104_v38 }
 0x141   : > { %v1941_v15 = vpop.f32.mrb[36].mxu1  ;;  %v1853_v16 = vpop.f32.mrb[36].mxu0 }
 0x142   : > { %v1942_v17 = vpop.f32.mrb[37].mxu1  ;;  %v1854_v47 = vpop.f32.mrb[37].mxu0 }
 0x143   : > { %v1943_v18 = vadd.f32 %v1942_v17, %v1941_v15  ;;  %v1944_v20 = vpop.f32.mrb[38].mxu1  ;;  %v2559_v23 = vadd.f32 %v1854_v47, %v1853_v16  ;;  %v1856_v24 = vpop.f32.mrb[38].mxu0  ;;  %v1128_v17 = vadd.f32 %v1846_v49, %v2522_v41 }
 0x144   : > { %v1945_v27 = vpop.f32.mrb[39].mxu1  ;;  %v1857_v53 = vpop.f32.mrb[39].mxu0 }
 0x145   : > { %v1946_v28 = vadd.f32 %v1945_v27, %v1944_v20  ;;  %v2562_v34 = vadd.f32 %v1857_v53, %v1856_v24  ;;  %v2564_v35 = vadd.f32 %v1943_v18, %v1109_v9 }
 0x147   : > { %v2566_v36 = vadd.f32 %v1946_v28, %v1112_v14  ;;  %v1133_v28 = vadd.f32 %v2549_v62, %v2522_v41 }
 0x149   : > { %v1947_v39 = vpop.f32.mrb[40].mxu1  ;;  %v1859_v21 = vpop.f32.mrb[40].mxu0 }
 0x14a   : > { %v1948_v40 = vpop.f32.mrb[41].mxu1  ;;  %v1860_v0 = vpop.f32.mrb[41].mxu0 }
 0x14b   : > { %v1949_v44 = vadd.f32 %v1948_v40, %v1947_v39  ;;  %v1950_v45 = vpop.f32.mrb[42].mxu1  ;;  %v2569_v46 = vadd.f32 %v1860_v0, %v1859_v21  ;;  %v1862_v26 = vpop.f32.mrb[42].mxu0 }
 0x14c   : > { %v1951_v48 = vpop.f32.mrb[43].mxu1  ;;  %v1863_v8 = vpop.f32.mrb[43].mxu0 }
 0x14d   : > { %v1952_v56 = vadd.f32 %v1951_v48, %v1950_v45  ;;  %v2572_v57 = vadd.f32 %v1863_v8, %v1862_v26  ;;  %v2574_v58 = vadd.f32 %v1949_v44, %v1117_v42 }
 0x14f   : > { %v2576_v33 = vadd.f32 %v1952_v56, %v1120_v52 }
 0x151   : > { %v1953_v60 = vpop.f32.mrb[44].mxu1  ;;  %v1865_v61 = vpop.f32.mrb[44].mxu0 }
 0x152   : > { %v1954_v22 = vpop.f32.mrb[45].mxu1  ;;  %v1866_v63 = vpop.f32.mrb[45].mxu0 }
 0x153   : > { %v1955_v4 = vadd.f32 %v1954_v22, %v1953_v60  ;;  %v1956_v38 = vpop.f32.mrb[46].mxu1  ;;  %v2579_v5 = vadd.f32 %v1866_v63, %v1865_v61  ;;  %v1868_v15 = vpop.f32.mrb[46].mxu0 }
 0x154   : > { %v1957_v29 = vpop.f32.mrb[47].mxu1  ;;  %v1869_v16 = vpop.f32.mrb[47].mxu0 }
 0x155   : > { %v1958_v47 = vadd.f32 %v1957_v29, %v1956_v38  ;;  %v2582_v9 = vadd.f32 %v1869_v16, %v1868_v15  ;;  %v2584_v18 = vadd.f32 %v1955_v4, %v1125_v3  ;;  %v1144_v15 = vadd.f32 %v2562_v34, %v2522_v41 }
 0x157   : > { %v2586_v20 = vadd.f32 %v1958_v47, %v1128_v17 }
 0x159   : > { %v1959_v24 = vpop.f32.mrb[48].mxu1  ;;  %v2043_v27 = vpop.f32.mrb[48].mxu0 }
 0x15a   : > { %v1399_v43 = vadd.f32 %v2043_v27, %v2532_v10  ;;  %v1960_v53 = vpop.f32.mrb[49].mxu1  ;;  %v1390_v14 = vpop.f32.mrb[49].mxu0  ;;  %v1136_v10 = vadd.f32 %v2552_v2, %v2522_v41 }
 0x15b   : > { %v1961_v49 = vadd.f32 %v1960_v53, %v1959_v24  ;;  %v1391_v39 = vadd.f32 %v1390_v14, %v2526_v54  ;;  %v1962_v21 = vpop.f32.mrb[50].mxu1  ;;  %v2044_v40 = vpop.f32.mrb[50].mxu0 }
 0x15c   : > { %v1519_v0 = vmax.f32 %v1399_v43, 0.0  ;;  %v1402_v62 = vadd.f32 %v2044_v40, %v2534_v11  ;;  %v1963_v42 = vpop.f32.mrb[51].mxu1  ;;  %v1393_v44 = vpop.f32.mrb[51].mxu0 }
 0x15d   : > { %v1517_v45 = vmax.f32 %v1391_v39, 0.0  ;;  %v1964_v26 = vadd.f32 %v1963_v42, %v1962_v21  ;;  %v1394_v48 = vadd.f32 %v1393_v44, %v2528_v55  ;;  %v2602_v8 = vadd.f32 %v1961_v49, %v1133_v28 }
 0x15e   : > { %1551 = vst [vmem:[%s2595_s26 + $0x10] sm:$0xff] %v1519_v0  ;;  %v1520_v54 = vmax.f32 %v1402_v62, 0.0  ;;  %v1141_v55 = vadd.f32 %v2559_v23, %v2522_v41  ;;  %v1149_v39 = vadd.f32 %v2569_v46, %v2522_v41  ;;  %v1152_v0 = vadd.f32 %v2572_v57, %v2522_v41 }
 0x15f   : > { %1549 = vst [vmem:[%s2595_s26] sm:$0xff] %v1517_v45  ;;  %v1518_v52 = vmax.f32 %v1394_v48, 0.0  ;;  %v2606_v56 = vadd.f32 %v1964_v26, %v1136_v10 }
 0x160   : > { %1552 = vst [vmem:[%s2595_s26 + $0x18] sm:$0xff] %v1520_v54 }
 0x161   : > { %1550 = vst [vmem:[%s2595_s26 + $0x8] sm:$0xff] %v1518_v52  ;;  %v1965_v2 = vpop.f32.mrb[52].mxu1  ;;  %v2047_v60 = vpop.f32.mrb[52].mxu0 }
 0x162   : > { %v1415_v11 = vadd.f32 %v2047_v60, %v2544_v50  ;;  %v1966_v61 = vpop.f32.mrb[53].mxu1  ;;  %v1406_v22 = vpop.f32.mrb[53].mxu0 }
 0x163   : > { %v1967_v63 = vadd.f32 %v1966_v61, %v1965_v2  ;;  %v1407_v3 = vadd.f32 %v1406_v22, %v2538_v30  ;;  %v1968_v4 = vpop.f32.mrb[54].mxu1  ;;  %v2048_v38 = vpop.f32.mrb[54].mxu0 }
 0x164   : > { %v1523_v29 = vmax.f32 %v1415_v11, 0.0  ;;  %v1418_v50 = vadd.f32 %v2048_v38, %v2546_v51  ;;  %v1969_v16 = vpop.f32.mrb[55].mxu1  ;;  %v1409_v17 = vpop.f32.mrb[55].mxu0 }
 0x165   : > { %v1521_v47 = vmax.f32 %v1407_v3, 0.0  ;;  %v1970_v24 = vadd.f32 %v1969_v16, %v1968_v4  ;;  %v1410_v23 = vadd.f32 %v1409_v17, %v2540_v32  ;;  %v1302_v27 = vadd.f32 %v1967_v63, %v1141_v55 }
 0x166   : > { %1555 = vst [vmem:[%s2595_s26 + $0x30] sm:$0xff] %v1523_v29  ;;  %v1524_v43 = vmax.f32 %v1418_v50, 0.0  ;;  %v1160_v3 = vadd.f32 %v2582_v9, %v2522_v41 }
 0x167   : > { %1553 = vst [vmem:[%s2595_s26 + $0x20] sm:$0xff] %v1521_v47  ;;  %v1522_v30 = vmax.f32 %v1410_v23, 0.0  ;;  %v2620_v53 = vadd.f32 %v1970_v24, %v1144_v15 }
 0x168   : > { %1556 = vst [vmem:[%s2595_s26 + $0x38] sm:$0xff] %v1524_v43 }
 0x169   : > { %1554 = vst [vmem:[%s2595_s26 + $0x28] sm:$0xff] %v1522_v30  ;;  %v1971_v14 = vpop.f32.mrb[56].mxu1  ;;  %v2051_v34 = vpop.f32.mrb[56].mxu0  ;;  %v1165_v30 = vadd.f32 %v2503_v59, %v2522_v41 }
 0x16a   : > { %v1431_v28 = vadd.f32 %v2051_v34, %v2564_v35  ;;  %v1972_v51 = vpop.f32.mrb[57].mxu1  ;;  %v1422_v49 = vpop.f32.mrb[57].mxu0 }
 0x16b   : > { %v1973_v32 = vadd.f32 %v1972_v51, %v1971_v14  ;;  %v1423_v21 = vadd.f32 %v1422_v49, %v2554_v6  ;;  %v1974_v40 = vpop.f32.mrb[58].mxu1  ;;  %v2052_v10 = vpop.f32.mrb[58].mxu0  ;;  %v1168_v51 = vadd.f32 %v2505_v1, %v2522_v41 }
 0x16c   : > { %v1527_v62 = vmax.f32 %v1431_v28, 0.0  ;;  %v1434_v35 = vadd.f32 %v2052_v10, %v2566_v36  ;;  %v1975_v42 = vpop.f32.mrb[59].mxu1  ;;  %v1425_v44 = vpop.f32.mrb[59].mxu0 }
 0x16d   : > { %v1525_v45 = vmax.f32 %v1423_v21, 0.0  ;;  %v1976_v26 = vadd.f32 %v1975_v42, %v1974_v40  ;;  %v1426_v46 = vadd.f32 %v1425_v44, %v2556_v12  ;;  %v2632_v48 = vadd.f32 %v1973_v32, %v1149_v39 }
 0x16e   : > { %1559 = vst [vmem:[%s2595_s26 + $0x50] sm:$0xff] %v1527_v62  ;;  %v1528_v6 = vmax.f32 %v1434_v35, 0.0  ;;  %v1157_v12 = vadd.f32 %v2579_v5, %v2522_v41 }
 0x16f   : > { %1557 = vst [vmem:[%s2595_s26 + $0x40] sm:$0xff] %v1525_v45  ;;  %v1526_v54 = vmax.f32 %v1426_v46, 0.0  ;;  %v2636_v52 = vadd.f32 %v1976_v26, %v1152_v0  ;;  %v1173_v45 = vadd.f32 %v2507_v7, %v2522_v41 }
 0x170   : > { %1560 = vst [vmem:[%s2595_s26 + $0x58] sm:$0xff] %v1528_v6 }
 0x171   : > { %1558 = vst [vmem:[%s2595_s26 + $0x48] sm:$0xff] %v1526_v54  ;;  %v1977_v57 = vpop.f32.mrb[60].mxu1  ;;  %v2055_v2 = vpop.f32.mrb[60].mxu0  ;;  %v1176_v54 = vadd.f32 %v2509_v13, %v2522_v41 }
 0x172   : > { %v1447_v36 = vadd.f32 %v2055_v2, %v2584_v18  ;;  %v1978_v60 = vpop.f32.mrb[61].mxu1  ;;  %v1438_v11 = vpop.f32.mrb[61].mxu0 }
 0x173   : > { %v1979_v61 = vadd.f32 %v1978_v60, %v1977_v57  ;;  %v1439_v22 = vadd.f32 %v1438_v11, %v2574_v58  ;;  %v1980_v55 = vpop.f32.mrb[62].mxu1  ;;  %v2056_v63 = vpop.f32.mrb[62].mxu0 }
 0x174   : > { %v1531_v4 = vmax.f32 %v1447_v36, 0.0  ;;  %v1450_v18 = vadd.f32 %v2056_v63, %v2586_v20  ;;  %v1981_v38 = vpop.f32.mrb[63].mxu1  ;;  %v1441_v15 = vpop.f32.mrb[63].mxu0 }
 0x175   : > { %v1529_v29 = vmax.f32 %v1439_v22, 0.0  ;;  %v1982_v50 = vadd.f32 %v1981_v38, %v1980_v55  ;;  %v1442_v5 = vadd.f32 %v1441_v15, %v2576_v33  ;;  %v1318_v16 = vadd.f32 %v1979_v61, %v1157_v12 }
 0x176   : > { %1563 = vst [vmem:[%s2595_s26 + $0x70] sm:$0xff] %v1531_v4  ;;  %v1532_v17 = vmax.f32 %v1450_v18, 0.0  ;;  %v1181_v38 = vadd.f32 %v2511_v19, %v2522_v41 }
 0x177   : > { %1561 = vst [vmem:[%s2595_s26 + $0x60] sm:$0xff] %v1529_v29  ;;  %v1530_v58 = vmax.f32 %v1442_v5, 0.0  ;;  %v1321_v47 = vadd.f32 %v1982_v50, %v1160_v3  ;;  %v1184_v5 = vadd.f32 %v2513_v25, %v2522_v41 }
 0x178   : > { %1564 = vst [vmem:[%s2595_s26 + $0x78] sm:$0xff] %v1532_v17 }
 0x179   : > { %1562 = vst [vmem:[%s2595_s26 + $0x68] sm:$0xff] %v1530_v58  ;;  %v1983_v24 = vpop.f32.mrb[64].mxu1  ;;  %v2059_v23 = vpop.f32.mrb[64].mxu0 }
 0x17a   : > { %v1463_v9 = vadd.f32 %v2059_v23, %v1302_v27  ;;  %v1984_v43 = vpop.f32.mrb[65].mxu1  ;;  %v1454_v20 = vpop.f32.mrb[65].mxu0 }
 0x17b   : > { %v1985_v14 = vadd.f32 %v1984_v43, %v1983_v24  ;;  %v1455_v33 = vadd.f32 %v1454_v20, %v2602_v8  ;;  %v1986_v34 = vpop.f32.mrb[66].mxu1  ;;  %v2060_v28 = vpop.f32.mrb[66].mxu0 }
 0x17c   : > { %v1535_v49 = vmax.f32 %v1463_v9, 0.0  ;;  %v1466_v27 = vadd.f32 %v2060_v28, %v2620_v53  ;;  %v1987_v39 = vpop.f32.mrb[67].mxu1  ;;  %v1457_v32 = vpop.f32.mrb[67].mxu0  ;;  %v1189_v28 = vadd.f32 %v2515_v31, %v2522_v41 }
 0x17d   : > { %v1533_v21 = vmax.f32 %v1455_v33, 0.0  ;;  %v1988_v40 = vadd.f32 %v1987_v39, %v1986_v34  ;;  %v1458_v59 = vadd.f32 %v1457_v32, %v2606_v56  ;;  %v1326_v10 = vadd.f32 %v1985_v14, %v1165_v30 }
 0x17e   : > { %1567 = vst [vmem:[%s2595_s26 + $0x90] sm:$0xff] %v1535_v49  ;;  %v1536_v0 = vmax.f32 %v1466_v27, 0.0  ;;  %v1192_v32 = vadd.f32 %v2517_v37, %v2522_v41 }
 0x17f   : > { %1565 = vst [vmem:[%s2595_s26 + $0x80] sm:$0xff] %v1533_v21  ;;  %v1534_v8 = vmax.f32 %v1458_v59, 0.0  ;;  %v1329_v62 = vadd.f32 %v1988_v40, %v1168_v51 }
 0x180   : > { %1568 = vst [vmem:[%s2595_s26 + $0x98] sm:$0xff] %v1536_v0 }
 0x181   : > { %1566 = vst [vmem:[%s2595_s26 + $0x88] sm:$0xff] %v1534_v8  ;;  %v1989_v35 = vpop.f32.mrb[68].mxu1  ;;  %v2063_v42 = vpop.f32.mrb[68].mxu0 }
 0x182   : > { %v1479_v1 = vadd.f32 %v2063_v42, %v1318_v16  ;;  %v1990_v44 = vpop.f32.mrb[69].mxu1  ;;  %v1470_v53 = vpop.f32.mrb[69].mxu0 }
 0x183   : > { %v1991_v26 = vadd.f32 %v1990_v44, %v1989_v35  ;;  %v1471_v56 = vadd.f32 %v1470_v53, %v2632_v48  ;;  %v1992_v46 = vpop.f32.mrb[70].mxu1  ;;  %v2064_v6 = vpop.f32.mrb[70].mxu0 }
 0x184   : > { %v1539_v57 = vmax.f32 %v1479_v1, 0.0  ;;  %v1482_v2 = vadd.f32 %v2064_v6, %v1321_v47  ;;  %v1993_v36 = vpop.f32.mrb[71].mxu1  ;;  %v1473_v60 = vpop.f32.mrb[71].mxu0 }
 0x185   : > { %v1537_v11 = vmax.f32 %v1471_v56, 0.0  ;;  %v1994_v12 = vadd.f32 %v1993_v36, %v1992_v46  ;;  %v1474_v61 = vadd.f32 %v1473_v60, %v2636_v52  ;;  %v1334_v7 = vadd.f32 %v1991_v26, %v1173_v45 }
 0x186   : > { %1571 = vst [vmem:[%s2595_s26 + $0xb0] sm:$0xff] %v1539_v57  ;;  %v1540_v22 = vmax.f32 %v1482_v2, 0.0 }
 0x187   : > { %1569 = vst [vmem:[%s2595_s26 + $0xa0] sm:$0xff] %v1537_v11  ;;  %v1538_v48 = vmax.f32 %v1474_v61, 0.0  ;;  %v1337_v55 = vadd.f32 %v1994_v12, %v1176_v54 }
 0x188   : > { %1572 = vst [vmem:[%s2595_s26 + $0xb8] sm:$0xff] %v1540_v22 }
 0x189   : > { %1570 = vst [vmem:[%s2595_s26 + $0xa8] sm:$0xff] %v1538_v48  ;;  %v1995_v63 = vpop.f32.mrb[72].mxu1  ;;  %v2067_v3 = vpop.f32.mrb[72].mxu0 }
 0x18a   : > { %v1495_v4 = vadd.f32 %v2067_v3, %v1334_v7  ;;  %v1996_v13 = vpop.f32.mrb[73].mxu1  ;;  %v1486_v18 = vpop.f32.mrb[73].mxu0 }
 0x18b   : > { %v1997_v15 = vadd.f32 %v1996_v13, %v1995_v63  ;;  %v1487_v52 = vadd.f32 %v1486_v18, %v1326_v10  ;;  %v1998_v29 = vpop.f32.mrb[74].mxu1  ;;  %v2068_v50 = vpop.f32.mrb[74].mxu0 }
 0x18c   : > { %v1543_v16 = vmax.f32 %v1495_v4, 0.0  ;;  %v1498_v17 = vadd.f32 %v2068_v50, %v1337_v55  ;;  %v1999_v58 = vpop.f32.mrb[75].mxu1  ;;  %v1489_v47 = vpop.f32.mrb[75].mxu0 }
 0x18d   : > { %v1541_v24 = vmax.f32 %v1487_v52, 0.0  ;;  %v2000_v23 = vadd.f32 %v1999_v58, %v1998_v29  ;;  %v1490_v9 = vadd.f32 %v1489_v47, %v1329_v62  ;;  %v1342_v43 = vadd.f32 %v1997_v15, %v1181_v38 }
 0x18e   : > { %1575 = vst [vmem:[%s2595_s26 + $0xd0] sm:$0xff] %v1543_v16  ;;  %v1544_v19 = vmax.f32 %v1498_v17, 0.0 }
 0x18f   : > { %1573 = vst [vmem:[%s2595_s26 + $0xc0] sm:$0xff] %v1541_v24  ;;  %v1542_v20 = vmax.f32 %v1490_v9, 0.0  ;;  %v1345_v30 = vadd.f32 %v2000_v23, %v1184_v5 }
 0x190   : > { %1576 = vst [vmem:[%s2595_s26 + $0xd8] sm:$0xff] %v1544_v19 }
 0x191   : > { %1574 = vst [vmem:[%s2595_s26 + $0xc8] sm:$0xff] %v1542_v20  ;;  %v2001_v14 = vpop.f32.mrb[76].mxu1  ;;  %v2071_v33 = vpop.f32.mrb[76].mxu0 }
 0x192   : > { %v2002_v34 = vpop.f32.mrb[77].mxu1  ;;  %v1502_v25 = vpop.f32.mrb[77].mxu0 }
 0x193   : > { %v2003_v51 = vadd.f32 %v2002_v34, %v2001_v14  ;;  %v1503_v49 = vadd.f32 %v1502_v25, %v1342_v43  ;;  %v2004_v27 = vpop.f32.mrb[78].mxu1  ;;  %v2072_v39 = vpop.f32.mrb[78].mxu0 }
 0x194   : > { %v2005_v21 = vpop.f32.mrb[79].mxu1  ;;  %v1505_v40 = vpop.f32.mrb[79].mxu0 }
 0x195   : > { %v1350_v59 = vadd.f32 %v2003_v51, %v1189_v28  ;;  %v1545_v10 = vmax.f32 %v1503_v49, 0.0  ;;  %v2006_v0 = vadd.f32 %v2005_v21, %v2004_v27  ;;  %v1506_v8 = vadd.f32 %v1505_v40, %v1345_v30 }
 0x197   : > { %v1511_v62 = vadd.f32 %v2071_v33, %v1350_v59  ;;  %1577 = vst [vmem:[%s2595_s26 + $0xe0] sm:$0xff] %v1545_v10  ;;  %v1353_v35 = vadd.f32 %v2006_v0, %v1192_v32  ;;  %v1546_v31 = vmax.f32 %v1506_v8, 0.0 }
 0x199   : > { %v1547_v42 = vmax.f32 %v1511_v62, 0.0  ;;  %v1514_v1 = vadd.f32 %v2072_v39, %v1353_v35  ;;  %1578 = vst [vmem:[%s2595_s26 + $0xe8] sm:$0xff] %v1546_v31 }
 0x19b   : > { %1579 = vst [vmem:[%s2595_s26 + $0xf0] sm:$0xff] %v1547_v42  ;;  %v1548_v44 = vmax.f32 %v1514_v1, 0.0 }
 0x19d   : > { %1580 = vst [vmem:[%s2595_s26 + $0xf8] sm:$0xff] %v1548_v44 }
 0x19e PF: > { %s13_s12 = sadd.s32 1, %s2255_s12  }
 0x19f   : > { %p10_p4 = scmp.ge.s32.totalorder %s13_s12, 7  }
 0x1a1   :  { %12 = sbr.rel (!%p10_p4) target bundleno = 1 (0x1), region = 62 }

// kernel: convnet_forward.10
= control target key start
LH: loop header
LB: loop body
LE: loop exit
PB: predicated region body
PF: predicated region fallthrough
CT: control target
= control target key end

     0   :  { %v2347_v42 = vmov 0   ;;  %vm1159_vm0 = vcmask 1041408   ;;  %vm1116_vm1 = vcmask 31744   ;;  %s3080_s1 = inlined_call_operand.vmem [shape: bf16[900,128], index: 1, kind: input, shape index: {}]   ;;  %s3081_s0 = inlined_call_operand.vmem [shape: bf16[216,900], index: 0, kind: input, shape index: {}]   ;;  %s3082_s2 = inlined_call_operand.vmem [shape: f32[1,128], index: 2, kind: input, shape index: {}]   ;;  %s3083_s3 = inlined_call_operand.vmem [shape: f32[216,128], index: 3, kind: output, shape index: {}]  }
   0x1   :  { %v2282_v0 = vld [vmem:[%s3080_s1 + $0x40] sm:$0xff]   ;;  %v2286_v4 = vld [vmem:[%s3080_s1 + $0x48] sm:$0xff]   ;;  %v2290_v8 = vld [vmem:[%s3080_s1 + $0x50] sm:$0xff]  }
   0x2   :  { %v2283_v1 = vld [vmem:[%s3080_s1] sm:$0xff]   ;;  %1981 = vmatprep.subr.bf16.mxu0 %v2282_v0  ;;  %v2287_v5 = vld [vmem:[%s3080_s1 + $0x8] sm:$0xff]   ;;  %v2291_v9 = vld [vmem:[%s3080_s1 + $0x10] sm:$0xff]  }
   0x3   :  { %v2284_v2 = vld [vmem:[%s3080_s1 + $0xc0] sm:$0xff]   ;;  %1982 = vmatpush3.bf16.msra.mxu0 %v2283_v1  ;;  %v2288_v6 = vld [vmem:[%s3080_s1 + $0xc8] sm:$0xff]   ;;  %v2292_v10 = vld [vmem:[%s3080_s1 + $0xd0] sm:$0xff]  }
   0x4   :  { %v2285_v3 = vld [vmem:[%s3080_s1 + $0x80] sm:$0xff]   ;;  %2081 = vmatprep.subr.bf16.mxu1 %v2284_v2  ;;  %1983 = vmatprep.subr.bf16.mxu0 %v2286_v4  ;;  %v2289_v7 = vld [vmem:[%s3080_s1 + $0x88] sm:$0xff]   ;;  %v2293_v11 = vld [vmem:[%s3080_s1 + $0x90] sm:$0xff]  }
   0x5   :  { %2082 = vmatpush3.bf16.msra.mxu1 %v2285_v3  ;;  %v2294_v12 = vld [vmem:[%s3080_s1 + $0x58] sm:$0xff]   ;;  %v2298_v16 = vld [vmem:[%s3080_s1 + $0x60] sm:$0xff]   ;;  %v2302_v20 = vld [vmem:[%s3080_s1 + $0x68] sm:$0xff]  }
   0x6   :  { %2083 = vmatprep.subr.bf16.mxu1 %v2288_v6  ;;  %v2295_v13 = vld [vmem:[%s3080_s1 + $0x18] sm:$0xff]   ;;  %v2299_v17 = vld [vmem:[%s3080_s1 + $0x20] sm:$0xff]   ;;  %v2303_v21 = vld [vmem:[%s3080_s1 + $0x28] sm:$0xff]  }
   0x7   :  { %1984 = vmatpush3.bf16.msra.mxu0 %v2287_v5  ;;  %v2296_v14 = vld [vmem:[%s3080_s1 + $0xd8] sm:$0xff]   ;;  %v2300_v18 = vld [vmem:[%s3080_s1 + $0xe0] sm:$0xff]   ;;  %v2304_v22 = vld [vmem:[%s3080_s1 + $0xe8] sm:$0xff]  }
   0x8   :  { %1985 = vmatprep.subr.bf16.mxu0 %v2290_v8  ;;  %v2297_v15 = vld [vmem:[%s3080_s1 + $0x98] sm:$0xff]   ;;  %v2301_v19 = vld [vmem:[%s3080_s1 + $0xa0] sm:$0xff]   ;;  %v2305_v23 = vld [vmem:[%s3080_s1 + $0xa8] sm:$0xff]  }
   0x9   :  { %2084 = vmatpush3.bf16.msra.mxu1 %v2289_v7  ;;  %v2306_v24 = vld [vmem:[%s3080_s1 + $0x70] sm:$0xff]   ;;  %v2310_v28 = vld [vmem:[%s3080_s1 + $0x78] sm:$0xff]   ;;  %v15_v31 = vld [vmem:[%s3081_s0] sm:$0xff] }
   0xa   :  { %2085 = vmatprep.subr.bf16.mxu1 %v2292_v10  ;;  %v2307_v25 = vld [vmem:[%s3080_s1 + $0x30] sm:$0xff]   ;;  %v2311_v29 = vld [vmem:[%s3080_s1 + $0x38] sm:$0xff]   ;;  %v19_v32 = vld [vmem:[%s3081_s0 + $0x20] sm:$0xff] }
   0xb   :  { %1986 = vmatpush3.bf16.msra.mxu0 %v2291_v9  ;;  %v2308_v26 = vld [vmem:[%s3080_s1 + $0xf0] sm:$0xff]   ;;  %v2312_v30 = vld [vmem:[%s3080_s1 + $0xf8] sm:$0xff]   ;;  %v1798_v33 = vcombine.low %v15_v31, %v19_v32  ;;  %v1799_v34 = vcombine.high %v15_v31, %v19_v32  ;;  %v2314_v36 = vld [vmem:[%s3080_s1 + $0x140] sm:$0xff]  }
   0xc   :  { %1987 = vmatprep.subr.bf16.mxu0 %v2294_v12  ;;  %v2309_v27 = vld [vmem:[%s3080_s1 + $0xb0] sm:$0xff]   ;;  %v2313_v35 = vld [vmem:[%s3080_s1 + $0xb8] sm:$0xff]   ;;  %v16_v37 = vld [vmem:[%s3081_s0 + $0x8] sm:$0xff] }
   0xd   :  { %2086 = vmatpush3.bf16.msra.mxu1 %v2293_v11  ;;  %1195 = vmatprep.mubr.bf16.mxu0 %v1799_v34  ;;  %v20_v38 = vld [vmem:[%s3081_s0 + $0x28] sm:$0xff]  ;;  %v2315_v41 = vld [vmem:[%s3080_s1 + $0x100] sm:$0xff]   ;;  %v2320_v61 = vld [vmem:[%s3080_s1 + $0x150] sm:$0xff]  }
   0xe   :  { %2087 = vmatprep.subr.bf16.mxu1 %v2296_v14  ;;  %v1800_v39 = vcombine.low %v16_v37, %v20_v38  ;;  %v1801_v40 = vcombine.high %v16_v37, %v20_v38  ;;  %v2316_v43 = vld [vmem:[%s3080_s1 + $0x180] sm:$0xff]   ;;  %v24_v47 = vld [vmem:[%s3081_s0 + $0x48] sm:$0xff]  ;;  %v2321_v0 = vld [vmem:[%s3080_s1 + $0x110] sm:$0xff]  }
   0xf   :  { %1988 = vmatpush3.bf16.msra.mxu0 %v2295_v13  ;;  %v23_v44 = vld [vmem:[%s3081_s0 + $0x40] sm:$0xff]  ;;  %v28_v48 = vld [vmem:[%s3081_s0 + $0x68] sm:$0xff]  ;;  %v2322_v1 = vld [vmem:[%s3080_s1 + $0x190] sm:$0xff]  }
  0x10   :  { %1989 = vmatprep.subr.bf16.mxu0 %v2298_v16  ;;  %v27_v45 = vld [vmem:[%s3081_s0 + $0x60] sm:$0xff]  ;;  %1339 = vmatprep.mubr.bf16.mxu1 %v1801_v40  ;;  %v1809_v49 = vcombine.high %v24_v47, %v28_v48  ;;  %v2317_v50 = vld [vmem:[%s3080_s1 + $0x148] sm:$0xff]   ;;  %v1808_v59 = vcombine.low %v24_v47, %v28_v48  ;;  %v2323_v6 = vld [vmem:[%s3080_s1 + $0x158] sm:$0xff]  }
  0x11   :  { %2088 = vmatpush3.bf16.msra.mxu1 %v2297_v15  ;;  %v1807_v46 = vcombine.high %v23_v44, %v27_v45  ;;  %v31_v51 = vld [vmem:[%s3081_s0 + $0x80] sm:$0xff]  ;;  %v1806_v52 = vcombine.low %v23_v44, %v27_v45  ;;  %v2318_v55 = vld [vmem:[%s3080_s1 + $0x108] sm:$0xff]   ;;  %v2324_v8 = vld [vmem:[%s3080_s1 + $0x118] sm:$0xff]  }
  0x12   :  { %2089 = vmatprep.subr.bf16.mxu1 %v2300_v18  ;;  %v35_v53 = vld [vmem:[%s3081_s0 + $0xa0] sm:$0xff]  ;;  %v32_v56 = vld [vmem:[%s3081_s0 + $0x88] sm:$0xff]  ;;  %v2325_v10 = vld [vmem:[%s3080_s1 + $0x198] sm:$0xff]  }
  0x13   :  { %1990 = vmatpush3.bf16.msra.mxu0 %v2299_v17  ;;  %v1815_v54 = vcombine.high %v31_v51, %v35_v53  ;;  %v36_v57 = vld [vmem:[%s3081_s0 + $0xa8] sm:$0xff]  ;;  %v39_v62 = vld [vmem:[%s3081_s0 + $0xc0] sm:$0xff]  ;;  %v1814_v2 = vcombine.low %v31_v51, %v35_v53  ;;  %v2332_v31 = vld [vmem:[%s3080_s1 + $0x1b0] sm:$0xff]  }
  0x14   :  { %1991 = vmatprep.subr.bf16.mxu0 %v2302_v20  ;;  %v2319_v58 = vld [vmem:[%s3080_s1 + $0x188] sm:$0xff]   ;;  %v1817_v60 = vcombine.high %v32_v56, %v36_v57  ;;  %v43_v63 = vld [vmem:[%s3081_s0 + $0xe0] sm:$0xff]  ;;  %v1816_v7 = vcombine.low %v32_v56, %v36_v57  ;;  %v2335_v38 = vld [vmem:[%s3080_s1 + $0x1b8] sm:$0xff]  }
  0x15   :  { %2090 = vmatpush3.bf16.msra.mxu1 %v2301_v19  ;;  %v1823_v3 = vcombine.high %v39_v62, %v43_v63  ;;  %v40_v4 = vld [vmem:[%s3081_s0 + $0xc8] sm:$0xff]  ;;  %v47_v11 = vld [vmem:[%s3081_s0 + $0x100] sm:$0xff]  ;;  %v1822_v14 = vcombine.low %v39_v62, %v43_v63  ;;  %v2336_v44 = vld [vmem:[%s3080_s1 + $0x178] sm:$0xff]  }
  0x16   :  { %2091 = vmatprep.subr.bf16.mxu1 %v2304_v22  ;;  %v44_v5 = vld [vmem:[%s3081_s0 + $0xe8] sm:$0xff]  ;;  %v51_v12 = vld [vmem:[%s3081_s0 + $0x120] sm:$0xff]  ;;  %v2337_v45 = vld [vmem:[%s3080_s1 + $0x138] sm:$0xff]  }
  0x17   :  { %1992 = vmatpush3.bf16.msra.mxu0 %v2303_v21  ;;  %v1825_v9 = vcombine.high %v40_v4, %v44_v5  ;;  %v2326_v13 = vld [vmem:[%s3080_s1 + $0x160] sm:$0xff]   ;;  %v1831_v16 = vcombine.high %v47_v11, %v51_v12  ;;  %v48_v17 = vld [vmem:[%s3081_s0 + $0x108] sm:$0xff]  ;;  %v1824_v20 = vcombine.low %v40_v4, %v44_v5 }
  0x18   :  { %1993 = vmatprep.subr.bf16.mxu0 %v2306_v24  ;;  %v2327_v15 = vld [vmem:[%s3080_s1 + $0x1a0] sm:$0xff]   ;;  %v52_v18 = vld [vmem:[%s3081_s0 + $0x128] sm:$0xff] }
  0x19   :  { %2092 = vmatpush3.bf16.msra.mxu1 %v2305_v23  ;;  %v2328_v19 = vld [vmem:[%s3080_s1 + $0x120] sm:$0xff]   ;;  %v1833_v21 = vcombine.high %v48_v17, %v52_v18  ;;  %v2329_v22 = vld [vmem:[%s3080_s1 + $0x1a8] sm:$0xff]   ;;  %v1832_v32 = vcombine.low %v48_v17, %v52_v18 }
  0x1a   :  { %2093 = vmatprep.subr.bf16.mxu1 %v2308_v26  ;;  %v2330_v23 = vld [vmem:[%s3080_s1 + $0x168] sm:$0xff]   ;;  %v55_v24 = vld [vmem:[%s3081_s0 + $0x140] sm:$0xff] }
  0x1b   :  { %1994 = vmatpush3.bf16.msra.mxu0 %v2307_v25  ;;  %v59_v25 = vld [vmem:[%s3081_s0 + $0x160] sm:$0xff]  ;;  %v2331_v26 = vld [vmem:[%s3080_s1 + $0x128] sm:$0xff]  }
  0x1c   :  { %1995 = vmatprep.subr.bf16.mxu0 %v2310_v28  ;;  %v1839_v28 = vcombine.high %v55_v24, %v59_v25  ;;  %v67_v37 = vld [vmem:[%s3081_s0 + $0x1a0] sm:$0xff]  ;;  %v1838_v40 = vcombine.low %v55_v24, %v59_v25  ;;  %v72_v53 = vld [vmem:[%s3081_s0 + $0x1c8] sm:$0xff] }
  0x1d   :  { %2094 = vmatpush3.bf16.msra.mxu1 %v2309_v27  ;;  %v1830_v27 = vcombine.low %v47_v11, %v51_v12  ;;  %v2342_v47 = vld [vmem:[%s3080_s1 + $0x1c0] ss:$0 sps:$4 sm:$0x33]   ;;  %v84_v62 = vld [vmem:[%s3081_s0 + $0x228] sm:$0xff] }
  0x1e   :  { %2095 = vmatprep.subr.bf16.mxu1 %v2312_v30  ;;  %v60_v30 = vld [vmem:[%s3081_s0 + $0x168] sm:$0xff]  ;;  %v79_v57 = vld [vmem:[%s3081_s0 + $0x200] sm:$0xff] }
  0x1f   :  { %1996 = vmatpush3.bf16.msra.mxu0 %v2311_v29  ;;  %v56_v29 = vld [vmem:[%s3081_s0 + $0x148] sm:$0xff]  ;;  %v103_v17 = vld [vmem:[%s3081_s0 + $0x2c0] sm:$0xff] }
  0x20   :  { %2181 = vmatprep.subr.bf16.mxu0 %v2314_v36  ;;  %v1841_v34 = vcombine.high %v56_v29, %v60_v30  ;;  %v63_v36 = vld [vmem:[%s3081_s0 + $0x180] sm:$0xff]  ;;  %v88_v5 = vld [vmem:[%s3081_s0 + $0x248] sm:$0xff] }
  0x21   :  { %2096 = vmatpush3.bf16.msra.mxu1 %v2313_v35  ;;  %v2334_v35 = vld [vmem:[%s3080_s1 + $0x130] sm:$0xff]   ;;  %v1846_v51 = vcombine.low %v63_v36, %v67_v37  ;;  %v107_v18 = vld [vmem:[%s3081_s0 + $0x2e0] sm:$0xff] }
  0x22   :  { %1196 = vmatmul.mubr.bf16.vlgmr.msra.gmra.mrb[0].mxu0 %v1798_v33  ;;  %1595 = vmatprep.subr.bf16.mxu1 %v2347_v42  ;;  %v2333_v33 = vld [vmem:[%s3080_s1 + $0x170] sm:$0xff]   ;;  %v111_v25 = vld [vmem:[%s3081_s0 + $0x300] sm:$0xff] }
  0x23   :  { %2182 = vmatpush3.bf16.msra.mxu0 %v2315_v41  ;;  %1203 = vmatprep.mubr.bf16.mxu0 %v1807_v46  ;;  %v68_v41 = vld [vmem:[%s3081_s0 + $0x1a8] sm:$0xff]  ;;  %v1840_v46 = vcombine.low %v56_v29, %v60_v30 }
  0x24   :  { %1340 = vmatmul.mubr.bf16.vlgmr.msra.gmra.mrb[0].mxu1 %v1800_v39  ;;  %2183 = vmatprep.subr.bf16.mxu0 %v2317_v50  ;;  %v64_v39 = vld [vmem:[%s3081_s0 + $0x188] sm:$0xff]  ;;  %v75_v50 = vld [vmem:[%s3081_s0 + $0x1e0] sm:$0xff] }
  0x25   :  { %1596 = vmatpush1.bf16.msra.mxu1 %v2316_v43  ;;  %1347 = vmatprep.mubr.bf16.mxu1 %v1809_v49  ;;  %v1847_v43 = vcombine.high %v63_v36, %v67_v37  ;;  %v1849_v48 = vcombine.high %v64_v39, %v68_v41  ;;  %v1161_v49 = vsel %vm1159_vm0, %v2342_v47, 0  ;;  %v112_v29 = vld [vmem:[%s3081_s0 + $0x308] sm:$0xff] }
  0x26   :  { %1597 = vmatprep.subr.bf16.mxu1 %v2347_v42  ;;  %v116_v30 = vld [vmem:[%s3081_s0 + $0x328] sm:$0xff] }
  0x27   :  { %2184 = vmatpush3.bf16.msra.mxu0 %v2318_v55  ;;  %v1848_v55 = vcombine.low %v64_v39, %v68_v41  ;;  %v120_v36 = vld [vmem:[%s3081_s0 + $0x348] sm:$0xff]  ;;  %v1896_v37 = vcombine.low %v112_v29, %v116_v30  ;;  %v17_v39 = vld [vmem:[%s3081_s0 + $0x10] sm:$0xff] }
  0x28   :  { %2185 = vmatprep.subr.bf16.mxu0 %v2320_v61  ;;  %v80_v61 = vld [vmem:[%s3081_s0 + $0x208] sm:$0xff] }
  0x29   :  { %1598 = vmatpush1.bf16.msra.mxu1 %v2319_v58  ;;  %v83_v58 = vld [vmem:[%s3081_s0 + $0x220] sm:$0xff] }
  0x2a   :  { %1204 = vmatmul.mubr.bf16.gmra.mrb[4].mxu0 %v1806_v52  ;;  %1599 = vmatprep.subr.bf16.mxu1 %v2347_v42 }
  0x2b   :  { %1211 = vmatprep.mubr.bf16.mxu0 %v1815_v54  ;;  %2186 = vmatpush3.bf16.msra.mxu0 %v2321_v0  ;;  %v76_v54 = vld [vmem:[%s3081_s0 + $0x1e8] sm:$0xff]  ;;  %v1865_v0 = vcombine.high %v80_v61, %v84_v62 }
  0x2c   :  { %1348 = vmatmul.mubr.bf16.gmra.mrb[4].mxu1 %v1808_v59  ;;  %2187 = vmatprep.subr.bf16.mxu0 %v2323_v6  ;;  %v1857_v56 = vcombine.high %v72_v53, %v76_v54  ;;  %v1856_v63 = vcombine.low %v72_v53, %v76_v54  ;;  %v92_v6 = vld [vmem:[%s3081_s0 + $0x268] sm:$0xff] }
  0x2d   :  { %1355 = vmatprep.mubr.bf16.mxu1 %v1817_v60  ;;  %1600 = vmatpush1.bf16.msra.mxu1 %v2322_v1  ;;  %v1863_v60 = vcombine.high %v79_v57, %v83_v58  ;;  %v87_v1 = vld [vmem:[%s3081_s0 + $0x240] sm:$0xff] }
  0x2e   :  { %1601 = vmatprep.subr.bf16.mxu1 %v2347_v42 }
  0x2f   :  { %2188 = vmatpush3.bf16.msra.mxu0 %v2324_v8  ;;  %v1873_v8 = vcombine.high %v88_v5, %v92_v6 }
  0x30   :  { %2189 = vmatprep.subr.bf16.mxu0 %v2326_v13  ;;  %v96_v13 = vld [vmem:[%s3081_s0 + $0x288] sm:$0xff] }
  0x31   :  { %1602 = vmatpush1.bf16.msra.mxu1 %v2325_v10  ;;  %v99_v10 = vld [vmem:[%s3081_s0 + $0x2a0] sm:$0xff] }
  0x32   :  { %1212 = vmatmul.mubr.bf16.gmra.mrb[8].mxu0 %v1814_v2  ;;  %1603 = vmatprep.subr.bf16.mxu1 %v2347_v42  ;;  %v91_v2 = vld [vmem:[%s3081_s0 + $0x260] sm:$0xff] }
  0x33   :  { %1219 = vmatprep.mubr.bf16.mxu0 %v1823_v3  ;;  %2190 = vmatpush3.bf16.msra.mxu0 %v2328_v19  ;;  %v1862_v3 = vcombine.low %v79_v57, %v83_v58  ;;  %v1871_v4 = vcombine.high %v87_v1, %v91_v2  ;;  %v1870_v11 = vcombine.low %v87_v1, %v91_v2 }
  0x34   :  { %1356 = vmatmul.mubr.bf16.gmra.mrb[8].mxu1 %v1816_v7  ;;  %2191 = vmatprep.subr.bf16.mxu0 %v2330_v23  ;;  %v1864_v7 = vcombine.low %v80_v61, %v84_v62 }
  0x35   :  { %1363 = vmatprep.mubr.bf16.mxu1 %v1825_v9  ;;  %1604 = vmatpush1.bf16.msra.mxu1 %v2327_v15  ;;  %v95_v9 = vld [vmem:[%s3081_s0 + $0x280] sm:$0xff]  ;;  %v1872_v15 = vcombine.low %v88_v5, %v92_v6 }
  0x36   :  { %1605 = vmatprep.subr.bf16.mxu1 %v2347_v42  ;;  %v1879_v12 = vcombine.high %v95_v9, %v99_v10  ;;  %v1878_v19 = vcombine.low %v95_v9, %v99_v10 }
  0x37   :  { %2192 = vmatpush3.bf16.msra.mxu0 %v2331_v26  ;;  %v115_v26 = vld [vmem:[%s3081_s0 + $0x320] sm:$0xff] }
  0x38   :  { %2193 = vmatprep.subr.bf16.mxu0 %v2333_v33  ;;  %v119_v33 = vld [vmem:[%s3081_s0 + $0x340] sm:$0xff] }
  0x39   :  { %1606 = vmatpush1.bf16.msra.mxu1 %v2329_v22  ;;  %v108_v22 = vld [vmem:[%s3081_s0 + $0x2e8] sm:$0xff]  ;;  %v1902_v41 = vcombine.low %v119_v33, %v119_v33 }
  0x3a   :  { %1220 = vmatmul.mubr.bf16.gmra.mrb[12].mxu0 %v1822_v14  ;;  %1607 = vmatprep.subr.bf16.mxu1 %v2347_v42  ;;  %v100_v14 = vld [vmem:[%s3081_s0 + $0x2a8] sm:$0xff] }
  0x3b   :  { %1227 = vmatprep.mubr.bf16.mxu0 %v1831_v16  ;;  %2194 = vmatpush3.bf16.msra.mxu0 %v2334_v35  ;;  %v1881_v16 = vcombine.high %v96_v13, %v100_v14  ;;  %v1880_v23 = vcombine.low %v96_v13, %v100_v14  ;;  %v1903_v35 = vcombine.high %v119_v33, %v119_v33 }
  0x3c   :  { %1364 = vmatmul.mubr.bf16.gmra.mrb[12].mxu1 %v1824_v20  ;;  %2195 = vmatprep.subr.bf16.mxu0 %v2336_v44  ;;  %v1887_v20 = vcombine.high %v103_v17, %v107_v18  ;;  %v18_v44 = vld [vmem:[%s3081_s0 + $0x18] sm:$0xff] }
  0x3d   :  { %1371 = vmatprep.mubr.bf16.mxu1 %v1833_v21  ;;  %1608 = vmatpush1.bf16.msra.mxu1 %v2332_v31  ;;  %v104_v21 = vld [vmem:[%s3081_s0 + $0x2c8] sm:$0xff] }
  0x3e   :  { %1609 = vmatprep.subr.bf16.mxu1 %v2347_v42  ;;  %v1889_v24 = vcombine.high %v104_v21, %v108_v22  ;;  %v1888_v31 = vcombine.low %v104_v21, %v108_v22 }
  0x3f   :  { %2196 = vmatpush3.bf16.msra.mxu0 %v2337_v45  ;;  %v22_v45 = vld [vmem:[%s3081_s0 + $0x38] sm:$0xff] }
  0x40   :  { %v1805_v47 = vcombine.high %v18_v44, %v22_v45  ;;  %v1804_v53 = vcombine.low %v18_v44, %v22_v45  ;;  %v82_v44 = vld [vmem:[%s3081_s0 + $0x218] sm:$0xff] }
  0x41   :  { %1610 = vmatpush1.bf16.msra.mxu1 %v2335_v38  ;;  %v1905_v38 = vcombine.high %v120_v36, %v120_v36  ;;  %v86_v45 = vld [vmem:[%s3081_s0 + $0x238] sm:$0xff] }
  0x42   :  { %1228 = vmatmul.mubr.bf16.gmra.mrb[16].mxu0 %v1830_v27  ;;  %1611 = vmatprep.subr.bf16.mxu1 %v2347_v42  ;;  %v71_v42 = vld [vmem:[%s3081_s0 + $0x1c0] sm:$0xff]  ;;  %v1886_v27 = vcombine.low %v103_v17, %v107_v18 }
  0x43   :  { %1235 = vmatprep.mubr.bf16.mxu0 %v1839_v28  ;;  %v1855_v52 = vcombine.high %v71_v42, %v75_v50  ;;  %v1854_v59 = vcombine.low %v71_v42, %v75_v50  ;;  %v1895_v28 = vcombine.high %v111_v25, %v115_v26 }
  0x44   :  { %1372 = vmatmul.mubr.bf16.gmra.mrb[16].mxu1 %v1832_v32  ;;  %v1897_v32 = vcombine.high %v112_v29, %v116_v30 }
  0x45   :  { %1379 = vmatprep.mubr.bf16.mxu1 %v1841_v34  ;;  %1612 = vmatpush1.bf16.msra.mxu1 %v1161_v49  ;;  %v1894_v34 = vcombine.low %v111_v25, %v115_v26  ;;  %v29_v49 = vld [vmem:[%s3081_s0 + $0x70] sm:$0xff] }
  0x4a   :  { %1236 = vmatmul.mubr.bf16.gmra.mrb[20].mxu0 %v1838_v40  ;;  %v21_v40 = vld [vmem:[%s3081_s0 + $0x30] sm:$0xff] }
  0x4b   :  { %1243 = vmatprep.mubr.bf16.mxu0 %v1847_v43  ;;  %v1803_v43 = vcombine.high %v17_v39, %v21_v40  ;;  %v1802_v42 = vcombine.low %v17_v39, %v21_v40  ;;  %v81_v39 = vld [vmem:[%s3081_s0 + $0x210] sm:$0xff] }
  0x4c   :  { %1380 = vmatmul.mubr.bf16.gmra.mrb[20].mxu1 %v1840_v46  ;;  %v1904_v46 = vcombine.low %v120_v36, %v120_v36  ;;  %v78_v36 = vld [vmem:[%s3081_s0 + $0x1f8] sm:$0xff]  ;;  %v85_v40 = vld [vmem:[%s3081_s0 + $0x230] sm:$0xff] }
  0x4d   :  { %1387 = vmatprep.mubr.bf16.mxu1 %v1849_v48  ;;  %v25_v48 = vld [vmem:[%s3081_s0 + $0x50] sm:$0xff] }
  0x4e   :  { %v1811_v50 = vcombine.high %v25_v48, %v29_v49  ;;  %v1810_v57 = vcombine.low %v25_v48, %v29_v49  ;;  %v89_v48 = vld [vmem:[%s3081_s0 + $0x250] sm:$0xff] }
  0x4f   :  { %v93_v49 = vld [vmem:[%s3081_s0 + $0x270] sm:$0xff] }
  0x52   :  { %1244 = vmatmul.mubr.bf16.gmra.mrb[24].mxu0 %v1846_v51  ;;  %v26_v51 = vld [vmem:[%s3081_s0 + $0x58] sm:$0xff] }
  0x53   :  { %1251 = vmatprep.mubr.bf16.mxu0 %v1855_v52  ;;  %v30_v52 = vld [vmem:[%s3081_s0 + $0x78] sm:$0xff] }
  0x54   :  { %1388 = vmatmul.mubr.bf16.gmra.mrb[24].mxu1 %v1848_v55  ;;  %v1813_v54 = vcombine.high %v26_v51, %v30_v52  ;;  %v33_v55 = vld [vmem:[%s3081_s0 + $0x90] sm:$0xff]  ;;  %v1812_v61 = vcombine.low %v26_v51, %v30_v52  ;;  %v90_v51 = vld [vmem:[%s3081_s0 + $0x258] sm:$0xff] }
  0x55   :  { %1395 = vmatprep.mubr.bf16.mxu1 %v1857_v56  ;;  %v37_v56 = vld [vmem:[%s3081_s0 + $0xb0] sm:$0xff]  ;;  %v94_v52 = vld [vmem:[%s3081_s0 + $0x278] sm:$0xff] }
  0x56   :  { %v1819_v58 = vcombine.high %v33_v55, %v37_v56  ;;  %v1818_v1 = vcombine.low %v33_v55, %v37_v56  ;;  %v97_v55 = vld [vmem:[%s3081_s0 + $0x290] sm:$0xff] }
  0x57   :  { %v101_v56 = vld [vmem:[%s3081_s0 + $0x2b0] sm:$0xff] }
  0x5a   :  { %1252 = vmatmul.mubr.bf16.gmra.mrb[28].mxu0 %v1854_v59  ;;  %v34_v59 = vld [vmem:[%s3081_s0 + $0x98] sm:$0xff] }
  0x5b   :  { %1259 = vmatprep.mubr.bf16.mxu0 %v1863_v60  ;;  %v38_v60 = vld [vmem:[%s3081_s0 + $0xb8] sm:$0xff] }
  0x5c   :  { %1396 = vmatmul.mubr.bf16.gmra.mrb[28].mxu1 %v1856_v63  ;;  %v1821_v62 = vcombine.high %v34_v59, %v38_v60  ;;  %v41_v63 = vld [vmem:[%s3081_s0 + $0xd0] sm:$0xff]  ;;  %v1820_v5 = vcombine.low %v34_v59, %v38_v60  ;;  %v98_v59 = vld [vmem:[%s3081_s0 + $0x298] sm:$0xff] }
  0x5d   :  { %1403 = vmatprep.mubr.bf16.mxu1 %v1865_v0  ;;  %v45_v0 = vld [vmem:[%s3081_s0 + $0xf0] sm:$0xff]  ;;  %v102_v60 = vld [vmem:[%s3081_s0 + $0x2b8] sm:$0xff] }
  0x5e   :  { %v1827_v2 = vcombine.high %v41_v63, %v45_v0  ;;  %v1826_v9 = vcombine.low %v41_v63, %v45_v0  ;;  %v105_v63 = vld [vmem:[%s3081_s0 + $0x2d0] sm:$0xff] }
  0x5f   :  { %v109_v0 = vld [vmem:[%s3081_s0 + $0x2f0] sm:$0xff] }
  0x62   :  { %1260 = vmatmul.mubr.bf16.gmra.mrb[32].mxu0 %v1862_v3  ;;  %v42_v3 = vld [vmem:[%s3081_s0 + $0xd8] sm:$0xff] }
  0x63   :  { %1267 = vmatprep.mubr.bf16.mxu0 %v1871_v4  ;;  %v46_v4 = vld [vmem:[%s3081_s0 + $0xf8] sm:$0xff] }
  0x64   :  { %1404 = vmatmul.mubr.bf16.gmra.mrb[32].mxu1 %v1864_v7  ;;  %v1829_v6 = vcombine.high %v42_v3, %v46_v4  ;;  %v49_v7 = vld [vmem:[%s3081_s0 + $0x110] sm:$0xff]  ;;  %v1828_v13 = vcombine.low %v42_v3, %v46_v4  ;;  %v106_v3 = vld [vmem:[%s3081_s0 + $0x2d8] sm:$0xff] }
  0x65   :  { %1411 = vmatprep.mubr.bf16.mxu1 %v1873_v8  ;;  %v53_v8 = vld [vmem:[%s3081_s0 + $0x130] sm:$0xff]  ;;  %v110_v4 = vld [vmem:[%s3081_s0 + $0x2f8] sm:$0xff] }
  0x66   :  { %v1835_v10 = vcombine.high %v49_v7, %v53_v8  ;;  %v1834_v17 = vcombine.low %v49_v7, %v53_v8  ;;  %v113_v7 = vld [vmem:[%s3081_s0 + $0x310] sm:$0xff] }
  0x67   :  { %v117_v8 = vld [vmem:[%s3081_s0 + $0x330] sm:$0xff] }
  0x6a   :  { %1268 = vmatmul.mubr.bf16.gmra.mrb[36].mxu0 %v1870_v11  ;;  %v50_v11 = vld [vmem:[%s3081_s0 + $0x118] sm:$0xff] }
  0x6b   :  { %1275 = vmatprep.mubr.bf16.mxu0 %v1879_v12  ;;  %v54_v12 = vld [vmem:[%s3081_s0 + $0x138] sm:$0xff] }
  0x6c   :  { %1412 = vmatmul.mubr.bf16.gmra.mrb[36].mxu1 %v1872_v15  ;;  %v1837_v14 = vcombine.high %v50_v11, %v54_v12  ;;  %v57_v15 = vld [vmem:[%s3081_s0 + $0x150] sm:$0xff]  ;;  %v1836_v21 = vcombine.low %v50_v11, %v54_v12  ;;  %v114_v11 = vld [vmem:[%s3081_s0 + $0x318] sm:$0xff] }
  0x6d   :  { %1419 = vmatprep.mubr.bf16.mxu1 %v1881_v16  ;;  %v61_v16 = vld [vmem:[%s3081_s0 + $0x170] sm:$0xff]  ;;  %v118_v12 = vld [vmem:[%s3081_s0 + $0x338] sm:$0xff] }
  0x6e   :  { %v1843_v18 = vcombine.high %v57_v15, %v61_v16  ;;  %v1842_v25 = vcombine.low %v57_v15, %v61_v16  ;;  %v121_v15 = vld [vmem:[%s3081_s0 + $0x350] sm:$0xff]  ;;  %v1898_v16 = vcombine.low %v113_v7, %v117_v8 }
  0x72   :  { %1276 = vmatmul.mubr.bf16.gmra.mrb[40].mxu0 %v1878_v19  ;;  %v58_v19 = vld [vmem:[%s3081_s0 + $0x158] sm:$0xff] }
  0x73   :  { %1283 = vmatprep.mubr.bf16.mxu0 %v1887_v20  ;;  %v62_v20 = vld [vmem:[%s3081_s0 + $0x178] sm:$0xff] }
  0x74   :  { %1420 = vmatmul.mubr.bf16.gmra.mrb[40].mxu1 %v1880_v23  ;;  %v1845_v22 = vcombine.high %v58_v19, %v62_v20  ;;  %v65_v23 = vld [vmem:[%s3081_s0 + $0x190] sm:$0xff]  ;;  %v1844_v29 = vcombine.low %v58_v19, %v62_v20  ;;  %v1900_v19 = vcombine.low %v114_v11, %v118_v12 }
  0x75   :  { %1427 = vmatprep.mubr.bf16.mxu1 %v1889_v24  ;;  %v69_v24 = vld [vmem:[%s3081_s0 + $0x1b0] sm:$0xff] }
  0x76   :  { %v1851_v26 = vcombine.high %v65_v23, %v69_v24  ;;  %v1850_v33 = vcombine.low %v65_v23, %v69_v24  ;;  %v1906_v24 = vcombine.low %v121_v15, %v121_v15 }
  0x7a   :  { %1284 = vmatmul.mubr.bf16.gmra.mrb[44].mxu0 %v1886_v27  ;;  %v66_v27 = vld [vmem:[%s3081_s0 + $0x198] sm:$0xff] }
  0x7b   :  { %1291 = vmatprep.mubr.bf16.mxu0 %v1895_v28  ;;  %v70_v28 = vld [vmem:[%s3081_s0 + $0x1b8] sm:$0xff] }
  0x7c   :  { %1428 = vmatmul.mubr.bf16.gmra.mrb[44].mxu1 %v1888_v31  ;;  %v1853_v30 = vcombine.high %v66_v27, %v70_v28  ;;  %v73_v31 = vld [vmem:[%s3081_s0 + $0x1d0] sm:$0xff] }
  0x7d   :  { %1435 = vmatprep.mubr.bf16.mxu1 %v1897_v32  ;;  %v77_v32 = vld [vmem:[%s3081_s0 + $0x1f0] sm:$0xff] }
  0x82   :  { %1292 = vmatmul.mubr.bf16.gmra.mrb[48].mxu0 %v1894_v34  ;;  %v1859_v34 = vcombine.high %v73_v31, %v77_v32 }
  0x83   :  { %1299 = vmatprep.mubr.bf16.mxu0 %v1903_v35  ;;  %v74_v35 = vld [vmem:[%s3081_s0 + $0x1d8] sm:$0xff] }
  0x84   :  { %1436 = vmatmul.mubr.bf16.gmra.mrb[48].mxu1 %v1896_v37  ;;  %v1852_v37 = vcombine.low %v66_v27, %v70_v28 }
  0x85   :  { %1443 = vmatprep.mubr.bf16.mxu1 %v1905_v38  ;;  %v1861_v38 = vcombine.high %v74_v35, %v78_v36 }
  0x8a   :  { %1300 = vmatmul.mubr.bf16.gmra.mrb[52].mxu0 %v1902_v41  ;;  %v1858_v41 = vcombine.low %v73_v31, %v77_v32 }
  0x8b   :  { %1483 = vmatprep.mubr.bf16.mxu0 %v1803_v43  ;;  %v1867_v43 = vcombine.high %v81_v39, %v85_v40 }
  0x8c   :  { %1444 = vmatmul.mubr.bf16.gmra.mrb[52].mxu1 %v1904_v46  ;;  %v1860_v46 = vcombine.low %v74_v35, %v78_v36 }
  0x8d   :  { %1967 = vmatprep.mubr.msk.bf16.mxu1 %vm1116_vm1, %v1805_v47  ;;  %v1869_v47 = vcombine.high %v82_v44, %v86_v45 }
  0x92   :  { %1484 = vmatmul.mubr.bf16.vlgmr.msra.gmra.mrb[56].mxu0 %v1802_v42  ;;  %v1866_v42 = vcombine.low %v81_v39, %v85_v40 }
  0x93   :  { %1491 = vmatprep.mubr.bf16.mxu0 %v1811_v50  ;;  %v1875_v50 = vcombine.high %v89_v48, %v93_v49 }
  0x94   :  { %1628 = vmatmul.mubr.bf16.vlgmr.msra.gmra.mrb[56].mxu1 %v1804_v53  ;;  %v1868_v53 = vcombine.low %v82_v44, %v86_v45 }
  0x95   :  { %1968 = vmatprep.mubr.msk.bf16.mxu1 %vm1116_vm1, %v1813_v54  ;;  %v1877_v54 = vcombine.high %v90_v51, %v94_v52 }
  0x9a   :  { %1492 = vmatmul.mubr.bf16.gmra.mrb[60].mxu0 %v1810_v57  ;;  %v1874_v57 = vcombine.low %v89_v48, %v93_v49 }
  0x9b   :  { %1499 = vmatprep.mubr.bf16.mxu0 %v1819_v58  ;;  %v1883_v58 = vcombine.high %v97_v55, %v101_v56 }
  0x9c   :  { %1636 = vmatmul.mubr.bf16.gmra.mrb[60].mxu1 %v1812_v61  ;;  %v1876_v61 = vcombine.low %v90_v51, %v94_v52 }
  0x9d   :  { %1969 = vmatprep.mubr.msk.bf16.mxu1 %vm1116_vm1, %v1821_v62  ;;  %v1885_v62 = vcombine.high %v98_v59, %v102_v60 }
  0xa2   :  { %1500 = vmatmul.mubr.bf16.gmra.mrb[64].mxu0 %v1818_v1  ;;  %v1882_v1 = vcombine.low %v97_v55, %v101_v56 }
  0xa3   :  { %1507 = vmatprep.mubr.bf16.mxu0 %v1827_v2  ;;  %v1891_v2 = vcombine.high %v105_v63, %v109_v0 }
  0xa4   :  { %1644 = vmatmul.mubr.bf16.gmra.mrb[64].mxu1 %v1820_v5  ;;  %v1884_v5 = vcombine.low %v98_v59, %v102_v60 }
  0xa5   :  { %1970 = vmatprep.mubr.msk.bf16.mxu1 %vm1116_vm1, %v1829_v6  ;;  %v1893_v6 = vcombine.high %v106_v3, %v110_v4 }
  0xaa   :  { %1508 = vmatmul.mubr.bf16.gmra.mrb[68].mxu0 %v1826_v9  ;;  %v1890_v9 = vcombine.low %v105_v63, %v109_v0 }
  0xab   :  { %1515 = vmatprep.mubr.bf16.mxu0 %v1835_v10  ;;  %v1899_v10 = vcombine.high %v113_v7, %v117_v8 }
  0xac   :  { %1652 = vmatmul.mubr.bf16.gmra.mrb[68].mxu1 %v1828_v13  ;;  %v1892_v13 = vcombine.low %v106_v3, %v110_v4 }
  0xad   :  { %1971 = vmatprep.mubr.msk.bf16.mxu1 %vm1116_vm1, %v1837_v14  ;;  %v1901_v14 = vcombine.high %v114_v11, %v118_v12 }
  0xb2   :  { %1516 = vmatmul.mubr.bf16.gmra.mrb[72].mxu0 %v1834_v17  ;;  %v1907_v17 = vcombine.high %v121_v15, %v121_v15 }
  0xb3   :  { %1523 = vmatprep.mubr.bf16.mxu0 %v1843_v18  ;;  %v122_v18 = vld [vmem:[%s3081_s0 + $0x358] sm:$0xff] }
  0xb4   :  { %1660 = vmatmul.mubr.bf16.gmra.mrb[72].mxu1 %v1836_v21  ;;  %v1909_v20 = vcombine.high %v122_v18, %v122_v18  ;;  %v1908_v32 = vcombine.low %v122_v18, %v122_v18 }
  0xb5   :  { %1972 = vmatprep.mubr.msk.bf16.mxu1 %vm1116_vm1, %v1845_v22  ;;  %v2888_v22 = vld [vmem:[%s3082_s2] ss:$0 sm:$0xff] }
  0xba   :  { %1524 = vmatmul.mubr.bf16.gmra.mrb[76].mxu0 %v1842_v25 }
  0xbb   :  { %1531 = vmatprep.mubr.bf16.mxu0 %v1851_v26 }
  0xbc   :  { %1668 = vmatmul.mubr.bf16.gmra.mrb[76].mxu1 %v1844_v29 }
  0xbd   :  { %1973 = vmatprep.mubr.msk.bf16.mxu1 %vm1116_vm1, %v1853_v30 }
  0xc2   :  { %1532 = vmatmul.mubr.bf16.gmra.mrb[80].mxu0 %v1850_v33 }
  0xc3   :  { %1539 = vmatprep.mubr.bf16.mxu0 %v1859_v34 }
  0xc4   :  { %1676 = vmatmul.mubr.bf16.gmra.mrb[80].mxu1 %v1852_v37 }
  0xc5   :  { %1974 = vmatprep.mubr.msk.bf16.mxu1 %vm1116_vm1, %v1861_v38 }
  0xca   :  { %1540 = vmatmul.mubr.bf16.gmra.mrb[84].mxu0 %v1858_v41 }
  0xcb   :  { %1547 = vmatprep.mubr.bf16.mxu0 %v1867_v43 }
  0xcc   :  { %1684 = vmatmul.mubr.bf16.gmra.mrb[84].mxu1 %v1860_v46 }
  0xcd   :  { %1975 = vmatprep.mubr.msk.bf16.mxu1 %vm1116_vm1, %v1869_v47 }
  0xd2   :  { %1548 = vmatmul.mubr.bf16.gmra.mrb[88].mxu0 %v1866_v42 }
  0xd3   :  { %1555 = vmatprep.mubr.bf16.mxu0 %v1875_v50 }
  0xd4   :  { %1692 = vmatmul.mubr.bf16.gmra.mrb[88].mxu1 %v1868_v53 }
  0xd5   :  { %1976 = vmatprep.mubr.msk.bf16.mxu1 %vm1116_vm1, %v1877_v54 }
  0xda   :  { %1556 = vmatmul.mubr.bf16.gmra.mrb[92].mxu0 %v1874_v57 }
  0xdb   :  { %1563 = vmatprep.mubr.bf16.mxu0 %v1883_v58 }
  0xdc   :  { %1700 = vmatmul.mubr.bf16.gmra.mrb[92].mxu1 %v1876_v61 }
  0xdd   :  { %1977 = vmatprep.mubr.msk.bf16.mxu1 %vm1116_vm1, %v1885_v62 }
  0xe2   :  { %1564 = vmatmul.mubr.bf16.gmra.mrb[96].mxu0 %v1882_v1 }
  0xe3   :  { %1571 = vmatprep.mubr.bf16.mxu0 %v1891_v2 }
  0xe4   :  { %1708 = vmatmul.mubr.bf16.gmra.mrb[96].mxu1 %v1884_v5 }
  0xe5   :  { %1978 = vmatprep.mubr.msk.bf16.mxu1 %vm1116_vm1, %v1893_v6 }
  0xea   :  { %1572 = vmatmul.mubr.bf16.gmra.mrb[100].mxu0 %v1890_v9 }
  0xeb   :  { %1579 = vmatprep.mubr.bf16.mxu0 %v1899_v10 }
  0xec   :  { %1716 = vmatmul.mubr.bf16.gmra.mrb[100].mxu1 %v1892_v13 }
  0xed   :  { %1979 = vmatprep.mubr.msk.bf16.mxu1 %vm1116_vm1, %v1901_v14 }
  0xf2   :  { %1580 = vmatmul.mubr.bf16.gmra.mrb[104].mxu0 %v1898_v16 }
  0xf3   :  { %1587 = vmatprep.mubr.bf16.mxu0 %v1907_v17 }
  0xf4   :  { %1724 = vmatmul.mubr.bf16.gmra.mrb[104].mxu1 %v1900_v19 }
  0xf5   :  { %v1997_v21 = vpop.f32.mrb[0].mxu0  ;;  %1980 = vmatprep.mubr.msk.bf16.mxu1 %vm1116_vm1, %v1909_v20 }
  0xf6   :  { %v1998_v23 = vpop.f32.mrb[1].mxu0 }
  0xf7   :  { %v1999_v25 = vadd.f32 %v1998_v23, %v1997_v21  ;;  %v2000_v26 = vpop.f32.mrb[2].mxu0  ;;  %v2097_v27 = vpop.f32.mrb[0].mxu1 }
  0xf8   :  { %v2001_v28 = vpop.f32.mrb[3].mxu0  ;;  %v2098_v31 = vpop.f32.mrb[1].mxu1 }
  0xf9   :  { %v1198_v29 = vadd.f32 %v1999_v25, %v2888_v22  ;;  %v2002_v30 = vadd.f32 %v2001_v28, %v2000_v26  ;;  %v2099_v33 = vadd.f32 %v2098_v31, %v2097_v27  ;;  %v2100_v34 = vpop.f32.mrb[2].mxu1 }
  0xfa   :  { %1588 = vmatmul.mubr.bf16.gmra.mrb[108].mxu0 %v1906_v24  ;;  %v2101_v36 = vpop.f32.mrb[3].mxu1 }
  0xfb   :  { %v1201_v35 = vadd.f32 %v2002_v30, %v2888_v22  ;;  %v2893_v37 = vadd.f32 %v2099_v33, %v1198_v29  ;;  %v2102_v38 = vadd.f32 %v2101_v36, %v2100_v34 }
  0xfc   :  { %1732 = vmatmul.mubr.bf16.gmra.mrb[108].mxu1 %v1908_v32 }
  0xfd   :  { %v2003_v39 = vpop.f32.mrb[4].mxu0  ;;  %v2895_v40 = vadd.f32 %v2102_v38, %v1201_v35 }
  0xfe   :  { %v2004_v41 = vpop.f32.mrb[5].mxu0 }
  0xff   :  { %v2005_v43 = vadd.f32 %v2004_v41, %v2003_v39  ;;  %v2006_v44 = vpop.f32.mrb[6].mxu0  ;;  %v2103_v45 = vpop.f32.mrb[4].mxu1 }
 0x100   :  { %v2007_v46 = vpop.f32.mrb[7].mxu0  ;;  %v2104_v49 = vpop.f32.mrb[5].mxu1 }
 0x101   :  { %v1206_v47 = vadd.f32 %v2005_v43, %v2888_v22  ;;  %v2008_v48 = vadd.f32 %v2007_v46, %v2006_v44  ;;  %v2105_v42 = vadd.f32 %v2104_v49, %v2103_v45  ;;  %v2106_v50 = vpop.f32.mrb[6].mxu1 }
 0x102   :  { %v2107_v52 = vpop.f32.mrb[7].mxu1 }
 0x103   :  { %v1209_v51 = vadd.f32 %v2008_v48, %v2888_v22  ;;  %v2899_v53 = vadd.f32 %v2105_v42, %v1206_v47  ;;  %v2108_v54 = vadd.f32 %v2107_v52, %v2106_v50 }
 0x105   :  { %v2009_v55 = vpop.f32.mrb[8].mxu0  ;;  %v2901_v56 = vadd.f32 %v2108_v54, %v1209_v51 }
 0x106   :  { %v2010_v57 = vpop.f32.mrb[9].mxu0 }
 0x107   :  { %v2011_v58 = vadd.f32 %v2010_v57, %v2009_v55  ;;  %v2012_v59 = vpop.f32.mrb[10].mxu0  ;;  %v2109_v60 = vpop.f32.mrb[8].mxu1 }
 0x108   :  { %v2013_v61 = vpop.f32.mrb[11].mxu0  ;;  %v2110_v0 = vpop.f32.mrb[9].mxu1 }
 0x109   :  { %v1214_v62 = vadd.f32 %v2011_v58, %v2888_v22  ;;  %v2014_v63 = vadd.f32 %v2013_v61, %v2012_v59  ;;  %v2111_v1 = vadd.f32 %v2110_v0, %v2109_v60  ;;  %v2112_v2 = vpop.f32.mrb[10].mxu1 }
 0x10a   :  { %v2113_v4 = vpop.f32.mrb[11].mxu1 }
 0x10b   :  { %v1217_v3 = vadd.f32 %v2014_v63, %v2888_v22  ;;  %v2905_v5 = vadd.f32 %v2111_v1, %v1214_v62  ;;  %v2114_v6 = vadd.f32 %v2113_v4, %v2112_v2 }
 0x10d   :  { %v2015_v7 = vpop.f32.mrb[12].mxu0  ;;  %v2907_v8 = vadd.f32 %v2114_v6, %v1217_v3 }
 0x10e   :  { %v2016_v9 = vpop.f32.mrb[13].mxu0 }
 0x10f   :  { %v2017_v10 = vadd.f32 %v2016_v9, %v2015_v7  ;;  %v2018_v11 = vpop.f32.mrb[14].mxu0  ;;  %v2115_v12 = vpop.f32.mrb[12].mxu1 }
 0x110   :  { %v2019_v13 = vpop.f32.mrb[15].mxu0  ;;  %v2116_v16 = vpop.f32.mrb[13].mxu1 }
 0x111   :  { %v1222_v14 = vadd.f32 %v2017_v10, %v2888_v22  ;;  %v2020_v15 = vadd.f32 %v2019_v13, %v2018_v11  ;;  %v2117_v17 = vadd.f32 %v2116_v16, %v2115_v12  ;;  %v2118_v18 = vpop.f32.mrb[14].mxu1 }
 0x112   :  { %v2119_v20 = vpop.f32.mrb[15].mxu1 }
 0x113   :  { %v1225_v19 = vadd.f32 %v2020_v15, %v2888_v22  ;;  %v2911_v21 = vadd.f32 %v2117_v17, %v1222_v14  ;;  %v2120_v23 = vadd.f32 %v2119_v20, %v2118_v18 }
 0x115   :  { %v2021_v24 = vpop.f32.mrb[16].mxu0  ;;  %v2913_v25 = vadd.f32 %v2120_v23, %v1225_v19 }
 0x116   :  { %v2022_v26 = vpop.f32.mrb[17].mxu0 }
 0x117   :  { %v2023_v27 = vadd.f32 %v2022_v26, %v2021_v24  ;;  %v2024_v28 = vpop.f32.mrb[18].mxu0  ;;  %v2121_v29 = vpop.f32.mrb[16].mxu1 }
 0x118   :  { %v2025_v30 = vpop.f32.mrb[19].mxu0  ;;  %v2122_v33 = vpop.f32.mrb[17].mxu1 }
 0x119   :  { %v1230_v31 = vadd.f32 %v2023_v27, %v2888_v22  ;;  %v2026_v32 = vadd.f32 %v2025_v30, %v2024_v28  ;;  %v2123_v34 = vadd.f32 %v2122_v33, %v2121_v29  ;;  %v2124_v35 = vpop.f32.mrb[18].mxu1 }
 0x11a   :  { %v2125_v38 = vpop.f32.mrb[19].mxu1 }
 0x11b   :  { %v1233_v36 = vadd.f32 %v2026_v32, %v2888_v22  ;;  %v2917_v39 = vadd.f32 %v2123_v34, %v1230_v31  ;;  %v2126_v41 = vadd.f32 %v2125_v38, %v2124_v35 }
 0x11d   :  { %v2027_v43 = vpop.f32.mrb[20].mxu0  ;;  %v2919_v44 = vadd.f32 %v2126_v41, %v1233_v36 }
 0x11e   :  { %v2028_v45 = vpop.f32.mrb[21].mxu0 }
 0x11f   :  { %v2029_v46 = vadd.f32 %v2028_v45, %v2027_v43  ;;  %v2030_v47 = vpop.f32.mrb[22].mxu0  ;;  %v2127_v48 = vpop.f32.mrb[20].mxu1 }
 0x120   :  { %v2031_v49 = vpop.f32.mrb[23].mxu0  ;;  %v2128_v51 = vpop.f32.mrb[21].mxu1 }
 0x121   :  { %v1238_v42 = vadd.f32 %v2029_v46, %v2888_v22  ;;  %v2032_v50 = vadd.f32 %v2031_v49, %v2030_v47  ;;  %v2129_v52 = vadd.f32 %v2128_v51, %v2127_v48  ;;  %v2130_v54 = vpop.f32.mrb[22].mxu1 }
 0x122   :  { %v2131_v57 = vpop.f32.mrb[23].mxu1 }
 0x123   :  { %v1241_v55 = vadd.f32 %v2032_v50, %v2888_v22  ;;  %v2923_v58 = vadd.f32 %v2129_v52, %v1238_v42  ;;  %v2132_v59 = vadd.f32 %v2131_v57, %v2130_v54 }
 0x125   :  { %v2033_v60 = vpop.f32.mrb[24].mxu0  ;;  %v2925_v61 = vadd.f32 %v2132_v59, %v1241_v55 }
 0x126   :  { %v2034_v62 = vpop.f32.mrb[25].mxu0 }
 0x127   :  { %v2035_v63 = vadd.f32 %v2034_v62, %v2033_v60  ;;  %v2036_v0 = vpop.f32.mrb[26].mxu0  ;;  %v2133_v1 = vpop.f32.mrb[24].mxu1 }
 0x128   :  { %v2037_v2 = vpop.f32.mrb[27].mxu0  ;;  %v2134_v6 = vpop.f32.mrb[25].mxu1 }
 0x129   :  { %v1246_v3 = vadd.f32 %v2035_v63, %v2888_v22  ;;  %v2038_v4 = vadd.f32 %v2037_v2, %v2036_v0  ;;  %v2135_v7 = vadd.f32 %v2134_v6, %v2133_v1  ;;  %v2136_v9 = vpop.f32.mrb[26].mxu1 }
 0x12a   :  { %v2137_v11 = vpop.f32.mrb[27].mxu1 }
 0x12b   :  { %v1249_v10 = vadd.f32 %v2038_v4, %v2888_v22  ;;  %v2929_v12 = vadd.f32 %v2135_v7, %v1246_v3  ;;  %v2138_v13 = vadd.f32 %v2137_v11, %v2136_v9 }
 0x12d   :  { %v2039_v14 = vpop.f32.mrb[28].mxu0  ;;  %v2931_v15 = vadd.f32 %v2138_v13, %v1249_v10 }
 0x12e   :  { %v2040_v16 = vpop.f32.mrb[29].mxu0 }
 0x12f   :  { %v2041_v17 = vadd.f32 %v2040_v16, %v2039_v14  ;;  %v2042_v18 = vpop.f32.mrb[30].mxu0  ;;  %v2139_v19 = vpop.f32.mrb[28].mxu1 }
 0x130   :  { %v2043_v20 = vpop.f32.mrb[31].mxu0  ;;  %v2140_v26 = vpop.f32.mrb[29].mxu1 }
 0x131   :  { %v1254_v23 = vadd.f32 %v2041_v17, %v2888_v22  ;;  %v2044_v24 = vadd.f32 %v2043_v20, %v2042_v18  ;;  %v2141_v27 = vadd.f32 %v2140_v26, %v2139_v19  ;;  %v2142_v28 = vpop.f32.mrb[30].mxu1 }
 0x132   :  { %v2143_v30 = vpop.f32.mrb[31].mxu1 }
 0x133   :  { %v1257_v29 = vadd.f32 %v2044_v24, %v2888_v22  ;;  %v2935_v31 = vadd.f32 %v2141_v27, %v1254_v23  ;;  %v2144_v32 = vadd.f32 %v2143_v30, %v2142_v28 }
 0x135   :  { %v2045_v33 = vpop.f32.mrb[32].mxu0  ;;  %v2937_v34 = vadd.f32 %v2144_v32, %v1257_v29 }
 0x136   :  { %v2046_v35 = vpop.f32.mrb[33].mxu0 }
 0x137   :  { %v2047_v36 = vadd.f32 %v2046_v35, %v2045_v33  ;;  %v2048_v38 = vpop.f32.mrb[34].mxu0  ;;  %v2145_v41 = vpop.f32.mrb[32].mxu1 }
 0x138   :  { %v2049_v43 = vpop.f32.mrb[35].mxu0  ;;  %v2146_v47 = vpop.f32.mrb[33].mxu1 }
 0x139   :  { %v1262_v45 = vadd.f32 %v2047_v36, %v2888_v22  ;;  %v2050_v46 = vadd.f32 %v2049_v43, %v2048_v38  ;;  %v2147_v48 = vadd.f32 %v2146_v47, %v2145_v41  ;;  %v2148_v49 = vpop.f32.mrb[34].mxu1 }
 0x13a   :  { %v2149_v50 = vpop.f32.mrb[35].mxu1 }
 0x13b   :  { %v1265_v42 = vadd.f32 %v2050_v46, %v2888_v22  ;;  %v2941_v51 = vadd.f32 %v2147_v48, %v1262_v45  ;;  %v2150_v52 = vadd.f32 %v2149_v50, %v2148_v49 }
 0x13d   :  { %v2051_v54 = vpop.f32.mrb[36].mxu0  ;;  %v2943_v55 = vadd.f32 %v2150_v52, %v1265_v42 }
 0x13e   :  { %v2052_v57 = vpop.f32.mrb[37].mxu0 }
 0x13f   :  { %v2053_v59 = vadd.f32 %v2052_v57, %v2051_v54  ;;  %v2054_v60 = vpop.f32.mrb[38].mxu0  ;;  %v2151_v62 = vpop.f32.mrb[36].mxu1 }
 0x140   :  { %v2055_v63 = vpop.f32.mrb[39].mxu0  ;;  %v2152_v2 = vpop.f32.mrb[37].mxu1 }
 0x141   :  { %v1270_v0 = vadd.f32 %v2053_v59, %v2888_v22  ;;  %v2056_v1 = vadd.f32 %v2055_v63, %v2054_v60  ;;  %v2153_v3 = vadd.f32 %v2152_v2, %v2151_v62  ;;  %v2154_v4 = vpop.f32.mrb[38].mxu1 }
 0x142   :  { %v2155_v7 = vpop.f32.mrb[39].mxu1 }
 0x143   :  { %v1273_v6 = vadd.f32 %v2056_v1, %v2888_v22  ;;  %v2947_v9 = vadd.f32 %v2153_v3, %v1270_v0  ;;  %v2156_v10 = vadd.f32 %v2155_v7, %v2154_v4 }
 0x145   :  { %v2057_v11 = vpop.f32.mrb[40].mxu0  ;;  %v2949_v13 = vadd.f32 %v2156_v10, %v1273_v6 }
 0x146   :  { %v2058_v14 = vpop.f32.mrb[41].mxu0 }
 0x147   :  { %v2059_v16 = vadd.f32 %v2058_v14, %v2057_v11  ;;  %v2060_v17 = vpop.f32.mrb[42].mxu0  ;;  %v2157_v18 = vpop.f32.mrb[40].mxu1 }
 0x148   :  { %v2061_v19 = vpop.f32.mrb[43].mxu0  ;;  %v2158_v24 = vpop.f32.mrb[41].mxu1 }
 0x149   :  { %v1278_v20 = vadd.f32 %v2059_v16, %v2888_v22  ;;  %v2062_v23 = vadd.f32 %v2061_v19, %v2060_v17  ;;  %v2159_v26 = vadd.f32 %v2158_v24, %v2157_v18  ;;  %v2160_v27 = vpop.f32.mrb[42].mxu1 }
 0x14a   :  { %v2161_v29 = vpop.f32.mrb[43].mxu1 }
 0x14b   :  { %v1281_v28 = vadd.f32 %v2062_v23, %v2888_v22  ;;  %v2953_v30 = vadd.f32 %v2159_v26, %v1278_v20  ;;  %v2162_v32 = vadd.f32 %v2161_v29, %v2160_v27 }
 0x14d   :  { %v2063_v33 = vpop.f32.mrb[44].mxu0  ;;  %v2955_v35 = vadd.f32 %v2162_v32, %v1281_v28 }
 0x14e   :  { %v2064_v36 = vpop.f32.mrb[45].mxu0 }
 0x14f   :  { %v2065_v38 = vadd.f32 %v2064_v36, %v2063_v33  ;;  %v2066_v41 = vpop.f32.mrb[46].mxu0  ;;  %v2163_v43 = vpop.f32.mrb[44].mxu1 }
 0x150   :  { %v2067_v45 = vpop.f32.mrb[47].mxu0  ;;  %v2164_v48 = vpop.f32.mrb[45].mxu1 }
 0x151   :  { %v1286_v46 = vadd.f32 %v2065_v38, %v2888_v22  ;;  %v2068_v47 = vadd.f32 %v2067_v45, %v2066_v41  ;;  %v2165_v49 = vadd.f32 %v2164_v48, %v2163_v43  ;;  %v2166_v42 = vpop.f32.mrb[46].mxu1 }
 0x152   :  { %v2167_v52 = vpop.f32.mrb[47].mxu1 }
 0x153   :  { %v1289_v50 = vadd.f32 %v2068_v47, %v2888_v22  ;;  %v2959_v54 = vadd.f32 %v2165_v49, %v1286_v46  ;;  %v2168_v57 = vadd.f32 %v2167_v52, %v2166_v42 }
 0x155   :  { %v2069_v59 = vpop.f32.mrb[48].mxu0  ;;  %v2961_v60 = vadd.f32 %v2168_v57, %v1289_v50 }
 0x156   :  { %v2070_v62 = vpop.f32.mrb[49].mxu0 }
 0x157   :  { %v2071_v63 = vadd.f32 %v2070_v62, %v2069_v59  ;;  %v2072_v0 = vpop.f32.mrb[50].mxu0  ;;  %v2169_v1 = vpop.f32.mrb[48].mxu1 }
 0x158   :  { %v2073_v2 = vpop.f32.mrb[51].mxu0  ;;  %v2170_v6 = vpop.f32.mrb[49].mxu1 }
 0x159   :  { %v1294_v3 = vadd.f32 %v2071_v63, %v2888_v22  ;;  %v2074_v4 = vadd.f32 %v2073_v2, %v2072_v0  ;;  %v2171_v7 = vadd.f32 %v2170_v6, %v2169_v1  ;;  %v2172_v10 = vpop.f32.mrb[50].mxu1 }
 0x15a   :  { %v2173_v14 = vpop.f32.mrb[51].mxu1 }
 0x15b   :  { %v1297_v11 = vadd.f32 %v2074_v4, %v2888_v22  ;;  %v2965_v16 = vadd.f32 %v2171_v7, %v1294_v3  ;;  %v2174_v17 = vadd.f32 %v2173_v14, %v2172_v10 }
 0x15d   :  { %v2075_v18 = vpop.f32.mrb[52].mxu0  ;;  %v2967_v19 = vadd.f32 %v2174_v17, %v1297_v11 }
 0x15e   :  { %v2076_v20 = vpop.f32.mrb[53].mxu0 }
 0x15f   :  { %v2077_v23 = vadd.f32 %v2076_v20, %v2075_v18  ;;  %v2078_v24 = vpop.f32.mrb[54].mxu0  ;;  %v2175_v26 = vpop.f32.mrb[52].mxu1 }
 0x160   :  { %v2079_v27 = vpop.f32.mrb[55].mxu0  ;;  %v2176_v29 = vpop.f32.mrb[53].mxu1 }
 0x161   :  { %v1302_v28 = vadd.f32 %v2077_v23, %v2888_v22  ;;  %v2177_v32 = vadd.f32 %v2176_v29, %v2175_v26  ;;  %v2178_v33 = vpop.f32.mrb[54].mxu1 }
 0x162   :  { %v2179_v36 = vpop.f32.mrb[55].mxu1 }
 0x163   :  { %v2970_v38 = vadd.f32 %v2177_v32, %v1302_v28 }
 0x165   :  { %v2197_v41 = vpop.f32.mrb[56].mxu0 }
 0x166   :  { %v2198_v43 = vpop.f32.mrb[57].mxu0 }
 0x167   :  { %v2199_v45 = vadd.f32 %v2198_v43, %v2197_v41  ;;  %v2200_v46 = vpop.f32.mrb[58].mxu0  ;;  %v1629_v48 = vpop.f32.mrb[56].mxu1 }
 0x168   :  { %v2201_v47 = vpop.f32.mrb[59].mxu0  ;;  %v1631_v50 = vpop.f32.mrb[57].mxu1 }
 0x169   :  { %v2202_v49 = vadd.f32 %v2201_v47, %v2200_v46  ;;  %v1486_v42 = vadd.f32 %v2199_v45, %v2893_v37  ;;  %v1632_v52 = vpop.f32.mrb[58].mxu1 }
 0x16a   :  { %v1634_v59 = vpop.f32.mrb[59].mxu1 }
 0x16b   :  { %v1630_v57 = vadd.f32 %v1629_v48, %v1486_v42  ;;  %v1489_v22 = vadd.f32 %v2202_v49, %v2895_v40 }
 0x16d   :  { %v1739_v62 = vmax.f32 %v1630_v57, 0.0  ;;  %v1633_v63 = vadd.f32 %v1632_v52, %v1489_v22  ;;  %v2203_v0 = vpop.f32.mrb[60].mxu0 }
 0x16e   :  { %v2204_v1 = vpop.f32.mrb[61].mxu0 }
 0x16f   :  { %1766 = vst [vmem:[%s3083_s3] sm:$0xff] %v1739_v62  ;;  %v1740_v2 = vmax.f32 %v1633_v63, 0.0  ;;  %v2205_v3 = vadd.f32 %v2204_v1, %v2203_v0  ;;  %v2206_v4 = vpop.f32.mrb[62].mxu0  ;;  %v1637_v7 = vpop.f32.mrb[60].mxu1 }
 0x170   :  { %v2207_v6 = vpop.f32.mrb[63].mxu0  ;;  %v1639_v10 = vpop.f32.mrb[61].mxu1 }
 0x171   :  { %1767 = vst [vmem:[%s3083_s3 + $0x8] sm:$0xff] %v1740_v2  ;;  %v2208_v37 = vadd.f32 %v2207_v6, %v2206_v4  ;;  %v1494_v40 = vadd.f32 %v2205_v3, %v2899_v53  ;;  %v1640_v11 = vpop.f32.mrb[62].mxu1 }
 0x172   :  { %v1642_v18 = vpop.f32.mrb[63].mxu1 }
 0x173   :  { %v1638_v14 = vadd.f32 %v1637_v7, %v1494_v40  ;;  %v1497_v17 = vadd.f32 %v2208_v37, %v2901_v56 }
 0x175   :  { %v1741_v20 = vmax.f32 %v1638_v14, 0.0  ;;  %v1641_v23 = vadd.f32 %v1640_v11, %v1497_v17  ;;  %v2209_v24 = vpop.f32.mrb[64].mxu0 }
 0x176   :  { %v2210_v26 = vpop.f32.mrb[65].mxu0 }
 0x177   :  { %1768 = vst [vmem:[%s3083_s3 + $0x10] sm:$0xff] %v1741_v20  ;;  %v1742_v27 = vmax.f32 %v1641_v23, 0.0  ;;  %v2211_v28 = vadd.f32 %v2210_v26, %v2209_v24  ;;  %v2212_v29 = vpop.f32.mrb[66].mxu0  ;;  %v1645_v33 = vpop.f32.mrb[64].mxu1 }
 0x178   :  { %v2213_v32 = vpop.f32.mrb[67].mxu0  ;;  %v1647_v36 = vpop.f32.mrb[65].mxu1 }
 0x179   :  { %1769 = vst [vmem:[%s3083_s3 + $0x18] sm:$0xff] %v1742_v27  ;;  %v2214_v53 = vadd.f32 %v2213_v32, %v2212_v29  ;;  %v1502_v56 = vadd.f32 %v2211_v28, %v2905_v5  ;;  %v1648_v41 = vpop.f32.mrb[66].mxu1 }
 0x17a   :  { %v1650_v46 = vpop.f32.mrb[67].mxu1 }
 0x17b   :  { %v1646_v43 = vadd.f32 %v1645_v33, %v1502_v56  ;;  %v1505_v45 = vadd.f32 %v2214_v53, %v2907_v8 }
 0x17d   :  { %v1743_v47 = vmax.f32 %v1646_v43, 0.0  ;;  %v1649_v48 = vadd.f32 %v1648_v41, %v1505_v45  ;;  %v2215_v49 = vpop.f32.mrb[68].mxu0 }
 0x17e   :  { %v2216_v42 = vpop.f32.mrb[69].mxu0 }
 0x17f   :  { %1770 = vst [vmem:[%s3083_s3 + $0x20] sm:$0xff] %v1743_v47  ;;  %v1744_v50 = vmax.f32 %v1649_v48, 0.0  ;;  %v2217_v52 = vadd.f32 %v2216_v42, %v2215_v49  ;;  %v2218_v57 = vpop.f32.mrb[70].mxu0  ;;  %v1653_v59 = vpop.f32.mrb[68].mxu1 }
 0x180   :  { %v2219_v22 = vpop.f32.mrb[71].mxu0  ;;  %v1655_v62 = vpop.f32.mrb[69].mxu1 }
 0x181   :  { %1771 = vst [vmem:[%s3083_s3 + $0x28] sm:$0xff] %v1744_v50  ;;  %v2220_v5 = vadd.f32 %v2219_v22, %v2218_v57  ;;  %v1510_v8 = vadd.f32 %v2217_v52, %v2911_v21  ;;  %v1656_v63 = vpop.f32.mrb[70].mxu1 }
 0x182   :  { %v1658_v2 = vpop.f32.mrb[71].mxu1 }
 0x183   :  { %v1654_v0 = vadd.f32 %v1653_v59, %v1510_v8  ;;  %v1513_v1 = vadd.f32 %v2220_v5, %v2913_v25 }
 0x185   :  { %v1745_v3 = vmax.f32 %v1654_v0, 0.0  ;;  %v1657_v4 = vadd.f32 %v1656_v63, %v1513_v1  ;;  %v2221_v6 = vpop.f32.mrb[72].mxu0 }
 0x186   :  { %v2222_v7 = vpop.f32.mrb[73].mxu0 }
 0x187   :  { %1772 = vst [vmem:[%s3083_s3 + $0x30] sm:$0xff] %v1745_v3  ;;  %v1746_v37 = vmax.f32 %v1657_v4, 0.0  ;;  %v2223_v40 = vadd.f32 %v2222_v7, %v2221_v6  ;;  %v2224_v10 = vpop.f32.mrb[74].mxu0  ;;  %v1661_v14 = vpop.f32.mrb[72].mxu1 }
 0x188   :  { %v2225_v11 = vpop.f32.mrb[75].mxu0  ;;  %v1663_v17 = vpop.f32.mrb[73].mxu1 }
 0x189   :  { %1773 = vst [vmem:[%s3083_s3 + $0x38] sm:$0xff] %v1746_v37  ;;  %v2226_v21 = vadd.f32 %v2225_v11, %v2224_v10  ;;  %v1518_v25 = vadd.f32 %v2223_v40, %v2917_v39  ;;  %v1664_v18 = vpop.f32.mrb[74].mxu1 }
 0x18a   :  { %v1666_v24 = vpop.f32.mrb[75].mxu1 }
 0x18b   :  { %v1662_v20 = vadd.f32 %v1661_v14, %v1518_v25  ;;  %v1521_v23 = vadd.f32 %v2226_v21, %v2919_v44 }
 0x18d   :  { %v1747_v26 = vmax.f32 %v1662_v20, 0.0  ;;  %v1665_v27 = vadd.f32 %v1664_v18, %v1521_v23  ;;  %v2227_v28 = vpop.f32.mrb[76].mxu0 }
 0x18e   :  { %v2228_v29 = vpop.f32.mrb[77].mxu0 }
 0x18f   :  { %1774 = vst [vmem:[%s3083_s3 + $0x40] sm:$0xff] %v1747_v26  ;;  %v1748_v32 = vmax.f32 %v1665_v27, 0.0  ;;  %v2229_v33 = vadd.f32 %v2228_v29, %v2227_v28  ;;  %v2230_v53 = vpop.f32.mrb[78].mxu0  ;;  %v1669_v36 = vpop.f32.mrb[76].mxu1 }
 0x190   :  { %v2231_v56 = vpop.f32.mrb[79].mxu0  ;;  %v1671_v41 = vpop.f32.mrb[77].mxu1 }
 0x191   :  { %1775 = vst [vmem:[%s3083_s3 + $0x48] sm:$0xff] %v1748_v32  ;;  %v2232_v39 = vadd.f32 %v2231_v56, %v2230_v53  ;;  %v1526_v44 = vadd.f32 %v2229_v33, %v2923_v58  ;;  %v1672_v43 = vpop.f32.mrb[78].mxu1 }
 0x192   :  { %v1674_v47 = vpop.f32.mrb[79].mxu1 }
 0x193   :  { %v1670_v45 = vadd.f32 %v1669_v36, %v1526_v44  ;;  %v1529_v46 = vadd.f32 %v2232_v39, %v2925_v61 }
 0x195   :  { %v1749_v48 = vmax.f32 %v1670_v45, 0.0  ;;  %v1673_v49 = vadd.f32 %v1672_v43, %v1529_v46  ;;  %v2233_v42 = vpop.f32.mrb[80].mxu0 }
 0x196   :  { %v2234_v50 = vpop.f32.mrb[81].mxu0 }
 0x197   :  { %1776 = vst [vmem:[%s3083_s3 + $0x50] sm:$0xff] %v1749_v48  ;;  %v1750_v52 = vmax.f32 %v1673_v49, 0.0  ;;  %v2235_v57 = vadd.f32 %v2234_v50, %v2233_v42  ;;  %v2236_v22 = vpop.f32.mrb[82].mxu0  ;;  %v1677_v5 = vpop.f32.mrb[80].mxu1 }
 0x198   :  { %v2237_v59 = vpop.f32.mrb[83].mxu0  ;;  %v1679_v8 = vpop.f32.mrb[81].mxu1 }
 0x199   :  { %1777 = vst [vmem:[%s3083_s3 + $0x58] sm:$0xff] %v1750_v52  ;;  %v2238_v58 = vadd.f32 %v2237_v59, %v2236_v22  ;;  %v1534_v61 = vadd.f32 %v2235_v57, %v2929_v12  ;;  %v1680_v62 = vpop.f32.mrb[82].mxu1 }
 0x19a   :  { %v1682_v1 = vpop.f32.mrb[83].mxu1 }
 0x19b   :  { %v1678_v63 = vadd.f32 %v1677_v5, %v1534_v61  ;;  %v1537_v0 = vadd.f32 %v2238_v58, %v2931_v15 }
 0x19d   :  { %v1751_v2 = vmax.f32 %v1678_v63, 0.0  ;;  %v1681_v3 = vadd.f32 %v1680_v62, %v1537_v0  ;;  %v2239_v4 = vpop.f32.mrb[84].mxu0 }
 0x19e   :  { %v2240_v6 = vpop.f32.mrb[85].mxu0 }
 0x19f   :  { %1778 = vst [vmem:[%s3083_s3 + $0x60] sm:$0xff] %v1751_v2  ;;  %v1752_v7 = vmax.f32 %v1681_v3, 0.0  ;;  %v2241_v37 = vadd.f32 %v2240_v6, %v2239_v4  ;;  %v2242_v40 = vpop.f32.mrb[86].mxu0  ;;  %v1685_v11 = vpop.f32.mrb[84].mxu1 }
 0x1a0   :  { %v2243_v10 = vpop.f32.mrb[87].mxu0  ;;  %v1687_v14 = vpop.f32.mrb[85].mxu1 }
 0x1a1   :  { %1779 = vst [vmem:[%s3083_s3 + $0x68] sm:$0xff] %v1752_v7  ;;  %v2244_v12 = vadd.f32 %v2243_v10, %v2242_v40  ;;  %v1542_v15 = vadd.f32 %v2241_v37, %v2935_v31  ;;  %v1688_v21 = vpop.f32.mrb[86].mxu1 }
 0x1a2   :  { %v1690_v18 = vpop.f32.mrb[87].mxu1 }
 0x1a3   :  { %v1686_v25 = vadd.f32 %v1685_v11, %v1542_v15  ;;  %v1545_v17 = vadd.f32 %v2244_v12, %v2937_v34 }
 0x1a5   :  { %v1753_v20 = vmax.f32 %v1686_v25, 0.0  ;;  %v1689_v23 = vadd.f32 %v1688_v21, %v1545_v17  ;;  %v2245_v24 = vpop.f32.mrb[88].mxu0 }
 0x1a6   :  { %v2246_v26 = vpop.f32.mrb[89].mxu0 }
 0x1a7   :  { %1780 = vst [vmem:[%s3083_s3 + $0x70] sm:$0xff] %v1753_v20  ;;  %v1754_v27 = vmax.f32 %v1689_v23, 0.0  ;;  %v2247_v28 = vadd.f32 %v2246_v26, %v2245_v24  ;;  %v2248_v29 = vpop.f32.mrb[90].mxu0  ;;  %v1693_v33 = vpop.f32.mrb[88].mxu1 }
 0x1a8   :  { %v2249_v32 = vpop.f32.mrb[91].mxu0  ;;  %v1695_v53 = vpop.f32.mrb[89].mxu1 }
 0x1a9   :  { %1781 = vst [vmem:[%s3083_s3 + $0x78] sm:$0xff] %v1754_v27  ;;  %v2250_v31 = vadd.f32 %v2249_v32, %v2248_v29  ;;  %v1550_v34 = vadd.f32 %v2247_v28, %v2941_v51  ;;  %v1696_v56 = vpop.f32.mrb[90].mxu1 }
 0x1aa   :  { %v1698_v44 = vpop.f32.mrb[91].mxu1 }
 0x1ab   :  { %v1694_v36 = vadd.f32 %v1693_v33, %v1550_v34  ;;  %v1553_v39 = vadd.f32 %v2250_v31, %v2943_v55 }
 0x1ad   :  { %v1755_v41 = vmax.f32 %v1694_v36, 0.0  ;;  %v1697_v43 = vadd.f32 %v1696_v56, %v1553_v39  ;;  %v2251_v45 = vpop.f32.mrb[92].mxu0 }
 0x1ae   :  { %v2252_v46 = vpop.f32.mrb[93].mxu0 }
 0x1af   :  { %1782 = vst [vmem:[%s3083_s3 + $0x80] sm:$0xff] %v1755_v41  ;;  %v1756_v47 = vmax.f32 %v1697_v43, 0.0  ;;  %v2253_v48 = vadd.f32 %v2252_v46, %v2251_v45  ;;  %v2254_v49 = vpop.f32.mrb[94].mxu0  ;;  %v1701_v50 = vpop.f32.mrb[92].mxu1 }
 0x1b0   :  { %v2255_v42 = vpop.f32.mrb[95].mxu0  ;;  %v1703_v52 = vpop.f32.mrb[93].mxu1 }
 0x1b1   :  { %1783 = vst [vmem:[%s3083_s3 + $0x88] sm:$0xff] %v1756_v47  ;;  %v2256_v51 = vadd.f32 %v2255_v42, %v2254_v49  ;;  %v1558_v55 = vadd.f32 %v2253_v48, %v2947_v9  ;;  %v1704_v57 = vpop.f32.mrb[94].mxu1 }
 0x1b2   :  { %v1706_v5 = vpop.f32.mrb[95].mxu1 }
 0x1b3   :  { %v1702_v22 = vadd.f32 %v1701_v50, %v1558_v55  ;;  %v1561_v59 = vadd.f32 %v2256_v51, %v2949_v13 }
 0x1b5   :  { %v1757_v58 = vmax.f32 %v1702_v22, 0.0  ;;  %v1705_v61 = vadd.f32 %v1704_v57, %v1561_v59  ;;  %v2257_v8 = vpop.f32.mrb[96].mxu0 }
 0x1b6   :  { %v2258_v62 = vpop.f32.mrb[97].mxu0 }
 0x1b7   :  { %1784 = vst [vmem:[%s3083_s3 + $0x90] sm:$0xff] %v1757_v58  ;;  %v1758_v63 = vmax.f32 %v1705_v61, 0.0  ;;  %v2259_v0 = vadd.f32 %v2258_v62, %v2257_v8  ;;  %v2260_v1 = vpop.f32.mrb[98].mxu0  ;;  %v1709_v3 = vpop.f32.mrb[96].mxu1 }
 0x1b8   :  { %v2261_v2 = vpop.f32.mrb[99].mxu0  ;;  %v1711_v4 = vpop.f32.mrb[97].mxu1 }
 0x1b9   :  { %1785 = vst [vmem:[%s3083_s3 + $0x98] sm:$0xff] %v1758_v63  ;;  %v2262_v9 = vadd.f32 %v2261_v2, %v2260_v1  ;;  %v1566_v13 = vadd.f32 %v2259_v0, %v2953_v30  ;;  %v1712_v6 = vpop.f32.mrb[98].mxu1 }
 0x1ba   :  { %v1714_v40 = vpop.f32.mrb[99].mxu1 }
 0x1bb   :  { %v1710_v7 = vadd.f32 %v1709_v3, %v1566_v13  ;;  %v1569_v37 = vadd.f32 %v2262_v9, %v2955_v35 }
 0x1bd   :  { %v1759_v10 = vmax.f32 %v1710_v7, 0.0  ;;  %v1713_v11 = vadd.f32 %v1712_v6, %v1569_v37  ;;  %v2263_v12 = vpop.f32.mrb[100].mxu0 }
 0x1be   :  { %v2264_v15 = vpop.f32.mrb[101].mxu0 }
 0x1bf   :  { %1786 = vst [vmem:[%s3083_s3 + $0xa0] sm:$0xff] %v1759_v10  ;;  %v1760_v14 = vmax.f32 %v1713_v11, 0.0  ;;  %v2265_v21 = vadd.f32 %v2264_v15, %v2263_v12  ;;  %v2266_v25 = vpop.f32.mrb[102].mxu0  ;;  %v1717_v18 = vpop.f32.mrb[100].mxu1 }
 0x1c0   :  { %v2267_v17 = vpop.f32.mrb[103].mxu0  ;;  %v1719_v20 = vpop.f32.mrb[101].mxu1 }
 0x1c1   :  { %1787 = vst [vmem:[%s3083_s3 + $0xa8] sm:$0xff] %v1760_v14  ;;  %v2268_v30 = vadd.f32 %v2267_v17, %v2266_v25  ;;  %v1574_v35 = vadd.f32 %v2265_v21, %v2959_v54  ;;  %v1720_v23 = vpop.f32.mrb[102].mxu1 }
 0x1c2   :  { %v1722_v27 = vpop.f32.mrb[103].mxu1 }
 0x1c3   :  { %v1718_v24 = vadd.f32 %v1717_v18, %v1574_v35  ;;  %v1577_v26 = vadd.f32 %v2268_v30, %v2961_v60 }
 0x1c5   :  { %v1761_v28 = vmax.f32 %v1718_v24, 0.0  ;;  %v1721_v29 = vadd.f32 %v1720_v23, %v1577_v26  ;;  %v2269_v32 = vpop.f32.mrb[104].mxu0 }
 0x1c6   :  { %v2270_v33 = vpop.f32.mrb[105].mxu0 }
 0x1c7   :  { %1788 = vst [vmem:[%s3083_s3 + $0xb0] sm:$0xff] %v1761_v28  ;;  %v1762_v31 = vmax.f32 %v1721_v29, 0.0  ;;  %v2271_v34 = vadd.f32 %v2270_v33, %v2269_v32  ;;  %v2272_v53 = vpop.f32.mrb[106].mxu0  ;;  %v1725_v36 = vpop.f32.mrb[104].mxu1 }
 0x1c8   :  { %v2273_v56 = vpop.f32.mrb[107].mxu0  ;;  %v1727_v39 = vpop.f32.mrb[105].mxu1 }
 0x1c9   :  { %1789 = vst [vmem:[%s3083_s3 + $0xb8] sm:$0xff] %v1762_v31  ;;  %v2274_v54 = vadd.f32 %v2273_v56, %v2272_v53  ;;  %v1582_v60 = vadd.f32 %v2271_v34, %v2965_v16  ;;  %v1728_v44 = vpop.f32.mrb[106].mxu1 }
 0x1ca   :  { %v1730_v45 = vpop.f32.mrb[107].mxu1 }
 0x1cb   :  { %v1726_v41 = vadd.f32 %v1725_v36, %v1582_v60  ;;  %v1585_v43 = vadd.f32 %v2274_v54, %v2967_v19 }
 0x1cd   :  { %v1763_v46 = vmax.f32 %v1726_v41, 0.0  ;;  %v1729_v47 = vadd.f32 %v1728_v44, %v1585_v43  ;;  %v2275_v48 = vpop.f32.mrb[108].mxu0 }
 0x1ce   :  { %v2276_v49 = vpop.f32.mrb[109].mxu0 }
 0x1cf   :  { %1790 = vst [vmem:[%s3083_s3 + $0xc0] sm:$0xff] %v1763_v46  ;;  %v1764_v42 = vmax.f32 %v1729_v47, 0.0  ;;  %v2277_v50 = vadd.f32 %v2276_v49, %v2275_v48  ;;  %v2278_v51 = vpop.f32.mrb[110].mxu0  ;;  %v1733_v52 = vpop.f32.mrb[108].mxu1 }
 0x1d0   :  { %v2279_v55 = vpop.f32.mrb[111].mxu0  ;;  %v1735_v19 = vpop.f32.mrb[109].mxu1 }
 0x1d1   :  { %1791 = vst [vmem:[%s3083_s3 + $0xc8] sm:$0xff] %v1764_v42  ;;  %v1590_v16 = vadd.f32 %v2277_v50, %v2970_v38  ;;  %v1736_v57 = vpop.f32.mrb[110].mxu1 }
 0x1d2   :  { %v1737_v59 = vpop.f32.mrb[111].mxu1 }
 0x1d3   :  { %v1734_v22 = vadd.f32 %v1733_v52, %v1590_v16 }
 0x1d5   :  { %v1765_v5 = vmax.f32 %v1734_v22, 0.0 }
 0x1d7   :  { %1792 = vst [vmem:[%s3083_s3 + $0xd0] sm:$0xff] %v1765_v5 }

// kernel: convnet_forward.11
= control target key start
LH: loop header
LB: loop body
LE: loop exit
PB: predicated region body
PF: predicated region fallthrough
CT: control target
= control target key end

     0   :  { %v934_v0 = vmov 0   ;;  %vm437_vm0 = vcmask 392192   ;;  %s1231_s1 = inlined_call_operand.vmem [shape: bf16[432,128], index: 1, kind: input, shape index: {}]   ;;  %s1232_s0 = inlined_call_operand.vmem [shape: bf16[136,432], index: 0, kind: input, shape index: {}]   ;;  %s1233_s2 = inlined_call_operand.vmem [shape: f32[1,128], index: 2, kind: input, shape index: {}]   ;;  %s1234_s3 = inlined_call_operand.vmem [shape: f32[136,128], index: 3, kind: output, shape index: {}]  }
   0x1   :  { %569 = vmatprep.subr.bf16.mxu1 %v934_v0  ;;  %v855_v1 = vld [vmem:[%s1231_s1 + $0x80] sm:$0xff]   ;;  %v858_v4 = vld [vmem:[%s1231_s1 + $0x88] sm:$0xff]   ;;  %v861_v7 = vld [vmem:[%s1231_s1 + $0x90] sm:$0xff]  }
   0x2   :  { %v856_v2 = vld [vmem:[%s1231_s1 + $0x40] sm:$0xff]   ;;  %570 = vmatpush1.bf16.msra.mxu1 %v855_v1  ;;  %v859_v5 = vld [vmem:[%s1231_s1 + $0x48] sm:$0xff]   ;;  %v862_v8 = vld [vmem:[%s1231_s1 + $0x50] sm:$0xff]  }
   0x3   :  { %v857_v3 = vld [vmem:[%s1231_s1] sm:$0xff]   ;;  %784 = vmatprep.subr.bf16.mxu0 %v856_v2  ;;  %571 = vmatprep.subr.bf16.mxu1 %v934_v0  ;;  %v860_v6 = vld [vmem:[%s1231_s1 + $0x8] sm:$0xff]   ;;  %v863_v9 = vld [vmem:[%s1231_s1 + $0x10] sm:$0xff]  }
   0x4   :  { %785 = vmatpush3.bf16.msra.mxu0 %v857_v3  ;;  %v864_v10 = vld [vmem:[%s1231_s1 + $0x98] sm:$0xff]   ;;  %v868_v13 = vld [vmem:[%s1231_s1 + $0x60] sm:$0xff]   ;;  %v871_v16 = vld [vmem:[%s1231_s1 + $0x68] sm:$0xff]  }
   0x5   :  { %786 = vmatprep.subr.bf16.mxu0 %v859_v5  ;;  %v865_v11 = vld [vmem:[%s1231_s1 + $0x58] sm:$0xff]   ;;  %v867_v14 = vld [vmem:[%s1231_s1 + $0xa0] sm:$0xff]   ;;  %v870_v17 = vld [vmem:[%s1231_s1 + $0xa8] sm:$0xff]  }
   0x6   :  { %572 = vmatpush1.bf16.msra.mxu1 %v858_v4  ;;  %v866_v12 = vld [vmem:[%s1231_s1 + $0x18] sm:$0xff]   ;;  %v869_v15 = vld [vmem:[%s1231_s1 + $0x20] sm:$0xff]   ;;  %v872_v18 = vld [vmem:[%s1231_s1 + $0x28] sm:$0xff]  }
   0x7   :  { %573 = vmatprep.subr.bf16.mxu1 %v934_v0  ;;  %v874_v19 = vld [vmem:[%s1231_s1 + $0x70] sm:$0xff]   ;;  %v876_v22 = vld [vmem:[%s1231_s1 + $0xb8] sm:$0xff]   ;;  %v879_v26 = vld [vmem:[%s1231_s1 + $0xc0] sm:$0xff]  }
   0x8   :  { %787 = vmatpush3.bf16.msra.mxu0 %v860_v6  ;;  %v873_v20 = vld [vmem:[%s1231_s1 + $0xb0] sm:$0xff]   ;;  %v877_v23 = vld [vmem:[%s1231_s1 + $0x78] sm:$0xff]   ;;  %v883_v30 = vld [vmem:[%s1231_s1 + $0xc8] sm:$0xff]  }
   0x9   :  { %788 = vmatprep.subr.bf16.mxu0 %v862_v8  ;;  %v875_v21 = vld [vmem:[%s1231_s1 + $0x30] sm:$0xff]   ;;  %v878_v25 = vld [vmem:[%s1231_s1 + $0x38] sm:$0xff]   ;;  %v47_v56 = vld [vmem:[%s1232_s0 + $0x100] sm:$0xff] }
   0xa   :  { %574 = vmatpush1.bf16.msra.mxu1 %v861_v7  ;;  %v882_v24 = vld [vmem:[%s1232_s0 + $0x4] ss:$16 sps:$4 sm:$0xff]   ;;  %v889_v27 = vld [vmem:[%s1232_s0 + $0xc] ss:$16 sps:$4 sm:$0xff]   ;;  %v880_v28 = vld [vmem:[%s1232_s0] ss:$16 sps:$4 sm:$0xff]   ;;  %v745_v58 = vcombine.high %v47_v56, %v47_v56  ;;  %v744_v61 = vcombine.low %v47_v56, %v47_v56 }
   0xb   :  { %575 = vmatprep.subr.bf16.mxu1 %v934_v0  ;;  %497 = vmatprep.mubr.bf16.mxu0 %v882_v24  ;;  %v885_v29 = vld [vmem:[%s1232_s0 + $0x24] ss:$16 sps:$4 sm:$0xff]   ;;  %v890_v32 = vld [vmem:[%s1232_s0 + $0x20] ss:$16 sps:$4 sm:$0xff]   ;;  %v887_v34 = vld [vmem:[%s1232_s0 + $0x8] ss:$16 sps:$4 sm:$0xff]  }
   0xc   :  { %789 = vmatpush3.bf16.msra.mxu0 %v863_v9  ;;  %775 = vmatprep.mubr.msk.bf16.mxu1 %vm437_vm0, %v889_v27  ;;  %v884_v31 = vld [vmem:[%s1231_s1 + $0xd0] sm:$0xff]   ;;  %v893_v35 = vld [vmem:[%s1232_s0 + $0x2c] ss:$16 sps:$4 sm:$0xff]   ;;  %v896_v38 = vld [vmem:[%s1232_s0 + $0x28] ss:$16 sps:$4 sm:$0xff]  }
   0xd   :  { %790 = vmatprep.subr.bf16.mxu0 %v865_v11  ;;  %v891_v33 = vld [vmem:[%s1232_s0 + $0x44] ss:$16 sps:$4 sm:$0xff]   ;;  %v895_v36 = vld [vmem:[%s1232_s0 + $0x40] ss:$16 sps:$4 sm:$0xff]   ;;  %v899_v39 = vld [vmem:[%s1232_s0 + $0x4c] ss:$16 sps:$4 sm:$0xff]  }
   0xe   :  { %576 = vmatpush1.bf16.msra.mxu1 %v864_v10  ;;  %v897_v37 = vld [vmem:[%s1232_s0 + $0x64] ss:$16 sps:$4 sm:$0xff]   ;;  %v901_v40 = vld [vmem:[%s1232_s0 + $0x60] ss:$16 sps:$4 sm:$0xff]   ;;  %v902_v42 = vld [vmem:[%s1232_s0 + $0x48] ss:$16 sps:$4 sm:$0xff]  }
   0xf   :  { %577 = vmatprep.subr.bf16.mxu1 %v934_v0  ;;  %v903_v41 = vld [vmem:[%s1232_s0 + $0x84] ss:$16 sps:$4 sm:$0xff]   ;;  %v905_v43 = vld [vmem:[%s1232_s0 + $0x6c] ss:$16 sps:$4 sm:$0xff]   ;;  %v907_v44 = vld [vmem:[%s1232_s0 + $0x80] ss:$16 sps:$4 sm:$0xff]  }
  0x10   :  { %791 = vmatpush3.bf16.msra.mxu0 %v866_v12  ;;  %v909_v45 = vld [vmem:[%s1232_s0 + $0xa4] ss:$16 sps:$4 sm:$0xff]   ;;  %v908_v46 = vld [vmem:[%s1232_s0 + $0x68] ss:$16 sps:$4 sm:$0xff]   ;;  %v911_v47 = vld [vmem:[%s1232_s0 + $0x8c] ss:$16 sps:$4 sm:$0xff]  }
  0x11   :  { %792 = vmatprep.subr.bf16.mxu0 %v868_v13  ;;  %v913_v48 = vld [vmem:[%s1232_s0 + $0xa0] ss:$16 sps:$4 sm:$0xff]   ;;  %v915_v49 = vld [vmem:[%s1232_s0 + $0xc4] ss:$16 sps:$4 sm:$0xff]   ;;  %v914_v50 = vld [vmem:[%s1232_s0 + $0x88] ss:$16 sps:$4 sm:$0xff]  }
  0x12   :  { %578 = vmatpush1.bf16.msra.mxu1 %v867_v14  ;;  %v917_v51 = vld [vmem:[%s1232_s0 + $0xac] ss:$16 sps:$4 sm:$0xff]   ;;  %v919_v52 = vld [vmem:[%s1232_s0 + $0xc0] ss:$16 sps:$4 sm:$0xff]   ;;  %v921_v53 = vld [vmem:[%s1232_s0 + $0xe4] ss:$16 sps:$4 sm:$0xff]  }
  0x13   :  { %579 = vmatprep.subr.bf16.mxu1 %v934_v0  ;;  %v920_v54 = vld [vmem:[%s1232_s0 + $0xa8] ss:$16 sps:$4 sm:$0xff]   ;;  %v923_v55 = vld [vmem:[%s1232_s0 + $0xcc] ss:$16 sps:$4 sm:$0xff]   ;;  %v925_v57 = vld [vmem:[%s1232_s0 + $0xe0] ss:$16 sps:$4 sm:$0xff]  }
  0x14   :  { %793 = vmatpush3.bf16.msra.mxu0 %v869_v15  ;;  %v926_v59 = vld [vmem:[%s1232_s0 + $0xc8] ss:$16 sps:$4 sm:$0xff]   ;;  %v928_v60 = vld [vmem:[%s1232_s0 + $0xec] ss:$16 sps:$4 sm:$0xff]   ;;  %v1161_v8 = vld [vmem:[%s1233_s2] ss:$0 sm:$0xff] }
  0x15   :  { %794 = vmatprep.subr.bf16.mxu0 %v871_v16  ;;  %v48_v62 = vld [vmem:[%s1232_s0 + $0x108] sm:$0xff] }
  0x16   :  { %580 = vmatpush1.bf16.msra.mxu1 %v870_v17  ;;  %v931_v63 = vld [vmem:[%s1232_s0 + $0xe8] ss:$16 sps:$4 sm:$0xff]   ;;  %v746_v1 = vcombine.low %v48_v62, %v48_v62 }
  0x17   :  { %581 = vmatprep.subr.bf16.mxu1 %v934_v0 }
  0x18   :  { %795 = vmatpush3.bf16.msra.mxu0 %v872_v18 }
  0x19   :  { %796 = vmatprep.subr.bf16.mxu0 %v874_v19 }
  0x1a   :  { %582 = vmatpush1.bf16.msra.mxu1 %v873_v20 }
  0x1b   :  { %583 = vmatprep.subr.bf16.mxu1 %v934_v0 }
  0x1c   :  { %797 = vmatpush3.bf16.msra.mxu0 %v875_v21 }
  0x1d   :  { %798 = vmatprep.subr.bf16.mxu0 %v877_v23 }
  0x1e   :  { %584 = vmatpush1.bf16.msra.mxu1 %v876_v22 }
  0x1f   :  { %585 = vmatprep.subr.bf16.mxu1 %v934_v0 }
  0x20   :  { %799 = vmatpush3.bf16.msra.mxu0 %v878_v25 }
  0x22   :  { %586 = vmatpush1.bf16.msra.mxu1 %v879_v26 }
  0x23   :  { %498 = vmatmul.mubr.bf16.vlgmr.msra.gmra.mrb[0].mxu0 %v880_v28  ;;  %587 = vmatprep.subr.bf16.mxu1 %v934_v0 }
  0x24   :  { %505 = vmatprep.mubr.bf16.mxu0 %v885_v29 }
  0x26   :  { %588 = vmatpush1.bf16.msra.mxu1 %v883_v30 }
  0x27   :  { %589 = vmatprep.subr.bf16.mxu1 %v934_v0  ;;  %v747_v0 = vcombine.high %v48_v62, %v48_v62 }
  0x2a   :  { %590 = vmatpush1.bf16.msra.mxu1 %v884_v31 }
  0x2b   :  { %506 = vmatmul.mubr.bf16.gmra.mrb[4].mxu0 %v890_v32 }
  0x2c   :  { %513 = vmatprep.mubr.bf16.mxu0 %v891_v33 }
  0x2d   :  { %602 = vmatmul.mubr.bf16.vlgmr.msra.gmra.mrb[0].mxu1 %v887_v34 }
  0x2e   :  { %776 = vmatprep.mubr.msk.bf16.mxu1 %vm437_vm0, %v893_v35 }
  0x33   :  { %514 = vmatmul.mubr.bf16.gmra.mrb[8].mxu0 %v895_v36 }
  0x34   :  { %521 = vmatprep.mubr.bf16.mxu0 %v897_v37 }
  0x35   :  { %610 = vmatmul.mubr.bf16.gmra.mrb[4].mxu1 %v896_v38 }
  0x36   :  { %777 = vmatprep.mubr.msk.bf16.mxu1 %vm437_vm0, %v899_v39 }
  0x3b   :  { %522 = vmatmul.mubr.bf16.gmra.mrb[12].mxu0 %v901_v40 }
  0x3c   :  { %529 = vmatprep.mubr.bf16.mxu0 %v903_v41 }
  0x3d   :  { %618 = vmatmul.mubr.bf16.gmra.mrb[8].mxu1 %v902_v42 }
  0x3e   :  { %778 = vmatprep.mubr.msk.bf16.mxu1 %vm437_vm0, %v905_v43 }
  0x43   :  { %530 = vmatmul.mubr.bf16.gmra.mrb[16].mxu0 %v907_v44 }
  0x44   :  { %537 = vmatprep.mubr.bf16.mxu0 %v909_v45 }
  0x45   :  { %626 = vmatmul.mubr.bf16.gmra.mrb[12].mxu1 %v908_v46 }
  0x46   :  { %779 = vmatprep.mubr.msk.bf16.mxu1 %vm437_vm0, %v911_v47 }
  0x4b   :  { %538 = vmatmul.mubr.bf16.gmra.mrb[20].mxu0 %v913_v48 }
  0x4c   :  { %545 = vmatprep.mubr.bf16.mxu0 %v915_v49 }
  0x4d   :  { %634 = vmatmul.mubr.bf16.gmra.mrb[16].mxu1 %v914_v50 }
  0x4e   :  { %780 = vmatprep.mubr.msk.bf16.mxu1 %vm437_vm0, %v917_v51 }
  0x53   :  { %546 = vmatmul.mubr.bf16.gmra.mrb[24].mxu0 %v919_v52 }
  0x54   :  { %553 = vmatprep.mubr.bf16.mxu0 %v921_v53 }
  0x55   :  { %642 = vmatmul.mubr.bf16.gmra.mrb[20].mxu1 %v920_v54 }
  0x56   :  { %781 = vmatprep.mubr.msk.bf16.mxu1 %vm437_vm0, %v923_v55 }
  0x5b   :  { %554 = vmatmul.mubr.bf16.gmra.mrb[28].mxu0 %v925_v57 }
  0x5c   :  { %561 = vmatprep.mubr.bf16.mxu0 %v745_v58 }
  0x5d   :  { %650 = vmatmul.mubr.bf16.gmra.mrb[24].mxu1 %v926_v59 }
  0x5e   :  { %782 = vmatprep.mubr.msk.bf16.mxu1 %vm437_vm0, %v928_v60 }
  0x63   :  { %562 = vmatmul.mubr.bf16.gmra.mrb[32].mxu0 %v744_v61 }
  0x65   :  { %658 = vmatmul.mubr.bf16.gmra.mrb[28].mxu1 %v931_v63 }
  0x66   :  { %783 = vmatprep.mubr.msk.bf16.mxu1 %vm437_vm0, %v747_v0 }
  0x6d   :  { %666 = vmatmul.mubr.bf16.gmra.mrb[32].mxu1 %v746_v1 }
  0xf6   :  { %v800_v2 = vpop.f32.mrb[0].mxu0 }
  0xf7   :  { %v801_v3 = vpop.f32.mrb[1].mxu0 }
  0xf8   :  { %v802_v4 = vadd.f32 %v801_v3, %v800_v2  ;;  %v803_v5 = vpop.f32.mrb[2].mxu0 }
  0xf9   :  { %v804_v6 = vpop.f32.mrb[3].mxu0 }
  0xfa   :  { %v805_v7 = vadd.f32 %v804_v6, %v803_v5  ;;  %v500_v9 = vadd.f32 %v802_v4, %v1161_v8 }
  0xfc   :  { %v503_v17 = vadd.f32 %v805_v7, %v1161_v8 }
  0xfe   :  { %v806_v10 = vpop.f32.mrb[4].mxu0 }
  0xff   :  { %v807_v11 = vpop.f32.mrb[5].mxu0 }
 0x100   :  { %v603_v12 = vpop.f32.mrb[0].mxu1  ;;  %v808_v13 = vadd.f32 %v807_v11, %v806_v10  ;;  %v809_v14 = vpop.f32.mrb[6].mxu0 }
 0x101   :  { %v604_v15 = vadd.f32 %v603_v12, %v500_v9  ;;  %v605_v16 = vpop.f32.mrb[1].mxu1  ;;  %v810_v18 = vpop.f32.mrb[7].mxu0 }
 0x102   :  { %v606_v19 = vpop.f32.mrb[2].mxu1  ;;  %v811_v20 = vadd.f32 %v810_v18, %v809_v14  ;;  %v508_v25 = vadd.f32 %v808_v13, %v1161_v8 }
 0x103   :  { %v673_v21 = vmax.f32 %v604_v15, 0.0  ;;  %v607_v22 = vadd.f32 %v606_v19, %v503_v17  ;;  %v608_v23 = vpop.f32.mrb[3].mxu1 }
 0x104   :  { %v511_v33 = vadd.f32 %v811_v20, %v1161_v8 }
 0x105   :  { %690 = vst [vmem:[%s1234_s3] sm:$0xff] %v673_v21  ;;  %v674_v24 = vmax.f32 %v607_v22, 0.0 }
 0x106   :  { %v812_v26 = vpop.f32.mrb[8].mxu0 }
 0x107   :  { %691 = vst [vmem:[%s1234_s3 + $0x8] sm:$0xff] %v674_v24  ;;  %v813_v27 = vpop.f32.mrb[9].mxu0 }
 0x108   :  { %v611_v28 = vpop.f32.mrb[4].mxu1  ;;  %v814_v29 = vadd.f32 %v813_v27, %v812_v26  ;;  %v815_v30 = vpop.f32.mrb[10].mxu0 }
 0x109   :  { %v612_v31 = vadd.f32 %v611_v28, %v508_v25  ;;  %v613_v32 = vpop.f32.mrb[5].mxu1  ;;  %v816_v34 = vpop.f32.mrb[11].mxu0 }
 0x10a   :  { %v614_v35 = vpop.f32.mrb[6].mxu1  ;;  %v817_v36 = vadd.f32 %v816_v34, %v815_v30  ;;  %v516_v41 = vadd.f32 %v814_v29, %v1161_v8 }
 0x10b   :  { %v675_v37 = vmax.f32 %v612_v31, 0.0  ;;  %v615_v38 = vadd.f32 %v614_v35, %v511_v33  ;;  %v616_v39 = vpop.f32.mrb[7].mxu1 }
 0x10c   :  { %v519_v49 = vadd.f32 %v817_v36, %v1161_v8 }
 0x10d   :  { %692 = vst [vmem:[%s1234_s3 + $0x10] sm:$0xff] %v675_v37  ;;  %v676_v40 = vmax.f32 %v615_v38, 0.0 }
 0x10e   :  { %v818_v42 = vpop.f32.mrb[12].mxu0 }
 0x10f   :  { %693 = vst [vmem:[%s1234_s3 + $0x18] sm:$0xff] %v676_v40  ;;  %v819_v43 = vpop.f32.mrb[13].mxu0 }
 0x110   :  { %v619_v44 = vpop.f32.mrb[8].mxu1  ;;  %v820_v45 = vadd.f32 %v819_v43, %v818_v42  ;;  %v821_v46 = vpop.f32.mrb[14].mxu0 }
 0x111   :  { %v620_v47 = vadd.f32 %v619_v44, %v516_v41  ;;  %v621_v48 = vpop.f32.mrb[9].mxu1  ;;  %v822_v50 = vpop.f32.mrb[15].mxu0 }
 0x112   :  { %v622_v51 = vpop.f32.mrb[10].mxu1  ;;  %v823_v52 = vadd.f32 %v822_v50, %v821_v46  ;;  %v524_v57 = vadd.f32 %v820_v45, %v1161_v8 }
 0x113   :  { %v677_v53 = vmax.f32 %v620_v47, 0.0  ;;  %v623_v54 = vadd.f32 %v622_v51, %v519_v49  ;;  %v624_v55 = vpop.f32.mrb[11].mxu1 }
 0x114   :  { %v527_v1 = vadd.f32 %v823_v52, %v1161_v8 }
 0x115   :  { %694 = vst [vmem:[%s1234_s3 + $0x20] sm:$0xff] %v677_v53  ;;  %v678_v56 = vmax.f32 %v623_v54, 0.0 }
 0x116   :  { %v824_v58 = vpop.f32.mrb[16].mxu0 }
 0x117   :  { %695 = vst [vmem:[%s1234_s3 + $0x28] sm:$0xff] %v678_v56  ;;  %v825_v59 = vpop.f32.mrb[17].mxu0 }
 0x118   :  { %v627_v60 = vpop.f32.mrb[12].mxu1  ;;  %v826_v61 = vadd.f32 %v825_v59, %v824_v58  ;;  %v827_v62 = vpop.f32.mrb[18].mxu0 }
 0x119   :  { %v628_v63 = vadd.f32 %v627_v60, %v524_v57  ;;  %v629_v0 = vpop.f32.mrb[13].mxu1  ;;  %v828_v2 = vpop.f32.mrb[19].mxu0 }
 0x11a   :  { %v630_v3 = vpop.f32.mrb[14].mxu1  ;;  %v829_v4 = vadd.f32 %v828_v2, %v827_v62  ;;  %v532_v10 = vadd.f32 %v826_v61, %v1161_v8 }
 0x11b   :  { %v679_v5 = vmax.f32 %v628_v63, 0.0  ;;  %v631_v6 = vadd.f32 %v630_v3, %v527_v1  ;;  %v632_v7 = vpop.f32.mrb[15].mxu1 }
 0x11c   :  { %v535_v18 = vadd.f32 %v829_v4, %v1161_v8 }
 0x11d   :  { %696 = vst [vmem:[%s1234_s3 + $0x30] sm:$0xff] %v679_v5  ;;  %v680_v9 = vmax.f32 %v631_v6, 0.0 }
 0x11e   :  { %v830_v11 = vpop.f32.mrb[20].mxu0 }
 0x11f   :  { %697 = vst [vmem:[%s1234_s3 + $0x38] sm:$0xff] %v680_v9  ;;  %v831_v12 = vpop.f32.mrb[21].mxu0 }
 0x120   :  { %v635_v13 = vpop.f32.mrb[16].mxu1  ;;  %v832_v14 = vadd.f32 %v831_v12, %v830_v11  ;;  %v833_v15 = vpop.f32.mrb[22].mxu0 }
 0x121   :  { %v636_v16 = vadd.f32 %v635_v13, %v532_v10  ;;  %v637_v17 = vpop.f32.mrb[17].mxu1  ;;  %v834_v19 = vpop.f32.mrb[23].mxu0 }
 0x122   :  { %v638_v20 = vpop.f32.mrb[18].mxu1  ;;  %v835_v21 = vadd.f32 %v834_v19, %v833_v15  ;;  %v540_v26 = vadd.f32 %v832_v14, %v1161_v8 }
 0x123   :  { %v681_v22 = vmax.f32 %v636_v16, 0.0  ;;  %v639_v23 = vadd.f32 %v638_v20, %v535_v18  ;;  %v640_v24 = vpop.f32.mrb[19].mxu1 }
 0x124   :  { %v543_v34 = vadd.f32 %v835_v21, %v1161_v8 }
 0x125   :  { %698 = vst [vmem:[%s1234_s3 + $0x40] sm:$0xff] %v681_v22  ;;  %v682_v25 = vmax.f32 %v639_v23, 0.0 }
 0x126   :  { %v836_v27 = vpop.f32.mrb[24].mxu0 }
 0x127   :  { %699 = vst [vmem:[%s1234_s3 + $0x48] sm:$0xff] %v682_v25  ;;  %v837_v28 = vpop.f32.mrb[25].mxu0 }
 0x128   :  { %v643_v29 = vpop.f32.mrb[20].mxu1  ;;  %v838_v30 = vadd.f32 %v837_v28, %v836_v27  ;;  %v839_v31 = vpop.f32.mrb[26].mxu0 }
 0x129   :  { %v644_v32 = vadd.f32 %v643_v29, %v540_v26  ;;  %v645_v33 = vpop.f32.mrb[21].mxu1  ;;  %v840_v35 = vpop.f32.mrb[27].mxu0 }
 0x12a   :  { %v646_v36 = vpop.f32.mrb[22].mxu1  ;;  %v841_v37 = vadd.f32 %v840_v35, %v839_v31  ;;  %v548_v42 = vadd.f32 %v838_v30, %v1161_v8 }
 0x12b   :  { %v683_v38 = vmax.f32 %v644_v32, 0.0  ;;  %v647_v39 = vadd.f32 %v646_v36, %v543_v34  ;;  %v648_v40 = vpop.f32.mrb[23].mxu1 }
 0x12c   :  { %v551_v50 = vadd.f32 %v841_v37, %v1161_v8 }
 0x12d   :  { %700 = vst [vmem:[%s1234_s3 + $0x50] sm:$0xff] %v683_v38  ;;  %v684_v41 = vmax.f32 %v647_v39, 0.0 }
 0x12e   :  { %v842_v43 = vpop.f32.mrb[28].mxu0 }
 0x12f   :  { %701 = vst [vmem:[%s1234_s3 + $0x58] sm:$0xff] %v684_v41  ;;  %v843_v44 = vpop.f32.mrb[29].mxu0 }
 0x130   :  { %v651_v45 = vpop.f32.mrb[24].mxu1  ;;  %v844_v46 = vadd.f32 %v843_v44, %v842_v43  ;;  %v845_v47 = vpop.f32.mrb[30].mxu0 }
 0x131   :  { %v652_v48 = vadd.f32 %v651_v45, %v548_v42  ;;  %v653_v49 = vpop.f32.mrb[25].mxu1  ;;  %v846_v51 = vpop.f32.mrb[31].mxu0 }
 0x132   :  { %v654_v52 = vpop.f32.mrb[26].mxu1  ;;  %v847_v53 = vadd.f32 %v846_v51, %v845_v47  ;;  %v556_v58 = vadd.f32 %v844_v46, %v1161_v8 }
 0x133   :  { %v685_v54 = vmax.f32 %v652_v48, 0.0  ;;  %v655_v55 = vadd.f32 %v654_v52, %v551_v50  ;;  %v656_v56 = vpop.f32.mrb[27].mxu1 }
 0x134   :  { %v559_v2 = vadd.f32 %v847_v53, %v1161_v8 }
 0x135   :  { %702 = vst [vmem:[%s1234_s3 + $0x60] sm:$0xff] %v685_v54  ;;  %v686_v57 = vmax.f32 %v655_v55, 0.0 }
 0x136   :  { %v848_v59 = vpop.f32.mrb[32].mxu0 }
 0x137   :  { %703 = vst [vmem:[%s1234_s3 + $0x68] sm:$0xff] %v686_v57  ;;  %v849_v60 = vpop.f32.mrb[33].mxu0 }
 0x138   :  { %v659_v61 = vpop.f32.mrb[28].mxu1  ;;  %v850_v62 = vadd.f32 %v849_v60, %v848_v59  ;;  %v851_v63 = vpop.f32.mrb[34].mxu0 }
 0x139   :  { %v660_v0 = vadd.f32 %v659_v61, %v556_v58  ;;  %v661_v1 = vpop.f32.mrb[29].mxu1  ;;  %v852_v3 = vpop.f32.mrb[35].mxu0 }
 0x13a   :  { %v662_v4 = vpop.f32.mrb[30].mxu1  ;;  %v564_v5 = vadd.f32 %v850_v62, %v1161_v8 }
 0x13b   :  { %v687_v6 = vmax.f32 %v660_v0, 0.0  ;;  %v663_v7 = vadd.f32 %v662_v4, %v559_v2  ;;  %v664_v9 = vpop.f32.mrb[31].mxu1 }
 0x13d   :  { %704 = vst [vmem:[%s1234_s3 + $0x70] sm:$0xff] %v687_v6  ;;  %v688_v10 = vmax.f32 %v663_v7, 0.0 }
 0x13f   :  { %705 = vst [vmem:[%s1234_s3 + $0x78] sm:$0xff] %v688_v10 }
 0x140   :  { %v667_v11 = vpop.f32.mrb[32].mxu1 }
 0x141   :  { %v668_v12 = vadd.f32 %v667_v11, %v564_v5  ;;  %v669_v13 = vpop.f32.mrb[33].mxu1 }
 0x142   :  { %v670_v14 = vpop.f32.mrb[34].mxu1 }
 0x143   :  { %v689_v15 = vmax.f32 %v668_v12, 0.0  ;;  %v671_v16 = vpop.f32.mrb[35].mxu1 }
 0x145   :  { %706 = vst [vmem:[%s1234_s3 + $0x80] sm:$0xff] %v689_v15 }

// kernel: convnet_forward.12
= control target key start
LH: loop header
LB: loop body
LE: loop exit
PB: predicated region body
PF: predicated region fallthrough
CT: control target
= control target key end

     0   :  { %v983_v34 = vmov 0.0   ;;  %vm984_vm0 = vmmov 0   ;;  %vm454_vm1 = vcmask 523264   ;;  %s1254_s1 = inlined_call_operand.vmem [shape: bf16[576,128], index: 1, kind: input, shape index: {}]   ;;  %s1255_s0 = inlined_call_operand.vmem [shape: bf16[72,576], index: 0, kind: input, shape index: {}]   ;;  %s1256_s2 = inlined_call_operand.vmem [shape: f32[1,128], index: 2, kind: input, shape index: {}]   ;;  %s1257_s3 = inlined_call_operand.vmem [shape: f32[72,128], index: 3, kind: output, shape index: {}]  }
   0x1   :  { %v914_v0 = vld [vmem:[%s1254_s1 + $0x40] sm:$0xff]   ;;  %v918_v4 = vld [vmem:[%s1254_s1 + $0x48] sm:$0xff]   ;;  %v922_v8 = vld [vmem:[%s1254_s1 + $0x50] sm:$0xff]  }
   0x2   :  { %v915_v1 = vld [vmem:[%s1254_s1 + $0xc0] sm:$0xff]   ;;  %775 = vmatprep.subr.bf16.mxu0 %v914_v0  ;;  %v919_v5 = vld [vmem:[%s1254_s1 + $0xc8] sm:$0xff]   ;;  %v923_v9 = vld [vmem:[%s1254_s1 + $0xd0] sm:$0xff]  }
   0x3   :  { %v916_v2 = vld [vmem:[%s1254_s1] sm:$0xff]   ;;  %821 = vmatprep.subr.bf16.mxu1 %v915_v1  ;;  %v920_v6 = vld [vmem:[%s1254_s1 + $0x8] sm:$0xff]   ;;  %v924_v10 = vld [vmem:[%s1254_s1 + $0x10] sm:$0xff]  }
   0x4   :  { %v917_v3 = vld [vmem:[%s1254_s1 + $0x80] sm:$0xff]   ;;  %776 = vmatpush3.bf16.msra.mxu0 %v916_v2  ;;  %v921_v7 = vld [vmem:[%s1254_s1 + $0x88] sm:$0xff]   ;;  %v925_v11 = vld [vmem:[%s1254_s1 + $0x90] sm:$0xff]  }
   0x5   :  { %822 = vmatpush3.bf16.msra.mxu1 %v917_v3  ;;  %777 = vmatprep.subr.bf16.mxu0 %v918_v4  ;;  %v926_v12 = vld [vmem:[%s1254_s1 + $0x58] sm:$0xff]   ;;  %v930_v16 = vld [vmem:[%s1254_s1 + $0x60] sm:$0xff]   ;;  %v934_v20 = vld [vmem:[%s1254_s1 + $0x68] sm:$0xff]  }
   0x6   :  { %823 = vmatprep.subr.bf16.mxu1 %v919_v5  ;;  %v927_v13 = vld [vmem:[%s1254_s1 + $0xd8] sm:$0xff]   ;;  %v931_v17 = vld [vmem:[%s1254_s1 + $0xe0] sm:$0xff]   ;;  %v935_v21 = vld [vmem:[%s1254_s1 + $0xe8] sm:$0xff]  }
   0x7   :  { %v928_v14 = vld [vmem:[%s1254_s1 + $0x18] sm:$0xff]   ;;  %v932_v18 = vld [vmem:[%s1254_s1 + $0x20] sm:$0xff]   ;;  %v936_v22 = vld [vmem:[%s1254_s1 + $0x28] sm:$0xff]  }
   0x8   :  { %778 = vmatpush3.bf16.msra.mxu0 %v920_v6  ;;  %v929_v15 = vld [vmem:[%s1254_s1 + $0x98] sm:$0xff]   ;;  %v933_v19 = vld [vmem:[%s1254_s1 + $0xa0] sm:$0xff]   ;;  %v937_v23 = vld [vmem:[%s1254_s1 + $0xa8] sm:$0xff]  }
   0x9   :  { %824 = vmatpush3.bf16.msra.mxu1 %v921_v7  ;;  %779 = vmatprep.subr.bf16.mxu0 %v922_v8  ;;  %v938_v24 = vld [vmem:[%s1254_s1 + $0x70] sm:$0xff]   ;;  %v942_v28 = vld [vmem:[%s1254_s1 + $0x78] sm:$0xff]   ;;  %v951_v36 = vld [vmem:[%s1255_s0 + $0xc] ss:$20 sps:$4 sm:$0xff]  }
   0xa   :  { %825 = vmatprep.subr.bf16.mxu1 %v923_v9  ;;  %v939_v25 = vld [vmem:[%s1254_s1 + $0xf0] sm:$0xff]   ;;  %v943_v29 = vld [vmem:[%s1254_s1 + $0xf8] sm:$0xff]   ;;  %v952_v37 = vld [vmem:[%s1254_s1 + $0x100] sm:$0xff]   ;;  %574 = vmatprep.mubr.bf16.mxu1 %v951_v36 }
   0xb   :  { %v940_v26 = vld [vmem:[%s1254_s1 + $0x30] sm:$0xff]   ;;  %v944_v30 = vld [vmem:[%s1254_s1 + $0x38] sm:$0xff]   ;;  %v953_v38 = vld [vmem:[%s1255_s0 + $0x2c] ss:$20 sps:$4 sm:$0xff]  }
   0xc   :  { %780 = vmatpush3.bf16.msra.mxu0 %v924_v10  ;;  %v941_v27 = vld [vmem:[%s1254_s1 + $0xb0] sm:$0xff]   ;;  %v945_v31 = vld [vmem:[%s1254_s1 + $0xb8] sm:$0xff]   ;;  %v959_v40 = vld [vmem:[%s1254_s1 + $0x108] sm:$0xff]  }
   0xd   :  { %826 = vmatpush3.bf16.msra.mxu1 %v925_v11  ;;  %781 = vmatprep.subr.bf16.mxu0 %v926_v12  ;;  %v946_v32 = vld [vmem:[%s1255_s0] ss:$20 sps:$4 sm:$0xff]   ;;  %v948_v33 = vld [vmem:[%s1255_s0 + $0x4] ss:$20 sps:$4 sm:$0xff]   ;;  %v949_v35 = vld [vmem:[%s1255_s0 + $0x8] ss:$20 sps:$4 sm:$0xff]  }
   0xe   :  { %827 = vmatprep.subr.bf16.mxu1 %v927_v13  ;;  %502 = vmatprep.mubr.bf16.mxu0 %v948_v33  ;;  %v955_v39 = vld [vmem:[%s1255_s0 + $0x34] ss:$20 sps:$4 sm:$0xff]   ;;  %v958_v42 = vld [vmem:[%s1255_s0 + $0x30] ss:$20 sps:$4 sm:$0xff]   ;;  %v975_v47 = vld [vmem:[%s1254_s1 + $0x118] sm:$0xff]  }
   0xf   :  { %v957_v41 = vld [vmem:[%s1255_s0 + $0x28] ss:$20 sps:$4 sm:$0xff]   ;;  %v966_v45 = vld [vmem:[%s1254_s1 + $0x110] sm:$0xff]   ;;  %v965_v48 = vld [vmem:[%s1255_s0 + $0x58] ss:$20 sps:$4 sm:$0xff]  }
  0x10   :  { %782 = vmatpush3.bf16.msra.mxu0 %v928_v14  ;;  %v960_v43 = vld [vmem:[%s1255_s0 + $0x54] ss:$20 sps:$4 sm:$0xff]   ;;  %v962_v44 = vld [vmem:[%s1255_s0 + $0x5c] ss:$20 sps:$4 sm:$0xff]   ;;  %v969_v50 = vld [vmem:[%s1255_s0 + $0x84] ss:$20 sps:$4 sm:$0xff]  }
  0x11   :  { %828 = vmatpush3.bf16.msra.mxu1 %v929_v15  ;;  %783 = vmatprep.subr.bf16.mxu0 %v930_v16  ;;  %v964_v46 = vld [vmem:[%s1255_s0 + $0x50] ss:$20 sps:$4 sm:$0xff]   ;;  %v40_v52 = vld [vmem:[%s1255_s0 + $0xa8] sm:$0xff]  ;;  %v972_v54 = vld [vmem:[%s1255_s0 + $0x80] ss:$20 sps:$4 sm:$0xff]  }
  0x12   :  { %829 = vmatprep.subr.bf16.mxu1 %v931_v17  ;;  %v967_v49 = vld [vmem:[%s1255_s0 + $0x7c] ss:$20 sps:$4 sm:$0xff]   ;;  %v39_v51 = vld [vmem:[%s1255_s0 + $0xa0] sm:$0xff]  ;;  %v971_v53 = vld [vmem:[%s1255_s0 + $0x78] ss:$20 sps:$4 sm:$0xff]   ;;  %v732_v56 = vcombine.high %v40_v52, %v40_v52  ;;  %v731_v58 = vcombine.low %v40_v52, %v40_v52 }
  0x13   :  { %v730_v55 = vcombine.high %v39_v51, %v39_v51  ;;  %v729_v57 = vcombine.low %v39_v51, %v39_v51  ;;  %v978_v59 = vld [vmem:[%s1255_s0 + $0x10] ss:$20 sps:$4 sm:$0xff]   ;;  %v979_v60 = vld [vmem:[%s1255_s0 + $0x88] ss:$20 sps:$4 sm:$0xff]   ;;  %v980_v61 = vld [vmem:[%s1255_s0 + $0x38] ss:$20 sps:$4 sm:$0xff]  }
  0x14   :  { %784 = vmatpush3.bf16.msra.mxu0 %v932_v18  ;;  %v981_v62 = vld [vmem:[%s1255_s0 + $0xb0] ss:$0 sps:$4 sm:$0xff]   ;;  %v982_v63 = vld [vmem:[%s1255_s0 + $0x60] ss:$20 sps:$4 sm:$0xff]  }
  0x15   :  { %830 = vmatpush3.bf16.msra.mxu1 %v933_v19  ;;  %785 = vmatprep.subr.bf16.mxu0 %v934_v20  ;;  %v1198_v1 = vld [vmem:[%s1256_s2] ss:$0 sm:$0xff] }
  0x16   :  { %831 = vmatprep.subr.bf16.mxu1 %v935_v21 }
  0x18   :  { %786 = vmatpush3.bf16.msra.mxu0 %v936_v22 }
  0x19   :  { %832 = vmatpush3.bf16.msra.mxu1 %v937_v23  ;;  %787 = vmatprep.subr.bf16.mxu0 %v938_v24 }
  0x1a   :  { %833 = vmatprep.subr.bf16.mxu1 %v939_v25 }
  0x1c   :  { %788 = vmatpush3.bf16.msra.mxu0 %v940_v26 }
  0x1d   :  { %834 = vmatpush3.bf16.msra.mxu1 %v941_v27  ;;  %789 = vmatprep.subr.bf16.mxu0 %v942_v28 }
  0x1e   :  { %835 = vmatprep.subr.bf16.mxu1 %v943_v29 }
  0x20   :  { %790 = vmatpush3.bf16.msra.mxu0 %v944_v30 }
  0x21   :  { %836 = vmatpush3.bf16.msra.mxu1 %v945_v31  ;;  %876 = vmatprep.subr.bf16.mxu0 %v983_v34 }
  0x22   :  { %904 = vmatprep.subr.bf16.mxu1 %v983_v34 }
  0x23   :  { %503 = vmatmul.mubr.bf16.vlgmr.msra.gmra.mrb[0].mxu0 %v946_v32 }
  0x24   :  { %575 = vmatmul.mubr.bf16.vlgmr.msra.gmra.mrb[0].mxu1 %v949_v35  ;;  %877 = vmatpush3.bf16.msra.mxu0 %v952_v37 }
  0x25   :  { %510 = vmatprep.mubr.bf16.mxu0 %v953_v38  ;;  %878 = vmatprep.subr.bf16.mxu0 %v983_v34 }
  0x26   :  { %582 = vmatprep.mubr.bf16.mxu1 %v955_v39  ;;  %908 = vmatpush3.bf16.msra.mxu1 %v952_v37 }
  0x27   :  { %905 = vmatprep.subr.bf16.mxu1 %v983_v34 }
  0x28   :  { %879 = vmatpush3.bf16.msra.mxu0 %v959_v40 }
  0x29   :  { %880 = vmatprep.subr.bf16.mxu0 %v983_v34 }
  0x2a   :  { %909 = vmatpush3.bf16.msra.mxu1 %v959_v40 }
  0x2b   :  { %511 = vmatmul.mubr.bf16.gmra.mrb[4].mxu0 %v957_v41  ;;  %906 = vmatprep.subr.bf16.mxu1 %v983_v34 }
  0x2c   :  { %583 = vmatmul.mubr.bf16.gmra.mrb[4].mxu1 %v958_v42  ;;  %518 = vmatprep.mubr.bf16.mxu0 %v960_v43 }
  0x2d   :  { %590 = vmatprep.mubr.bf16.mxu1 %v962_v44  ;;  %881 = vmatpush3.bf16.msra.mxu0 %v966_v45 }
  0x2e   :  { %882 = vmatprep.subr.bf16.mxu0 %v983_v34  ;;  %910 = vmatpush3.bf16.msra.mxu1 %v966_v45 }
  0x2f   :  { %907 = vmatprep.subr.bf16.mxu1 %v983_v34 }
  0x31   :  { %883 = vmatpush3.bf16.msra.mxu0 %v975_v47 }
  0x32   :  { %911 = vmatpush3.bf16.msra.mxu1 %v975_v47 }
  0x33   :  { %519 = vmatmul.mubr.bf16.gmra.mrb[8].mxu0 %v964_v46 }
  0x34   :  { %591 = vmatmul.mubr.bf16.gmra.mrb[8].mxu1 %v965_v48  ;;  %526 = vmatprep.mubr.bf16.mxu0 %v967_v49 }
  0x35   :  { %598 = vmatprep.mubr.bf16.mxu1 %v969_v50 }
  0x3b   :  { %527 = vmatmul.mubr.bf16.gmra.mrb[12].mxu0 %v971_v53 }
  0x3c   :  { %599 = vmatmul.mubr.bf16.gmra.mrb[12].mxu1 %v972_v54  ;;  %534 = vmatprep.mubr.bf16.mxu0 %v730_v55 }
  0x3d   :  { %606 = vmatprep.mubr.bf16.mxu1 %v732_v56 }
  0x43   :  { %535 = vmatmul.mubr.bf16.gmra.mrb[16].mxu0 %v729_v57 }
  0x44   :  { %607 = vmatmul.mubr.bf16.gmra.mrb[16].mxu1 %v731_v58  ;;  %884 = vmatprep.mubr.msk.bf16.mxu0 %vm984_vm0, %v983_v34 }
  0x45   :  { %896 = vmatprep.mubr.msk.bf16.mxu1 %vm984_vm0, %v983_v34 }
  0x4b   :  { %885 = vmatmul.mubr.msk.bf16.vlgmr.msra.gmra.mrb[20].mxu0 %vm454_vm1, %v978_v59 }
  0x4c   :  { %897 = vmatmul.mubr.msk.bf16.vlgmr.msra.gmra.mrb[20].mxu1 %vm454_vm1, %v979_v60  ;;  %888 = vmatprep.mubr.msk.bf16.mxu0 %vm984_vm0, %v983_v34 }
  0x4d   :  { %900 = vmatprep.mubr.msk.bf16.mxu1 %vm984_vm0, %v983_v34 }
  0x53   :  { %889 = vmatmul.mubr.msk.bf16.gmra.mrb[24].mxu0 %vm454_vm1, %v980_v61 }
  0x54   :  { %901 = vmatmul.mubr.msk.bf16.gmra.mrb[24].mxu1 %vm454_vm1, %v981_v62  ;;  %892 = vmatprep.mubr.msk.bf16.mxu0 %vm984_vm0, %v983_v34 }
  0x5b   :  { %893 = vmatmul.mubr.msk.bf16.gmra.mrb[28].mxu0 %vm454_vm1, %v982_v63 }
  0xf6   :  { %v791_v0 = vpop.f32.mrb[0].mxu0 }
  0xf7   :  { %v792_v2 = vpop.f32.mrb[1].mxu0  ;;  %v837_v3 = vpop.f32.mrb[0].mxu1 }
  0xf8   :  { %v793_v4 = vadd.f32 %v792_v2, %v791_v0  ;;  %v794_v5 = vpop.f32.mrb[2].mxu0  ;;  %v838_v6 = vpop.f32.mrb[1].mxu1 }
  0xf9   :  { %v795_v7 = vpop.f32.mrb[3].mxu0  ;;  %v839_v8 = vadd.f32 %v838_v6, %v837_v3  ;;  %v840_v9 = vpop.f32.mrb[2].mxu1 }
  0xfa   :  { %v505_v10 = vadd.f32 %v793_v4, %v1198_v1  ;;  %v796_v11 = vadd.f32 %v795_v7, %v794_v5  ;;  %v841_v12 = vpop.f32.mrb[3].mxu1 }
  0xfb   :  { %v842_v13 = vadd.f32 %v841_v12, %v840_v9 }
  0xfc   :  { %v508_v14 = vadd.f32 %v796_v11, %v1198_v1  ;;  %v1202_v15 = vadd.f32 %v839_v8, %v505_v10 }
  0xfe   :  { %v797_v16 = vpop.f32.mrb[4].mxu0  ;;  %v1204_v17 = vadd.f32 %v842_v13, %v508_v14 }
  0xff   :  { %v798_v18 = vpop.f32.mrb[5].mxu0  ;;  %v843_v19 = vpop.f32.mrb[4].mxu1 }
 0x100   :  { %v799_v20 = vadd.f32 %v798_v18, %v797_v16  ;;  %v800_v21 = vpop.f32.mrb[6].mxu0  ;;  %v844_v22 = vpop.f32.mrb[5].mxu1 }
 0x101   :  { %v801_v23 = vpop.f32.mrb[7].mxu0  ;;  %v845_v24 = vadd.f32 %v844_v22, %v843_v19  ;;  %v846_v25 = vpop.f32.mrb[6].mxu1 }
 0x102   :  { %v513_v26 = vadd.f32 %v799_v20, %v1198_v1  ;;  %v802_v27 = vadd.f32 %v801_v23, %v800_v21  ;;  %v847_v28 = vpop.f32.mrb[7].mxu1 }
 0x103   :  { %v848_v29 = vadd.f32 %v847_v28, %v846_v25 }
 0x104   :  { %v516_v30 = vadd.f32 %v802_v27, %v1198_v1  ;;  %v1208_v31 = vadd.f32 %v845_v24, %v513_v26 }
 0x106   :  { %v803_v32 = vpop.f32.mrb[8].mxu0  ;;  %v1210_v33 = vadd.f32 %v848_v29, %v516_v30 }
 0x107   :  { %v804_v34 = vpop.f32.mrb[9].mxu0  ;;  %v849_v35 = vpop.f32.mrb[8].mxu1 }
 0x108   :  { %v805_v36 = vadd.f32 %v804_v34, %v803_v32  ;;  %v806_v37 = vpop.f32.mrb[10].mxu0  ;;  %v850_v38 = vpop.f32.mrb[9].mxu1 }
 0x109   :  { %v807_v39 = vpop.f32.mrb[11].mxu0  ;;  %v851_v40 = vadd.f32 %v850_v38, %v849_v35  ;;  %v852_v41 = vpop.f32.mrb[10].mxu1 }
 0x10a   :  { %v521_v42 = vadd.f32 %v805_v36, %v1198_v1  ;;  %v808_v43 = vadd.f32 %v807_v39, %v806_v37  ;;  %v853_v44 = vpop.f32.mrb[11].mxu1 }
 0x10b   :  { %v854_v45 = vadd.f32 %v853_v44, %v852_v41 }
 0x10c   :  { %v524_v46 = vadd.f32 %v808_v43, %v1198_v1  ;;  %v1214_v47 = vadd.f32 %v851_v40, %v521_v42 }
 0x10e   :  { %v809_v48 = vpop.f32.mrb[12].mxu0  ;;  %v1216_v49 = vadd.f32 %v854_v45, %v524_v46 }
 0x10f   :  { %v810_v50 = vpop.f32.mrb[13].mxu0  ;;  %v855_v51 = vpop.f32.mrb[12].mxu1 }
 0x110   :  { %v811_v52 = vadd.f32 %v810_v50, %v809_v48  ;;  %v812_v53 = vpop.f32.mrb[14].mxu0  ;;  %v856_v54 = vpop.f32.mrb[13].mxu1 }
 0x111   :  { %v813_v55 = vpop.f32.mrb[15].mxu0  ;;  %v857_v56 = vadd.f32 %v856_v54, %v855_v51  ;;  %v858_v57 = vpop.f32.mrb[14].mxu1 }
 0x112   :  { %v529_v58 = vadd.f32 %v811_v52, %v1198_v1  ;;  %v814_v59 = vadd.f32 %v813_v55, %v812_v53  ;;  %v859_v60 = vpop.f32.mrb[15].mxu1 }
 0x113   :  { %v860_v61 = vadd.f32 %v859_v60, %v858_v57 }
 0x114   :  { %v532_v62 = vadd.f32 %v814_v59, %v1198_v1  ;;  %v601_v63 = vadd.f32 %v857_v56, %v529_v58 }
 0x116   :  { %v815_v0 = vpop.f32.mrb[16].mxu0  ;;  %v604_v2 = vadd.f32 %v860_v61, %v532_v62 }
 0x117   :  { %v816_v3 = vpop.f32.mrb[17].mxu0  ;;  %v861_v4 = vpop.f32.mrb[16].mxu1 }
 0x118   :  { %v817_v5 = vadd.f32 %v816_v3, %v815_v0  ;;  %v818_v6 = vpop.f32.mrb[18].mxu0  ;;  %v862_v7 = vpop.f32.mrb[17].mxu1 }
 0x119   :  { %v819_v8 = vpop.f32.mrb[19].mxu0  ;;  %v863_v9 = vadd.f32 %v862_v7, %v861_v4  ;;  %v864_v10 = vpop.f32.mrb[18].mxu1 }
 0x11a   :  { %v537_v11 = vadd.f32 %v817_v5, %v1198_v1  ;;  %v865_v12 = vpop.f32.mrb[19].mxu1 }
 0x11c   :  { %v609_v13 = vadd.f32 %v863_v9, %v537_v11 }
 0x11e   :  { %v648_v14 = vpop.f32.mrb[20].mxu0 }
 0x11f   :  { %v649_v16 = vadd.f32 %v648_v14, %v1202_v15  ;;  %v672_v18 = vpop.f32.mrb[20].mxu1  ;;  %v886_v19 = vpop.f32.mrb[21].mxu0 }
 0x120   :  { %v673_v20 = vadd.f32 %v672_v18, %v601_v63  ;;  %v898_v21 = vpop.f32.mrb[21].mxu1  ;;  %v651_v22 = vpop.f32.mrb[22].mxu0 }
 0x121   :  { %v686_v23 = vmax.f32 %v649_v16, 0.0  ;;  %v652_v24 = vadd.f32 %v651_v22, %v1204_v17  ;;  %v675_v25 = vpop.f32.mrb[22].mxu1  ;;  %v887_v26 = vpop.f32.mrb[23].mxu0 }
 0x122   :  { %v692_v27 = vmax.f32 %v673_v20, 0.0  ;;  %v676_v28 = vadd.f32 %v675_v25, %v604_v2  ;;  %v899_v29 = vpop.f32.mrb[23].mxu1 }
 0x123   :  { %695 = vst [vmem:[%s1257_s3] sm:$0xff] %v686_v23  ;;  %v687_v1 = vmax.f32 %v652_v24, 0.0 }
 0x124   :  { %701 = vst [vmem:[%s1257_s3 + $0x30] sm:$0xff] %v692_v27  ;;  %v693_v15 = vmax.f32 %v676_v28, 0.0 }
 0x125   :  { %696 = vst [vmem:[%s1257_s3 + $0x8] sm:$0xff] %v687_v1 }
 0x126   :  { %702 = vst [vmem:[%s1257_s3 + $0x38] sm:$0xff] %v693_v15  ;;  %v656_v17 = vpop.f32.mrb[24].mxu0 }
 0x127   :  { %v657_v30 = vadd.f32 %v656_v17, %v1208_v31  ;;  %v680_v32 = vpop.f32.mrb[24].mxu1  ;;  %v890_v34 = vpop.f32.mrb[25].mxu0 }
 0x128   :  { %v681_v35 = vadd.f32 %v680_v32, %v609_v13  ;;  %v659_v36 = vpop.f32.mrb[26].mxu0  ;;  %v902_v37 = vpop.f32.mrb[25].mxu1 }
 0x129   :  { %v688_v38 = vmax.f32 %v657_v30, 0.0  ;;  %v660_v39 = vadd.f32 %v659_v36, %v1210_v33  ;;  %v891_v40 = vpop.f32.mrb[27].mxu0  ;;  %v683_v41 = vpop.f32.mrb[26].mxu1 }
 0x12a   :  { %v694_v42 = vmax.f32 %v681_v35, 0.0  ;;  %v903_v43 = vpop.f32.mrb[27].mxu1 }
 0x12b   :  { %697 = vst [vmem:[%s1257_s3 + $0x10] sm:$0xff] %v688_v38  ;;  %v689_v44 = vmax.f32 %v660_v39, 0.0 }
 0x12c   :  { %703 = vst [vmem:[%s1257_s3 + $0x40] sm:$0xff] %v694_v42 }
 0x12d   :  { %698 = vst [vmem:[%s1257_s3 + $0x18] sm:$0xff] %v689_v44 }
 0x12e   :  { %v664_v31 = vpop.f32.mrb[28].mxu0 }
 0x12f   :  { %v665_v33 = vadd.f32 %v664_v31, %v1214_v47  ;;  %v894_v45 = vpop.f32.mrb[29].mxu0 }
 0x130   :  { %v667_v46 = vpop.f32.mrb[30].mxu0 }
 0x131   :  { %v690_v48 = vmax.f32 %v665_v33, 0.0  ;;  %v668_v50 = vadd.f32 %v667_v46, %v1216_v49  ;;  %v895_v51 = vpop.f32.mrb[31].mxu0 }
 0x133   :  { %699 = vst [vmem:[%s1257_s3 + $0x20] sm:$0xff] %v690_v48  ;;  %v691_v52 = vmax.f32 %v668_v50, 0.0 }
 0x135   :  { %700 = vst [vmem:[%s1257_s3 + $0x28] sm:$0xff] %v691_v52 }

// kernel: convnet_forward.13
= control target key start
LH: loop header
LB: loop body
LE: loop exit
PB: predicated region body
PF: predicated region fallthrough
CT: control target
= control target key end

     0   :  { %s6971_s27 = smov 0   ;;  %s7892_s0 = inlined_call_operand.vmem [shape: bf16[2,2304], index: 0, kind: input, shape index: {}]   ;;  %s7893_s1 = inlined_call_operand.vmem [shape: bf16[2304,1164], index: 1, kind: input, shape index: {}]   ;;  %s7894_s2 = inlined_call_operand.vmem [shape: f32[1,1164], index: 2, kind: input, shape index: {}]   ;;  %s7895_s3 = inlined_call_operand.vmem [shape: f32[2,1164], index: 3, kind: input, shape index: {}]   ;;  %s7896_s4 = inlined_call_operand.vmem [shape: bf16[1164,100], index: 4, kind: input, shape index: {}]   ;;  %s7897_s5 = inlined_call_operand.vmem [shape: f32[1,100], index: 5, kind: input, shape index: {}]   ;;  %s7898_s6 = inlined_call_operand.vmem [shape: f32[2,100], index: 6, kind: input, shape index: {}]   ;;  %s7899_s7 = inlined_call_operand.vmem [shape: bf16[100,50], index: 7, kind: input, shape index: {}]   ;;  %s7900_s8 = inlined_call_operand.vmem [shape: f32[1,50], index: 8, kind: input, shape index: {}]   ;;  %s7901_s9 = inlined_call_operand.vmem [shape: bf16[50,10], index: 9, kind: input, shape index: {}]   ;;  %s7902_s10 = inlined_call_operand.vmem [shape: f32[1,10], index: 10, kind: input, shape index: {}]   ;;  %s7903_s11 = inlined_call_operand.vmem [shape: f32[1,10], index: 11, kind: input, shape index: {}]   ;;  %s7904_s12 = inlined_call_operand.<no memory space> [shape: f32[1,1], index: 12, kind: input, shape index: {}]   ;;  %s7905_s13 = inlined_call_operand.vmem [shape: f32[2,1], index: 13, kind: output, shape index: {}]  }
   0x1   :  { %v18_v0 = vstv %s7904_s12 }
   0x2   :  { %19 = vst [vmem:[#allocation3] sm:$0x1] %v18_v0 }
   0x3 LB: > { %s6977_s28 = sadd.s32 4294967295, %s6890_s27   ;;  %p5317_p0 = scmp.ge.s32.totalorder %s6890_s27, 1  ;;  %s6890_s27 = sphi %s6971_s27, %s25_s27  }
   0x4   : > { %p396_p1 = scmp.lt.s32.totalorder %s6890_s27, 4 }
   0x6   : > { %p397_p2 = pnand %p5317_p0, %p396_p1 }
   0x7   : > { %s440_s12 = smul.u32 (!%p397_p2), 6, %s6977_s28  ;;  %p5319_p5 = scmp.ne.s32.totalorder (!%p397_p2), %s6977_s28, 0 }
   0x8   : > { %400 = sbr.rel (%p397_p2) target bundleno = 1633 (0x661), region = 72 }
   0x9   : > { %s445_s29 = smul.u32 (!%p397_p2), 96, %s6977_s28  ;;  %p441_p3 = scmp.lt.s32.totalorder (!%p397_p2), %s440_s12, 17 }
   0xb   : > { %p446_p4 = scmp.lt.s32.totalorder (!%p397_p2), %s445_s29, 287 }
   0xf   : > { %s7907_s12 = smov (!%p441_p3, %s440_s12), 17  ;;  %s7909_s29 = smov (!%p446_p4, %s445_s29), 287 }
  0x10   : > { %s443_s15 = scalar_lea.vmem %s7892_s0, %s7907_s12  ;;  %s6064_s16 = smul.u32 40, %s7909_s29  ;;  %vm459_vm0 = vcmask (!%p5319_p5), 1041408   ;;  %vm460_vm1 = vcmask (!%p5319_p5), 93186   ;;  %v6892_v1 = vmov (!%p5319_p5), 0.0  }
  0x11   : > { %456 = sbr.rel (%p5319_p5) target bundleno = 24 (0x18), region = 76  ;;  %457 = vst [vmem:[#allocation2] sm:$0xff] (!%p5319_p5), %v6892_v1  ;;  %458 = vst [vmem:[#allocation2 + $0x8] sm:$0xff] (!%p5319_p5), %v6892_v1 }
  0x12   : > { %s6992_s19 = scalar_lea.vmem %s7893_s1, %s6064_s16  ;;  %vm461_vm2 = vmor (!%p5319_p5), %vm460_vm1, %vm459_vm0 }
  0x13   : > { %462 = vst.msk [vmem:[#allocation2 + $0x10] sm:$0xf] (!%p5319_p5), %vm461_vm2, %v6892_v1 }
  0x18 PF: > { %v6079_v2 = vld [vmem:[%s6992_s19 + $0x4] ss:$40 sps:$4 sm:$0xff]   ;;  %v6083_v4 = vld [vmem:[%s6992_s19] ss:$40 sps:$4 sm:$0xff]   ;;  %v6085_v6 = vld [vmem:[%s6992_s19 + $0x54] ss:$40 sps:$4 sm:$0xff]   ;;  %v952_v40 = vlaneseq }
  0x19   : > { %v6081_v3 = vld [vmem:[%s6992_s19 + $0x504] ss:$40 sps:$4 sm:$0xff]   ;;  %3401 = vmatprep.subr.bf16.mxu1 %v6079_v2  ;;  %v6084_v5 = vld [vmem:[%s6992_s19 + $0x500] ss:$40 sps:$4 sm:$0xff]   ;;  %v6087_v7 = vld [vmem:[%s6992_s19 + $0x554] ss:$40 sps:$4 sm:$0xff]  }
  0x1a   : > { %3442 = vmatprep.subr.bf16.mxu0 %v6081_v3  ;;  %3402 = vmatpush1.bf16.msra.mxu1 %v6083_v4  ;;  %v6089_v8 = vld [vmem:[%s6992_s19 + $0x50] ss:$40 sps:$4 sm:$0xff]   ;;  %v6091_v10 = vld [vmem:[%s6992_s19 + $0xa4] ss:$40 sps:$4 sm:$0xff]   ;;  %v6095_v12 = vld [vmem:[%s6992_s19 + $0xa0] ss:$40 sps:$4 sm:$0xff]  }
  0x1b   : > { %3443 = vmatpush1.bf16.msra.mxu0 %v6084_v5  ;;  %3403 = vmatprep.subr.bf16.mxu1 %v6085_v6  ;;  %v6090_v9 = vld [vmem:[%s6992_s19 + $0x550] ss:$40 sps:$4 sm:$0xff]   ;;  %v6093_v11 = vld [vmem:[%s6992_s19 + $0x5a4] ss:$40 sps:$4 sm:$0xff]   ;;  %v6096_v13 = vld [vmem:[%s6992_s19 + $0x5a0] ss:$40 sps:$4 sm:$0xff]  }
  0x1c   : > { %3444 = vmatprep.subr.bf16.mxu0 %v6087_v7  ;;  %v6097_v14 = vld [vmem:[%s6992_s19 + $0xf4] ss:$40 sps:$4 sm:$0xff]   ;;  %v6101_v16 = vld [vmem:[%s6992_s19 + $0xf0] ss:$40 sps:$4 sm:$0xff]   ;;  %v6103_v18 = vld [vmem:[%s6992_s19 + $0x144] ss:$40 sps:$4 sm:$0xff]  }
  0x1d   : > { %v6099_v15 = vld [vmem:[%s6992_s19 + $0x5f4] ss:$40 sps:$4 sm:$0xff]   ;;  %v6102_v17 = vld [vmem:[%s6992_s19 + $0x5f0] ss:$40 sps:$4 sm:$0xff]   ;;  %v6105_v19 = vld [vmem:[%s6992_s19 + $0x644] ss:$40 sps:$4 sm:$0xff]  }
  0x1e   : > { %3404 = vmatpush1.bf16.msra.mxu1 %v6089_v8  ;;  %v6107_v20 = vld [vmem:[%s6992_s19 + $0x140] ss:$40 sps:$4 sm:$0xff]   ;;  %v6109_v22 = vld [vmem:[%s6992_s19 + $0x194] ss:$40 sps:$4 sm:$0xff]   ;;  %v6113_v24 = vld [vmem:[%s6992_s19 + $0x190] ss:$40 sps:$4 sm:$0xff]  }
  0x1f   : > { %3445 = vmatpush1.bf16.msra.mxu0 %v6090_v9  ;;  %3405 = vmatprep.subr.bf16.mxu1 %v6091_v10  ;;  %v6108_v21 = vld [vmem:[%s6992_s19 + $0x640] ss:$40 sps:$4 sm:$0xff]   ;;  %v6111_v23 = vld [vmem:[%s6992_s19 + $0x694] ss:$40 sps:$4 sm:$0xff]   ;;  %v6114_v25 = vld [vmem:[%s6992_s19 + $0x690] ss:$40 sps:$4 sm:$0xff]  }
  0x20   : > { %3446 = vmatprep.subr.bf16.mxu0 %v6093_v11  ;;  %v6115_v26 = vld [vmem:[%s6992_s19 + $0x1e4] ss:$40 sps:$4 sm:$0xff]   ;;  %v6119_v28 = vld [vmem:[%s6992_s19 + $0x1e0] ss:$40 sps:$4 sm:$0xff]   ;;  %v6121_v30 = vld [vmem:[%s6992_s19 + $0x234] ss:$40 sps:$4 sm:$0xff]  }
  0x21   : > { %v6117_v27 = vld [vmem:[%s6992_s19 + $0x6e4] ss:$40 sps:$4 sm:$0xff]   ;;  %v6120_v29 = vld [vmem:[%s6992_s19 + $0x6e0] ss:$40 sps:$4 sm:$0xff]   ;;  %v6123_v31 = vld [vmem:[%s6992_s19 + $0x734] ss:$40 sps:$4 sm:$0xff]  }
  0x22   : > { %3406 = vmatpush1.bf16.msra.mxu1 %v6095_v12  ;;  %v6125_v32 = vld [vmem:[%s6992_s19 + $0x230] ss:$40 sps:$4 sm:$0xff]   ;;  %v6127_v34 = vld [vmem:[%s6992_s19 + $0x284] ss:$40 sps:$4 sm:$0xff]   ;;  %v6131_v36 = vld [vmem:[%s6992_s19 + $0x280] ss:$40 sps:$4 sm:$0xff]  }
  0x23   : > { %3447 = vmatpush1.bf16.msra.mxu0 %v6096_v13  ;;  %3407 = vmatprep.subr.bf16.mxu1 %v6097_v14  ;;  %v6126_v33 = vld [vmem:[%s6992_s19 + $0x730] ss:$40 sps:$4 sm:$0xff]   ;;  %v6129_v35 = vld [vmem:[%s6992_s19 + $0x784] ss:$40 sps:$4 sm:$0xff]   ;;  %v6132_v37 = vld [vmem:[%s6992_s19 + $0x780] ss:$40 sps:$4 sm:$0xff]  }
  0x24   : > { %3448 = vmatprep.subr.bf16.mxu0 %v6099_v15  ;;  %v6893_v38 = vmov 1966171168   ;;  %v6133_v41 = vld [vmem:[%s6992_s19 + $0x2d4] ss:$40 sps:$4 sm:$0xff]   ;;  %v6137_v43 = vld [vmem:[%s6992_s19 + $0x2d0] ss:$40 sps:$4 sm:$0xff]  }
  0x25   : > { %v950_v39 = vunpack.c.l.s4 %v6893_v38  ;;  %v6135_v42 = vld [vmem:[%s6992_s19 + $0x7d4] ss:$40 sps:$4 sm:$0xff]   ;;  %v7034_v45 = vshrl.u32 %v952_v40, 7  ;;  %v6138_v46 = vld [vmem:[%s6992_s19 + $0x7d0] ss:$40 sps:$4 sm:$0xff]   ;;  %vm4076_vm3 = vcmask 1041408  }
  0x26   : > { %3408 = vmatpush1.bf16.msra.mxu1 %v6101_v16  ;;  %v6139_v47 = vld [vmem:[%s6992_s19 + $0x324] ss:$40 sps:$4 sm:$0xff]   ;;  %v6143_v49 = vld [vmem:[%s6992_s19 + $0x320] ss:$40 sps:$4 sm:$0xff]   ;;  %v6145_v52 = vld [vmem:[%s6992_s19 + $0x374] ss:$40 sps:$4 sm:$0xff]  }
  0x27   : > { %3449 = vmatpush1.bf16.msra.mxu0 %v6102_v17  ;;  %3409 = vmatprep.subr.bf16.mxu1 %v6103_v18  ;;  %v951_v44 = vunpack.c.0.s8 %v950_v39  ;;  %v6141_v48 = vld [vmem:[%s6992_s19 + $0x824] ss:$40 sps:$4 sm:$0xff]   ;;  %v6144_v50 = vld [vmem:[%s6992_s19 + $0x820] ss:$40 sps:$4 sm:$0xff]   ;;  %v6147_v53 = vld [vmem:[%s6992_s19 + $0x874] ss:$40 sps:$4 sm:$0xff]  }
  0x28   : > { %3450 = vmatprep.subr.bf16.mxu0 %v6105_v19  ;;  %v466_v54 = vld [vmem:[%s443_s15] sm:$0x3f]  ;;  %v6149_v55 = vld [vmem:[%s6992_s19 + $0x370] ss:$40 sps:$4 sm:$0xff]   ;;  %v6157_v3 = vld [vmem:[%s6992_s19 + $0x414] ss:$40 sps:$4 sm:$0xff]  }
  0x29   : > { %v7042_v51 = vsub.s32 %v951_v44, %v7034_v45  ;;  %v948_v57 = vcombine.high %v466_v54, %v466_v54  ;;  %v6150_v58 = vld [vmem:[%s6992_s19 + $0x870] ss:$40 sps:$4 sm:$0xff]   ;;  %v6151_v59 = vld [vmem:[%s6992_s19 + $0x3c4] ss:$40 sps:$4 sm:$0xff]   ;;  %v6155_v63 = vld [vmem:[%s6992_s19 + $0x3c0] ss:$40 sps:$4 sm:$0xff]  }
  0x2a   : > { %3410 = vmatpush1.bf16.msra.mxu1 %v6107_v20  ;;  %v6153_v60 = vld [vmem:[%s6992_s19 + $0x8c4] ss:$40 sps:$4 sm:$0xff]   ;;  %v6156_v2 = vld [vmem:[%s6992_s19 + $0x8c0] ss:$40 sps:$4 sm:$0xff]   ;;  %v6159_v4 = vld [vmem:[%s6992_s19 + $0x914] ss:$40 sps:$4 sm:$0xff]  }
  0x2b   : > { %3451 = vmatpush1.bf16.msra.mxu0 %v6108_v21  ;;  %3411 = vmatprep.subr.bf16.mxu1 %v6109_v22  ;;  %v955_v56 = vrot.slane %v466_v54, %v7042_v51  ;;  %v962_v62 = vrot.slane %v948_v57, %v7042_v51  ;;  %v6161_v6 = vld [vmem:[%s6992_s19 + $0x410] ss:$40 sps:$4 sm:$0xff]   ;;  %v6163_v8 = vld [vmem:[%s6992_s19 + $0x464] ss:$40 sps:$4 sm:$0xff]   ;;  %v6167_v10 = vld [vmem:[%s6992_s19 + $0x460] ss:$40 sps:$4 sm:$0xff]  }
  0x2c   : > { %3452 = vmatprep.subr.bf16.mxu0 %v6111_v23  ;;  %v6162_v7 = vld [vmem:[%s6992_s19 + $0x910] ss:$40 sps:$4 sm:$0xff]   ;;  %v6165_v9 = vld [vmem:[%s6992_s19 + $0x964] ss:$40 sps:$4 sm:$0xff]   ;;  %v6168_v11 = vld [vmem:[%s6992_s19 + $0x960] ss:$40 sps:$4 sm:$0xff]  }
  0x2d   : > { %v963_v61 = vcombine.high %v955_v56, %v955_v56  ;;  %v7062_v1 = vrot.slane %v962_v62, %v7042_v51  ;;  %v6169_v12 = vld [vmem:[%s6992_s19 + $0x4b4] ss:$40 sps:$4 sm:$0xff]   ;;  %v6173_v14 = vld [vmem:[%s6992_s19 + $0x4b0] ss:$40 sps:$4 sm:$0xff]   ;;  %v7083_v15 = vrot.slane %v955_v56, %v7042_v51  ;;  %v6177_v17 = vld [vmem:[%s6992_s19 + $0xa04] ss:$40 sps:$4 sm:$0xff]   ;;  %v964_v19 = vcombine.high %v962_v62, %v962_v62 }
  0x2e   : > { %3412 = vmatpush1.bf16.msra.mxu1 %v6113_v24  ;;  %v6171_v13 = vld [vmem:[%s6992_s19 + $0x9b4] ss:$40 sps:$4 sm:$0xff]   ;;  %v6174_v16 = vld [vmem:[%s6992_s19 + $0x9b0] ss:$40 sps:$4 sm:$0xff]   ;;  %v6175_v20 = vld [vmem:[%s6992_s19 + $0xa00] ss:$40 sps:$4 sm:$0xff]  }
  0x2f   : > { %3453 = vmatpush1.bf16.msra.mxu0 %v6114_v25  ;;  %3413 = vmatprep.subr.bf16.mxu1 %v6115_v26  ;;  %v7059_v0 = vrot.slane %v963_v61, %v7042_v51  ;;  %v6180_v18 = vld [vmem:[%s6992_s19 + $0xc] ss:$40 sps:$4 sm:$0xff]   ;;  %v7091_v21 = vcombine.high %v7083_v15, %v7083_v15  ;;  %v6178_v22 = vld [vmem:[%s6992_s19 + $0x8] ss:$40 sps:$4 sm:$0xff]   ;;  %v6186_v24 = vld [vmem:[%s6992_s19 + $0x5c] ss:$40 sps:$4 sm:$0xff]   ;;  %v7097_v25 = vrot.slane %v964_v19, %v7042_v51 }
  0x30   : > { %3454 = vmatprep.subr.bf16.mxu0 %v6117_v27  ;;  %v6183_v23 = vld [vmem:[%s6992_s19 + $0xa54] ss:$40 sps:$4 sm:$0xff]   ;;  %v6181_v26 = vld [vmem:[%s6992_s19 + $0xa50] ss:$40 sps:$4 sm:$0xff]   ;;  %v6199_v38 = vld [vmem:[%s6992_s19 + $0xb40] ss:$40 sps:$4 sm:$0xff]  }
  0x31   : > { %v7069_v5 = vcombine.high %v7059_v0, %v7059_v0  ;;  %3433 = vmatprep.mubr.bf16.mxu1 %v7059_v0  ;;  %v6184_v27 = vld [vmem:[%s6992_s19 + $0x58] ss:$40 sps:$4 sm:$0xff]   ;;  %v6202_v39 = vld [vmem:[%s6992_s19 + $0x148] ss:$40 sps:$4 sm:$0xff]   ;;  %v6207_v40 = vld [vmem:[%s6992_s19 + $0xb94] ss:$40 sps:$4 sm:$0xff]  }
  0x32   : > { %3414 = vmatpush1.bf16.msra.mxu1 %v6119_v28  ;;  %v6189_v28 = vld [vmem:[%s6992_s19 + $0xaa4] ss:$40 sps:$4 sm:$0xff]   ;;  %v6217_v51 = vld [vmem:[%s6992_s19 + $0xc30] ss:$40 sps:$4 sm:$0xff]   ;;  %v6231_v57 = vld [vmem:[%s6992_s19 + $0xcd4] ss:$40 sps:$4 sm:$0xff]  }
  0x33   : > { %3455 = vmatpush1.bf16.msra.mxu0 %v6120_v29  ;;  %3415 = vmatprep.subr.bf16.mxu1 %v6121_v30  ;;  %v6192_v29 = vld [vmem:[%s6992_s19 + $0xac] ss:$40 sps:$4 sm:$0xff]   ;;  %v6187_v30 = vld [vmem:[%s6992_s19 + $0xaa0] ss:$40 sps:$4 sm:$0xff]   ;;  %vm4077_vm4 = vcmask 93186   ;;  %p5800_p6 = scmp.ne.s32.totalorder %s6977_s28, 2 }
  0x34   : > { %3456 = vmatprep.subr.bf16.mxu0 %v6123_v31  ;;  %3474 = vmatprep.mubr.bf16.mxu0 %v7069_v5  ;;  %v6190_v31 = vld [vmem:[%s6992_s19 + $0xa8] ss:$40 sps:$4 sm:$0xff]   ;;  %v6213_v44 = vld [vmem:[%s6992_s19 + $0xbe4] ss:$40 sps:$4 sm:$0xff]   ;;  %vm4078_vm5 = vmor %vm4077_vm4, %vm4076_vm3  ;;  %vm4849_vm9 = vcmask (!%p5800_p6), 97280   ;;  %vm4853_vm10 = vcmask (!%p5800_p6), 1045504  }
  0x35   : > { %v6228_v54 = vld [vmem:[%s6992_s19 + $0x28c] ss:$40 sps:$4 sm:$0xff]   ;;  %v6226_v56 = vld [vmem:[%s6992_s19 + $0x288] ss:$40 sps:$4 sm:$0xff]   ;;  %vm6897_vm11 = vmmov (!%p5800_p6), 0   ;;  %vm5122_vm13 = vcmask (!%p5800_p6), 818176  }
  0x36   : > { %3416 = vmatpush1.bf16.msra.mxu1 %v6125_v32  ;;  %v6195_v32 = vld [vmem:[%s6992_s19 + $0xaf4] ss:$40 sps:$4 sm:$0xff]   ;;  %v6237_v61 = vld [vmem:[%s6992_s19 + $0xd24] ss:$40 sps:$4 sm:$0xff]   ;;  %v6259_v19 = vld [vmem:[%s6992_s19 + $0xe60] ss:$40 sps:$4 sm:$0xff]  }
  0x37   : > { %3457 = vmatpush1.bf16.msra.mxu0 %v6126_v33  ;;  %3417 = vmatprep.subr.bf16.mxu1 %v6127_v34  ;;  %v6198_v33 = vld [vmem:[%s6992_s19 + $0xfc] ss:$40 sps:$4 sm:$0xff]   ;;  %v6193_v34 = vld [vmem:[%s6992_s19 + $0xaf0] ss:$40 sps:$4 sm:$0xff]   ;;  %v6240_v62 = vld [vmem:[%s6992_s19 + $0x32c] ss:$40 sps:$4 sm:$0xff]  }
  0x38   : > { %3458 = vmatprep.subr.bf16.mxu0 %v6129_v35  ;;  %v6196_v35 = vld [vmem:[%s6992_s19 + $0xf8] ss:$40 sps:$4 sm:$0xff]   ;;  %vm5210_vm14 = vcmask (!%p5800_p6), 1040384   ;;  %vm5206_vm15 = vcmask (!%p5800_p6), 408576   ;;  %vm5263_vm0 = vcmask (!%p5800_p6), 74752   ;;  %vm5275_vm1 = vcmask (!%p5800_p6), 1024  }
  0x3a   : > { %3418 = vmatpush1.bf16.msra.mxu1 %v6131_v36  ;;  %v6201_v36 = vld [vmem:[%s6992_s19 + $0xb44] ss:$40 sps:$4 sm:$0xff]  }
  0x3b   : > { %3459 = vmatpush1.bf16.msra.mxu0 %v6132_v37  ;;  %3419 = vmatprep.subr.bf16.mxu1 %v6133_v41  ;;  %v6204_v37 = vld [vmem:[%s6992_s19 + $0x14c] ss:$40 sps:$4 sm:$0xff]   ;;  %v6210_v41 = vld [vmem:[%s6992_s19 + $0x19c] ss:$40 sps:$4 sm:$0xff]  }
  0x3c   : > { %3460 = vmatprep.subr.bf16.mxu0 %v6135_v42  ;;  %v6205_v42 = vld [vmem:[%s6992_s19 + $0xb90] ss:$40 sps:$4 sm:$0xff]  }
  0x3e   : > { %3420 = vmatpush1.bf16.msra.mxu1 %v6137_v43  ;;  %v6208_v43 = vld [vmem:[%s6992_s19 + $0x198] ss:$40 sps:$4 sm:$0xff]  }
  0x3f   : > { %3461 = vmatpush1.bf16.msra.mxu0 %v6138_v46  ;;  %3421 = vmatprep.subr.bf16.mxu1 %v6139_v47  ;;  %v6216_v46 = vld [vmem:[%s6992_s19 + $0x1ec] ss:$40 sps:$4 sm:$0xff]   ;;  %v6211_v47 = vld [vmem:[%s6992_s19 + $0xbe0] ss:$40 sps:$4 sm:$0xff]  }
  0x40   : > { %3462 = vmatprep.subr.bf16.mxu0 %v6141_v48  ;;  %v6214_v48 = vld [vmem:[%s6992_s19 + $0x1e8] ss:$40 sps:$4 sm:$0xff]  }
  0x42   : > { %3422 = vmatpush1.bf16.msra.mxu1 %v6143_v49  ;;  %v6219_v49 = vld [vmem:[%s6992_s19 + $0xc34] ss:$40 sps:$4 sm:$0xff]  }
  0x43   : > { %3463 = vmatpush1.bf16.msra.mxu0 %v6144_v50  ;;  %3423 = vmatprep.subr.bf16.mxu1 %v6145_v52  ;;  %v6222_v50 = vld [vmem:[%s6992_s19 + $0x23c] ss:$40 sps:$4 sm:$0xff]   ;;  %v6220_v52 = vld [vmem:[%s6992_s19 + $0x238] ss:$40 sps:$4 sm:$0xff]  }
  0x44   : > { %3464 = vmatprep.subr.bf16.mxu0 %v6147_v53  ;;  %v6225_v53 = vld [vmem:[%s6992_s19 + $0xc84] ss:$40 sps:$4 sm:$0xff]  }
  0x46   : > { %3424 = vmatpush1.bf16.msra.mxu1 %v6149_v55  ;;  %v6223_v55 = vld [vmem:[%s6992_s19 + $0xc80] ss:$40 sps:$4 sm:$0xff]  }
  0x47   : > { %3465 = vmatpush1.bf16.msra.mxu0 %v6150_v58  ;;  %3425 = vmatprep.subr.bf16.mxu1 %v6151_v59  ;;  %v6234_v58 = vld [vmem:[%s6992_s19 + $0x2dc] ss:$40 sps:$4 sm:$0xff]   ;;  %v6229_v59 = vld [vmem:[%s6992_s19 + $0xcd0] ss:$40 sps:$4 sm:$0xff]  }
  0x48   : > { %3466 = vmatprep.subr.bf16.mxu0 %v6153_v60  ;;  %v6232_v60 = vld [vmem:[%s6992_s19 + $0x2d8] ss:$40 sps:$4 sm:$0xff]  }
  0x4a   : > { %3426 = vmatpush1.bf16.msra.mxu1 %v6155_v63  ;;  %v6235_v63 = vld [vmem:[%s6992_s19 + $0xd20] ss:$40 sps:$4 sm:$0xff]  }
  0x4b   : > { %3467 = vmatpush1.bf16.msra.mxu0 %v6156_v2  ;;  %3427 = vmatprep.subr.bf16.mxu1 %v6157_v3  ;;  %v6238_v2 = vld [vmem:[%s6992_s19 + $0x328] ss:$40 sps:$4 sm:$0xff]   ;;  %v6243_v3 = vld [vmem:[%s6992_s19 + $0xd74] ss:$40 sps:$4 sm:$0xff]  }
  0x4c   : > { %3468 = vmatprep.subr.bf16.mxu0 %v6159_v4  ;;  %v6246_v4 = vld [vmem:[%s6992_s19 + $0x37c] ss:$40 sps:$4 sm:$0xff]  }
  0x4e   : > { %3428 = vmatpush1.bf16.msra.mxu1 %v6161_v6  ;;  %v6241_v6 = vld [vmem:[%s6992_s19 + $0xd70] ss:$40 sps:$4 sm:$0xff]  }
  0x4f   : > { %3469 = vmatpush1.bf16.msra.mxu0 %v6162_v7  ;;  %3429 = vmatprep.subr.bf16.mxu1 %v6163_v8  ;;  %v6244_v7 = vld [vmem:[%s6992_s19 + $0x378] ss:$40 sps:$4 sm:$0xff]   ;;  %v6249_v8 = vld [vmem:[%s6992_s19 + $0xdc4] ss:$40 sps:$4 sm:$0xff]  }
  0x50   : > { %3470 = vmatprep.subr.bf16.mxu0 %v6165_v9  ;;  %v6252_v9 = vld [vmem:[%s6992_s19 + $0x3cc] ss:$40 sps:$4 sm:$0xff]  }
  0x52   : > { %3430 = vmatpush1.bf16.msra.mxu1 %v6167_v10  ;;  %v6247_v10 = vld [vmem:[%s6992_s19 + $0xdc0] ss:$40 sps:$4 sm:$0xff]  }
  0x53   : > { %3471 = vmatpush1.bf16.msra.mxu0 %v6168_v11  ;;  %3431 = vmatprep.subr.bf16.mxu1 %v6169_v12  ;;  %v6250_v11 = vld [vmem:[%s6992_s19 + $0x3c8] ss:$40 sps:$4 sm:$0xff]   ;;  %v6255_v12 = vld [vmem:[%s6992_s19 + $0xe14] ss:$40 sps:$4 sm:$0xff]  }
  0x54   : > { %3472 = vmatprep.subr.bf16.mxu0 %v6171_v13  ;;  %v6258_v13 = vld [vmem:[%s6992_s19 + $0x41c] ss:$40 sps:$4 sm:$0xff]  }
  0x56   : > { %3432 = vmatpush1.bf16.msra.mxu1 %v6173_v14  ;;  %v6253_v14 = vld [vmem:[%s6992_s19 + $0xe10] ss:$40 sps:$4 sm:$0xff]  }
  0x57   : > { %3473 = vmatpush1.bf16.msra.mxu0 %v6174_v16  ;;  %3524 = vmatprep.subr.bf16.mxu1 %v6180_v18  ;;  %v6256_v16 = vld [vmem:[%s6992_s19 + $0x418] ss:$40 sps:$4 sm:$0xff]   ;;  %v6264_v18 = vld [vmem:[%s6992_s19 + $0x46c] ss:$40 sps:$4 sm:$0xff]  }
  0x58   : > { %3483 = vmatprep.subr.bf16.mxu0 %v6177_v17  ;;  %v6261_v17 = vld [vmem:[%s6992_s19 + $0xe64] ss:$40 sps:$4 sm:$0xff]  }
  0x59   : > { %3434 = vmatmul.mubr.bf16.vlgmr.msra.gmra.mrb[0].mxu1 %v7083_v15 }
  0x5a   : > { %3475 = vmatmul.mubr.bf16.vlgmr.msra.gmra.mrb[0].mxu0 %v7091_v21  ;;  %3525 = vmatpush1.bf16.msra.mxu1 %v6178_v22  ;;  %v6267_v22 = vld [vmem:[%s6992_s19 + $0xeb4] ss:$40 sps:$4 sm:$0xff]  }
  0x5b   : > { %3484 = vmatpush1.bf16.msra.mxu0 %v6175_v20  ;;  %3526 = vmatprep.subr.bf16.mxu1 %v6186_v24  ;;  %v6262_v20 = vld [vmem:[%s6992_s19 + $0x468] ss:$40 sps:$4 sm:$0xff]  }
  0x5c   : > { %3485 = vmatprep.subr.bf16.mxu0 %v6183_v23  ;;  %3515 = vmatprep.mubr.bf16.mxu0 %v7097_v25  ;;  %v6270_v23 = vld [vmem:[%s6992_s19 + $0x4bc] ss:$40 sps:$4 sm:$0xff]   ;;  %v6265_v24 = vld [vmem:[%s6992_s19 + $0xeb0] ss:$40 sps:$4 sm:$0xff]  }
  0x5d   : > { %3556 = vmatprep.mubr.bf16.mxu1 %v7059_v0 }
  0x5e   : > { %3527 = vmatpush1.bf16.msra.mxu1 %v6184_v27  ;;  %v6274_v27 = vld [vmem:[%s6992_s19 + $0x50c] ss:$40 sps:$4 sm:$0xff]  }
  0x5f   : > { %3486 = vmatpush1.bf16.msra.mxu0 %v6181_v26  ;;  %3528 = vmatprep.subr.bf16.mxu1 %v6192_v29  ;;  %v6268_v26 = vld [vmem:[%s6992_s19 + $0x4b8] ss:$40 sps:$4 sm:$0xff]   ;;  %v6272_v29 = vld [vmem:[%s6992_s19 + $0x508] ss:$40 sps:$4 sm:$0xff]  }
  0x60   : > { %3487 = vmatprep.subr.bf16.mxu0 %v6189_v28  ;;  %v6277_v28 = vld [vmem:[%s6992_s19 + $0x14] ss:$40 sps:$4 sm:$0xff]  }
  0x62   : > { %3529 = vmatpush1.bf16.msra.mxu1 %v6190_v31  ;;  %v6280_v31 = vld [vmem:[%s6992_s19 + $0x55c] ss:$40 sps:$4 sm:$0xff]  }
  0x63   : > { %3488 = vmatpush1.bf16.msra.mxu0 %v6187_v30  ;;  %3530 = vmatprep.subr.bf16.mxu1 %v6198_v33  ;;  %v6275_v30 = vld [vmem:[%s6992_s19 + $0x10] ss:$40 sps:$4 sm:$0xff]  }
  0x64   : > { %3489 = vmatprep.subr.bf16.mxu0 %v6195_v32  ;;  %v6283_v32 = vld [vmem:[%s6992_s19 + $0x64] ss:$40 sps:$4 sm:$0xff]   ;;  %v6278_v33 = vld [vmem:[%s6992_s19 + $0x558] ss:$40 sps:$4 sm:$0xff]  }
  0x66   : > { %3531 = vmatpush1.bf16.msra.mxu1 %v6196_v35  ;;  %v6286_v35 = vld [vmem:[%s6992_s19 + $0x5ac] ss:$40 sps:$4 sm:$0xff]  }
  0x67   : > { %3490 = vmatpush1.bf16.msra.mxu0 %v6193_v34  ;;  %3532 = vmatprep.subr.bf16.mxu1 %v6204_v37  ;;  %v6281_v34 = vld [vmem:[%s6992_s19 + $0x60] ss:$40 sps:$4 sm:$0xff]  }
  0x68   : > { %3491 = vmatprep.subr.bf16.mxu0 %v6201_v36  ;;  %v6289_v36 = vld [vmem:[%s6992_s19 + $0xb4] ss:$40 sps:$4 sm:$0xff]   ;;  %v6284_v37 = vld [vmem:[%s6992_s19 + $0x5a8] ss:$40 sps:$4 sm:$0xff]  }
  0x6a   : > { %3533 = vmatpush1.bf16.msra.mxu1 %v6202_v39  ;;  %v6292_v39 = vld [vmem:[%s6992_s19 + $0x5fc] ss:$40 sps:$4 sm:$0xff]  }
  0x6b   : > { %3492 = vmatpush1.bf16.msra.mxu0 %v6199_v38  ;;  %3534 = vmatprep.subr.bf16.mxu1 %v6210_v41  ;;  %v6287_v38 = vld [vmem:[%s6992_s19 + $0xb0] ss:$40 sps:$4 sm:$0xff]  }
  0x6c   : > { %3493 = vmatprep.subr.bf16.mxu0 %v6207_v40  ;;  %v6295_v40 = vld [vmem:[%s6992_s19 + $0x104] ss:$40 sps:$4 sm:$0xff]   ;;  %v6290_v41 = vld [vmem:[%s6992_s19 + $0x5f8] ss:$40 sps:$4 sm:$0xff]  }
  0x6e   : > { %3535 = vmatpush1.bf16.msra.mxu1 %v6208_v43  ;;  %v6298_v43 = vld [vmem:[%s6992_s19 + $0x64c] ss:$40 sps:$4 sm:$0xff]  }
  0x6f   : > { %3494 = vmatpush1.bf16.msra.mxu0 %v6205_v42  ;;  %3536 = vmatprep.subr.bf16.mxu1 %v6216_v46  ;;  %v6293_v42 = vld [vmem:[%s6992_s19 + $0x100] ss:$40 sps:$4 sm:$0xff]  }
  0x70   : > { %3495 = vmatprep.subr.bf16.mxu0 %v6213_v44  ;;  %v6301_v44 = vld [vmem:[%s6992_s19 + $0x154] ss:$40 sps:$4 sm:$0xff]   ;;  %v6296_v46 = vld [vmem:[%s6992_s19 + $0x648] ss:$40 sps:$4 sm:$0xff]  }
  0x72   : > { %3537 = vmatpush1.bf16.msra.mxu1 %v6214_v48  ;;  %v6304_v48 = vld [vmem:[%s6992_s19 + $0x69c] ss:$40 sps:$4 sm:$0xff]  }
  0x73   : > { %3496 = vmatpush1.bf16.msra.mxu0 %v6211_v47  ;;  %3538 = vmatprep.subr.bf16.mxu1 %v6222_v50  ;;  %v6299_v47 = vld [vmem:[%s6992_s19 + $0x150] ss:$40 sps:$4 sm:$0xff]  }
  0x74   : > { %3497 = vmatprep.subr.bf16.mxu0 %v6219_v49  ;;  %v6307_v49 = vld [vmem:[%s6992_s19 + $0x1a4] ss:$40 sps:$4 sm:$0xff]   ;;  %v6302_v50 = vld [vmem:[%s6992_s19 + $0x698] ss:$40 sps:$4 sm:$0xff]  }
  0x76   : > { %3539 = vmatpush1.bf16.msra.mxu1 %v6220_v52  ;;  %v6310_v52 = vld [vmem:[%s6992_s19 + $0x6ec] ss:$40 sps:$4 sm:$0xff]  }
  0x77   : > { %3498 = vmatpush1.bf16.msra.mxu0 %v6217_v51  ;;  %3540 = vmatprep.subr.bf16.mxu1 %v6228_v54  ;;  %v6305_v51 = vld [vmem:[%s6992_s19 + $0x1a0] ss:$40 sps:$4 sm:$0xff]  }
  0x78   : > { %3499 = vmatprep.subr.bf16.mxu0 %v6225_v53  ;;  %v6313_v53 = vld [vmem:[%s6992_s19 + $0x1f4] ss:$40 sps:$4 sm:$0xff]   ;;  %v6308_v54 = vld [vmem:[%s6992_s19 + $0x6e8] ss:$40 sps:$4 sm:$0xff]  }
  0x7a   : > { %3541 = vmatpush1.bf16.msra.mxu1 %v6226_v56  ;;  %v6316_v56 = vld [vmem:[%s6992_s19 + $0x73c] ss:$40 sps:$4 sm:$0xff]  }
  0x7b   : > { %3500 = vmatpush1.bf16.msra.mxu0 %v6223_v55  ;;  %3542 = vmatprep.subr.bf16.mxu1 %v6234_v58  ;;  %v6311_v55 = vld [vmem:[%s6992_s19 + $0x1f0] ss:$40 sps:$4 sm:$0xff]  }
  0x7c   : > { %3501 = vmatprep.subr.bf16.mxu0 %v6231_v57  ;;  %v6319_v57 = vld [vmem:[%s6992_s19 + $0x244] ss:$40 sps:$4 sm:$0xff]   ;;  %v6314_v58 = vld [vmem:[%s6992_s19 + $0x738] ss:$40 sps:$4 sm:$0xff]  }
  0x7e   : > { %3543 = vmatpush1.bf16.msra.mxu1 %v6232_v60  ;;  %v6322_v60 = vld [vmem:[%s6992_s19 + $0x78c] ss:$40 sps:$4 sm:$0xff]  }
  0x7f   : > { %3502 = vmatpush1.bf16.msra.mxu0 %v6229_v59  ;;  %3544 = vmatprep.subr.bf16.mxu1 %v6240_v62  ;;  %v6317_v59 = vld [vmem:[%s6992_s19 + $0x240] ss:$40 sps:$4 sm:$0xff]  }
  0x80   : > { %3503 = vmatprep.subr.bf16.mxu0 %v6237_v61  ;;  %v6325_v61 = vld [vmem:[%s6992_s19 + $0x294] ss:$40 sps:$4 sm:$0xff]   ;;  %v6320_v62 = vld [vmem:[%s6992_s19 + $0x788] ss:$40 sps:$4 sm:$0xff]  }
  0x82   : > { %3545 = vmatpush1.bf16.msra.mxu1 %v6238_v2  ;;  %v6328_v2 = vld [vmem:[%s6992_s19 + $0x7dc] ss:$40 sps:$4 sm:$0xff]  }
  0x83   : > { %3504 = vmatpush1.bf16.msra.mxu0 %v6235_v63  ;;  %3546 = vmatprep.subr.bf16.mxu1 %v6246_v4  ;;  %v6323_v63 = vld [vmem:[%s6992_s19 + $0x290] ss:$40 sps:$4 sm:$0xff]  }
  0x84   : > { %3505 = vmatprep.subr.bf16.mxu0 %v6243_v3  ;;  %v6331_v3 = vld [vmem:[%s6992_s19 + $0x2e4] ss:$40 sps:$4 sm:$0xff]   ;;  %v6326_v4 = vld [vmem:[%s6992_s19 + $0x7d8] ss:$40 sps:$4 sm:$0xff]  }
  0x86   : > { %3547 = vmatpush1.bf16.msra.mxu1 %v6244_v7  ;;  %v6334_v7 = vld [vmem:[%s6992_s19 + $0x82c] ss:$40 sps:$4 sm:$0xff]  }
  0x87   : > { %3506 = vmatpush1.bf16.msra.mxu0 %v6241_v6  ;;  %3548 = vmatprep.subr.bf16.mxu1 %v6252_v9  ;;  %v6329_v6 = vld [vmem:[%s6992_s19 + $0x2e0] ss:$40 sps:$4 sm:$0xff]  }
  0x88   : > { %3507 = vmatprep.subr.bf16.mxu0 %v6249_v8  ;;  %v6337_v8 = vld [vmem:[%s6992_s19 + $0x334] ss:$40 sps:$4 sm:$0xff]   ;;  %v6332_v9 = vld [vmem:[%s6992_s19 + $0x828] ss:$40 sps:$4 sm:$0xff]  }
  0x8a   : > { %3549 = vmatpush1.bf16.msra.mxu1 %v6250_v11  ;;  %v6340_v11 = vld [vmem:[%s6992_s19 + $0x87c] ss:$40 sps:$4 sm:$0xff]  }
  0x8b   : > { %3508 = vmatpush1.bf16.msra.mxu0 %v6247_v10  ;;  %3550 = vmatprep.subr.bf16.mxu1 %v6258_v13  ;;  %v6335_v10 = vld [vmem:[%s6992_s19 + $0x330] ss:$40 sps:$4 sm:$0xff]  }
  0x8c   : > { %3509 = vmatprep.subr.bf16.mxu0 %v6255_v12  ;;  %v6343_v12 = vld [vmem:[%s6992_s19 + $0x384] ss:$40 sps:$4 sm:$0xff]   ;;  %v6338_v13 = vld [vmem:[%s6992_s19 + $0x878] ss:$40 sps:$4 sm:$0xff]  }
  0x8e   : > { %3551 = vmatpush1.bf16.msra.mxu1 %v6256_v16  ;;  %v6346_v16 = vld [vmem:[%s6992_s19 + $0x8cc] ss:$40 sps:$4 sm:$0xff]  }
  0x8f   : > { %3510 = vmatpush1.bf16.msra.mxu0 %v6253_v14  ;;  %3552 = vmatprep.subr.bf16.mxu1 %v6264_v18  ;;  %v6341_v14 = vld [vmem:[%s6992_s19 + $0x380] ss:$40 sps:$4 sm:$0xff]  }
  0x90   : > { %3511 = vmatprep.subr.bf16.mxu0 %v6261_v17  ;;  %v6349_v17 = vld [vmem:[%s6992_s19 + $0x3d4] ss:$40 sps:$4 sm:$0xff]   ;;  %v6344_v18 = vld [vmem:[%s6992_s19 + $0x8c8] ss:$40 sps:$4 sm:$0xff]  }
  0x92   : > { %3553 = vmatpush1.bf16.msra.mxu1 %v6262_v20  ;;  %v6352_v20 = vld [vmem:[%s6992_s19 + $0x91c] ss:$40 sps:$4 sm:$0xff]  }
  0x93   : > { %3512 = vmatpush1.bf16.msra.mxu0 %v6259_v19  ;;  %3554 = vmatprep.subr.bf16.mxu1 %v6270_v23  ;;  %v6347_v19 = vld [vmem:[%s6992_s19 + $0x3d0] ss:$40 sps:$4 sm:$0xff]  }
  0x94   : > { %3513 = vmatprep.subr.bf16.mxu0 %v6267_v22  ;;  %v6355_v22 = vld [vmem:[%s6992_s19 + $0x424] ss:$40 sps:$4 sm:$0xff]   ;;  %v6350_v23 = vld [vmem:[%s6992_s19 + $0x918] ss:$40 sps:$4 sm:$0xff]  }
  0x96   : > { %3555 = vmatpush1.bf16.msra.mxu1 %v6268_v26  ;;  %v6358_v26 = vld [vmem:[%s6992_s19 + $0x96c] ss:$40 sps:$4 sm:$0xff]  }
  0x97   : > { %3514 = vmatpush1.bf16.msra.mxu0 %v6265_v24  ;;  %3565 = vmatprep.subr.bf16.mxu1 %v6274_v27  ;;  %v6353_v24 = vld [vmem:[%s6992_s19 + $0x420] ss:$40 sps:$4 sm:$0xff]   ;;  %v6361_v27 = vld [vmem:[%s6992_s19 + $0x474] ss:$40 sps:$4 sm:$0xff]  }
  0x98   : > { %3647 = vmatprep.subr.bf16.mxu0 %v6277_v28  ;;  %v6356_v28 = vld [vmem:[%s6992_s19 + $0x968] ss:$40 sps:$4 sm:$0xff]  }
  0x99   : > { %3557 = vmatmul.mubr.bf16.vlgmr.msra.gmra.mrb[4].mxu1 %v7083_v15 }
  0x9a   : > { %3516 = vmatmul.mubr.bf16.vlgmr.msra.gmra.mrb[0].mxu0 %v7062_v1  ;;  %3566 = vmatpush1.bf16.msra.mxu1 %v6272_v29  ;;  %v6359_v29 = vld [vmem:[%s6992_s19 + $0x470] ss:$40 sps:$4 sm:$0xff]  }
  0x9b   : > { %3648 = vmatpush1.bf16.msra.mxu0 %v6275_v30  ;;  %3567 = vmatprep.subr.bf16.mxu1 %v6280_v31  ;;  %v6364_v30 = vld [vmem:[%s6992_s19 + $0x9bc] ss:$40 sps:$4 sm:$0xff]  }
  0x9c   : > { %3649 = vmatprep.subr.bf16.mxu0 %v6283_v32  ;;  %3597 = vmatprep.mubr.bf16.mxu1 %v7069_v5  ;;  %v6367_v31 = vld [vmem:[%s6992_s19 + $0x4c4] ss:$40 sps:$4 sm:$0xff]   ;;  %v6362_v32 = vld [vmem:[%s6992_s19 + $0x9b8] ss:$40 sps:$4 sm:$0xff]  }
  0x9d   : > { %3679 = vmatprep.mubr.bf16.mxu0 %v7059_v0 }
  0x9e   : > { %3568 = vmatpush1.bf16.msra.mxu1 %v6278_v33  ;;  %v6365_v33 = vld [vmem:[%s6992_s19 + $0x4c0] ss:$40 sps:$4 sm:$0xff]  }
  0x9f   : > { %3650 = vmatpush1.bf16.msra.mxu0 %v6281_v34  ;;  %3569 = vmatprep.subr.bf16.mxu1 %v6286_v35  ;;  %v6370_v34 = vld [vmem:[%s6992_s19 + $0xa0c] ss:$40 sps:$4 sm:$0xff]  }
  0xa0   : > { %3651 = vmatprep.subr.bf16.mxu0 %v6289_v36  ;;  %v6373_v35 = vld [vmem:[%s6992_s19 + $0x514] ss:$40 sps:$4 sm:$0xff]   ;;  %v6368_v36 = vld [vmem:[%s6992_s19 + $0xa08] ss:$40 sps:$4 sm:$0xff]  }
  0xa2   : > { %3570 = vmatpush1.bf16.msra.mxu1 %v6284_v37  ;;  %v6371_v37 = vld [vmem:[%s6992_s19 + $0x510] ss:$40 sps:$4 sm:$0xff]  }
  0xa3   : > { %3652 = vmatpush1.bf16.msra.mxu0 %v6287_v38  ;;  %3571 = vmatprep.subr.bf16.mxu1 %v6292_v39  ;;  %v6376_v38 = vld [vmem:[%s6992_s19 + $0xa5c] ss:$40 sps:$4 sm:$0xff]  }
  0xa4   : > { %3653 = vmatprep.subr.bf16.mxu0 %v6295_v40  ;;  %v6379_v39 = vld [vmem:[%s6992_s19 + $0x564] ss:$40 sps:$4 sm:$0xff]   ;;  %v6374_v40 = vld [vmem:[%s6992_s19 + $0xa58] ss:$40 sps:$4 sm:$0xff]  }
  0xa6   : > { %3572 = vmatpush1.bf16.msra.mxu1 %v6290_v41  ;;  %v6377_v41 = vld [vmem:[%s6992_s19 + $0x560] ss:$40 sps:$4 sm:$0xff]  }
  0xa7   : > { %3654 = vmatpush1.bf16.msra.mxu0 %v6293_v42  ;;  %3573 = vmatprep.subr.bf16.mxu1 %v6298_v43  ;;  %v6382_v42 = vld [vmem:[%s6992_s19 + $0xaac] ss:$40 sps:$4 sm:$0xff]  }
  0xa8   : > { %3655 = vmatprep.subr.bf16.mxu0 %v6301_v44  ;;  %v6385_v43 = vld [vmem:[%s6992_s19 + $0x5b4] ss:$40 sps:$4 sm:$0xff]   ;;  %v6380_v44 = vld [vmem:[%s6992_s19 + $0xaa8] ss:$40 sps:$4 sm:$0xff]  }
  0xaa   : > { %3574 = vmatpush1.bf16.msra.mxu1 %v6296_v46  ;;  %v6383_v46 = vld [vmem:[%s6992_s19 + $0x5b0] ss:$40 sps:$4 sm:$0xff]  }
  0xab   : > { %3656 = vmatpush1.bf16.msra.mxu0 %v6299_v47  ;;  %3575 = vmatprep.subr.bf16.mxu1 %v6304_v48  ;;  %v6388_v47 = vld [vmem:[%s6992_s19 + $0xafc] ss:$40 sps:$4 sm:$0xff]  }
  0xac   : > { %3657 = vmatprep.subr.bf16.mxu0 %v6307_v49  ;;  %v6391_v48 = vld [vmem:[%s6992_s19 + $0x604] ss:$40 sps:$4 sm:$0xff]   ;;  %v6386_v49 = vld [vmem:[%s6992_s19 + $0xaf8] ss:$40 sps:$4 sm:$0xff]  }
  0xae   : > { %3576 = vmatpush1.bf16.msra.mxu1 %v6302_v50  ;;  %v6389_v50 = vld [vmem:[%s6992_s19 + $0x600] ss:$40 sps:$4 sm:$0xff]  }
  0xaf   : > { %3658 = vmatpush1.bf16.msra.mxu0 %v6305_v51  ;;  %3577 = vmatprep.subr.bf16.mxu1 %v6310_v52  ;;  %v6394_v51 = vld [vmem:[%s6992_s19 + $0xb4c] ss:$40 sps:$4 sm:$0xff]  }
  0xb0   : > { %3659 = vmatprep.subr.bf16.mxu0 %v6313_v53  ;;  %v6397_v52 = vld [vmem:[%s6992_s19 + $0x654] ss:$40 sps:$4 sm:$0xff]   ;;  %v6392_v53 = vld [vmem:[%s6992_s19 + $0xb48] ss:$40 sps:$4 sm:$0xff]  }
  0xb2   : > { %3578 = vmatpush1.bf16.msra.mxu1 %v6308_v54  ;;  %v6395_v54 = vld [vmem:[%s6992_s19 + $0x650] ss:$40 sps:$4 sm:$0xff]  }
  0xb3   : > { %3660 = vmatpush1.bf16.msra.mxu0 %v6311_v55  ;;  %3579 = vmatprep.subr.bf16.mxu1 %v6316_v56  ;;  %v6400_v55 = vld [vmem:[%s6992_s19 + $0xb9c] ss:$40 sps:$4 sm:$0xff]  }
  0xb4   : > { %3661 = vmatprep.subr.bf16.mxu0 %v6319_v57  ;;  %v6403_v56 = vld [vmem:[%s6992_s19 + $0x6a4] ss:$40 sps:$4 sm:$0xff]   ;;  %v6398_v57 = vld [vmem:[%s6992_s19 + $0xb98] ss:$40 sps:$4 sm:$0xff]  }
  0xb6   : > { %3580 = vmatpush1.bf16.msra.mxu1 %v6314_v58  ;;  %v6401_v58 = vld [vmem:[%s6992_s19 + $0x6a0] ss:$40 sps:$4 sm:$0xff]  }
  0xb7   : > { %3662 = vmatpush1.bf16.msra.mxu0 %v6317_v59  ;;  %3581 = vmatprep.subr.bf16.mxu1 %v6322_v60  ;;  %v6406_v59 = vld [vmem:[%s6992_s19 + $0xbec] ss:$40 sps:$4 sm:$0xff]  }
  0xb8   : > { %3663 = vmatprep.subr.bf16.mxu0 %v6325_v61  ;;  %v6409_v60 = vld [vmem:[%s6992_s19 + $0x6f4] ss:$40 sps:$4 sm:$0xff]   ;;  %v6404_v61 = vld [vmem:[%s6992_s19 + $0xbe8] ss:$40 sps:$4 sm:$0xff]  }
  0xba   : > { %3582 = vmatpush1.bf16.msra.mxu1 %v6320_v62  ;;  %v6407_v62 = vld [vmem:[%s6992_s19 + $0x6f0] ss:$40 sps:$4 sm:$0xff]  }
  0xbb   : > { %3664 = vmatpush1.bf16.msra.mxu0 %v6323_v63  ;;  %3583 = vmatprep.subr.bf16.mxu1 %v6328_v2  ;;  %v6412_v63 = vld [vmem:[%s6992_s19 + $0xc3c] ss:$40 sps:$4 sm:$0xff]  }
  0xbc   : > { %3665 = vmatprep.subr.bf16.mxu0 %v6331_v3  ;;  %v6415_v2 = vld [vmem:[%s6992_s19 + $0x744] ss:$40 sps:$4 sm:$0xff]   ;;  %v6410_v3 = vld [vmem:[%s6992_s19 + $0xc38] ss:$40 sps:$4 sm:$0xff]  }
  0xbe   : > { %3584 = vmatpush1.bf16.msra.mxu1 %v6326_v4  ;;  %v6413_v4 = vld [vmem:[%s6992_s19 + $0x740] ss:$40 sps:$4 sm:$0xff]  }
  0xbf   : > { %3666 = vmatpush1.bf16.msra.mxu0 %v6329_v6  ;;  %3585 = vmatprep.subr.bf16.mxu1 %v6334_v7  ;;  %v6418_v6 = vld [vmem:[%s6992_s19 + $0xc8c] ss:$40 sps:$4 sm:$0xff]  }
  0xc0   : > { %3667 = vmatprep.subr.bf16.mxu0 %v6337_v8  ;;  %v6421_v7 = vld [vmem:[%s6992_s19 + $0x794] ss:$40 sps:$4 sm:$0xff]   ;;  %v6416_v8 = vld [vmem:[%s6992_s19 + $0xc88] ss:$40 sps:$4 sm:$0xff]  }
  0xc2   : > { %3586 = vmatpush1.bf16.msra.mxu1 %v6332_v9  ;;  %v6419_v9 = vld [vmem:[%s6992_s19 + $0x790] ss:$40 sps:$4 sm:$0xff]  }
  0xc3   : > { %3668 = vmatpush1.bf16.msra.mxu0 %v6335_v10  ;;  %3587 = vmatprep.subr.bf16.mxu1 %v6340_v11  ;;  %v6424_v10 = vld [vmem:[%s6992_s19 + $0xcdc] ss:$40 sps:$4 sm:$0xff]  }
  0xc4   : > { %3669 = vmatprep.subr.bf16.mxu0 %v6343_v12  ;;  %v6427_v11 = vld [vmem:[%s6992_s19 + $0x7e4] ss:$40 sps:$4 sm:$0xff]   ;;  %v6422_v12 = vld [vmem:[%s6992_s19 + $0xcd8] ss:$40 sps:$4 sm:$0xff]  }
  0xc6   : > { %3588 = vmatpush1.bf16.msra.mxu1 %v6338_v13  ;;  %v6425_v13 = vld [vmem:[%s6992_s19 + $0x7e0] ss:$40 sps:$4 sm:$0xff]  }
  0xc7   : > { %3670 = vmatpush1.bf16.msra.mxu0 %v6341_v14  ;;  %3589 = vmatprep.subr.bf16.mxu1 %v6346_v16  ;;  %v6430_v14 = vld [vmem:[%s6992_s19 + $0xd2c] ss:$40 sps:$4 sm:$0xff]  }
  0xc8   : > { %3671 = vmatprep.subr.bf16.mxu0 %v6349_v17  ;;  %v6433_v16 = vld [vmem:[%s6992_s19 + $0x834] ss:$40 sps:$4 sm:$0xff]   ;;  %v6428_v17 = vld [vmem:[%s6992_s19 + $0xd28] ss:$40 sps:$4 sm:$0xff]  }
  0xca   : > { %3590 = vmatpush1.bf16.msra.mxu1 %v6344_v18  ;;  %v6431_v18 = vld [vmem:[%s6992_s19 + $0x830] ss:$40 sps:$4 sm:$0xff]  }
  0xcb   : > { %3672 = vmatpush1.bf16.msra.mxu0 %v6347_v19  ;;  %3591 = vmatprep.subr.bf16.mxu1 %v6352_v20  ;;  %v6436_v19 = vld [vmem:[%s6992_s19 + $0xd7c] ss:$40 sps:$4 sm:$0xff]  }
  0xcc   : > { %3673 = vmatprep.subr.bf16.mxu0 %v6355_v22  ;;  %v6439_v20 = vld [vmem:[%s6992_s19 + $0x884] ss:$40 sps:$4 sm:$0xff]   ;;  %v6434_v22 = vld [vmem:[%s6992_s19 + $0xd78] ss:$40 sps:$4 sm:$0xff]  }
  0xce   : > { %3592 = vmatpush1.bf16.msra.mxu1 %v6350_v23  ;;  %v6437_v23 = vld [vmem:[%s6992_s19 + $0x880] ss:$40 sps:$4 sm:$0xff]  }
  0xcf   : > { %3674 = vmatpush1.bf16.msra.mxu0 %v6353_v24  ;;  %3593 = vmatprep.subr.bf16.mxu1 %v6358_v26  ;;  %v6442_v24 = vld [vmem:[%s6992_s19 + $0xdcc] ss:$40 sps:$4 sm:$0xff]  }
  0xd0   : > { %3675 = vmatprep.subr.bf16.mxu0 %v6361_v27  ;;  %v6445_v26 = vld [vmem:[%s6992_s19 + $0x8d4] ss:$40 sps:$4 sm:$0xff]   ;;  %v6440_v27 = vld [vmem:[%s6992_s19 + $0xdc8] ss:$40 sps:$4 sm:$0xff]  }
  0xd2   : > { %3594 = vmatpush1.bf16.msra.mxu1 %v6356_v28  ;;  %v6443_v28 = vld [vmem:[%s6992_s19 + $0x8d0] ss:$40 sps:$4 sm:$0xff]  }
  0xd3   : > { %3676 = vmatpush1.bf16.msra.mxu0 %v6359_v29  ;;  %3595 = vmatprep.subr.bf16.mxu1 %v6364_v30  ;;  %v6448_v29 = vld [vmem:[%s6992_s19 + $0xe1c] ss:$40 sps:$4 sm:$0xff]  }
  0xd4   : > { %3677 = vmatprep.subr.bf16.mxu0 %v6367_v31  ;;  %v6451_v30 = vld [vmem:[%s6992_s19 + $0x924] ss:$40 sps:$4 sm:$0xff]   ;;  %v6446_v31 = vld [vmem:[%s6992_s19 + $0xe18] ss:$40 sps:$4 sm:$0xff]  }
  0xd6   : > { %3596 = vmatpush1.bf16.msra.mxu1 %v6362_v32  ;;  %v6449_v32 = vld [vmem:[%s6992_s19 + $0x920] ss:$40 sps:$4 sm:$0xff]  }
  0xd7   : > { %3678 = vmatpush1.bf16.msra.mxu0 %v6365_v33  ;;  %3606 = vmatprep.subr.bf16.mxu1 %v6370_v34  ;;  %v6454_v33 = vld [vmem:[%s6992_s19 + $0xe6c] ss:$40 sps:$4 sm:$0xff]  }
  0xd8   : > { %3688 = vmatprep.subr.bf16.mxu0 %v6373_v35  ;;  %v6457_v34 = vld [vmem:[%s6992_s19 + $0x974] ss:$40 sps:$4 sm:$0xff]   ;;  %v6452_v35 = vld [vmem:[%s6992_s19 + $0xe68] ss:$40 sps:$4 sm:$0xff]  }
  0xd9   : > { %3598 = vmatmul.mubr.bf16.vlgmr.msra.gmra.mrb[4].mxu1 %v7091_v21 }
  0xda   : > { %3680 = vmatmul.mubr.bf16.vlgmr.msra.gmra.mrb[4].mxu0 %v7083_v15  ;;  %3607 = vmatpush1.bf16.msra.mxu1 %v6368_v36  ;;  %v6455_v36 = vld [vmem:[%s6992_s19 + $0x970] ss:$40 sps:$4 sm:$0xff]  }
  0xdb   : > { %3689 = vmatpush1.bf16.msra.mxu0 %v6371_v37  ;;  %3608 = vmatprep.subr.bf16.mxu1 %v6376_v38  ;;  %v6460_v37 = vld [vmem:[%s6992_s19 + $0xebc] ss:$40 sps:$4 sm:$0xff]  }
  0xdc   : > { %3690 = vmatprep.subr.bf16.mxu0 %v6379_v39  ;;  %3638 = vmatprep.mubr.bf16.mxu1 %v7097_v25  ;;  %v6463_v38 = vld [vmem:[%s6992_s19 + $0x9c4] ss:$40 sps:$4 sm:$0xff]   ;;  %v6458_v39 = vld [vmem:[%s6992_s19 + $0xeb8] ss:$40 sps:$4 sm:$0xff]  }
  0xdd   : > { %3720 = vmatprep.mubr.bf16.mxu0 %v7069_v5 }
  0xde   : > { %3609 = vmatpush1.bf16.msra.mxu1 %v6374_v40  ;;  %v6461_v40 = vld [vmem:[%s6992_s19 + $0x9c0] ss:$40 sps:$4 sm:$0xff]  }
  0xdf   : > { %3691 = vmatpush1.bf16.msra.mxu0 %v6377_v41  ;;  %3610 = vmatprep.subr.bf16.mxu1 %v6382_v42  ;;  %v6466_v41 = vld [vmem:[%s6992_s19 + $0xa14] ss:$40 sps:$4 sm:$0xff]  }
  0xe0   : > { %3692 = vmatprep.subr.bf16.mxu0 %v6385_v43  ;;  %v6469_v42 = vld [vmem:[%s6992_s19 + $0x1c] ss:$40 sps:$4 sm:$0xff]   ;;  %v6464_v43 = vld [vmem:[%s6992_s19 + $0xa10] ss:$40 sps:$4 sm:$0xff]  }
  0xe2   : > { %3611 = vmatpush1.bf16.msra.mxu1 %v6380_v44  ;;  %v6467_v44 = vld [vmem:[%s6992_s19 + $0x18] ss:$40 sps:$4 sm:$0xff]  }
  0xe3   : > { %3693 = vmatpush1.bf16.msra.mxu0 %v6383_v46  ;;  %3612 = vmatprep.subr.bf16.mxu1 %v6388_v47  ;;  %v6472_v46 = vld [vmem:[%s6992_s19 + $0xa64] ss:$40 sps:$4 sm:$0xff]  }
  0xe4   : > { %3694 = vmatprep.subr.bf16.mxu0 %v6391_v48  ;;  %v6475_v47 = vld [vmem:[%s6992_s19 + $0x6c] ss:$40 sps:$4 sm:$0xff]   ;;  %v6470_v48 = vld [vmem:[%s6992_s19 + $0xa60] ss:$40 sps:$4 sm:$0xff]  }
  0xe6   : > { %3613 = vmatpush1.bf16.msra.mxu1 %v6386_v49  ;;  %v6473_v49 = vld [vmem:[%s6992_s19 + $0x68] ss:$40 sps:$4 sm:$0xff]  }
  0xe7   : > { %3695 = vmatpush1.bf16.msra.mxu0 %v6389_v50  ;;  %3614 = vmatprep.subr.bf16.mxu1 %v6394_v51  ;;  %v6478_v50 = vld [vmem:[%s6992_s19 + $0xab4] ss:$40 sps:$4 sm:$0xff]  }
  0xe8   : > { %3696 = vmatprep.subr.bf16.mxu0 %v6397_v52  ;;  %v6481_v51 = vld [vmem:[%s6992_s19 + $0xbc] ss:$40 sps:$4 sm:$0xff]   ;;  %v6476_v52 = vld [vmem:[%s6992_s19 + $0xab0] ss:$40 sps:$4 sm:$0xff]  }
  0xea   : > { %3615 = vmatpush1.bf16.msra.mxu1 %v6392_v53  ;;  %v6479_v53 = vld [vmem:[%s6992_s19 + $0xb8] ss:$40 sps:$4 sm:$0xff]  }
  0xeb   : > { %3697 = vmatpush1.bf16.msra.mxu0 %v6395_v54  ;;  %3616 = vmatprep.subr.bf16.mxu1 %v6400_v55  ;;  %v6484_v54 = vld [vmem:[%s6992_s19 + $0xb04] ss:$40 sps:$4 sm:$0xff]  }
  0xec   : > { %3698 = vmatprep.subr.bf16.mxu0 %v6403_v56  ;;  %v6487_v55 = vld [vmem:[%s6992_s19 + $0x10c] ss:$40 sps:$4 sm:$0xff]   ;;  %v6482_v56 = vld [vmem:[%s6992_s19 + $0xb00] ss:$40 sps:$4 sm:$0xff]  }
  0xee   : > { %3617 = vmatpush1.bf16.msra.mxu1 %v6398_v57  ;;  %v6485_v57 = vld [vmem:[%s6992_s19 + $0x108] ss:$40 sps:$4 sm:$0xff]  }
  0xef   : > { %3699 = vmatpush1.bf16.msra.mxu0 %v6401_v58  ;;  %3618 = vmatprep.subr.bf16.mxu1 %v6406_v59  ;;  %v6490_v58 = vld [vmem:[%s6992_s19 + $0xb54] ss:$40 sps:$4 sm:$0xff]  }
  0xf0   : > { %3700 = vmatprep.subr.bf16.mxu0 %v6409_v60  ;;  %v6493_v59 = vld [vmem:[%s6992_s19 + $0x15c] ss:$40 sps:$4 sm:$0xff]   ;;  %v6488_v60 = vld [vmem:[%s6992_s19 + $0xb50] ss:$40 sps:$4 sm:$0xff]  }
  0xf2   : > { %3619 = vmatpush1.bf16.msra.mxu1 %v6404_v61  ;;  %v6491_v61 = vld [vmem:[%s6992_s19 + $0x158] ss:$40 sps:$4 sm:$0xff]  }
  0xf3   : > { %3701 = vmatpush1.bf16.msra.mxu0 %v6407_v62  ;;  %3620 = vmatprep.subr.bf16.mxu1 %v6412_v63  ;;  %v6496_v62 = vld [vmem:[%s6992_s19 + $0xba4] ss:$40 sps:$4 sm:$0xff]  }
  0xf4   : > { %3702 = vmatprep.subr.bf16.mxu0 %v6415_v2  ;;  %v6499_v63 = vld [vmem:[%s6992_s19 + $0x1ac] ss:$40 sps:$4 sm:$0xff]   ;;  %v6494_v2 = vld [vmem:[%s6992_s19 + $0xba0] ss:$40 sps:$4 sm:$0xff]  }
  0xf6   : > { %3621 = vmatpush1.bf16.msra.mxu1 %v6410_v3  ;;  %v6497_v3 = vld [vmem:[%s6992_s19 + $0x1a8] ss:$40 sps:$4 sm:$0xff]  }
  0xf7   : > { %3703 = vmatpush1.bf16.msra.mxu0 %v6413_v4  ;;  %3622 = vmatprep.subr.bf16.mxu1 %v6418_v6  ;;  %v6502_v4 = vld [vmem:[%s6992_s19 + $0xbf4] ss:$40 sps:$4 sm:$0xff]  }
  0xf8   : > { %3704 = vmatprep.subr.bf16.mxu0 %v6421_v7  ;;  %v6505_v6 = vld [vmem:[%s6992_s19 + $0x1fc] ss:$40 sps:$4 sm:$0xff]  }
  0xfa   : > { %3623 = vmatpush1.bf16.msra.mxu1 %v6416_v8 }
  0xfb   : > { %3705 = vmatpush1.bf16.msra.mxu0 %v6419_v9  ;;  %3624 = vmatprep.subr.bf16.mxu1 %v6424_v10  ;;  %v6500_v9 = vld [vmem:[%s6992_s19 + $0xbf0] ss:$40 sps:$4 sm:$0xff]  }
  0xfc   : > { %3706 = vmatprep.subr.bf16.mxu0 %v6427_v11  ;;  %v6503_v10 = vld [vmem:[%s6992_s19 + $0x1f8] ss:$40 sps:$4 sm:$0xff]  }
  0xfe   : > { %3625 = vmatpush1.bf16.msra.mxu1 %v6422_v12  ;;  %v6508_v12 = vld [vmem:[%s6992_s19 + $0xc44] ss:$40 sps:$4 sm:$0xff]  }
  0xff   : > { %3707 = vmatpush1.bf16.msra.mxu0 %v6425_v13  ;;  %3626 = vmatprep.subr.bf16.mxu1 %v6430_v14  ;;  %v6511_v13 = vld [vmem:[%s6992_s19 + $0x24c] ss:$40 sps:$4 sm:$0xff]  }
 0x100   : > { %3708 = vmatprep.subr.bf16.mxu0 %v6433_v16  ;;  %v6506_v16 = vld [vmem:[%s6992_s19 + $0xc40] ss:$40 sps:$4 sm:$0xff]  }
 0x102   : > { %3627 = vmatpush1.bf16.msra.mxu1 %v6428_v17  ;;  %v6509_v17 = vld [vmem:[%s6992_s19 + $0x248] ss:$40 sps:$4 sm:$0xff]  }
 0x103   : > { %3709 = vmatpush1.bf16.msra.mxu0 %v6431_v18  ;;  %3628 = vmatprep.subr.bf16.mxu1 %v6436_v19  ;;  %v6514_v18 = vld [vmem:[%s6992_s19 + $0xc94] ss:$40 sps:$4 sm:$0xff]  }
 0x104   : > { %3710 = vmatprep.subr.bf16.mxu0 %v6439_v20  ;;  %v6517_v19 = vld [vmem:[%s6992_s19 + $0x29c] ss:$40 sps:$4 sm:$0xff]   ;;  %v6512_v20 = vld [vmem:[%s6992_s19 + $0xc90] ss:$40 sps:$4 sm:$0xff]  }
 0x106   : > { %3629 = vmatpush1.bf16.msra.mxu1 %v6434_v22  ;;  %v6515_v22 = vld [vmem:[%s6992_s19 + $0x298] ss:$40 sps:$4 sm:$0xff]  }
 0x107   : > { %3711 = vmatpush1.bf16.msra.mxu0 %v6437_v23  ;;  %3630 = vmatprep.subr.bf16.mxu1 %v6442_v24  ;;  %v6520_v23 = vld [vmem:[%s6992_s19 + $0xce4] ss:$40 sps:$4 sm:$0xff]  }
 0x108   : > { %3712 = vmatprep.subr.bf16.mxu0 %v6445_v26  ;;  %v6523_v24 = vld [vmem:[%s6992_s19 + $0x2ec] ss:$40 sps:$4 sm:$0xff]   ;;  %v6518_v26 = vld [vmem:[%s6992_s19 + $0xce0] ss:$40 sps:$4 sm:$0xff]  }
 0x10a   : > { %3631 = vmatpush1.bf16.msra.mxu1 %v6440_v27  ;;  %v6521_v27 = vld [vmem:[%s6992_s19 + $0x2e8] ss:$40 sps:$4 sm:$0xff]  }
 0x10b   : > { %3713 = vmatpush1.bf16.msra.mxu0 %v6443_v28  ;;  %3632 = vmatprep.subr.bf16.mxu1 %v6448_v29  ;;  %v6526_v28 = vld [vmem:[%s6992_s19 + $0xd34] ss:$40 sps:$4 sm:$0xff]  }
 0x10c   : > { %3714 = vmatprep.subr.bf16.mxu0 %v6451_v30  ;;  %v6529_v29 = vld [vmem:[%s6992_s19 + $0x33c] ss:$40 sps:$4 sm:$0xff]   ;;  %v6524_v30 = vld [vmem:[%s6992_s19 + $0xd30] ss:$40 sps:$4 sm:$0xff]  }
 0x10e   : > { %3633 = vmatpush1.bf16.msra.mxu1 %v6446_v31  ;;  %v6527_v31 = vld [vmem:[%s6992_s19 + $0x338] ss:$40 sps:$4 sm:$0xff]  }
 0x10f   : > { %3715 = vmatpush1.bf16.msra.mxu0 %v6449_v32  ;;  %3634 = vmatprep.subr.bf16.mxu1 %v6454_v33  ;;  %v6532_v32 = vld [vmem:[%s6992_s19 + $0xd84] ss:$40 sps:$4 sm:$0xff]  }
 0x110   : > { %3716 = vmatprep.subr.bf16.mxu0 %v6457_v34  ;;  %v6535_v33 = vld [vmem:[%s6992_s19 + $0x38c] ss:$40 sps:$4 sm:$0xff]   ;;  %v6530_v34 = vld [vmem:[%s6992_s19 + $0xd80] ss:$40 sps:$4 sm:$0xff]  }
 0x112   : > { %3635 = vmatpush1.bf16.msra.mxu1 %v6452_v35  ;;  %v6533_v35 = vld [vmem:[%s6992_s19 + $0x388] ss:$40 sps:$4 sm:$0xff]  }
 0x113   : > { %3717 = vmatpush1.bf16.msra.mxu0 %v6455_v36  ;;  %3636 = vmatprep.subr.bf16.mxu1 %v6460_v37  ;;  %v6538_v36 = vld [vmem:[%s6992_s19 + $0xdd4] ss:$40 sps:$4 sm:$0xff]  }
 0x114   : > { %3718 = vmatprep.subr.bf16.mxu0 %v6463_v38  ;;  %v6541_v37 = vld [vmem:[%s6992_s19 + $0x3dc] ss:$40 sps:$4 sm:$0xff]   ;;  %v6536_v38 = vld [vmem:[%s6992_s19 + $0xdd0] ss:$40 sps:$4 sm:$0xff]  }
 0x116   : > { %3637 = vmatpush1.bf16.msra.mxu1 %v6458_v39  ;;  %v6539_v39 = vld [vmem:[%s6992_s19 + $0x3d8] ss:$40 sps:$4 sm:$0xff]  }
 0x117   : > { %3719 = vmatpush1.bf16.msra.mxu0 %v6461_v40  ;;  %3770 = vmatprep.subr.bf16.mxu1 %v6469_v42  ;;  %v6544_v40 = vld [vmem:[%s6992_s19 + $0xe24] ss:$40 sps:$4 sm:$0xff]   ;;  %v6542_v42 = vld [vmem:[%s6992_s19 + $0xe20] ss:$40 sps:$4 sm:$0xff]  }
 0x118   : > { %3729 = vmatprep.subr.bf16.mxu0 %v6466_v41  ;;  %v6547_v41 = vld [vmem:[%s6992_s19 + $0x42c] ss:$40 sps:$4 sm:$0xff]  }
 0x119   : > { %3639 = vmatmul.mubr.bf16.vlgmr.msra.gmra.mrb[4].mxu1 %v7062_v1 }
 0x11a   : > { %3721 = vmatmul.mubr.bf16.vlgmr.msra.gmra.mrb[4].mxu0 %v7091_v21  ;;  %3771 = vmatpush1.bf16.msra.mxu1 %v6467_v44  ;;  %v6550_v44 = vld [vmem:[%s6992_s19 + $0xe74] ss:$40 sps:$4 sm:$0xff]  }
 0x11b   : > { %3730 = vmatpush1.bf16.msra.mxu0 %v6464_v43  ;;  %3772 = vmatprep.subr.bf16.mxu1 %v6475_v47  ;;  %v6545_v43 = vld [vmem:[%s6992_s19 + $0x428] ss:$40 sps:$4 sm:$0xff]  }
 0x11c   : > { %3731 = vmatprep.subr.bf16.mxu0 %v6472_v46  ;;  %3761 = vmatprep.mubr.bf16.mxu0 %v7097_v25  ;;  %v6553_v46 = vld [vmem:[%s6992_s19 + $0x47c] ss:$40 sps:$4 sm:$0xff]   ;;  %v6548_v47 = vld [vmem:[%s6992_s19 + $0xe70] ss:$40 sps:$4 sm:$0xff]  }
 0x11d   : > { %3802 = vmatprep.mubr.bf16.mxu1 %v7059_v0 }
 0x11e   : > { %3773 = vmatpush1.bf16.msra.mxu1 %v6473_v49  ;;  %v6556_v49 = vld [vmem:[%s6992_s19 + $0xec4] ss:$40 sps:$4 sm:$0xff]  }
 0x11f   : > { %3732 = vmatpush1.bf16.msra.mxu0 %v6470_v48  ;;  %3774 = vmatprep.subr.bf16.mxu1 %v6481_v51  ;;  %v6551_v48 = vld [vmem:[%s6992_s19 + $0x478] ss:$40 sps:$4 sm:$0xff]  }
 0x120   : > { %3733 = vmatprep.subr.bf16.mxu0 %v6478_v50  ;;  %v6559_v50 = vld [vmem:[%s6992_s19 + $0x4cc] ss:$40 sps:$4 sm:$0xff]   ;;  %v6554_v51 = vld [vmem:[%s6992_s19 + $0xec0] ss:$40 sps:$4 sm:$0xff]  }
 0x122   : > { %3775 = vmatpush1.bf16.msra.mxu1 %v6479_v53  ;;  %v6562_v53 = vld [vmem:[%s6992_s19 + $0x51c] ss:$40 sps:$4 sm:$0xff]  }
 0x123   : > { %3734 = vmatpush1.bf16.msra.mxu0 %v6476_v52  ;;  %3776 = vmatprep.subr.bf16.mxu1 %v6487_v55  ;;  %v6557_v52 = vld [vmem:[%s6992_s19 + $0x4c8] ss:$40 sps:$4 sm:$0xff]   ;;  %v6560_v55 = vld [vmem:[%s6992_s19 + $0x518] ss:$40 sps:$4 sm:$0xff]  }
 0x124   : > { %3735 = vmatprep.subr.bf16.mxu0 %v6484_v54  ;;  %v6565_v54 = vld [vmem:[%s6992_s19 + $0x24] ss:$40 sps:$4 sm:$0xff]  }
 0x126   : > { %3777 = vmatpush1.bf16.msra.mxu1 %v6485_v57  ;;  %v6568_v57 = vld [vmem:[%s6992_s19 + $0x56c] ss:$40 sps:$4 sm:$0xff]  }
 0x127   : > { %3736 = vmatpush1.bf16.msra.mxu0 %v6482_v56  ;;  %3778 = vmatprep.subr.bf16.mxu1 %v6493_v59  ;;  %v6563_v56 = vld [vmem:[%s6992_s19 + $0x20] ss:$40 sps:$4 sm:$0xff]  }
 0x128   : > { %3737 = vmatprep.subr.bf16.mxu0 %v6490_v58  ;;  %v6571_v58 = vld [vmem:[%s6992_s19 + $0x74] ss:$40 sps:$4 sm:$0xff]   ;;  %v6566_v59 = vld [vmem:[%s6992_s19 + $0x568] ss:$40 sps:$4 sm:$0xff]  }
 0x12a   : > { %3779 = vmatpush1.bf16.msra.mxu1 %v6491_v61  ;;  %v6574_v61 = vld [vmem:[%s6992_s19 + $0x5bc] ss:$40 sps:$4 sm:$0xff]  }
 0x12b   : > { %3738 = vmatpush1.bf16.msra.mxu0 %v6488_v60  ;;  %3780 = vmatprep.subr.bf16.mxu1 %v6499_v63  ;;  %v6569_v60 = vld [vmem:[%s6992_s19 + $0x70] ss:$40 sps:$4 sm:$0xff]  }
 0x12c   : > { %3739 = vmatprep.subr.bf16.mxu0 %v6496_v62  ;;  %v7327_v7 = vpop.f32.mrb[0].mxu1  ;;  %v6577_v62 = vld [vmem:[%s6992_s19 + $0xc4] ss:$40 sps:$4 sm:$0xff]   ;;  %v6572_v63 = vld [vmem:[%s6992_s19 + $0x5b8] ss:$40 sps:$4 sm:$0xff]  }
 0x12d   : > { %v7329_v8 = vpop.f32.mrb[1].mxu1 }
 0x12e   : > { %3781 = vmatpush1.bf16.msra.mxu1 %v6497_v3  ;;  %v3439_v11 = vpop.f32.mrb[2].mxu1  ;;  %v6580_v3 = vld [vmem:[%s6992_s19 + $0x60c] ss:$40 sps:$4 sm:$0xff]  }
 0x12f   : > { %3740 = vmatpush1.bf16.msra.mxu0 %v6494_v2  ;;  %3782 = vmatprep.subr.bf16.mxu1 %v6505_v6  ;;  %v3440_v14 = vpop.f32.mrb[3].mxu1  ;;  %v6575_v2 = vld [vmem:[%s6992_s19 + $0xc0] ss:$40 sps:$4 sm:$0xff]  }
 0x130   : > { %3741 = vmatprep.subr.bf16.mxu0 %v6502_v4  ;;  %v6583_v4 = vld [vmem:[%s6992_s19 + $0x114] ss:$40 sps:$4 sm:$0xff]   ;;  %v6578_v6 = vld [vmem:[%s6992_s19 + $0x608] ss:$40 sps:$4 sm:$0xff]   ;;  %v6584_v11 = vld [vmem:[%s6992_s19 + $0x658] ss:$40 sps:$4 sm:$0xff]  }
 0x131   : > { %v6595_v14 = vld [vmem:[%s6992_s19 + $0x1b4] ss:$40 sps:$4 sm:$0xff]  }
 0x132   : > { %3783 = vmatpush1.bf16.msra.mxu1 %v6503_v10  ;;  %v6589_v10 = vld [vmem:[%s6992_s19 + $0x164] ss:$40 sps:$4 sm:$0xff]  }
 0x133   : > { %3742 = vmatpush1.bf16.msra.mxu0 %v6500_v9  ;;  %3784 = vmatprep.subr.bf16.mxu1 %v6511_v13  ;;  %v6581_v9 = vld [vmem:[%s6992_s19 + $0x110] ss:$40 sps:$4 sm:$0xff]   ;;  %v6592_v13 = vld [vmem:[%s6992_s19 + $0x6ac] ss:$40 sps:$4 sm:$0xff]  }
 0x134   : > { %3743 = vmatprep.subr.bf16.mxu0 %v6508_v12  ;;  %v6587_v12 = vld [vmem:[%s6992_s19 + $0x160] ss:$40 sps:$4 sm:$0xff]  }
 0x136   : > { %3785 = vmatpush1.bf16.msra.mxu1 %v6509_v17  ;;  %v6593_v17 = vld [vmem:[%s6992_s19 + $0x1b0] ss:$40 sps:$4 sm:$0xff]  }
 0x137   : > { %3744 = vmatpush1.bf16.msra.mxu0 %v6506_v16  ;;  %3786 = vmatprep.subr.bf16.mxu1 %v6517_v19  ;;  %v6590_v16 = vld [vmem:[%s6992_s19 + $0x6a8] ss:$40 sps:$4 sm:$0xff]   ;;  %v6601_v19 = vld [vmem:[%s6992_s19 + $0x204] ss:$40 sps:$4 sm:$0xff]  }
 0x138   : > { %3745 = vmatprep.subr.bf16.mxu0 %v6514_v18  ;;  %v6598_v18 = vld [vmem:[%s6992_s19 + $0x6fc] ss:$40 sps:$4 sm:$0xff]  }
 0x13a   : > { %3787 = vmatpush1.bf16.msra.mxu1 %v6515_v22 }
 0x13b   : > { %3746 = vmatpush1.bf16.msra.mxu0 %v6512_v20  ;;  %3788 = vmatprep.subr.bf16.mxu1 %v6523_v24 }
 0x13c   : > { %3747 = vmatprep.subr.bf16.mxu0 %v6520_v23 }
 0x13e   : > { %3789 = vmatpush1.bf16.msra.mxu1 %v6521_v27  ;;  %v6596_v27 = vld [vmem:[%s6992_s19 + $0x6f8] ss:$40 sps:$4 sm:$0xff]  }
 0x13f   : > { %3748 = vmatpush1.bf16.msra.mxu0 %v6518_v26  ;;  %3790 = vmatprep.subr.bf16.mxu1 %v6529_v29 }
 0x140   : > { %3749 = vmatprep.subr.bf16.mxu0 %v6526_v28  ;;  %v6599_v28 = vld [vmem:[%s6992_s19 + $0x200] ss:$40 sps:$4 sm:$0xff]  }
 0x142   : > { %3791 = vmatpush1.bf16.msra.mxu1 %v6527_v31 }
 0x143   : > { %3750 = vmatpush1.bf16.msra.mxu0 %v6524_v30  ;;  %3792 = vmatprep.subr.bf16.mxu1 %v6535_v33  ;;  %v6607_v30 = vld [vmem:[%s6992_s19 + $0x254] ss:$40 sps:$4 sm:$0xff]  }
 0x144   : > { %3751 = vmatprep.subr.bf16.mxu0 %v6532_v32  ;;  %v6605_v32 = vld [vmem:[%s6992_s19 + $0x250] ss:$40 sps:$4 sm:$0xff]   ;;  %v6610_v33 = vld [vmem:[%s6992_s19 + $0x79c] ss:$40 sps:$4 sm:$0xff]  }
 0x146   : > { %3793 = vmatpush1.bf16.msra.mxu1 %v6533_v35  ;;  %v6608_v35 = vld [vmem:[%s6992_s19 + $0x798] ss:$40 sps:$4 sm:$0xff]  }
 0x147   : > { %3752 = vmatpush1.bf16.msra.mxu0 %v6530_v34  ;;  %3794 = vmatprep.subr.bf16.mxu1 %v6541_v37  ;;  %v6613_v34 = vld [vmem:[%s6992_s19 + $0x2a4] ss:$40 sps:$4 sm:$0xff]  }
 0x148   : > { %3753 = vmatprep.subr.bf16.mxu0 %v6538_v36  ;;  %v6611_v36 = vld [vmem:[%s6992_s19 + $0x2a0] ss:$40 sps:$4 sm:$0xff]   ;;  %v6616_v37 = vld [vmem:[%s6992_s19 + $0x7ec] ss:$40 sps:$4 sm:$0xff]  }
 0x14a   : > { %3795 = vmatpush1.bf16.msra.mxu1 %v6539_v39  ;;  %v6614_v39 = vld [vmem:[%s6992_s19 + $0x7e8] ss:$40 sps:$4 sm:$0xff]  }
 0x14b   : > { %3754 = vmatpush1.bf16.msra.mxu0 %v6536_v38  ;;  %3796 = vmatprep.subr.bf16.mxu1 %v6547_v41  ;;  %v6619_v38 = vld [vmem:[%s6992_s19 + $0x2f4] ss:$40 sps:$4 sm:$0xff]  }
 0x14c   : > { %3755 = vmatprep.subr.bf16.mxu0 %v6544_v40  ;;  %v6617_v40 = vld [vmem:[%s6992_s19 + $0x2f0] ss:$40 sps:$4 sm:$0xff]   ;;  %v6622_v41 = vld [vmem:[%s6992_s19 + $0x83c] ss:$40 sps:$4 sm:$0xff]  }
 0x14e   : > { %3797 = vmatpush1.bf16.msra.mxu1 %v6545_v43  ;;  %v6620_v43 = vld [vmem:[%s6992_s19 + $0x838] ss:$40 sps:$4 sm:$0xff]  }
 0x14f   : > { %3756 = vmatpush1.bf16.msra.mxu0 %v6542_v42  ;;  %3798 = vmatprep.subr.bf16.mxu1 %v6553_v46  ;;  %v6625_v42 = vld [vmem:[%s6992_s19 + $0x344] ss:$40 sps:$4 sm:$0xff]  }
 0x150   : > { %3757 = vmatprep.subr.bf16.mxu0 %v6550_v44  ;;  %v6623_v44 = vld [vmem:[%s6992_s19 + $0x340] ss:$40 sps:$4 sm:$0xff]   ;;  %v6628_v46 = vld [vmem:[%s6992_s19 + $0x88c] ss:$40 sps:$4 sm:$0xff]  }
 0x152   : > { %3799 = vmatpush1.bf16.msra.mxu1 %v6551_v48  ;;  %v6626_v48 = vld [vmem:[%s6992_s19 + $0x888] ss:$40 sps:$4 sm:$0xff]  }
 0x153   : > { %3758 = vmatpush1.bf16.msra.mxu0 %v6548_v47  ;;  %3800 = vmatprep.subr.bf16.mxu1 %v6559_v50  ;;  %v6631_v47 = vld [vmem:[%s6992_s19 + $0x394] ss:$40 sps:$4 sm:$0xff]  }
 0x154   : > { %3759 = vmatprep.subr.bf16.mxu0 %v6556_v49  ;;  %v6629_v49 = vld [vmem:[%s6992_s19 + $0x390] ss:$40 sps:$4 sm:$0xff]   ;;  %v6634_v50 = vld [vmem:[%s6992_s19 + $0x8dc] ss:$40 sps:$4 sm:$0xff]  }
 0x156   : > { %3801 = vmatpush1.bf16.msra.mxu1 %v6557_v52  ;;  %v6632_v52 = vld [vmem:[%s6992_s19 + $0x8d8] ss:$40 sps:$4 sm:$0xff]  }
 0x157   : > { %3760 = vmatpush1.bf16.msra.mxu0 %v6554_v51  ;;  %3811 = vmatprep.subr.bf16.mxu1 %v6562_v53  ;;  %v6637_v51 = vld [vmem:[%s6992_s19 + $0x3e4] ss:$40 sps:$4 sm:$0xff]   ;;  %v6635_v53 = vld [vmem:[%s6992_s19 + $0x3e0] ss:$40 sps:$4 sm:$0xff]  }
 0x158   : > { %3893 = vmatprep.subr.bf16.mxu0 %v6565_v54  ;;  %v6640_v54 = vld [vmem:[%s6992_s19 + $0x92c] ss:$40 sps:$4 sm:$0xff]  }
 0x159   : > { %3803 = vmatmul.mubr.bf16.vlgmr.msra.gmra.mrb[8].mxu1 %v7083_v15 }
 0x15a   : > { %3762 = vmatmul.mubr.bf16.vlgmr.msra.gmra.mrb[4].mxu0 %v7062_v1  ;;  %3812 = vmatpush1.bf16.msra.mxu1 %v6560_v55  ;;  %v6643_v55 = vld [vmem:[%s6992_s19 + $0x434] ss:$40 sps:$4 sm:$0xff]  }
 0x15b   : > { %3894 = vmatpush1.bf16.msra.mxu0 %v6563_v56  ;;  %3813 = vmatprep.subr.bf16.mxu1 %v6568_v57  ;;  %v6638_v56 = vld [vmem:[%s6992_s19 + $0x928] ss:$40 sps:$4 sm:$0xff]  }
 0x15c   : > { %3895 = vmatprep.subr.bf16.mxu0 %v6571_v58  ;;  %3843 = vmatprep.mubr.bf16.mxu1 %v7069_v5  ;;  %v6641_v57 = vld [vmem:[%s6992_s19 + $0x430] ss:$40 sps:$4 sm:$0xff]   ;;  %v6646_v58 = vld [vmem:[%s6992_s19 + $0x97c] ss:$40 sps:$4 sm:$0xff]  }
 0x15d   : > { %3925 = vmatprep.mubr.bf16.mxu0 %v7059_v0  ;;  %v6586_v0 = vld [vmem:[%s6992_s19 + $0x65c] ss:$40 sps:$4 sm:$0xff]  }
 0x15e   : > { %3814 = vmatpush1.bf16.msra.mxu1 %v6566_v59  ;;  %v6649_v59 = vld [vmem:[%s6992_s19 + $0x484] ss:$40 sps:$4 sm:$0xff]  }
 0x15f   : > { %3896 = vmatpush1.bf16.msra.mxu0 %v6569_v60  ;;  %3815 = vmatprep.subr.bf16.mxu1 %v6574_v61  ;;  %v6644_v60 = vld [vmem:[%s6992_s19 + $0x978] ss:$40 sps:$4 sm:$0xff]  }
 0x160   : > { %3897 = vmatprep.subr.bf16.mxu0 %v6577_v62  ;;  %v6647_v61 = vld [vmem:[%s6992_s19 + $0x480] ss:$40 sps:$4 sm:$0xff]   ;;  %v6652_v62 = vld [vmem:[%s6992_s19 + $0x9cc] ss:$40 sps:$4 sm:$0xff]  }
 0x162   : > { %3816 = vmatpush1.bf16.msra.mxu1 %v6572_v63  ;;  %v6655_v63 = vld [vmem:[%s6992_s19 + $0x4d4] ss:$40 sps:$4 sm:$0xff]  }
 0x163   : > { %3898 = vmatpush1.bf16.msra.mxu0 %v6575_v2  ;;  %3817 = vmatprep.subr.bf16.mxu1 %v6580_v3  ;;  %v6650_v2 = vld [vmem:[%s6992_s19 + $0x9c8] ss:$40 sps:$4 sm:$0xff]  }
 0x164   : > { %3899 = vmatprep.subr.bf16.mxu0 %v6583_v4  ;;  %v6653_v3 = vld [vmem:[%s6992_s19 + $0x4d0] ss:$40 sps:$4 sm:$0xff]   ;;  %v6658_v4 = vld [vmem:[%s6992_s19 + $0xa1c] ss:$40 sps:$4 sm:$0xff]  }
 0x166   : > { %3818 = vmatpush1.bf16.msra.mxu1 %v6578_v6  ;;  %v6661_v6 = vld [vmem:[%s6992_s19 + $0x524] ss:$40 sps:$4 sm:$0xff]  }
 0x167   : > { %3900 = vmatpush1.bf16.msra.mxu0 %v6581_v9  ;;  %3819 = vmatprep.subr.bf16.mxu1 %v6586_v0  ;;  %v6656_v9 = vld [vmem:[%s6992_s19 + $0xa18] ss:$40 sps:$4 sm:$0xff]  }
 0x168   : > { %3901 = vmatprep.subr.bf16.mxu0 %v6589_v10  ;;  %v6659_v0 = vld [vmem:[%s6992_s19 + $0x520] ss:$40 sps:$4 sm:$0xff]   ;;  %v6664_v10 = vld [vmem:[%s6992_s19 + $0xa6c] ss:$40 sps:$4 sm:$0xff]  }
 0x16a   : > { %3820 = vmatpush1.bf16.msra.mxu1 %v6584_v11  ;;  %v6667_v11 = vld [vmem:[%s6992_s19 + $0x574] ss:$40 sps:$4 sm:$0xff]  }
 0x16b   : > { %3902 = vmatpush1.bf16.msra.mxu0 %v6587_v12  ;;  %3821 = vmatprep.subr.bf16.mxu1 %v6592_v13  ;;  %v6662_v12 = vld [vmem:[%s6992_s19 + $0xa68] ss:$40 sps:$4 sm:$0xff]  }
 0x16c   : > { %3903 = vmatprep.subr.bf16.mxu0 %v6595_v14  ;;  %v6665_v13 = vld [vmem:[%s6992_s19 + $0x570] ss:$40 sps:$4 sm:$0xff]   ;;  %v6670_v14 = vld [vmem:[%s6992_s19 + $0xabc] ss:$40 sps:$4 sm:$0xff]  }
 0x16d   : > { %v3517_v20 = vpop.f32.mrb[0].mxu0 }
 0x16e   : > { %v7400_v22 = vadd.f32 %v3517_v20, %v7327_v7  ;;  %v3519_v23 = vpop.f32.mrb[1].mxu0  ;;  %3822 = vmatpush1.bf16.msra.mxu1 %v6590_v16  ;;  %v6604_v7 = vld [vmem:[%s6992_s19 + $0x74c] ss:$40 sps:$4 sm:$0xff]   ;;  %v6674_v20 = vld [vmem:[%s6992_s19 + $0xb08] ss:$40 sps:$4 sm:$0xff]  }
 0x16f   : > { %v7403_v24 = vadd.f32 %v3519_v23, %v7329_v8  ;;  %v3521_v26 = vpop.f32.mrb[2].mxu0  ;;  %3904 = vmatpush1.bf16.msra.mxu0 %v6593_v17  ;;  %3823 = vmatprep.subr.bf16.mxu1 %v6598_v18  ;;  %v6602_v8 = vld [vmem:[%s6992_s19 + $0x748] ss:$40 sps:$4 sm:$0xff]   ;;  %v6673_v16 = vld [vmem:[%s6992_s19 + $0x5c4] ss:$40 sps:$4 sm:$0xff]  }
 0x170   : > { %v3522_v29 = vpop.f32.mrb[3].mxu0  ;;  %3905 = vmatprep.subr.bf16.mxu0 %v6601_v19  ;;  %v6671_v17 = vld [vmem:[%s6992_s19 + $0x5c0] ss:$40 sps:$4 sm:$0xff]   ;;  %v6676_v18 = vld [vmem:[%s6992_s19 + $0xb0c] ss:$40 sps:$4 sm:$0xff]  }
 0x171   : > { %v4026_v31 = vcombine.low %v7400_v22, %v7403_v24  ;;  %v6679_v19 = vld [vmem:[%s6992_s19 + $0x614] ss:$40 sps:$4 sm:$0xff]   ;;  %v6677_v23 = vld [vmem:[%s6992_s19 + $0x610] ss:$40 sps:$4 sm:$0xff]   ;;  %v6685_v26 = vld [vmem:[%s6992_s19 + $0x664] ss:$40 sps:$4 sm:$0xff]  }
 0x172   : > { %3824 = vmatpush1.bf16.msra.mxu1 %v6596_v27  ;;  %v6680_v27 = vld [vmem:[%s6992_s19 + $0xb58] ss:$40 sps:$4 sm:$0xff]   ;;  %v6688_v29 = vld [vmem:[%s6992_s19 + $0xbac] ss:$40 sps:$4 sm:$0xff]  }
 0x173   : > { %3906 = vmatpush1.bf16.msra.mxu0 %v6599_v28  ;;  %3825 = vmatprep.subr.bf16.mxu1 %v6604_v7  ;;  %v6683_v28 = vld [vmem:[%s6992_s19 + $0x660] ss:$40 sps:$4 sm:$0xff]   ;;  %v6691_v7 = vld [vmem:[%s6992_s19 + $0x6b4] ss:$40 sps:$4 sm:$0xff]   ;;  %v6779_v24 = vld [vmem:[%s6992_s19 + $0xcf0] ss:$40 sps:$4 sm:$0xff]  }
 0x174   : > { %3907 = vmatprep.subr.bf16.mxu0 %v6607_v30  ;;  %v6686_v30 = vld [vmem:[%s6992_s19 + $0xba8] ss:$40 sps:$4 sm:$0xff]   ;;  %v6781_v22 = vld [vmem:[%s6992_s19 + $0xcf4] ss:$40 sps:$4 sm:$0xff]  }
 0x176   : > { %3826 = vmatpush1.bf16.msra.mxu1 %v6602_v8  ;;  %v6689_v8 = vld [vmem:[%s6992_s19 + $0x6b0] ss:$40 sps:$4 sm:$0xff]  }
 0x177   : > { %3908 = vmatpush1.bf16.msra.mxu0 %v6605_v32  ;;  %3827 = vmatprep.subr.bf16.mxu1 %v6610_v33  ;;  %v6694_v32 = vld [vmem:[%s6992_s19 + $0xbfc] ss:$40 sps:$4 sm:$0xff]  }
 0x178   : > { %3909 = vmatprep.subr.bf16.mxu0 %v6613_v34  ;;  %v6697_v33 = vld [vmem:[%s6992_s19 + $0x704] ss:$40 sps:$4 sm:$0xff]   ;;  %v6692_v34 = vld [vmem:[%s6992_s19 + $0xbf8] ss:$40 sps:$4 sm:$0xff]  }
 0x17a   : > { %3828 = vmatpush1.bf16.msra.mxu1 %v6608_v35  ;;  %v6695_v35 = vld [vmem:[%s6992_s19 + $0x700] ss:$40 sps:$4 sm:$0xff]  }
 0x17b   : > { %3910 = vmatpush1.bf16.msra.mxu0 %v6611_v36  ;;  %3829 = vmatprep.subr.bf16.mxu1 %v6616_v37  ;;  %v6700_v36 = vld [vmem:[%s6992_s19 + $0xc4c] ss:$40 sps:$4 sm:$0xff]  }
 0x17c   : > { %3911 = vmatprep.subr.bf16.mxu0 %v6619_v38  ;;  %v6703_v37 = vld [vmem:[%s6992_s19 + $0x754] ss:$40 sps:$4 sm:$0xff]   ;;  %v6698_v38 = vld [vmem:[%s6992_s19 + $0xc48] ss:$40 sps:$4 sm:$0xff]  }
 0x17e   : > { %3830 = vmatpush1.bf16.msra.mxu1 %v6614_v39  ;;  %v6701_v39 = vld [vmem:[%s6992_s19 + $0x750] ss:$40 sps:$4 sm:$0xff]  }
 0x17f   : > { %3912 = vmatpush1.bf16.msra.mxu0 %v6617_v40  ;;  %3831 = vmatprep.subr.bf16.mxu1 %v6622_v41  ;;  %v6706_v40 = vld [vmem:[%s6992_s19 + $0xc9c] ss:$40 sps:$4 sm:$0xff]  }
 0x180   : > { %3913 = vmatprep.subr.bf16.mxu0 %v6625_v42  ;;  %v6709_v41 = vld [vmem:[%s6992_s19 + $0x7a4] ss:$40 sps:$4 sm:$0xff]   ;;  %v6704_v42 = vld [vmem:[%s6992_s19 + $0xc98] ss:$40 sps:$4 sm:$0xff]  }
 0x182   : > { %3832 = vmatpush1.bf16.msra.mxu1 %v6620_v43  ;;  %v6707_v43 = vld [vmem:[%s6992_s19 + $0x7a0] ss:$40 sps:$4 sm:$0xff]  }
 0x183   : > { %3914 = vmatpush1.bf16.msra.mxu0 %v6623_v44  ;;  %3833 = vmatprep.subr.bf16.mxu1 %v6628_v46  ;;  %v6712_v44 = vld [vmem:[%s6992_s19 + $0xcec] ss:$40 sps:$4 sm:$0xff]  }
 0x184   : > { %3915 = vmatprep.subr.bf16.mxu0 %v6631_v47  ;;  %v6715_v46 = vld [vmem:[%s6992_s19 + $0x7f4] ss:$40 sps:$4 sm:$0xff]   ;;  %v6710_v47 = vld [vmem:[%s6992_s19 + $0xce8] ss:$40 sps:$4 sm:$0xff]  }
 0x186   : > { %3834 = vmatpush1.bf16.msra.mxu1 %v6626_v48  ;;  %v6713_v48 = vld [vmem:[%s6992_s19 + $0x7f0] ss:$40 sps:$4 sm:$0xff]  }
 0x187   : > { %3916 = vmatpush1.bf16.msra.mxu0 %v6629_v49  ;;  %3835 = vmatprep.subr.bf16.mxu1 %v6634_v50  ;;  %v6718_v49 = vld [vmem:[%s6992_s19 + $0xd3c] ss:$40 sps:$4 sm:$0xff]  }
 0x188   : > { %3917 = vmatprep.subr.bf16.mxu0 %v6637_v51  ;;  %v6721_v50 = vld [vmem:[%s6992_s19 + $0x844] ss:$40 sps:$4 sm:$0xff]   ;;  %v6716_v51 = vld [vmem:[%s6992_s19 + $0xd38] ss:$40 sps:$4 sm:$0xff]  }
 0x18a   : > { %3836 = vmatpush1.bf16.msra.mxu1 %v6632_v52  ;;  %v6719_v52 = vld [vmem:[%s6992_s19 + $0x840] ss:$40 sps:$4 sm:$0xff]  }
 0x18b   : > { %3918 = vmatpush1.bf16.msra.mxu0 %v6635_v53  ;;  %3837 = vmatprep.subr.bf16.mxu1 %v6640_v54  ;;  %v6724_v53 = vld [vmem:[%s6992_s19 + $0xd8c] ss:$40 sps:$4 sm:$0xff]  }
 0x18c   : > { %3919 = vmatprep.subr.bf16.mxu0 %v6643_v55  ;;  %v6727_v54 = vld [vmem:[%s6992_s19 + $0x894] ss:$40 sps:$4 sm:$0xff]   ;;  %v6722_v55 = vld [vmem:[%s6992_s19 + $0xd88] ss:$40 sps:$4 sm:$0xff]  }
 0x18e   : > { %3838 = vmatpush1.bf16.msra.mxu1 %v6638_v56  ;;  %v6725_v56 = vld [vmem:[%s6992_s19 + $0x890] ss:$40 sps:$4 sm:$0xff]  }
 0x18f   : > { %3920 = vmatpush1.bf16.msra.mxu0 %v6641_v57  ;;  %3839 = vmatprep.subr.bf16.mxu1 %v6646_v58  ;;  %v6730_v57 = vld [vmem:[%s6992_s19 + $0xddc] ss:$40 sps:$4 sm:$0xff]  }
 0x190   : > { %3921 = vmatprep.subr.bf16.mxu0 %v6649_v59  ;;  %v6733_v58 = vld [vmem:[%s6992_s19 + $0x8e4] ss:$40 sps:$4 sm:$0xff]   ;;  %v6728_v59 = vld [vmem:[%s6992_s19 + $0xdd8] ss:$40 sps:$4 sm:$0xff]  }
 0x192   : > { %3840 = vmatpush1.bf16.msra.mxu1 %v6644_v60  ;;  %v6731_v60 = vld [vmem:[%s6992_s19 + $0x8e0] ss:$40 sps:$4 sm:$0xff]  }
 0x193   : > { %3922 = vmatpush1.bf16.msra.mxu0 %v6647_v61  ;;  %3841 = vmatprep.subr.bf16.mxu1 %v6652_v62  ;;  %v6736_v61 = vld [vmem:[%s6992_s19 + $0xe2c] ss:$40 sps:$4 sm:$0xff]  }
 0x194   : > { %3923 = vmatprep.subr.bf16.mxu0 %v6655_v63  ;;  %v6739_v62 = vld [vmem:[%s6992_s19 + $0x934] ss:$40 sps:$4 sm:$0xff]   ;;  %v6734_v63 = vld [vmem:[%s6992_s19 + $0xe28] ss:$40 sps:$4 sm:$0xff]  }
 0x196   : > { %3842 = vmatpush1.bf16.msra.mxu1 %v6650_v2  ;;  %v6737_v2 = vld [vmem:[%s6992_s19 + $0x930] ss:$40 sps:$4 sm:$0xff]  }
 0x197   : > { %3924 = vmatpush1.bf16.msra.mxu0 %v6653_v3  ;;  %3852 = vmatprep.subr.bf16.mxu1 %v6658_v4  ;;  %v6742_v3 = vld [vmem:[%s6992_s19 + $0xe7c] ss:$40 sps:$4 sm:$0xff]  }
 0x198   : > { %3934 = vmatprep.subr.bf16.mxu0 %v6661_v6  ;;  %v6745_v4 = vld [vmem:[%s6992_s19 + $0x984] ss:$40 sps:$4 sm:$0xff]   ;;  %v6740_v6 = vld [vmem:[%s6992_s19 + $0xe78] ss:$40 sps:$4 sm:$0xff]  }
 0x199   : > { %3844 = vmatmul.mubr.bf16.vlgmr.msra.gmra.mrb[8].mxu1 %v7091_v21 }
 0x19a   : > { %3926 = vmatmul.mubr.bf16.vlgmr.msra.gmra.mrb[8].mxu0 %v7083_v15  ;;  %3853 = vmatpush1.bf16.msra.mxu1 %v6656_v9  ;;  %v6668_v15 = vld [vmem:[%s6992_s19 + $0xab8] ss:$40 sps:$4 sm:$0xff]  }
 0x19b   : > { %3935 = vmatpush1.bf16.msra.mxu0 %v6659_v0  ;;  %3854 = vmatprep.subr.bf16.mxu1 %v6664_v10  ;;  %v6743_v9 = vld [vmem:[%s6992_s19 + $0x980] ss:$40 sps:$4 sm:$0xff]   ;;  %v6748_v0 = vld [vmem:[%s6992_s19 + $0xecc] ss:$40 sps:$4 sm:$0xff]  }
 0x19c   : > { %3936 = vmatprep.subr.bf16.mxu0 %v6667_v11  ;;  %3884 = vmatprep.mubr.bf16.mxu1 %v7097_v25  ;;  %v6751_v10 = vld [vmem:[%s6992_s19 + $0x9d4] ss:$40 sps:$4 sm:$0xff]   ;;  %v6746_v11 = vld [vmem:[%s6992_s19 + $0xec8] ss:$40 sps:$4 sm:$0xff]  }
 0x19d   : > { %3966 = vmatprep.mubr.bf16.mxu0 %v7069_v5  ;;  %v6682_v5 = vld [vmem:[%s6992_s19 + $0xb5c] ss:$40 sps:$4 sm:$0xff]  }
 0x19e   : > { %3855 = vmatpush1.bf16.msra.mxu1 %v6662_v12  ;;  %v6749_v12 = vld [vmem:[%s6992_s19 + $0x9d0] ss:$40 sps:$4 sm:$0xff]  }
 0x19f   : > { %3937 = vmatpush1.bf16.msra.mxu0 %v6665_v13  ;;  %3856 = vmatprep.subr.bf16.mxu1 %v6670_v14  ;;  %v6754_v13 = vld [vmem:[%s6992_s19 + $0xa24] ss:$40 sps:$4 sm:$0xff]   ;;  %v6752_v14 = vld [vmem:[%s6992_s19 + $0xa20] ss:$40 sps:$4 sm:$0xff]  }
 0x1a0   : > { %3938 = vmatprep.subr.bf16.mxu0 %v6673_v16  ;;  %v6757_v16 = vld [vmem:[%s6992_s19 + $0xa74] ss:$40 sps:$4 sm:$0xff]  }
 0x1a2   : > { %3857 = vmatpush1.bf16.msra.mxu1 %v6668_v15  ;;  %v6755_v15 = vld [vmem:[%s6992_s19 + $0xa70] ss:$40 sps:$4 sm:$0xff]  }
 0x1a3   : > { %3939 = vmatpush1.bf16.msra.mxu0 %v6671_v17  ;;  %3858 = vmatprep.subr.bf16.mxu1 %v6676_v18  ;;  %v6760_v17 = vld [vmem:[%s6992_s19 + $0xac4] ss:$40 sps:$4 sm:$0xff]   ;;  %v6758_v18 = vld [vmem:[%s6992_s19 + $0xac0] ss:$40 sps:$4 sm:$0xff]  }
 0x1a4   : > { %3940 = vmatprep.subr.bf16.mxu0 %v6679_v19  ;;  %v6763_v19 = vld [vmem:[%s6992_s19 + $0xb14] ss:$40 sps:$4 sm:$0xff]  }
 0x1a6   : > { %3859 = vmatpush1.bf16.msra.mxu1 %v6674_v20  ;;  %v6761_v20 = vld [vmem:[%s6992_s19 + $0xb10] ss:$40 sps:$4 sm:$0xff]  }
 0x1a7   : > { %3941 = vmatpush1.bf16.msra.mxu0 %v6677_v23  ;;  %3860 = vmatprep.subr.bf16.mxu1 %v6682_v5  ;;  %v6766_v23 = vld [vmem:[%s6992_s19 + $0xb64] ss:$40 sps:$4 sm:$0xff]   ;;  %v6894_v5 = vmov 1983009808  }
 0x1a8   : > { %3942 = vmatprep.subr.bf16.mxu0 %v6685_v26  ;;  %v6764_v26 = vld [vmem:[%s6992_s19 + $0xb60] ss:$40 sps:$4 sm:$0xff]  }
 0x1aa   : > { %3861 = vmatpush1.bf16.msra.mxu1 %v6680_v27 }
 0x1ab   : > { %3943 = vmatpush1.bf16.msra.mxu0 %v6683_v28  ;;  %3862 = vmatprep.subr.bf16.mxu1 %v6688_v29  ;;  %v6767_v28 = vld [vmem:[%s6992_s19 + $0xbb0] ss:$40 sps:$4 sm:$0xff]   ;;  %v6772_v29 = vld [vmem:[%s6992_s19 + $0xc04] ss:$40 sps:$4 sm:$0xff]  }
 0x1ac   : > { %3944 = vmatprep.subr.bf16.mxu0 %v6691_v7 }
 0x1ae   : > { %3863 = vmatpush1.bf16.msra.mxu1 %v6686_v30 }
 0x1af   : > { %3945 = vmatpush1.bf16.msra.mxu0 %v6689_v8  ;;  %3864 = vmatprep.subr.bf16.mxu1 %v6694_v32 }
 0x1b0   : > { %3946 = vmatprep.subr.bf16.mxu0 %v6697_v33 }
 0x1b2   : > { %3865 = vmatpush1.bf16.msra.mxu1 %v6692_v34  ;;  %v6770_v34 = vld [vmem:[%s6992_s19 + $0xc00] ss:$40 sps:$4 sm:$0xff]  }
 0x1b3   : > { %3947 = vmatpush1.bf16.msra.mxu0 %v6695_v35  ;;  %3866 = vmatprep.subr.bf16.mxu1 %v6700_v36  ;;  %v6775_v36 = vld [vmem:[%s6992_s19 + $0xc54] ss:$40 sps:$4 sm:$0xff]  }
 0x1b4   : > { %3948 = vmatprep.subr.bf16.mxu0 %v6703_v37 }
 0x1b6   : > { %3867 = vmatpush1.bf16.msra.mxu1 %v6698_v38 }
 0x1b7   : > { %3949 = vmatpush1.bf16.msra.mxu0 %v6701_v39  ;;  %3868 = vmatprep.subr.bf16.mxu1 %v6706_v40  ;;  %v463_v39 = vld [vmem:[#allocation2] sm:$0xff] }
 0x1b8   : > { %3950 = vmatprep.subr.bf16.mxu0 %v6709_v41  ;;  %v6773_v41 = vld [vmem:[%s6992_s19 + $0xc50] ss:$40 sps:$4 sm:$0xff]  }
 0x1ba   : > { %3869 = vmatpush1.bf16.msra.mxu1 %v6704_v42  ;;  %v6778_v42 = vld [vmem:[%s6992_s19 + $0xca4] ss:$40 sps:$4 sm:$0xff]  }
 0x1bb   : > { %3951 = vmatpush1.bf16.msra.mxu0 %v6707_v43  ;;  %3870 = vmatprep.subr.bf16.mxu1 %v6712_v44  ;;  %v6776_v44 = vld [vmem:[%s6992_s19 + $0xca0] ss:$40 sps:$4 sm:$0xff]  }
 0x1bc   : > { %3952 = vmatprep.subr.bf16.mxu0 %v6715_v46  ;;  %v6782_v46 = vld [vmem:[%s6992_s19 + $0xd40] ss:$40 sps:$4 sm:$0xff]  }
 0x1be   : > { %3871 = vmatpush1.bf16.msra.mxu1 %v6710_v47  ;;  %v6787_v47 = vld [vmem:[%s6992_s19 + $0xd94] ss:$40 sps:$4 sm:$0xff]  }
 0x1bf   : > { %3953 = vmatpush1.bf16.msra.mxu0 %v6713_v48  ;;  %3872 = vmatprep.subr.bf16.mxu1 %v6718_v49  ;;  %v6785_v48 = vld [vmem:[%s6992_s19 + $0xd90] ss:$40 sps:$4 sm:$0xff]   ;;  %v6790_v49 = vld [vmem:[%s6992_s19 + $0xde4] ss:$40 sps:$4 sm:$0xff]  }
 0x1c0   : > { %3954 = vmatprep.subr.bf16.mxu0 %v6721_v50  ;;  %v6788_v50 = vld [vmem:[%s6992_s19 + $0xde0] ss:$40 sps:$4 sm:$0xff]  }
 0x1c2   : > { %3873 = vmatpush1.bf16.msra.mxu1 %v6716_v51  ;;  %v6793_v51 = vld [vmem:[%s6992_s19 + $0xe34] ss:$40 sps:$4 sm:$0xff]  }
 0x1c3   : > { %3955 = vmatpush1.bf16.msra.mxu0 %v6719_v52  ;;  %3874 = vmatprep.subr.bf16.mxu1 %v6724_v53  ;;  %v6791_v52 = vld [vmem:[%s6992_s19 + $0xe30] ss:$40 sps:$4 sm:$0xff]   ;;  %v6796_v53 = vld [vmem:[%s6992_s19 + $0xe84] ss:$40 sps:$4 sm:$0xff]  }
 0x1c4   : > { %3956 = vmatprep.subr.bf16.mxu0 %v6727_v54  ;;  %v6794_v54 = vld [vmem:[%s6992_s19 + $0xe80] ss:$40 sps:$4 sm:$0xff]  }
 0x1c6   : > { %3875 = vmatpush1.bf16.msra.mxu1 %v6722_v55  ;;  %v6799_v55 = vld [vmem:[%s6992_s19 + $0xed4] ss:$40 sps:$4 sm:$0xff]  }
 0x1c7   : > { %3957 = vmatpush1.bf16.msra.mxu0 %v6725_v56  ;;  %3876 = vmatprep.subr.bf16.mxu1 %v6730_v57  ;;  %v6797_v56 = vld [vmem:[%s6992_s19 + $0xed0] ss:$40 sps:$4 sm:$0xff]  }
 0x1c8   : > { %3958 = vmatprep.subr.bf16.mxu0 %v6733_v58 }
 0x1ca   : > { %3877 = vmatpush1.bf16.msra.mxu1 %v6728_v59 }
 0x1cb   : > { %3959 = vmatpush1.bf16.msra.mxu0 %v6731_v60  ;;  %3878 = vmatprep.subr.bf16.mxu1 %v6736_v61 }
 0x1cc   : > { %3960 = vmatprep.subr.bf16.mxu0 %v6739_v62 }
 0x1ce   : > { %3879 = vmatpush1.bf16.msra.mxu1 %v6734_v63 }
 0x1cf   : > { %3961 = vmatpush1.bf16.msra.mxu0 %v6737_v2  ;;  %3880 = vmatprep.subr.bf16.mxu1 %v6742_v3 }
 0x1d0   : > { %3962 = vmatprep.subr.bf16.mxu0 %v6745_v4 }
 0x1d2   : > { %3881 = vmatpush1.bf16.msra.mxu1 %v6740_v6 }
 0x1d3   : > { %3963 = vmatpush1.bf16.msra.mxu0 %v6743_v9  ;;  %3882 = vmatprep.subr.bf16.mxu1 %v6748_v0  ;;  %v464_v0 = vld [vmem:[#allocation2 + $0x8] sm:$0xff] }
 0x1d4   : > { %3964 = vmatprep.subr.bf16.mxu0 %v6751_v10 }
 0x1d6   : > { %3883 = vmatpush1.bf16.msra.mxu1 %v6746_v11 }
 0x1d7   : > { %3965 = vmatpush1.bf16.msra.mxu0 %v6749_v12 }
 0x1d8   : > { %3975 = vmatprep.subr.bf16.mxu0 %v6754_v13 }
 0x1d9   : > { %3885 = vmatmul.mubr.bf16.vlgmr.msra.gmra.mrb[8].mxu1 %v7062_v1 }
 0x1da   : > { %3967 = vmatmul.mubr.bf16.vlgmr.msra.gmra.mrb[8].mxu0 %v7091_v21  ;;  %v4029_v21 = vunpack.c.l.s4 %v6894_v5  ;;  %v6803_v5 = vld [vmem:[%s7896_s4 + $0x80] sm:$0xff] (!%p5800_p6)  }
 0x1db   : > { %3976 = vmatpush1.bf16.msra.mxu0 %v6752_v14  ;;  %4007 = vmatprep.mubr.bf16.mxu0 %v7097_v25  ;;  %v6769_v25 = vld [vmem:[%s6992_s19 + $0xbb4] ss:$40 sps:$4 sm:$0xff]  }
 0x1dc   : > { %3977 = vmatprep.subr.bf16.mxu0 %v6757_v16  ;;  %v4030_v27 = vunpack.c.0.s8 %v4029_v21  ;;  %v465_v16 = vld [vmem:[#allocation2 + $0x10] sm:$0xf]  ;;  %v6804_v21 = vld [vmem:[%s7896_s4 + $0x48] sm:$0xff] (!%p5800_p6)  }
 0x1de   : > { %v7530_v7 = vsub.s32 %v4030_v27, %v7034_v45  ;;  %v6807_v27 = vld [vmem:[%s7896_s4 + $0x88] sm:$0xff] (!%p5800_p6)  }
 0x1df   : > { %3978 = vmatpush1.bf16.msra.mxu0 %v6755_v15 }
 0x1e0   : > { %3979 = vmatprep.subr.bf16.mxu0 %v6760_v17  ;;  %v4034_v37 = vrot.slane %v4026_v31, %v7530_v7  ;;  %v6784_v31 = vld [vmem:[%s6992_s19 + $0xd44] ss:$40 sps:$4 sm:$0xff]  }
 0x1e3   : > { %3980 = vmatpush1.bf16.msra.mxu0 %v6758_v18 }
 0x1e4   : > { %3981 = vmatprep.subr.bf16.mxu0 %v6763_v19  ;;  %v6800_v19 = vld [vmem:[%s7896_s4 + $0x40] sm:$0xff] (!%p5800_p6)  }
 0x1e7   : > { %3982 = vmatpush1.bf16.msra.mxu0 %v6761_v20  ;;  %v6801_v20 = vld [vmem:[%s7896_s4] sm:$0xff] (!%p5800_p6)  }
 0x1e8   : > { %3983 = vmatprep.subr.bf16.mxu0 %v6766_v23  ;;  %v6802_v23 = vld [vmem:[%s7896_s4 + $0xc0] sm:$0xff] (!%p5800_p6)  }
 0x1e9   : > { %5917 = vmatprep.subr.bf16.mxu1 (!%p5800_p6), %v6802_v23 }
 0x1ea   : > { %5918 = vmatpush3.bf16.msra.mxu1 (!%p5800_p6), %v6803_v5 }
 0x1eb   : > { %3984 = vmatpush1.bf16.msra.mxu0 %v6764_v26  ;;  %v6805_v26 = vld [vmem:[%s7896_s4 + $0x8] sm:$0xff] (!%p5800_p6)  }
 0x1ec   : > { %3985 = vmatprep.subr.bf16.mxu0 %v6769_v25  ;;  %v3640_v30 = vpop.f32.mrb[4].mxu1  ;;  %v6806_v25 = vld [vmem:[%s7896_s4 + $0xc8] sm:$0xff] (!%p5800_p6)  }
 0x1ed   : > { %v3642_v8 = vpop.f32.mrb[5].mxu1  ;;  %5919 = vmatprep.subr.bf16.mxu1 (!%p5800_p6), %v6806_v25 }
 0x1ee   : > { %v4027_v32 = vcombine.low %v3640_v30, %v3642_v8  ;;  %v3644_v33 = vpop.f32.mrb[6].mxu1  ;;  %5920 = vmatpush3.bf16.msra.mxu1 (!%p5800_p6), %v6807_v27  ;;  %v6810_v30 = vld [vmem:[%s7896_s4 + $0xd0] sm:$0xff] (!%p5800_p6)   ;;  %v6833_v27 = vld [vmem:[%s7896_s4 + $0x100] sm:$0xff] (!%p5800_p6)  }
 0x1ef   : > { %3986 = vmatpush1.bf16.msra.mxu0 %v6767_v28  ;;  %v3645_v35 = vpop.f32.mrb[7].mxu1  ;;  %v6808_v28 = vld [vmem:[%s7896_s4 + $0x50] sm:$0xff] (!%p5800_p6)   ;;  %5921 = vmatprep.subr.bf16.mxu1 (!%p5800_p6), %v6810_v30  ;;  %v6813_v33 = vld [vmem:[%s7896_s4 + $0x18] sm:$0xff] (!%p5800_p6)  }
 0x1f0   : > { %3987 = vmatprep.subr.bf16.mxu0 %v6772_v29  ;;  %v4041_v38 = vrot.slane %v4027_v32, %v7530_v7  ;;  %v6809_v29 = vld [vmem:[%s7896_s4 + $0x10] sm:$0xff] (!%p5800_p6)   ;;  %v6812_v32 = vld [vmem:[%s7896_s4 + $0x58] sm:$0xff] (!%p5800_p6)  }
 0x1f1   : > { %v6811_v8 = vld [vmem:[%s7896_s4 + $0x90] sm:$0xff] (!%p5800_p6)   ;;  %v6815_v35 = vld [vmem:[%s7896_s4 + $0x98] sm:$0xff] (!%p5800_p6)  }
 0x1f2   : > { %v4042_v40 = vcombine.low %v4034_v37, %v4041_v38  ;;  %5922 = vmatpush3.bf16.msra.mxu1 (!%p5800_p6), %v6811_v8  ;;  %v6817_v37 = vld [vmem:[%s7896_s4 + $0x20] sm:$0xff] (!%p5800_p6)  }
 0x1f3   : > { %3988 = vmatpush1.bf16.msra.mxu0 %v6770_v34  ;;  %v6814_v34 = vld [vmem:[%s7896_s4 + $0xd8] sm:$0xff] (!%p5800_p6)   ;;  %v6818_v38 = vld [vmem:[%s7896_s4 + $0xe0] sm:$0xff] (!%p5800_p6)  }
 0x1f4   : > { %3989 = vmatprep.subr.bf16.mxu0 %v6775_v36  ;;  %v4071_v43 = vadd.f32 %v4042_v40, %v463_v39  ;;  %5923 = vmatprep.subr.bf16.mxu1 (!%p5800_p6), %v6814_v34  ;;  %v6816_v36 = vld [vmem:[%s7896_s4 + $0x60] sm:$0xff] (!%p5800_p6)   ;;  %v6820_v40 = vld [vmem:[%s7896_s4 + $0x68] sm:$0xff] (!%p5800_p6)  }
 0x1f5   : > { %v6819_v39 = vld [vmem:[%s7896_s4 + $0xa0] sm:$0xff] (!%p5800_p6)   ;;  %v6838_v34 = vld [vmem:[%s7896_s4 + $0x1c8] sm:$0xff] (!%p5800_p6)  }
 0x1f6   : > { %4074 = vst [vmem:[#allocation2] sm:$0xff] %v4071_v43  ;;  %5924 = vmatpush3.bf16.msra.mxu1 (!%p5800_p6), %v6815_v35  ;;  %v6823_v43 = vld [vmem:[%s7896_s4 + $0xa8] sm:$0xff] (!%p5800_p6)   ;;  %v6835_v8 = vld [vmem:[%s7896_s4 + $0x180] sm:$0xff] (!%p5800_p6)  }
 0x1f7   : > { %3990 = vmatpush1.bf16.msra.mxu0 %v6773_v41  ;;  %5925 = vmatprep.subr.bf16.mxu1 (!%p5800_p6), %v6818_v38  ;;  %v6821_v41 = vld [vmem:[%s7896_s4 + $0x28] sm:$0xff] (!%p5800_p6)  }
 0x1f8   : > { %3991 = vmatprep.subr.bf16.mxu0 %v6778_v42  ;;  %v6822_v42 = vld [vmem:[%s7896_s4 + $0xe8] sm:$0xff] (!%p5800_p6)  }
 0x1f9   : > { %v6837_v35 = vld [vmem:[%s7896_s4 + $0x108] sm:$0xff] (!%p5800_p6)  }
 0x1fa   : > { %5926 = vmatpush3.bf16.msra.mxu1 (!%p5800_p6), %v6819_v39 }
 0x1fb   : > { %3992 = vmatpush1.bf16.msra.mxu0 %v6776_v44  ;;  %5927 = vmatprep.subr.bf16.mxu1 (!%p5800_p6), %v6822_v42  ;;  %v6824_v44 = vld [vmem:[%s7896_s4 + $0x70] sm:$0xff] (!%p5800_p6)  }
 0x1fc   : > { %3993 = vmatprep.subr.bf16.mxu0 %v6781_v22  ;;  %v6825_v22 = vld [vmem:[%s7896_s4 + $0x30] sm:$0xff] (!%p5800_p6)  }
 0x1fd   : > { %v6841_v42 = vld [vmem:[%s7896_s4 + $0x110] sm:$0xff] (!%p5800_p6)  }
 0x1fe   : > { %5928 = vmatpush3.bf16.msra.mxu1 (!%p5800_p6), %v6823_v43  ;;  %v6844_v43 = vld [vmem:[%s7896_s4 + $0x158] sm:$0xff] (!%p5800_p6)  }
 0x1ff   : > { %3994 = vmatpush1.bf16.msra.mxu0 %v6779_v24  ;;  %v4093_v24 = vsub.s32 (!%p5800_p6), 0, %v7034_v45 }
 0x200   : > { %3995 = vmatprep.subr.bf16.mxu0 %v6784_v31  ;;  %v6826_v31 = vld [vmem:[%s7896_s4 + $0xf0] sm:$0xff] (!%p5800_p6)  }
 0x201   : > { %5929 = vmatprep.subr.bf16.mxu1 (!%p5800_p6), %v6826_v31  ;;  %v6846_v31 = vld [vmem:[%s7896_s4 + $0x1d8] sm:$0xff] (!%p5800_p6)  }
 0x203   : > { %3996 = vmatpush1.bf16.msra.mxu0 %v6782_v46  ;;  %v4097_v46 = vsub.s32 (!%p5800_p6), 1, %v7034_v45 }
 0x204   : > { %3997 = vmatprep.subr.bf16.mxu0 %v6787_v47  ;;  %v6827_v47 = vld [vmem:[%s7896_s4 + $0xb0] sm:$0xff] (!%p5800_p6)  }
 0x205   : > { %5930 = vmatpush3.bf16.msra.mxu1 (!%p5800_p6), %v6827_v47  ;;  %v6845_v47 = vld [vmem:[%s7896_s4 + $0x118] sm:$0xff] (!%p5800_p6)  }
 0x207   : > { %3998 = vmatpush1.bf16.msra.mxu0 %v6785_v48  ;;  %v4101_v48 = vsub.s32 (!%p5800_p6), 2, %v7034_v45 }
 0x208   : > { %3999 = vmatprep.subr.bf16.mxu0 %v6790_v49  ;;  %v6828_v49 = vld [vmem:[%s7896_s4 + $0x78] sm:$0xff] (!%p5800_p6)  }
 0x20b   : > { %4000 = vmatpush1.bf16.msra.mxu0 %v6788_v50  ;;  %v4105_v50 = vsub.s32 (!%p5800_p6), 3, %v7034_v45 }
 0x20c   : > { %4001 = vmatprep.subr.bf16.mxu0 %v6793_v51  ;;  %v6829_v51 = vld [vmem:[%s7896_s4 + $0x38] sm:$0xff] (!%p5800_p6)  }
 0x20f   : > { %4002 = vmatpush1.bf16.msra.mxu0 %v6791_v52  ;;  %v6830_v52 = vld [vmem:[%s7896_s4 + $0xf8] sm:$0xff] (!%p5800_p6)  }
 0x210   : > { %4003 = vmatprep.subr.bf16.mxu0 %v6796_v53  ;;  %v4087_v53 = vld [vmem:[%s7894_s2] sm:$0xff] (!%p5800_p6)  ;;  %5931 = vmatprep.subr.bf16.mxu1 (!%p5800_p6), %v6830_v52 }
 0x213   : > { %4004 = vmatpush1.bf16.msra.mxu0 %v6794_v54  ;;  %v4094_v54 = vrot.slane (!%p5800_p6), %v4087_v53, %v4093_v24 }
 0x214   : > { %4005 = vmatprep.subr.bf16.mxu0 %v6799_v55  ;;  %v4098_v55 = vrot.slane (!%p5800_p6), %v4087_v53, %v4097_v46 }
 0x217   : > { %4006 = vmatpush1.bf16.msra.mxu0 %v6797_v56  ;;  %v4102_v56 = vrot.slane (!%p5800_p6), %v4087_v53, %v4101_v48 }
 0x218   : > { %5895 = vmatprep.subr.bf16.mxu0 (!%p5800_p6), %v6800_v19 }
 0x21a   : > { %4008 = vmatmul.mubr.bf16.vlgmr.msra.gmra.mrb[8].mxu0 %v7062_v1 }
 0x21b   : > { %5896 = vmatpush3.bf16.msra.mxu0 (!%p5800_p6), %v6801_v20 }
 0x21c   : > { %5897 = vmatprep.subr.bf16.mxu0 (!%p5800_p6), %v6804_v21 }
 0x21f   : > { %5898 = vmatpush3.bf16.msra.mxu0 (!%p5800_p6), %v6805_v26 }
 0x220   : > { %5899 = vmatprep.subr.bf16.mxu0 (!%p5800_p6), %v6808_v28 }
 0x223   : > { %5900 = vmatpush3.bf16.msra.mxu0 (!%p5800_p6), %v6809_v29  ;;  %v6836_v29 = vld [vmem:[%s7896_s4 + $0x148] sm:$0xff] (!%p5800_p6)  }
 0x224   : > { %5901 = vmatprep.subr.bf16.mxu0 (!%p5800_p6), %v6812_v32 }
 0x227   : > { %5902 = vmatpush3.bf16.msra.mxu0 (!%p5800_p6), %v6813_v33 }
 0x228   : > { %5903 = vmatprep.subr.bf16.mxu0 (!%p5800_p6), %v6816_v36  ;;  %v6840_v36 = vld [vmem:[%s7896_s4 + $0x150] sm:$0xff] (!%p5800_p6)  }
 0x22b   : > { %5904 = vmatpush3.bf16.msra.mxu0 (!%p5800_p6), %v6817_v37  ;;  %v6839_v37 = vld [vmem:[%s7896_s4 + $0x188] sm:$0xff] (!%p5800_p6)  }
 0x22c   : > { %5905 = vmatprep.subr.bf16.mxu0 (!%p5800_p6), %v6820_v40  ;;  %v6842_v40 = vld [vmem:[%s7896_s4 + $0x1d0] sm:$0xff] (!%p5800_p6)  }
 0x22d   : > { %v3763_v57 = vpop.f32.mrb[4].mxu0 }
 0x22e   : > { %v3765_v58 = vpop.f32.mrb[5].mxu0 }
 0x22f   : > { %v4043_v59 = vcombine.low %v3763_v57, %v3765_v58  ;;  %v3767_v60 = vpop.f32.mrb[6].mxu0  ;;  %5906 = vmatpush3.bf16.msra.mxu0 (!%p5800_p6), %v6821_v41  ;;  %v4106_v57 = vrot.slane (!%p5800_p6), %v4087_v53, %v4105_v50  ;;  %v6831_v58 = vld [vmem:[%s7896_s4 + $0xb8] sm:$0xff] (!%p5800_p6)   ;;  %v4088_v41 = vld [vmem:[%s7894_s2 + $0x8] sm:$0x3] (!%p5800_p6) }
 0x230   : > { %v3768_v61 = vpop.f32.mrb[7].mxu0  ;;  %5907 = vmatprep.subr.bf16.mxu0 (!%p5800_p6), %v6824_v44  ;;  %v4131_v60 = vcombine.low (!%p5800_p6), %v4094_v54, %v4098_v55  ;;  %5932 = vmatpush3.bf16.msra.mxu1 (!%p5800_p6), %v6831_v58  ;;  %v6843_v44 = vld [vmem:[%s7896_s4 + $0x190] sm:$0xff] (!%p5800_p6)   ;;  %v4126_v48 = vrot.slane (!%p5800_p6), %v4088_v41, %v4093_v24  ;;  %v6847_v50 = vld [vmem:[%s7896_s4 + $0x198] sm:$0xff] (!%p5800_p6)   ;;  %v6850_v24 = vld [vmem:[%s7896_s4 + $0x1e0] sm:$0xff] (!%p5800_p6)  }
 0x231   : > { %v4051_v6 = vrot.slane %v4043_v59, %v7530_v7  ;;  %v6832_v59 = vld [vmem:[%s7896_s4 + $0x140] sm:$0xff] (!%p5800_p6)   ;;  %v4132_v61 = vcombine.low (!%p5800_p6), %v4102_v56, %v4106_v57  ;;  %v6852_v55 = vld [vmem:[%s7896_s4 + $0x168] sm:$0xff] (!%p5800_p6)  }
 0x232   : > { %v6853_v58 = vld [vmem:[%s7896_s4 + $0x128] sm:$0xff] (!%p5800_p6)  }
 0x233   : > { %5908 = vmatpush3.bf16.msra.mxu0 (!%p5800_p6), %v6825_v22 }
 0x234   : > { %5909 = vmatprep.subr.bf16.mxu0 (!%p5800_p6), %v6828_v49  ;;  %v4130_v49 = vrot.slane (!%p5800_p6), %v4088_v41, %v4097_v46  ;;  %v6851_v46 = vld [vmem:[%s7896_s4 + $0x1a0] sm:$0xff] (!%p5800_p6)  }
 0x235   : > { %v6873_v41 = vld [vmem:[%s7899_s7] sm:$0xff] (!%p5800_p6)  }
 0x236   : > { %v4165_v57 = vcombine.low (!%p5800_p6), %v4126_v48, %v4130_v49  ;;  %v6879_v48 = vld [vmem:[%s7899_s7 + $0x30] ss:$0 sps:$4 sm:$0x33] (!%p5800_p6)  }
 0x237   : > { %5910 = vmatpush3.bf16.msra.mxu0 (!%p5800_p6), %v6829_v51  ;;  %v6848_v51 = vld [vmem:[%s7896_s4 + $0x160] sm:$0xff] (!%p5800_p6)   ;;  %v5127_v49 = vsel (!%p5800_p6), %vm4076_vm3, %v6879_v48, 0 }
 0x238   : > { %5939 = vmatprep.subr.bf16.mxu0 (!%p5800_p6), %v6832_v59  ;;  %v6854_v59 = vld [vmem:[%s7896_s4 + $0x1e8] sm:$0xff] (!%p5800_p6)  }
 0x2ac   : > { %v3886_v62 = vpop.f32.mrb[8].mxu1 }
 0x2ad   : > { %v3888_v63 = vpop.f32.mrb[9].mxu1 }
 0x2ae   : > { %v4044_v2 = vcombine.low %v3886_v62, %v3888_v63  ;;  %v3890_v3 = vpop.f32.mrb[10].mxu1  ;;  %v4139_v62 = vrot.slane (!%p5800_p6), %v4131_v60, %v7530_v7  ;;  %v4146_v63 = vrot.slane (!%p5800_p6), %v4132_v61, %v7530_v7  ;;  %v6855_v61 = vld [vmem:[%s7896_s4 + $0x1a8] sm:$0xff] (!%p5800_p6)  }
 0x2af   : > { %v3891_v4 = vpop.f32.mrb[11].mxu1  ;;  %v4084_v3 = vld [vmem:[#allocation2] sm:$0xff] (!%p5800_p6) }
 0x2b0   : > { %v4058_v9 = vrot.slane %v4044_v2, %v7530_v7  ;;  %v6834_v2 = vld [vmem:[%s7896_s4 + $0x1c0] sm:$0xff] (!%p5800_p6)   ;;  %v4147_v4 = vcombine.low (!%p5800_p6), %v4139_v62, %v4146_v63  ;;  %v6856_v63 = vld [vmem:[%s7896_s4 + $0x170] sm:$0xff] (!%p5800_p6)  }
 0x2b1   : > { %5961 = vmatprep.subr.bf16.mxu1 (!%p5800_p6), %v6834_v2 }
 0x2b2   : > { %v4059_v10 = vcombine.low %v4051_v6, %v4058_v9  ;;  %v4176_v6 = vadd.f32 (!%p5800_p6), %v4147_v4, %v4084_v3  ;;  %v4182_v9 = vld [vmem:[%s7895_s3] sm:$0xff] (!%p5800_p6)  ;;  %v4172_v4 = vrot.slane (!%p5800_p6), %v4165_v57, %v7530_v7 }
 0x2b3   : > { %vm4185_vm6 = vcmp.ge.f32.partialorder (!%p5800_p6), %v4182_v9, 0.3  ;;  %v6858_v9 = vld [vmem:[%s7896_s4 + $0x1f0] sm:$0xff] (!%p5800_p6)  }
 0x2b4   : > { %v4072_v11 = vadd.f32 %v4059_v10, %v464_v0  ;;  %v4109_v0 = vsub.s32 (!%p5800_p6), 4, %v7034_v45  ;;  %v4179_v10 = vmax.f32 (!%p5800_p6), %v4176_v6, 0.0  ;;  %v6857_v6 = vld [vmem:[%s7896_s4 + $0x130] sm:$0xff] (!%p5800_p6)  }
 0x2b6   : > { %4075 = vst [vmem:[#allocation2 + $0x8] sm:$0xff] %v4072_v11  ;;  %v4113_v11 = vsub.s32 (!%p5800_p6), 5, %v7034_v45 }
 0x2bd   : > { %v4085_v52 = vld [vmem:[#allocation2 + $0x8] sm:$0xff] (!%p5800_p6) }
 0x2ed   : > { %v4009_v12 = vpop.f32.mrb[8].mxu0 }
 0x2ee   : > { %v4011_v1 = vpop.f32.mrb[9].mxu0 }
 0x2ef   : > { %v4060_v13 = vcombine.low %v4009_v12, %v4011_v1  ;;  %v4013_v14 = vpop.f32.mrb[10].mxu0  ;;  %4083 = sbr.rel (%p5800_p6) target bundleno = 1633 (0x661), region = 80  ;;  %v4188_v12 = vmul.f32 (!%p5800_p6), 1.4285715, %v4179_v10  ;;  %v4117_v1 = vsub.s32 (!%p5800_p6), 6, %v7034_v45 }
 0x2f0   : > { %v4014_v15 = vpop.f32.mrb[11].mxu0 }
 0x2f1   : > { %v4067_v17 = vrot.slane %v4060_v13, %v7530_v7  ;;  %v4121_v13 = vsub.s32 (!%p5800_p6), 7, %v7034_v45  ;;  %v4191_v14 = vsel (!%p5800_p6), %vm4185_vm6, %v4188_v12, 0.0  ;;  %v4118_v23 = vrot.slane (!%p5800_p6), %v4087_v53, %v4117_v1  ;;  %v4183_v45 = vld [vmem:[%s7895_s3 + $0x8] sm:$0xff] (!%p5800_p6)  ;;  %v4184_v1 = vld [vmem:[%s7895_s3 + $0x10] sm:$0xf] (!%p5800_p6) }
 0x2f2   : > { %v4197_v15 = vcombine.high (!%p5800_p6), %v4191_v14, %v4191_v14  ;;  %vm4186_vm7 = vcmp.ge.f32.partialorder (!%p5800_p6), %v4183_v45, 0.3  ;;  %vm4187_vm8 = vcmp.ge.f32.partialorder (!%p5800_p6), %v4184_v1, 0.3 }
 0x2f3   : > { %v4073_v18 = vadd.f32 %v4067_v17, %v465_v16  ;;  %v4204_v16 = vrot.slane (!%p5800_p6), %v4191_v14, %v7530_v7  ;;  %v4110_v17 = vrot.slane (!%p5800_p6), %v4087_v53, %v4109_v0  ;;  %v4122_v5 = vrot.slane (!%p5800_p6), %v4087_v53, %v4121_v13 }
 0x2f4   : > { %v4211_v20 = vrot.slane (!%p5800_p6), %v4197_v15, %v7530_v7  ;;  %v6859_v15 = vld [vmem:[%s7896_s4 + $0x1b0] sm:$0xff] (!%p5800_p6)  }
 0x2f5   : > { %4079 = vst.msk [vmem:[#allocation2 + $0x10] sm:$0xf] %vm4078_vm5, %v4073_v18  ;;  %v4114_v18 = vrot.slane (!%p5800_p6), %v4087_v53, %v4113_v11  ;;  %v4212_v19 = vcombine.high (!%p5800_p6), %v4204_v16, %v4204_v16  ;;  %v4249_v21 = vpack.c.bf16 (!%p5800_p6), %v4204_v16, %v4204_v16  ;;  %v4149_v33 = vcombine.low (!%p5800_p6), %v4118_v23, %v4122_v5  ;;  %v6849_v53 = vld [vmem:[%s7896_s4 + $0x120] sm:$0xff] (!%p5800_p6)   ;;  %v6860_v11 = vld [vmem:[%s7896_s4 + $0x178] sm:$0xff] (!%p5800_p6)  }
 0x2f6   : > { %v4213_v25 = vcombine.high %v4211_v20, %v4211_v20  ;;  %v4251_v28 = vpack.c.bf16 %v4211_v20, %v4211_v20  ;;  %v6863_v23 = vld [vmem:[%s7896_s4 + $0x1b8] sm:$0xff]  }
 0x2f7   : > { %v4250_v26 = vpack.c.bf16 %v4212_v19, %v4212_v19  ;;  %v4148_v32 = vcombine.low %v4110_v17, %v4114_v18  ;;  %v4163_v39 = vrot.slane %v4149_v33, %v7530_v7  ;;  %v6861_v17 = vld [vmem:[%s7896_s4 + $0x138] sm:$0xff]  }
 0x2f8   : > { %v4252_v30 = vpack.c.bf16 %v4213_v25, %v4213_v25  ;;  %v6862_v18 = vld [vmem:[%s7896_s4 + $0x1f8] sm:$0xff]  }
 0x2f9   : > { %4889 = vmatprep.mubr.bf16.mxu0 %v4250_v26  ;;  %v4156_v38 = vrot.slane %v4148_v32, %v7530_v7  ;;  %v6864_v26 = vld [vmem:[%s7896_s4 + $0x200] sm:$0xff]   ;;  %v6867_v33 = vld [vmem:[%s7896_s4 + $0x218] sm:$0xff]  }
 0x2fa   : > { %4890 = vmatmul.mubr.bf16.vlgmr.msra.gmra.mrb[0].mxu0 %v4249_v21  ;;  %4929 = vmatprep.mubr.bf16.mxu1 %v4252_v30 }
 0x2fb   : > { %5940 = vmatpush3.bf16.msra.mxu0 %v6833_v27  ;;  %4930 = vmatmul.mubr.bf16.vlgmr.msra.gmra.mrb[0].mxu1 %v4251_v28  ;;  %v4164_v22 = vcombine.low %v4156_v38, %v4163_v39  ;;  %v6895_v28 = vmov 0   ;;  %v6872_v38 = vld [vmem:[%s7896_s4 + $0x240] sm:$0x3f]  }
 0x2fc   : > { %5941 = vmatprep.subr.bf16.mxu0 %v6836_v29  ;;  %5962 = vmatpush3.bf16.msra.mxu1 %v6835_v8  ;;  %v4086_v12 = vld [vmem:[#allocation2 + $0x10] sm:$0xf]  ;;  %v6865_v8 = vld [vmem:[%s7896_s4 + $0x208] sm:$0xff]   ;;  %v4855_v39 = vsel %vm4853_vm10, %v6872_v38, 0 }
 0x2fd   : > { %5963 = vmatprep.subr.bf16.mxu1 %v6838_v34  ;;  %v4177_v54 = vadd.f32 %v4164_v22, %v4085_v52  ;;  %v4178_v16 = vadd.f32 %v4172_v4, %v4086_v12  ;;  %v6868_v34 = vld [vmem:[%s7896_s4 + $0x220] sm:$0xff]   ;;  %v6876_v22 = vld [vmem:[%s7899_s7 + $0x18] sm:$0xff]  }
 0x2ff   : > { %5942 = vmatpush3.bf16.msra.mxu0 %v6837_v35  ;;  %v4180_v56 = vmax.f32 %v4177_v54, 0.0  ;;  %v4181_v20 = vmax.f32 %v4178_v16, 0.0  ;;  %v6869_v35 = vld [vmem:[%s7896_s4 + $0x228] sm:$0xff]  }
 0x300   : > { %5943 = vmatprep.subr.bf16.mxu0 %v6840_v36  ;;  %5964 = vmatpush3.bf16.msra.mxu1 %v6839_v37  ;;  %v6870_v36 = vld [vmem:[%s7896_s4 + $0x230] sm:$0xff]   ;;  %v6871_v37 = vld [vmem:[%s7896_s4 + $0x238] sm:$0xff]  }
 0x301   : > { %5965 = vmatprep.subr.bf16.mxu1 %v6842_v40  ;;  %v4189_v60 = vmul.f32 1.4285715, %v4180_v56  ;;  %v4190_v5 = vmul.f32 1.4285715, %v4181_v20  ;;  %v6880_v20 = vld [vmem:[%s7901_s9] sm:$0xff]  }
 0x303   : > { %5944 = vmatpush3.bf16.msra.mxu0 %v6841_v42  ;;  %v4192_v62 = vsel %vm4186_vm7, %v4189_v60, 0.0  ;;  %v4193_v25 = vsel %vm4187_vm8, %v4190_v5, 0.0  ;;  %v6896_v42 = vmov 0.0   ;;  %v6881_v5 = vld [vmem:[%s7901_s9 + $0x8] sm:$0xff]  }
 0x304   : > { %5945 = vmatprep.subr.bf16.mxu0 %v6844_v43  ;;  %5966 = vmatpush3.bf16.msra.mxu1 %v6843_v44  ;;  %v4221_v2 = vrot.slane %v4192_v62, %v7530_v7  ;;  %v4214_v3 = vcombine.high %v4192_v62, %v4192_v62  ;;  %v4237_v27 = vrot.slane %v4193_v25, %v7530_v7  ;;  %v6874_v43 = vld [vmem:[%s7899_s7 + $0x8] sm:$0xff]   ;;  %v6875_v44 = vld [vmem:[%s7899_s7 + $0x10] sm:$0xff]  }
 0x305   : > { %5967 = vmatprep.subr.bf16.mxu1 %v6846_v31  ;;  %v6877_v31 = vld [vmem:[%s7899_s7 + $0x20] sm:$0xff]  }
 0x306   : > { %v4229_v0 = vcombine.high %v4221_v2, %v4221_v2  ;;  %v4228_v10 = vrot.slane %v4214_v3, %v7530_v7  ;;  %v4253_v21 = vpack.c.bf16 %v4221_v2, %v4221_v2  ;;  %v4238_v30 = vcombine.high %v4237_v27, %v4237_v27  ;;  %v6866_v7 = vld [vmem:[%s7896_s4 + $0x210] sm:$0xff]  }
 0x307   : > { %5946 = vmatpush3.bf16.msra.mxu0 %v6845_v47  ;;  %v4257_v40 = vpack.c.bf16 %v4237_v27, %v4237_v27  ;;  %v6878_v47 = vld [vmem:[%s7899_s7 + $0x28] sm:$0xff]   ;;  %v5876_v27 = vld [vmem:[%s7900_s8] ss:$0 sm:$0xff] }
 0x308   : > { %5947 = vmatprep.subr.bf16.mxu0 %v6848_v51  ;;  %5968 = vmatpush3.bf16.msra.mxu1 %v6847_v50  ;;  %v4254_v13 = vpack.c.bf16 %v4229_v0, %v4229_v0  ;;  %v4230_v14 = vcombine.high %v4228_v10, %v4228_v10  ;;  %v4255_v29 = vpack.c.bf16 %v4228_v10, %v4228_v10  ;;  %v5801_v51 = vld [vmem:[%s7897_s5] ss:$0 sm:$0xff] }
 0x309   : > { %5969 = vmatprep.subr.bf16.mxu1 %v6850_v24  ;;  %v4258_v32 = vpack.c.bf16 %v4238_v30, %v4238_v30 }
 0x30a   : > { %4969 = vmatprep.mubr.bf16.mxu0 %v4254_v13  ;;  %v4256_v19 = vpack.c.bf16 %v4230_v14, %v4230_v14  ;;  %v5058_v13 = vld [vmem:[%s7898_s6] sm:$0x3] }
 0x30b   : > { %5948 = vmatpush3.bf16.msra.mxu0 %v6849_v53  ;;  %vm5059_vm12 = vcmp.ge.f32.partialorder %v5058_v13, 0.3 }
 0x30c   : > { %5949 = vmatprep.subr.bf16.mxu0 %v6852_v55  ;;  %5970 = vmatpush3.bf16.msra.mxu1 %v6851_v46 }
 0x30d   : > { %5971 = vmatprep.subr.bf16.mxu1 %v6854_v59  ;;  %5009 = vmatprep.mubr.bf16.mxu1 %v4256_v19 }
 0x30f   : > { %5950 = vmatpush3.bf16.msra.mxu0 %v6853_v58 }
 0x310   : > { %5951 = vmatprep.subr.bf16.mxu0 %v6856_v63  ;;  %5972 = vmatpush3.bf16.msra.mxu1 %v6855_v61 }
 0x311   : > { %5973 = vmatprep.subr.bf16.mxu1 %v6858_v9 }
 0x313   : > { %5952 = vmatpush3.bf16.msra.mxu0 %v6857_v6 }
 0x314   : > { %5953 = vmatprep.subr.bf16.mxu0 %v6860_v11  ;;  %5974 = vmatpush3.bf16.msra.mxu1 %v6859_v15 }
 0x315   : > { %5975 = vmatprep.subr.bf16.mxu1 %v6862_v18 }
 0x317   : > { %5954 = vmatpush3.bf16.msra.mxu0 %v6861_v17 }
 0x318   : > { %5017 = vmatprep.subr.bf16.mxu0 %v6895_v28  ;;  %5976 = vmatpush3.bf16.msra.mxu1 %v6863_v23 }
 0x319   : > { %5996 = vmatprep.subr.bf16.mxu1 %v6896_v42 }
 0x31a   : > { %4970 = vmatmul.mubr.bf16.vlgmr.msra.gmra.mrb[4].mxu0 %v4253_v21  ;;  %v6882_v21 = vld [vmem:[%s7901_s9 + $0x10] sm:$0xff]  }
 0x31b   : > { %5018 = vmatpush1.bf16.msra.mxu0 %v6864_v26  ;;  %5010 = vmatmul.mubr.bf16.vlgmr.msra.gmra.mrb[4].mxu1 %v4255_v29  ;;  %v6883_v26 = vld [vmem:[%s7901_s9 + $0x18] ss:$0 sps:$4 sm:$0x11]  }
 0x31c   : > { %5019 = vmatprep.subr.bf16.mxu0 %v6895_v28  ;;  %5875 = vmatprep.mubr.msk.bf16.mxu0 %vm4849_vm9, %v4258_v32  ;;  %v5212_v25 = vsel %vm5210_vm14, %v6883_v26, 0 }
 0x31d   : > { %5997 = vmatpush3.bf16.msra.mxu1 %v6873_v41  ;;  %6010 = vmatprep.mubr.msk.bf16.mxu1 %vm6897_vm11, %v6896_v42 }
 0x31e   : > { %5998 = vmatprep.subr.bf16.mxu1 %v6896_v42 }
 0x31f   : > { %5020 = vmatpush1.bf16.msra.mxu0 %v6865_v8 }
 0x320   : > { %5021 = vmatprep.subr.bf16.mxu0 %v6895_v28 }
 0x321   : > { %5999 = vmatpush3.bf16.msra.mxu1 %v6874_v43 }
 0x322   : > { %6000 = vmatprep.subr.bf16.mxu1 %v6896_v42 }
 0x323   : > { %5022 = vmatpush1.bf16.msra.mxu0 %v6866_v7 }
 0x324   : > { %5023 = vmatprep.subr.bf16.mxu0 %v6895_v28 }
 0x325   : > { %6001 = vmatpush3.bf16.msra.mxu1 %v6875_v44  ;;  %v5892_v44 = vld [vmem:[#allocation3] ss:$0 sm:$0xff] }
 0x326   : > { %6002 = vmatprep.subr.bf16.mxu1 %v6896_v42 }
 0x327   : > { %5024 = vmatpush1.bf16.msra.mxu0 %v6867_v33 }
 0x328   : > { %5025 = vmatprep.subr.bf16.mxu0 %v6895_v28 }
 0x329   : > { %6003 = vmatpush3.bf16.msra.mxu1 %v6876_v22 }
 0x32a   : > { %6004 = vmatprep.subr.bf16.mxu1 %v6896_v42 }
 0x32b   : > { %5026 = vmatpush1.bf16.msra.mxu0 %v6868_v34  ;;  %v5885_v34 = vld [vmem:[%s7902_s10] ss:$0 sm:$0xff] }
 0x32c   : > { %5027 = vmatprep.subr.bf16.mxu0 %v6895_v28 }
 0x32d   : > { %6005 = vmatpush3.bf16.msra.mxu1 %v6877_v31 }
 0x32e   : > { %6006 = vmatprep.subr.bf16.mxu1 %v6896_v42 }
 0x32f   : > { %5028 = vmatpush1.bf16.msra.mxu0 %v6869_v35 }
 0x330   : > { %5029 = vmatprep.subr.bf16.mxu0 %v6895_v28 }
 0x331   : > { %6007 = vmatpush3.bf16.msra.mxu1 %v6878_v47 }
 0x332   : > { %6008 = vmatprep.subr.bf16.mxu1 %v6896_v42 }
 0x333   : > { %5030 = vmatpush1.bf16.msra.mxu0 %v6870_v36 }
 0x334   : > { %5031 = vmatprep.subr.bf16.mxu0 %v6895_v28 }
 0x335   : > { %6009 = vmatpush3.bf16.msra.mxu1 %v5127_v49 }
 0x336   : > { %6014 = vmatprep.subr.bf16.mxu1 %v6896_v42 }
 0x337   : > { %5032 = vmatpush1.bf16.msra.mxu0 %v6871_v37 }
 0x338   : > { %5033 = vmatprep.subr.bf16.mxu0 %v6895_v28 }
 0x33b   : > { %5034 = vmatpush1.bf16.msra.mxu0 %v4855_v39  ;;  %v5891_v39 = vld [vmem:[%s7903_s11] ss:$0 sm:$0xff] }
 0x33e   : > { %5050 = vmatmul.mubr.bf16.vlgmr.msra.gmra.mrb[8].mxu0 %v4257_v40 }
 0x3cd   : > { %v5911_v50 = vpop.f32.mrb[0].mxu0 }
 0x3ce   : > { %v5912_v52 = vpop.f32.mrb[1].mxu0  ;;  %v5933_v45 = vpop.f32.mrb[0].mxu1 }
 0x3cf   : > { %v5913_v53 = vadd.f32 %v5912_v52, %v5911_v50  ;;  %v5914_v54 = vpop.f32.mrb[2].mxu0  ;;  %v5934_v46 = vpop.f32.mrb[1].mxu1 }
 0x3d0   : > { %v5915_v24 = vpop.f32.mrb[3].mxu0  ;;  %v5935_v56 = vadd.f32 %v5934_v46, %v5933_v45  ;;  %v5936_v57 = vpop.f32.mrb[2].mxu1 }
 0x3d1   : > { %v4892_v55 = vadd.f32 %v5913_v53, %v5801_v51  ;;  %v5937_v58 = vpop.f32.mrb[3].mxu1 }
 0x3d3   : > { %v4932_v59 = vadd.f32 %v5935_v56, %v4892_v55 }
 0x3ed   : > { %v5955_v60 = vpop.f32.mrb[4].mxu0 }
 0x3ee   : > { %v5956_v61 = vpop.f32.mrb[5].mxu0  ;;  %v5977_v2 = vpop.f32.mrb[4].mxu1 }
 0x3ef   : > { %v5957_v62 = vadd.f32 %v5956_v61, %v5955_v60  ;;  %v5958_v63 = vpop.f32.mrb[6].mxu0  ;;  %v5978_v4 = vpop.f32.mrb[5].mxu1 }
 0x3f0   : > { %v5959_v3 = vpop.f32.mrb[7].mxu0  ;;  %v5979_v9 = vadd.f32 %v5978_v4, %v5977_v2  ;;  %v5980_v0 = vpop.f32.mrb[6].mxu1 }
 0x3f1   : > { %v4972_v6 = vadd.f32 %v5957_v62, %v4932_v59  ;;  %v5981_v10 = vpop.f32.mrb[7].mxu1 }
 0x3f3   : > { %v5012_v11 = vadd.f32 %v5979_v9, %v4972_v6 }
 0x411   : > { %v5051_v12 = vpop.f32.mrb[8].mxu0 }
 0x412   : > { %v5052_v1 = vadd.f32 %v5051_v12, %v5012_v11  ;;  %v5053_v14 = vpop.f32.mrb[9].mxu0 }
 0x413   : > { %v5054_v16 = vpop.f32.mrb[10].mxu0 }
 0x414   : > { %v5057_v15 = vmax.f32 %v5052_v1, 0.0  ;;  %v5055_v17 = vpop.f32.mrb[11].mxu0 }
 0x416   : > { %v5060_v18 = vmul.f32 1.4285715, %v5057_v15 }
 0x418   : > { %v5061_v19 = vsel %vm5059_vm12, %v5060_v18, 0.0 }
 0x419   : > { %v5062_v23 = vpack.c.bf16 %v5061_v19, %v5061_v19 }
 0x41b   : > { %6011 = vmatmul.mubr.msk.bf16.vlgmr.msra.gmra.mrb[8].mxu1 %vm5122_vm13, %v5062_v23 }
 0x41c   : > { %6015 = vmatpush3.bf16.msra.mxu1 %v6880_v20  ;;  %6022 = vmatprep.mubr.msk.bf16.mxu1 %vm6897_vm11, %v6896_v42 }
 0x41d   : > { %6016 = vmatprep.subr.bf16.mxu1 %v6896_v42 }
 0x420   : > { %6017 = vmatpush3.bf16.msra.mxu1 %v6881_v5 }
 0x421   : > { %6018 = vmatprep.subr.bf16.mxu1 %v6896_v42 }
 0x424   : > { %6019 = vmatpush3.bf16.msra.mxu1 %v6882_v21 }
 0x425   : > { %6020 = vmatprep.subr.bf16.mxu1 %v6896_v42 }
 0x428   : > { %6021 = vmatpush3.bf16.msra.mxu1 %v5212_v25 }
 0x4ee   : > { %v5163_v28 = vpop.f32.mrb[8].mxu1 }
 0x4ef   : > { %v5164_v29 = vadd.f32 %v5876_v27, %v5163_v28  ;;  %v6012_v30 = vpop.f32.mrb[9].mxu1 }
 0x4f0   : > { %v5166_v8 = vpop.f32.mrb[10].mxu1 }
 0x4f1   : > { %v5169_v32 = vmax.f32 %v5164_v29, 0.0  ;;  %v6013_v7 = vpop.f32.mrb[11].mxu1 }
 0x4f3   : > { %v5170_v33 = vpack.c.bf16 %v5169_v32, %v5169_v32 }
 0x4f5   : > { %6023 = vmatmul.mubr.msk.bf16.vlgmr.msra.gmra.mrb[12].mxu1 %vm5206_vm15, %v5170_v33 }
 0x5c8   : > { %v5248_v35 = vpop.f32.mrb[12].mxu1 }
 0x5c9   : > { %v5249_v36 = vadd.f32 %v5885_v34, %v5248_v35  ;;  %v6024_v37 = vpop.f32.mrb[13].mxu1 }
 0x5ca   : > { %v5251_v38 = vpop.f32.mrb[14].mxu1 }
 0x5cb   : > { %v5254_v40 = vmax.f32 %v5249_v36, 0.0  ;;  %v6025_v41 = vpop.f32.mrb[15].mxu1 }
 0x5cd   : > { %v5262_v42 = vmul.f32 %v5891_v39, %v5254_v40 }
 0x5cf   : > { %v5264_v43 = vsel %vm5263_vm0, %v5262_v42, 0.0 }
 0x5d0   : > { %5265 = vadd.xlane.f32.xlu0 %v5264_v43 }
 0x65d   : > { %v5266_v22 = vpop.xlane.xlu0 %5265 }
 0x65e   : > { %v5274_v31 = vadd.f32 %v5892_v44, %v5266_v22 }
 0x660   : > { %5276 = vst.msk [vmem:[%s7905_s13] sm:$0x3] %vm5275_vm1, %v5274_v31 }
 0x661 PF: > { %s25_s27 = sadd.s32 1, %s6890_s27  }
 0x662   : > { %p22_p7 = scmp.ge.s32.totalorder %s25_s27, 5  }
 0x664   :  { %24 = sbr.rel (!%p22_p7) target bundleno = 3 (0x3), region = 109 }

</bundles_post_ra>
